<compile_context>
chip_gen: v5e
topology: v5e:2x2
jax: 0.10.0
libtpu: 0.0.40
codegen_flags: <defaults>
</compile_context>

<pallas_src>
import numpy as np
import jax
import jax.numpy as jnp
from jax.experimental import pallas as pl
from jax.experimental.pallas import tpu as pltpu


# ----------------------------------------------------------------------------
# Tiling helpers
# ----------------------------------------------------------------------------

def _pick_tm(M, prefer=512):
    """Largest row tile <= prefer that divides M and is a multiple of 8.
    Divisor-based so no padding (and no extra HBM copy) is ever needed."""
    t = min(prefer, M)
    for cand in range(t, 7, -1):
        if M % cand == 0 and cand % 8 == 0:
            return cand
    return M  # tiny / odd M: single whole block


def _pick_window_group(nw2, S, C, cap=25, vmem_budget=20 * 1024 * 1024):
    """Largest divisor of nw^2 <= cap whose per-step VMEM footprint fits budget."""
    divs = [d for d in range(1, min(cap, nw2) + 1) if nw2 % d == 0]
    for g in reversed(divs):
        # double-buffered IO blocks (bf16) + rough f32 intermediates (q,kv,o,y,scores)
        io = 2 * (3 * g * S * C * 2 + g * S * S * 2)
        inter = g * S * (5 * C + 2 * S) * 4
        if io + inter <= vmem_budget:
            return g
    return 1


# ----------------------------------------------------------------------------
# Pallas kernels
# ----------------------------------------------------------------------------

def attn_block(x_win, mask_attn, wq_t, wkv_t, wfc_t, dim, n_batch):
    """Fused: Q/K/V projection + per-window attention + fc + LayerNorm.

    x_win:     (n_batch*nw2, S, C) bf16, shifted window-major tokens of feat_rt.
               The K/V side (feat_tr) is the SAME array with the two batch halves
               swapped, expressed purely through the index_map (no extra copy).
    mask_attn: (nw2, S, S) bf16 compact swin mask.
    Returns    (n_batch*nw2, S, C) bf16  = LayerNorm(fc(attention(...))).
    """
    BW, S, C = x_win.shape
    nw2 = mask_attn.shape[0]
    assert BW == n_batch * nw2
    half = n_batch // 2
    G = _pick_window_group(nw2, S, C)
    mblocks = nw2 // G
    GS = G * S
    scale = 1.0 / float(dim) ** 0.5

    def kernel(xq_ref, xkv_ref, m_ref, wq_ref, wkv_ref, wfc_ref, o_ref):
        a0 = xq_ref[...].reshape(GS, C)                      # bf16
        a1 = xkv_ref[...].reshape(GS, C)
        # fused projections: one big-M matmul per side (f32 accumulation)
        q = jnp.dot(a0, wq_ref[...], preferred_element_type=jnp.float32)
        kv = jnp.dot(a1, wkv_ref[...], preferred_element_type=jnp.float32)
        qg = q.astype(jnp.bfloat16).reshape(G, S, C)
        kg = kv[:, :C].astype(jnp.bfloat16).reshape(G, S, C)
        vg = kv[:, C:].astype(jnp.bfloat16).reshape(G, S, C)
        # scores + mask + softmax (f32)
        s = jnp.einsum('gqc,gkc->gqk', qg, kg,
                       preferred_element_type=jnp.float32)
        s = s * scale + m_ref[...].astype(jnp.float32)
        s = s - jnp.max(s, axis=-1, keepdims=True)
        p = jnp.exp(s)
        p = p * pl.reciprocal(jnp.sum(p, axis=-1, keepdims=True), approx=True)
        o = jnp.einsum('gqk,gkc->gqc', p.astype(jnp.bfloat16), vg,
                       preferred_element_type=jnp.float32)
        # batched fc + LayerNorm epilogue (single (G*S, C) matmul, one dense store)
        y = jnp.dot(o.reshape(GS, C).astype(jnp.bfloat16), wfc_ref[...],
                    preferred_element_type=jnp.float32)
        mean = jnp.mean(y, axis=-1, keepdims=True)
        var = jnp.mean(jnp.square(y - mean), axis=-1, keepdims=True)
        yn = (y - mean) * jax.lax.rsqrt(var + 1e-5)
        o_ref[...] = yn.reshape(G, S, C).astype(o_ref.dtype)

    q_map = lambda i, bb: (bb * mblocks + i, 0, 0)
    kv_map = lambda i, bb: (((bb + half) % n_batch) * mblocks + i, 0, 0)

    return pl.pallas_call(
        kernel,
        out_shape=jax.ShapeDtypeStruct((BW, S, C), jnp.bfloat16),
        # batch innermost so the mask block index (= outer axis) is constant across
        # the inner iterations -> each mask block DMA'd once, not n_batch times.
        grid=(mblocks, n_batch),
        in_specs=[pl.BlockSpec((G, S, C), q_map),
                  pl.BlockSpec((G, S, C), kv_map),
                  pl.BlockSpec((G, S, S), lambda i, bb: (i, 0, 0)),
                  pl.BlockSpec((C, C), lambda i, bb: (0, 0)),
                  pl.BlockSpec((C, 2 * C), lambda i, bb: (0, 0)),
                  pl.BlockSpec((C, C), lambda i, bb: (0, 0))],
        out_specs=pl.BlockSpec((G, S, C), q_map),
        compiler_params=pltpu.CompilerParams(
            dimension_semantics=("parallel", "parallel")),
    )(x_win, x_win, mask_attn, wq_t, wkv_t, wfc_t)


def ffn_delta(feat0, attn, w1a_t, w1b_t, w2_t, prefer_tm=512):
    """delta = ffn_norm( GELU( feat0@w1a + attn@w1b ) @ w2 ).

    Split-weight form of Linear(concat([feat0, attn])) — no in-kernel concat.
    feat0/attn are bf16 (M, C); output is f32 (the residual add against the
    original f32 inputs happens outside, fused into the final XLA epilogue)."""
    M, C = feat0.shape
    H = w1a_t.shape[1]
    tm = _pick_tm(M, prefer_tm)
    inv_sqrt2 = np.float32(1.0 / np.sqrt(2.0))

    def kernel(f0_ref, a_ref, w1a_ref, w1b_ref, w2_ref, o_ref):
        h = jnp.dot(f0_ref[...], w1a_ref[...], preferred_element_type=jnp.float32)
        h = h + jnp.dot(a_ref[...], w1b_ref[...], preferred_element_type=jnp.float32)
        h = 0.5 * h * (1.0 + jax.lax.erf(h * inv_sqrt2))     # exact (erf) GELU
        y = jnp.dot(h.astype(jnp.bfloat16), w2_ref[...],
                    preferred_element_type=jnp.float32)
        mean = jnp.mean(y, axis=-1, keepdims=True)
        var = jnp.mean(jnp.square(y - mean), axis=-1, keepdims=True)
        o_ref[...] = ((y - mean) * jax.lax.rsqrt(var + 1e-5)).astype(o_ref.dtype)

    return pl.pallas_call(
        kernel,
        out_shape=jax.ShapeDtypeStruct((M, C), jnp.float32),
        grid=(M // tm,),
        in_specs=[pl.BlockSpec((tm, C), lambda i: (i, 0)),
                  pl.BlockSpec((tm, C), lambda i: (i, 0)),
                  pl.BlockSpec((C, H), lambda i: (0, 0)),
                  pl.BlockSpec((C, H), lambda i: (0, 0)),
                  pl.BlockSpec((H, C), lambda i: (0, 0))],
        out_specs=pl.BlockSpec((tm, C), lambda i: (i, 0)),
        compiler_params=pltpu.CompilerParams(dimension_semantics=("parallel",)),
    )(feat0, attn, w1a_t, w1b_t, w2_t)


# ----------------------------------------------------------------------------
# Layout glue: shifted window-major permutation (applied once each way) + mask
# ----------------------------------------------------------------------------

def to_window_major(x_nchw, n_window):
    """(B, C, h, w) f32 -> (B*nw^2, S, C) bf16 in cyclically-shifted window-major
    token order.  Cast happens first so the roll/transpose copies are half-size."""
    B, C, h, w = x_nchw.shape
    ws_h, ws_w = h // n_window, w // n_window
    sh, sw = ws_h // 2, ws_w // 2
    x = x_nchw.astype(jnp.bfloat16)
    x = jnp.roll(x, shift=(-sh, -sw), axis=(2, 3))
    x = x.reshape(B, C, n_window, ws_h, n_window, ws_w)
    x = x.transpose(0, 2, 4, 3, 5, 1)            # (B, nw_h, nw_w, ws_h, ws_w, C)
    return x.reshape(B * n_window * n_window, ws_h * ws_w, C)


def from_window_major(x, B, C, h, w, n_window):
    """Inverse of to_window_major (without the dtype cast): (B*nw^2, S, C) -> (B, C, h, w)."""
    ws_h, ws_w = h // n_window, w // n_window
    sh, sw = ws_h // 2, ws_w // 2
    x = x.reshape(B, n_window, n_window, ws_h, ws_w, C)
    x = x.transpose(0, 5, 1, 3, 2, 4)            # (B, C, nw_h, ws_h, nw_w, ws_w)
    x = x.reshape(B, C, h, w)
    return jnp.roll(x, shift=(sh, sw), axis=(2, 3))


def shift_window_mask(h, w, n_window):
    """Compact (nw^2, S, S) swin shift mask (values 0 / -100, exact in bf16)."""
    ws_h, ws_w = h // n_window, w // n_window
    sh, sw = ws_h // 2, ws_w // 2
    mask = np.zeros((h, w), dtype=np.float32)
    h_slices = (slice(0, -ws_h), slice(-ws_h, -sh), slice(-sh, None))
    w_slices = (slice(0, -ws_w), slice(-ws_w, -sw), slice(-sw, None))
    count = 0
    for hs in h_slices:
        for wsl in w_slices:
            mask[hs, wsl] = count
            count += 1
    mw = mask.reshape(n_window, ws_h, n_window, ws_w).transpose(0, 2, 1, 3)
    mw = mw.reshape(n_window * n_window, ws_h * ws_w)
    diff = mw[:, None, :] - mw[:, :, None]
    mask_attn = np.where(diff != 0, np.float32(-100.0), np.float32(0.0))
    return jnp.asarray(mask_attn, dtype=jnp.bfloat16)


# ----------------------------------------------------------------------------
# Full forward
# ----------------------------------------------------------------------------

def maxsa_forward(x0, x1, params, n_window):
    """x0, x1: NCHW f32.  Returns fused NCHW feature (0.5*feat_r' + 0.5*feat_t')."""
    b, c, h, w = x0.shape
    nw2 = n_window * n_window
    ws_h, ws_w = h // n_window, w // n_window
    S = ws_h * ws_w

    mask_attn = shift_window_mask(h, w, n_window)        # (nw2, S, S) bf16

    # Single permutation pass into shifted window-major layout (bf16).
    fr = to_window_major(x0, n_window)                   # (b*nw2, S, C)
    ft = to_window_major(x1, n_window)
    x_win = jnp.concatenate([fr, ft], axis=0)            # feat_rt, (2b*nw2, S, C)
    # feat_tr = batch-half swap of feat_rt -> handled by the kernel's index_map.

    attn = attn_block(x_win, mask_attn, params["wq_t"], params["wkv_t"],
                      params["wfc_t"], dim=c, n_batch=2 * b)

    M = 2 * b * nw2 * S
    delta = ffn_delta(x_win.reshape(M, c), attn.reshape(M, c),
                      params["w1a_t"], params["w1b_t"], params["w2_t"])

    # Single inverse permutation of the FFN delta, then exact f32 residual + fusion.
    delta = from_window_major(delta.reshape(2 * b * nw2, S, c), 2 * b, c, h, w, n_window)
    d_r, d_t = delta[:b], delta[b:]
    # feat_f = 0.5*(feat_r + delta_r) + 0.5*(feat_t + delta_t)
    return 0.5 * (x0 + x1) + 0.5 * (d_r + d_t)


# ----------------------------------------------------------------------------
# Deterministic parameter init (xavier_uniform like param_init; LN gamma=1, beta=0)
# ----------------------------------------------------------------------------

def xavier_uniform(key, out_f, in_f):
    bound = float(np.sqrt(6.0 / (in_f + out_f)))
    return jax.random.uniform(key, (out_f, in_f), jnp.float32, -bound, bound)


def init_params(dim, ffn_dim, key):
    ks = jax.random.split(key, 6)
    hid = dim * 2 * ffn_dim
    wq = xavier_uniform(ks[0], dim, dim)
    wk = xavier_uniform(ks[1], dim, dim)
    wv = xavier_uniform(ks[2], dim, dim)
    wfc = xavier_uniform(ks[3], dim, dim)
    w1 = xavier_uniform(ks[4], hid, dim * 2)   # Linear(2*dim, hid) weight
    w2 = xavier_uniform(ks[5], dim, hid)       # Linear(hid, dim) weight
    bf = jnp.bfloat16
    # Weights stored transposed (in, out) so kernels compute x @ W^T directly;
    # Wk/Wv fused into one (dim, 2*dim) RHS; bf16 storage, f32 MXU accumulation.
    return {
        "wq_t":  wq.T.astype(bf),
        "wkv_t": jnp.concatenate([wk.T, wv.T], axis=1).astype(bf),  # (dim, 2*dim)
        "wfc_t": wfc.T.astype(bf),
        "w1a_t": w1[:, :dim].T.astype(bf),     # (dim, hid) — multiplies feat0
        "w1b_t": w1[:, dim:].T.astype(bf),     # (dim, hid) — multiplies attn
        "w2_t":  w2.T.astype(bf),              # (hid, dim)
    }


# ----------------------------------------------------------------------------
# Main
# ----------------------------------------------------------------------------

if __name__ == "__main__":
    dim = 32          # channels (small-shape stand-in for 256)
    n_window = 2      # small-shape stand-in for 10
    b, h, w = 2, 8, 8
    ffn_dim = 4

    key = jax.random.PRNGKey(0)
    kx0, kx1, kp = jax.random.split(key, 3)
    x0 = jax.random.normal(kx0, (b, dim, h, w), jnp.float32)
    x1 = jax.random.normal(kx1, (b, dim, h, w), jnp.float32)
    params = init_params(dim, ffn_dim, kp)

    out = jax.jit(lambda a, c: maxsa_forward(a, c, params, n_window))(x0, x1)
    jax.block_until_ready(out)
    assert out.shape == (b, dim, h, w)
    assert bool(jnp.all(jnp.isfinite(out)))
    print("KERNEL_OK")
</pallas_src>

<mosaic_0001>
module attributes {stable_mosaic.version = 11 : i64} {
  func.func @kernel(%arg0: i32, %arg1: memref<256x32xbf16, #tpu.memory_space<vmem>>, %arg2: memref<256x32xbf16, #tpu.memory_space<vmem>>, %arg3: memref<32x256xbf16, #tpu.memory_space<vmem>>, %arg4: memref<32x256xbf16, #tpu.memory_space<vmem>>, %arg5: memref<256x32xbf16, #tpu.memory_space<vmem>>, %arg6: memref<256x32xf32, #tpu.memory_space<vmem>>) attributes {dimension_semantics = [#tpu.dimension_semantics<parallel>], iteration_bounds = array<i64: 1>, scalar_prefetch = 0 : i64, scratch_operands = 0 : i64, tpu.core_type = #tpu.core_type<tc>, window_params = [{transform_indices = @transform_0, window_bounds = array<i64: 256, 32>}, {transform_indices = @transform_1, window_bounds = array<i64: 256, 32>}, {pipeline_mode = #tpu.pipeline_mode<synchronous>, transform_indices = @transform_2, window_bounds = array<i64: 32, 256>}, {pipeline_mode = #tpu.pipeline_mode<synchronous>, transform_indices = @transform_3, window_bounds = array<i64: 32, 256>}, {pipeline_mode = #tpu.pipeline_mode<synchronous>, transform_indices = @transform_4, window_bounds = array<i64: 256, 32>}, {transform_indices = @transform_5, window_bounds = array<i64: 256, 32>}]} {
    %c0 = arith.constant 0 : index
    %c0_0 = arith.constant 0 : index
    %0 = vector.load %arg1[%c0, %c0_0] : memref<256x32xbf16, #tpu.memory_space<vmem>>, vector<256x32xbf16>
    %c0_1 = arith.constant 0 : index
    %c0_2 = arith.constant 0 : index
    %1 = vector.load %arg3[%c0_1, %c0_2] : memref<32x256xbf16, #tpu.memory_space<vmem>>, vector<32x256xbf16>
    %cst = arith.constant dense<0.000000e+00> : vector<256x256xf32>
    %2 = tpu.matmul %0, %1, %cst {dimension_numbers = #tpu.dot_dimension_numbers<[1], [0], [0], [1], [0, 0, 1, 1], [], []>} : vector<256x32xbf16>, vector<32x256xbf16>, vector<256x256xf32> -> vector<256x256xf32>
    %c0_3 = arith.constant 0 : index
    %c0_4 = arith.constant 0 : index
    %3 = vector.load %arg2[%c0_3, %c0_4] : memref<256x32xbf16, #tpu.memory_space<vmem>>, vector<256x32xbf16>
    %c0_5 = arith.constant 0 : index
    %c0_6 = arith.constant 0 : index
    %4 = vector.load %arg4[%c0_5, %c0_6] : memref<32x256xbf16, #tpu.memory_space<vmem>>, vector<32x256xbf16>
    %cst_7 = arith.constant dense<0.000000e+00> : vector<256x256xf32>
    %5 = tpu.matmul %3, %4, %cst_7 {dimension_numbers = #tpu.dot_dimension_numbers<[1], [0], [0], [1], [0, 0, 1, 1], [], []>} : vector<256x32xbf16>, vector<32x256xbf16>, vector<256x256xf32> -> vector<256x256xf32>
    %6 = arith.addf %2, %5 : vector<256x256xf32>
    %cst_8 = arith.constant 5.000000e-01 : f32
    %7 = vector.broadcast %cst_8 : f32 to vector<256x256xf32>
    %8 = arith.mulf %7, %6 : vector<256x256xf32>
    %cst_9 = arith.constant 0.707106769 : f32
    %9 = vector.broadcast %cst_9 : f32 to vector<256x256xf32>
    %10 = arith.mulf %6, %9 : vector<256x256xf32>
    %11 = math.erf %10 : vector<256x256xf32>
    %cst_10 = arith.constant 1.000000e+00 : f32
    %12 = vector.broadcast %cst_10 : f32 to vector<256x256xf32>
    %13 = arith.addf %12, %11 : vector<256x256xf32>
    %14 = arith.mulf %8, %13 : vector<256x256xf32>
    %15 = arith.truncf %14 : vector<256x256xf32> to vector<256x256xbf16>
    %c0_11 = arith.constant 0 : index
    %c0_12 = arith.constant 0 : index
    %16 = vector.load %arg5[%c0_11, %c0_12] : memref<256x32xbf16, #tpu.memory_space<vmem>>, vector<256x32xbf16>
    %cst_13 = arith.constant dense<0.000000e+00> : vector<256x32xf32>
    %17 = tpu.matmul %15, %16, %cst_13 {dimension_numbers = #tpu.dot_dimension_numbers<[1], [0], [0], [1], [0, 0, 1, 1], [], []>} : vector<256x256xbf16>, vector<256x32xbf16>, vector<256x32xf32> -> vector<256x32xf32>
    %cst_14 = arith.constant dense<0.000000e+00> : vector<256xf32>
    %18 = vector.multi_reduction <add>, %17, %cst_14 [1] : vector<256x32xf32> to vector<256xf32>
    %19 = vector.shape_cast %18 : vector<256xf32> to vector<256x1xf32>
    %cst_15 = arith.constant 3.200000e+01 : f32
    %20 = vector.broadcast %cst_15 : f32 to vector<256x1xf32>
    %21 = arith.divf %19, %20 : vector<256x1xf32>
    %22 = vector.broadcast %21 : vector<256x1xf32> to vector<256x32xf32>
    %23 = arith.subf %17, %22 : vector<256x32xf32>
    %24 = arith.mulf %23, %23 : vector<256x32xf32>
    %cst_16 = arith.constant dense<0.000000e+00> : vector<256xf32>
    %25 = vector.multi_reduction <add>, %24, %cst_16 [1] : vector<256x32xf32> to vector<256xf32>
    %26 = vector.shape_cast %25 : vector<256xf32> to vector<256x1xf32>
    %cst_17 = arith.constant 3.200000e+01 : f32
    %27 = vector.broadcast %cst_17 : f32 to vector<256x1xf32>
    %28 = arith.divf %26, %27 : vector<256x1xf32>
    %29 = vector.broadcast %21 : vector<256x1xf32> to vector<256x32xf32>
    %30 = arith.subf %17, %29 : vector<256x32xf32>
    %cst_18 = arith.constant 9.99999974E-6 : f32
    %31 = vector.broadcast %cst_18 : f32 to vector<256x1xf32>
    %32 = arith.addf %28, %31 : vector<256x1xf32>
    %33 = math.rsqrt %32 : vector<256x1xf32>
    %34 = vector.broadcast %33 : vector<256x1xf32> to vector<256x32xf32>
    %35 = arith.mulf %30, %34 : vector<256x32xf32>
    %c0_19 = arith.constant 0 : index
    %c0_20 = arith.constant 0 : index
    %36 = vector.load %arg6[%c0_19, %c0_20] : memref<256x32xf32, #tpu.memory_space<vmem>>, vector<256x32xf32>
    tpu.vector_store %arg6[%c0_19, %c0_20], %35 {strides = array<i32>} : memref<256x32xf32, #tpu.memory_space<vmem>>, vector<256x32xf32>,
    return
  }
  func.func @transform_0(%arg0: i32) -> (i32, i32) {
    %c0_i32 = arith.constant 0 : i32
    %c0_i32_0 = arith.constant 0 : i32
    return %arg0, %c0_i32 : i32, i32
  }
  func.func @transform_1(%arg0: i32) -> (i32, i32) {
    %c0_i32 = arith.constant 0 : i32
    %c0_i32_0 = arith.constant 0 : i32
    return %arg0, %c0_i32 : i32, i32
  }
  func.func @transform_2(%arg0: i32) -> (i32, i32) {
    %c0_i32 = arith.constant 0 : i32
    %c0_i32_0 = arith.constant 0 : i32
    %c0_i32_1 = arith.constant 0 : i32
    return %c0_i32, %c0_i32_0 : i32, i32
  }
  func.func @transform_3(%arg0: i32) -> (i32, i32) {
    %c0_i32 = arith.constant 0 : i32
    %c0_i32_0 = arith.constant 0 : i32
    %c0_i32_1 = arith.constant 0 : i32
    return %c0_i32, %c0_i32_0 : i32, i32
  }
  func.func @transform_4(%arg0: i32) -> (i32, i32) {
    %c0_i32 = arith.constant 0 : i32
    %c0_i32_0 = arith.constant 0 : i32
    %c0_i32_1 = arith.constant 0 : i32
    return %c0_i32, %c0_i32_0 : i32, i32
  }
  func.func @transform_5(%arg0: i32) -> (i32, i32) {
    %c0_i32 = arith.constant 0 : i32
    %c0_i32_0 = arith.constant 0 : i32
    return %arg0, %c0_i32 : i32, i32
  }
}

module attributes {stable_mosaic.version = 11 : i64} {
  func.func @kernel(%arg0: i32, %arg1: i32, %arg2: memref<4x16x32xbf16, #tpu.memory_space<vmem>>, %arg3: memref<4x16x32xbf16, #tpu.memory_space<vmem>>, %arg4: memref<4x16x16xbf16, #tpu.memory_space<vmem>>, %arg5: memref<32x32xbf16, #tpu.memory_space<vmem>>, %arg6: memref<32x64xbf16, #tpu.memory_space<vmem>>, %arg7: memref<32x32xbf16, #tpu.memory_space<vmem>>, %arg8: memref<4x16x32xbf16, #tpu.memory_space<vmem>>) attributes {dimension_semantics = [#tpu.dimension_semantics<parallel>, #tpu.dimension_semantics<parallel>], iteration_bounds = array<i64: 1, 4>, scalar_prefetch = 0 : i64, scratch_operands = 0 : i64, tpu.core_type = #tpu.core_type<tc>, window_params = [{transform_indices = @transform_0, window_bounds = array<i64: 4, 16, 32>}, {transform_indices = @transform_1, window_bounds = array<i64: 4, 16, 32>}, {transform_indices = @transform_2, window_bounds = array<i64: 4, 16, 16>}, {pipeline_mode = #tpu.pipeline_mode<synchronous>, transform_indices = @transform_3, window_bounds = array<i64: 32, 32>}, {pipeline_mode = #tpu.pipeline_mode<synchronous>, transform_indices = @transform_4, window_bounds = array<i64: 32, 64>}, {pipeline_mode = #tpu.pipeline_mode<synchronous>, transform_indices = @transform_5, window_bounds = array<i64: 32, 32>}, {transform_indices = @transform_6, window_bounds = array<i64: 4, 16, 32>}]} {
    %c0 = arith.constant 0 : index
    %c0_0 = arith.constant 0 : index
    %c0_1 = arith.constant 0 : index
    %0 = vector.load %arg2[%c0, %c0_0, %c0_1] : memref<4x16x32xbf16, #tpu.memory_space<vmem>>, vector<4x16x32xbf16>
    %1 = vector.shape_cast %0 : vector<4x16x32xbf16> to vector<64x32xbf16>
    %c0_2 = arith.constant 0 : index
    %c0_3 = arith.constant 0 : index
    %c0_4 = arith.constant 0 : index
    %2 = vector.load %arg3[%c0_2, %c0_3, %c0_4] : memref<4x16x32xbf16, #tpu.memory_space<vmem>>, vector<4x16x32xbf16>
    %3 = vector.shape_cast %2 : vector<4x16x32xbf16> to vector<64x32xbf16>
    %c0_5 = arith.constant 0 : index
    %c0_6 = arith.constant 0 : index
    %4 = vector.load %arg5[%c0_5, %c0_6] : memref<32x32xbf16, #tpu.memory_space<vmem>>, vector<32x32xbf16>
    %cst = arith.constant dense<0.000000e+00> : vector<64x32xf32>
    %5 = tpu.matmul %1, %4, %cst {dimension_numbers = #tpu.dot_dimension_numbers<[1], [0], [0], [1], [0, 0, 1, 1], [], []>} : vector<64x32xbf16>, vector<32x32xbf16>, vector<64x32xf32> -> vector<64x32xf32>
    %c0_7 = arith.constant 0 : index
    %c0_8 = arith.constant 0 : index
    %6 = vector.load %arg6[%c0_7, %c0_8] : memref<32x64xbf16, #tpu.memory_space<vmem>>, vector<32x64xbf16>
    %cst_9 = arith.constant dense<0.000000e+00> : vector<64x64xf32>
    %7 = tpu.matmul %3, %6, %cst_9 {dimension_numbers = #tpu.dot_dimension_numbers<[1], [0], [0], [1], [0, 0, 1, 1], [], []>} : vector<64x32xbf16>, vector<32x64xbf16>, vector<64x64xf32> -> vector<64x64xf32>
    %8 = arith.truncf %5 : vector<64x32xf32> to vector<64x32xbf16>
    %9 = vector.shape_cast %8 : vector<64x32xbf16> to vector<4x16x32xbf16>
    %10 = vector.extract_strided_slice %7 {offsets = [0, 0], sizes = [64, 32], strides = [1, 1]} : vector<64x64xf32> to vector<64x32xf32>
    %11 = arith.truncf %10 : vector<64x32xf32> to vector<64x32xbf16>
    %12 = vector.shape_cast %11 : vector<64x32xbf16> to vector<4x16x32xbf16>
    %13 = vector.extract_strided_slice %7 {offsets = [0, 32], sizes = [64, 32], strides = [1, 1]} : vector<64x64xf32> to vector<64x32xf32>
    %14 = arith.truncf %13 : vector<64x32xf32> to vector<64x32xbf16>
    %15 = vector.shape_cast %14 : vector<64x32xbf16> to vector<4x16x32xbf16>
    "tpu.trace_start"() <{level = 10 : i32, message = "gqc,gkc->gqk"}> : () -> ()
    %cst_10 = arith.constant dense<0.000000e+00> : vector<4x16x16xf32>
    %16 = tpu.matmul %9, %12, %cst_10 {dimension_numbers = #tpu.dot_dimension_numbers<[2], [2], [1], [1], [0, 0, 0, 1, 1, 1], [0], [0]>} : vector<4x16x32xbf16>, vector<4x16x32xbf16>, vector<4x16x16xf32> -> vector<4x16x16xf32>
    "tpu.trace_stop"() : () -> ()
    %cst_11 = arith.constant 0.176776692 : f32
    %17 = vector.broadcast %cst_11 : f32 to vector<4x16x16xf32>
    %18 = arith.mulf %16, %17 : vector<4x16x16xf32>
    %c0_12 = arith.constant 0 : index
    %c0_13 = arith.constant 0 : index
    %c0_14 = arith.constant 0 : index
    %19 = vector.load %arg4[%c0_12, %c0_13, %c0_14] : memref<4x16x16xbf16, #tpu.memory_space<vmem>>, vector<4x16x16xbf16>
    %20 = arith.extf %19 : vector<4x16x16xbf16> to vector<4x16x16xf32>
    %21 = arith.addf %18, %20 : vector<4x16x16xf32>
    %cst_15 = arith.constant dense<0xFF800000> : vector<4x16xf32>
    %22 = vector.multi_reduction <maximumf>, %21, %cst_15 [2] : vector<4x16x16xf32> to vector<4x16xf32>
    %23 = vector.shape_cast %22 : vector<4x16xf32> to vector<4x16x1xf32>
    %24 = vector.broadcast %23 : vector<4x16x1xf32> to vector<4x16x16xf32>
    %25 = arith.subf %21, %24 : vector<4x16x16xf32>
    %26 = math.exp %25 : vector<4x16x16xf32>
    %cst_16 = arith.constant dense<0.000000e+00> : vector<4x16xf32>
    %27 = vector.multi_reduction <add>, %26, %cst_16 [2] : vector<4x16x16xf32> to vector<4x16xf32>
    %28 = vector.shape_cast %27 : vector<4x16xf32> to vector<4x16x1xf32>
    %29 = tpu.reciprocal %28 {approx = true} : vector<4x16x1xf32> -> vector<4x16x1xf32>
    %30 = vector.broadcast %29 : vector<4x16x1xf32> to vector<4x16x16xf32>
    %31 = arith.mulf %26, %30 : vector<4x16x16xf32>
    %32 = arith.truncf %31 : vector<4x16x16xf32> to vector<4x16x16xbf16>
    "tpu.trace_start"() <{level = 10 : i32, message = "gqk,gkc->gqc"}> : () -> ()
    %cst_17 = arith.constant dense<0.000000e+00> : vector<4x16x32xf32>
    %33 = tpu.matmul %32, %15, %cst_17 {dimension_numbers = #tpu.dot_dimension_numbers<[2], [1], [1], [2], [0, 0, 0, 1, 1, 2], [0], [0]>} : vector<4x16x16xbf16>, vector<4x16x32xbf16>, vector<4x16x32xf32> -> vector<4x16x32xf32>
    "tpu.trace_stop"() : () -> ()
    %34 = vector.shape_cast %33 : vector<4x16x32xf32> to vector<64x32xf32>
    %35 = arith.truncf %34 : vector<64x32xf32> to vector<64x32xbf16>
    %c0_18 = arith.constant 0 : index
    %c0_19 = arith.constant 0 : index
    %36 = vector.load %arg7[%c0_18, %c0_19] : memref<32x32xbf16, #tpu.memory_space<vmem>>, vector<32x32xbf16>
    %cst_20 = arith.constant dense<0.000000e+00> : vector<64x32xf32>
    %37 = tpu.matmul %35, %36, %cst_20 {dimension_numbers = #tpu.dot_dimension_numbers<[1], [0], [0], [1], [0, 0, 1, 1], [], []>} : vector<64x32xbf16>, vector<32x32xbf16>, vector<64x32xf32> -> vector<64x32xf32>
    %cst_21 = arith.constant dense<0.000000e+00> : vector<64xf32>
    %38 = vector.multi_reduction <add>, %37, %cst_21 [1] : vector<64x32xf32> to vector<64xf32>
    %39 = vector.shape_cast %38 : vector<64xf32> to vector<64x1xf32>
    %cst_22 = arith.constant 3.200000e+01 : f32
    %40 = vector.broadcast %cst_22 : f32 to vector<64x1xf32>
    %41 = arith.divf %39, %40 : vector<64x1xf32>
    %42 = vector.broadcast %41 : vector<64x1xf32> to vector<64x32xf32>
    %43 = arith.subf %37, %42 : vector<64x32xf32>
    %44 = arith.mulf %43, %43 : vector<64x32xf32>
    %cst_23 = arith.constant dense<0.000000e+00> : vector<64xf32>
    %45 = vector.multi_reduction <add>, %44, %cst_23 [1] : vector<64x32xf32> to vector<64xf32>
    %46 = vector.shape_cast %45 : vector<64xf32> to vector<64x1xf32>
    %cst_24 = arith.constant 3.200000e+01 : f32
    %47 = vector.broadcast %cst_24 : f32 to vector<64x1xf32>
    %48 = arith.divf %46, %47 : vector<64x1xf32>
    %49 = vector.broadcast %41 : vector<64x1xf32> to vector<64x32xf32>
    %50 = arith.subf %37, %49 : vector<64x32xf32>
    %cst_25 = arith.constant 9.99999974E-6 : f32
    %51 = vector.broadcast %cst_25 : f32 to vector<64x1xf32>
    %52 = arith.addf %48, %51 : vector<64x1xf32>
    %53 = math.rsqrt %52 : vector<64x1xf32>
    %54 = vector.broadcast %53 : vector<64x1xf32> to vector<64x32xf32>
    %55 = arith.mulf %50, %54 : vector<64x32xf32>
    %56 = vector.shape_cast %55 : vector<64x32xf32> to vector<4x16x32xf32>
    %57 = arith.truncf %56 : vector<4x16x32xf32> to vector<4x16x32xbf16>
    %c0_26 = arith.constant 0 : index
    %c0_27 = arith.constant 0 : index
    %c0_28 = arith.constant 0 : index
    %58 = vector.load %arg8[%c0_26, %c0_27, %c0_28] : memref<4x16x32xbf16, #tpu.memory_space<vmem>>, vector<4x16x32xbf16>
    tpu.vector_store %arg8[%c0_26, %c0_27, %c0_28], %57 {strides = array<i32>} : memref<4x16x32xbf16, #tpu.memory_space<vmem>>, vector<4x16x32xbf16>,
    return
  }
  func.func @transform_0(%arg0: i32, %arg1: i32) -> (i32, i32, i32) {
    %c1_i32 = arith.constant 1 : i32
    %0 = arith.muli %arg1, %c1_i32 : i32
    %1 = arith.addi %0, %arg0 : i32
    %c0_i32 = arith.constant 0 : i32
    %c0_i32_0 = arith.constant 0 : i32
    %c0_i32_1 = arith.constant 0 : i32
    return %1, %c0_i32, %c0_i32_0 : i32, i32, i32
  }
  func.func @transform_1(%arg0: i32, %arg1: i32) -> (i32, i32, i32) {
    %c2_i32 = arith.constant 2 : i32
    %0 = arith.addi %arg1, %c2_i32 : i32
    %c4_i32 = arith.constant 4 : i32
    %c0_i32 = arith.constant 0 : i32
    %1 = arith.cmpi eq, %c4_i32, %c0_i32 : i32
    %c1_i32 = arith.constant 1 : i32
    %2 = arith.select %1, %c1_i32, %c4_i32 : i32
    %3 = arith.remsi %0, %2 : i32
    %c0_i32_0 = arith.constant 0 : i32
    %4 = arith.cmpi ne, %3, %c0_i32_0 : i32
    %c0_i32_1 = arith.constant 0 : i32
    %5 = arith.cmpi slt, %3, %c0_i32_1 : i32
    %c0_i32_2 = arith.constant 0 : i32
    %6 = arith.cmpi slt, %2, %c0_i32_2 : i32
    %7 = arith.xori %5, %6 : i1
    %8 = arith.andi %7, %4 : i1
    %9 = arith.addi %3, %2 : i32
    %10 = arith.select %8, %9, %3 : i32
    %c1_i32_3 = arith.constant 1 : i32
    %11 = arith.muli %10, %c1_i32_3 : i32
    %12 = arith.addi %11, %arg0 : i32
    %c0_i32_4 = arith.constant 0 : i32
    %c0_i32_5 = arith.constant 0 : i32
    %c0_i32_6 = arith.constant 0 : i32
    return %12, %c0_i32_4, %c0_i32_5 : i32, i32, i32
  }
  func.func @transform_2(%arg0: i32, %arg1: i32) -> (i32, i32, i32) {
    %c0_i32 = arith.constant 0 : i32
    %c0_i32_0 = arith.constant 0 : i32
    %c0_i32_1 = arith.constant 0 : i32
    return %arg0, %c0_i32, %c0_i32_0 : i32, i32, i32
  }
  func.func @transform_3(%arg0: i32, %arg1: i32) -> (i32, i32) {
    %c0_i32 = arith.constant 0 : i32
    %c0_i32_0 = arith.constant 0 : i32
    %c0_i32_1 = arith.constant 0 : i32
    return %c0_i32, %c0_i32_0 : i32, i32
  }
  func.func @transform_4(%arg0: i32, %arg1: i32) -> (i32, i32) {
    %c0_i32 = arith.constant 0 : i32
    %c0_i32_0 = arith.constant 0 : i32
    %c0_i32_1 = arith.constant 0 : i32
    return %c0_i32, %c0_i32_0 : i32, i32
  }
  func.func @transform_5(%arg0: i32, %arg1: i32) -> (i32, i32) {
    %c0_i32 = arith.constant 0 : i32
    %c0_i32_0 = arith.constant 0 : i32
    %c0_i32_1 = arith.constant 0 : i32
    return %c0_i32, %c0_i32_0 : i32, i32
  }
  func.func @transform_6(%arg0: i32, %arg1: i32) -> (i32, i32, i32) {
    %c1_i32 = arith.constant 1 : i32
    %0 = arith.muli %arg1, %c1_i32 : i32
    %1 = arith.addi %0, %arg0 : i32
    %c0_i32 = arith.constant 0 : i32
    %c0_i32_0 = arith.constant 0 : i32
    %c0_i32_1 = arith.constant 0 : i32
    return %1, %c0_i32, %c0_i32_0 : i32, i32, i32
  }
}

</mosaic_0001>

<bundles_post_ra>
// kernel: _lambda_.2
= control target key start
LH: loop header
LB: loop body
LE: loop exit
PB: predicated region body
PF: predicated region fallthrough
CT: control target
= control target key end

     0   :  { %s1608_s21 = smov 0   ;;  %s1610_s22 = smov 0   ;;  %s1842_s0 = inlined_call_operand.vmem [shape: bf16[16,16,32], index: 0, kind: input, shape index: {}, may-alias: {0,1}]   ;;  %s1843_s1 = inlined_call_operand.vmem [shape: bf16[16,16,32], index: 1, kind: input, shape index: {}, may-alias: {0,1}]   ;;  %s1844_s2 = inlined_call_operand.vmem [shape: bf16[4,16,16], index: 2, kind: input, shape index: {}]   ;;  %s1845_s3 = inlined_call_operand.vmem [shape: bf16[32,32], index: 3, kind: input, shape index: {}]   ;;  %s1846_s4 = inlined_call_operand.vmem [shape: bf16[32,64], index: 4, kind: input, shape index: {}]   ;;  %s1847_s5 = inlined_call_operand.vmem [shape: bf16[32,32], index: 5, kind: input, shape index: {}]   ;;  %s1848_s6 = inlined_call_operand.vmem [shape: bf16[16,16,32], index: 6, kind: output, shape index: {}]  }
   0x1   :  { %s1612_s23 = smov 0  }
   0x2 LB: > { %s25_s24 = sadd.s32 1, %s1565_s22  ;;  %p1338_p0 = scmp.ge.s32.totalorder %s1569_s23, 1  ;;  %s1569_s23 = sphi %s1612_s23, %s16_s23   ;;  %s1565_s22 = sphi %s1610_s22, %s1850_s22   ;;  %s1561_s21 = sphi %s1608_s21, %s1849_s21  }
   0x3   : > { %p26_p1 = scmp.ge.s32.totalorder %s25_s24, 4  ;;  %p312_p2 = scmp.lt.s32.totalorder %s1569_s23, 5 }
   0x5   : > { %s1852_s24 = smov (%p26_p1, %s25_s24), 0  ;;  %p313_p3 = pnand %p1338_p0, %p312_p2 }
   0x6   : > { %s1339_s27 = sshll.u32 (!%p313_p3), %s1561_s21, 2  ;;  %s381_s28 = sadd.s32 (!%p313_p3), 2, %s1561_s21 }
   0x7   : > { %316 = sbr.rel (%p313_p3) target bundleno = 1204 (0x4b4), region = 44  ;;  %p374_p4 = scmp.lt.s32.totalorder (!%p313_p3), %s1339_s27, 15 }
   0x8   : > { %s383_s7 = ssub.s32 (!%p313_p3), 0, %s381_s28  ;;  %p382_p5 = scmp.lt.s32.totalorder (!%p313_p3), %s381_s28, 0 }
   0x9   : > { %s1342_s10 = smin.u32 (!%p313_p3), %s383_s7, %s381_s28  ;;  %s1571_s14 = smov (!%p313_p3), 96  }
   0xa   : > { %s385_s12 = sand.u32 (!%p313_p3), 3, %s1342_s10  }
   0xb   : > { %s386_s18 = ssub.s32 (!%p313_p3), 0, %s385_s12 }
   0xc   : > { %v1441_v0 = vld [vmem:[%s1845_s3 + $0x8] sm:$0xff]  ;;  %v1440_v1 = vld [vmem:[%s1845_s3] sm:$0xff]  ;;  %s1854_s27 = smov (!%p374_p4, %s1339_s27), 15  ;;  %vm485_vm0 = vcmask 261120   ;;  %s1856_s18 = smov (!%p382_p5, %s386_s18), %s385_s12  ;;  %vm772_vm1 = vcmask 130048   ;;  %vm1221_vm6 = vcmask 257024  }
   0xd   : > { %1465 = vmatpush.bf16.msra.mxu1 %v1441_v0  ;;  %504 = vmatpush.bf16.msra.mxu0 %v1441_v0  ;;  %v1443_v2 = vld [vmem:[%s1846_s4 + $0x8] sm:$0xff]  ;;  %s1429_s11 = sshll.u32 %s1854_s27, 3  ;;  %v1442_v4 = vld [vmem:[%s1846_s4] sm:$0xff]  ;;  %p1344_p6 = scmp.lt.s32.totalorder %s1856_s18, 0 }
   0xe   : > { %1466 = vmatpush.bf16.msra.mxu2 %v1441_v0  ;;  %1467 = vmatpush.bf16.msra.mxu3 %v1441_v0  ;;  %s378_s15 = scalar_lea.vmem %s1842_s0, %s1429_s11  ;;  %s392_s19 = sadd.s32 4, %s1856_s18 }
   0xf   : > { %v1433_v3 = vld [vmem:[%s378_s15 + $0x8] sm:$0xff]  ;;  %v1432_v5 = vld [vmem:[%s378_s15] sm:$0xff]  ;;  %s1858_s19 = smov (!%p1344_p6, %s392_s19), %s1856_s18  ;;  %v1434_v7 = vld [vmem:[%s378_s15 + $0x10] sm:$0xff] }
  0x10   : > { %s1345_s20 = sshll.u32 %s1858_s19, 2  ;;  %v1435_v9 = vld [vmem:[%s378_s15 + $0x18] sm:$0xff] }
  0x11   : > { %1468 = vmatpush.bf16.msra.mxu1 %v1440_v1  ;;  %505 = vmatpush.bf16.msra.mxu0 %v1440_v1  ;;  %p396_p7 = scmp.lt.s32.totalorder %s1345_s20, 15 }
  0x12   : > { %1469 = vmatpush.bf16.msra.mxu2 %v1440_v1  ;;  %1470 = vmatpush.bf16.msra.mxu3 %v1440_v1 }
  0x13   : > { %s1860_s20 = smov (!%p396_p7, %s1345_s20), 15 }
  0x14   : > { %1376 = vmatmul.msk.bf16.vlgmr.msra.gmra.mxu1 %vm485_vm0, %v1433_v3  ;;  %1375 = vmatmul.msk.bf16.vlgmr.msra.gmra.mxu0 %vm485_vm0, %v1432_v5  ;;  %s1430_s21 = sshll.u32 %s1860_s20, 3 }
  0x15   : > { %581 = vmatpush.bf16.msrb.mxu1 %v1443_v2  ;;  %s400_s29 = scalar_lea.vmem %s1843_s1, %s1430_s21  ;;  %1377 = vmatmul.msk.bf16.vlgmr.msra.gmra.mxu2 %vm485_vm0, %v1434_v7  ;;  %s1803_s21 = scalar_lea.vmem %s1848_s6, %s1429_s11 }
  0x16   : > { %v1436_v6 = vld [vmem:[%s400_s29] sm:$0xff]  ;;  %v1437_v8 = vld [vmem:[%s400_s29 + $0x8] sm:$0xff]  ;;  %1378 = vmatmul.msk.bf16.vlgmr.msra.gmra.mxu3 %vm485_vm0, %v1435_v9  ;;  %v1438_v10 = vld [vmem:[%s400_s29 + $0x10] sm:$0xff] }
  0x17   : > { %v1439_v11 = vld [vmem:[%s400_s29 + $0x18] sm:$0xff] }
  0x19   : > { %582 = vmatpush.bf16.msrb.mxu1 %v1442_v4 }
  0x24   : > { %1403 = vmatmul.msk.bf16.vlgmr.msrb.gmra.mxu1 %vm485_vm0, %v1436_v6 }
  0x34   : > { %1404 = vmatmul.msk.bf16.gmra.mxu1 %vm485_vm0, %v1437_v8  ;;  %v1447_v8 = vld [vmem:[%s1844_s2] sm:$0xff]  }
  0x35   : > { %v1448_v9 = vunpack.c.l.bf16 %v1447_v8 }
  0x44   : > { %1405 = vmatmul.msk.bf16.gmra.mxu1 %vm485_vm0, %v1438_v10 }
  0x54   : > { %1406 = vmatmul.msk.bf16.gmra.mxu1 %vm485_vm0, %v1439_v11 }
  0x91   : > { %v512_v12 = vpop.f32.mrf.mxu1  ;;  %v507_v14 = vpop.f32.mrf.mxu0 }
  0x92   : > { %v604_v21 = vpack.c.bf16 %v507_v14, %v507_v14  ;;  %v606_v38 = vpack.c.bf16 %v512_v12, %v512_v12  ;;  %v1449_v14 = vunpack.c.h.bf16 %v1447_v8 }
  0x94   : > { %v622_v25 = vunpack.c.l.b16 %v604_v21  ;;  %v652_v42 = vunpack.c.l.b16 %v606_v38 }
  0x98   : > { %v517_v37 = vpop.f32.mrf.mxu2 }
  0x99   : > { %v514_v13 = vpop.f32.mrf.mxu1  ;;  %v509_v18 = vpop.f32.mrf.mxu0  ;;  %v608_v49 = vpack.c.bf16 %v517_v37, %v517_v37 }
  0x9a   : > { %v605_v23 = vpack.c.bf16 %v509_v18, %v509_v18  ;;  %v607_v35 = vpack.c.bf16 %v514_v13, %v514_v13  ;;  %v522_v53 = vpop.f32.mrf.mxu3  ;;  %v1462_v18 = vld [vmem:[%s1844_s2 + $0x8] sm:$0xff]  }
  0x9b   : > { %v682_v54 = vunpack.c.l.b16 %v608_v49  ;;  %v610_v0 = vpack.c.bf16 %v522_v53, %v522_v53 }
  0x9c   : > { %v623_v26 = vunpack.c.l.b16 %v605_v23  ;;  %v653_v41 = vunpack.c.l.b16 %v607_v35 }
  0x9d   : > { %v712_v4 = vunpack.c.l.b16 %v610_v0 }
  0x9e   : > { %v624_v29 = vpack.c.b16 %v623_v26, %v622_v25  ;;  %v654_v43 = vpack.c.b16 %v653_v41, %v652_v42  ;;  %v1453_v26 = vunpack.c.h.bf16 %v1462_v18  ;;  %v1464_v42 = vld [vmem:[%s1844_s2 + $0x18] sm:$0xff]  }
  0x9f   : > { %v1461_v49 = vunpack.c.h.bf16 %v1464_v42 }
  0xa0   : > { %v519_v46 = vpop.f32.mrf.mxu2 }
  0xa1   : > { %v584_v15 = vpop.f32.mrf.mxu1  ;;  %v609_v51 = vpack.c.bf16 %v519_v46, %v519_v46 }
  0xa2   : > { %v612_v16 = vpack.c.bf16 %v584_v15, %v584_v15  ;;  %v524_v61 = vpop.f32.mrf.mxu3 }
  0xa3   : > { %v683_v55 = vunpack.c.l.b16 %v609_v51  ;;  %v611_v2 = vpack.c.bf16 %v524_v61, %v524_v61 }
  0xa4   : > { %v627_v20 = vunpack.c.l.b16 %v612_v16 }
  0xa5   : > { %v684_v58 = vpack.c.b16 %v683_v55, %v682_v54  ;;  %v713_v5 = vunpack.c.l.b16 %v611_v2 }
  0xa7   : > { %v714_v7 = vpack.c.b16 %v713_v5, %v712_v4 }
  0xa9   : > { %v586_v17 = vpop.f32.mrf.mxu1 }
  0xaa   : > { %v613_v19 = vpack.c.bf16 %v586_v17, %v586_v17 }
  0xac   : > { %v628_v22 = vunpack.c.l.b16 %v613_v19 }
  0xae   : > { %v1658_v24 = vpack.c.b16 %v628_v22, %v627_v20  ;;  %v1452_v20 = vunpack.c.l.bf16 %v1462_v18 }
  0xb0   : > { %v634_v27 = vsel %vm485_vm0, %v1658_v24, 0 }
  0xb1   : > { %v589_v28 = vpop.f32.mrf.mxu1  ;;  %643 = vmatpush.bf16.xpose.msrb.mxu2 %v634_v27 }
  0xb2   : > { %v614_v30 = vpack.c.bf16 %v589_v28, %v589_v28 }
  0xb4   : > { %v657_v33 = vunpack.c.l.b16 %v614_v30  ;;  %v1463_v30 = vld [vmem:[%s1844_s2 + $0x10] sm:$0xff]  }
  0xb5   : > { %v1457_v38 = vunpack.c.h.bf16 %v1463_v30 }
  0xb8   : > { %1407 = vmatmul.msk.bf16.vlgmr.msrb.gmra.mxu2 %vm485_vm0, %v624_v29 }
  0xb9   : > { %v591_v31 = vpop.f32.mrf.mxu1 }
  0xba   : > { %v615_v32 = vpack.c.bf16 %v591_v31, %v591_v31 }
  0xbc   : > { %v658_v34 = vunpack.c.l.b16 %v615_v32  ;;  %v1456_v32 = vunpack.c.l.bf16 %v1463_v30 }
  0xbe   : > { %v1663_v36 = vpack.c.b16 %v658_v34, %v657_v33 }
  0xc0   : > { %v664_v39 = vsel %vm485_vm0, %v1663_v36, 0 }
  0xc1   : > { %v594_v40 = vpop.f32.mrf.mxu1  ;;  %673 = vmatpush.bf16.xpose.msrb.mxu3 %v664_v39 }
  0xc2   : > { %v616_v44 = vpack.c.bf16 %v594_v40, %v594_v40 }
  0xc4   : > { %v687_v47 = vunpack.c.l.b16 %v616_v44  ;;  %v1460_v44 = vunpack.c.l.bf16 %v1464_v42 }
  0xc8   : > { %1408 = vmatmul.msk.bf16.vlgmr.msrb.gmra.mxu3 %vm485_vm0, %v654_v43 }
  0xc9   : > { %v596_v45 = vpop.f32.mrf.mxu1 }
  0xca   : > { %v617_v48 = vpack.c.bf16 %v596_v45, %v596_v45 }
  0xcc   : > { %v688_v50 = vunpack.c.l.b16 %v617_v48 }
  0xce   : > { %v1668_v52 = vpack.c.b16 %v688_v50, %v687_v47 }
  0xd0   : > { %v694_v56 = vsel %vm485_vm0, %v1668_v52, 0 }
  0xd1   : > { %v599_v57 = vpop.f32.mrf.mxu1  ;;  %703 = vmatpush.bf16.xpose.msra.mxu2 %v694_v56 }
  0xd2   : > { %v618_v59 = vpack.c.bf16 %v599_v57, %v599_v57 }
  0xd4   : > { %v717_v62 = vunpack.c.l.b16 %v618_v59 }
  0xd8   : > { %1409 = vmatmul.msk.bf16.vlgmr.msra.gmra.mxu2 %vm485_vm0, %v684_v58 }
  0xd9   : > { %v601_v60 = vpop.f32.mrf.mxu1 }
  0xda   : > { %v619_v63 = vpack.c.bf16 %v601_v60, %v601_v60 }
  0xdc   : > { %v718_v1 = vunpack.c.l.b16 %v619_v63 }
  0xde   : > { %v719_v3 = vpack.c.b16 %v718_v1, %v717_v62 }
  0xe0   : > { %v724_v6 = vsel %vm485_vm0, %v719_v3, 0 }
  0xe1   : > { %733 = vmatpush.bf16.xpose.msra.mxu3 %v724_v6 }
  0xe8   : > { %1410 = vmatmul.msk.bf16.vlgmr.msra.gmra.mxu3 %vm485_vm0, %v714_v7 }
 0x13b   : > { %v645_v10 = vpop.f32.mrf.mxu2 }
 0x13c   : > { %v740_v11 = vmul.f32 0.17677669, %v645_v10 }
 0x13e   : > { %v764_v12 = vadd.f32 %v1448_v9, %v740_v11 }
 0x140   : > { %v773_v13 = vsel %vm772_vm1, %v764_v12, -inf }
 0x141   : > { %774 = vmax.xlane.f32.xlu0 %v773_v13 }
 0x143   : > { %v647_v15 = vpop.f32.mrf.mxu2 }
 0x144   : > { %v741_v16 = vmul.f32 0.17677669, %v647_v15 }
 0x146   : > { %v765_v17 = vadd.f32 %v1449_v14, %v741_v16 }
 0x148   : > { %v776_v19 = vsel %vm772_vm1, %v765_v17, -inf }
 0x149   : > { %777 = vmax.xlane.f32.xlu0 %v776_v19 }
 0x14b   : > { %v675_v21 = vpop.f32.mrf.mxu3 }
 0x14c   : > { %v742_v22 = vmul.f32 0.17677669, %v675_v21 }
 0x14e   : > { %v766_v23 = vadd.f32 %v1452_v20, %v742_v22 }
 0x150   : > { %v779_v25 = vsel %vm772_vm1, %v766_v23, -inf }
 0x151   : > { %780 = vmax.xlane.f32.xlu1 %v779_v25 }
 0x153   : > { %v677_v27 = vpop.f32.mrf.mxu3 }
 0x154   : > { %v743_v28 = vmul.f32 0.17677669, %v677_v27 }
 0x156   : > { %v767_v29 = vadd.f32 %v1453_v26, %v743_v28 }
 0x158   : > { %v782_v31 = vsel %vm772_vm1, %v767_v29, -inf }
 0x159   : > { %783 = vmax.xlane.f32.xlu1 %v782_v31 }
 0x15b   : > { %v705_v33 = vpop.f32.mrf.mxu2 }
 0x15c   : > { %v744_v34 = vmul.f32 0.17677669, %v705_v33 }
 0x15e   : > { %v768_v35 = vadd.f32 %v1456_v32, %v744_v34 }
 0x160   : > { %v785_v37 = vsel %vm772_vm1, %v768_v35, -inf }
 0x161   : > { %786 = vmax.xlane.f32.xlu2 %v785_v37 }
 0x163   : > { %v707_v39 = vpop.f32.mrf.mxu2 }
 0x164   : > { %v745_v40 = vmul.f32 0.17677669, %v707_v39 }
 0x166   : > { %v769_v41 = vadd.f32 %v1457_v38, %v745_v40 }
 0x168   : > { %v788_v43 = vsel %vm772_vm1, %v769_v41, -inf }
 0x169   : > { %789 = vmax.xlane.f32.xlu2 %v788_v43 }
 0x16b   : > { %v735_v45 = vpop.f32.mrf.mxu3 }
 0x16c   : > { %v746_v46 = vmul.f32 0.17677669, %v735_v45 }
 0x16e   : > { %v770_v47 = vadd.f32 %v1460_v44, %v746_v46 }
 0x170   : > { %v791_v48 = vsel %vm772_vm1, %v770_v47, -inf }
 0x171   : > { %792 = vmax.xlane.f32.xlu0 %v791_v48 }
 0x173   : > { %v737_v50 = vpop.f32.mrf.mxu3 }
 0x174   : > { %v747_v51 = vmul.f32 0.17677669, %v737_v50 }
 0x176   : > { %v771_v53 = vadd.f32 %v1461_v49, %v747_v51 }
 0x178   : > { %v794_v54 = vsel %vm772_vm1, %v771_v53, -inf }
 0x179   : > { %795 = vmax.xlane.f32.xlu1 %v794_v54 }
 0x192   : > { %874 = vrot.lane.b32.xlu1 %v1658_v24, %s1571_s14 }
 0x19a   : > { %924 = vrot.lane.b32.xlu1 %v1668_v52, %s1571_s14 }
 0x1a2   : > { %949 = vrot.lane.b32.xlu1 %v719_v3, %s1571_s14 }
 0x1b4   : > { %v775_v55 = vpop.xlane.xlu0 %774 }
 0x1b5   : > { %v797_v56 = vsub.f32 %v764_v12, %v775_v55 }
 0x1b7   : > { %v805_v57 = vmul.f32 1.442695, %v797_v56 }
 0x1b9   : > { %1497 = vpow2.f32 %v805_v57 }
 0x1bc   : > { %v778_v58 = vpop.xlane.xlu0 %777 }
 0x1bd   : > { %v798_v59 = vsub.f32 %v765_v17, %v778_v58 }
 0x1bf   : > { %v1498_v60 = vpop.eup %1497  ;;  %v807_v61 = vmul.f32 1.442695, %v798_v59 }
 0x1c0   : > { %v821_v62 = vsel %vm772_vm1, %v1498_v60, 0.0 }
 0x1c1   : > { %1499 = vpow2.f32 %v807_v61  ;;  %822 = vadd.xlane.f32.xlu2 %v821_v62 }
 0x1c4   : > { %v781_v63 = vpop.xlane.xlu1 %780 }
 0x1c5   : > { %v799_v0 = vsub.f32 %v766_v23, %v781_v63 }
 0x1c7   : > { %v1500_v24 = vpop.eup %1499  ;;  %v809_v1 = vmul.f32 1.442695, %v799_v0 }
 0x1c8   : > { %v824_v52 = vsel %vm772_vm1, %v1500_v24, 0.0 }
 0x1c9   : > { %1501 = vpow2.f32 %v809_v1  ;;  %825 = vadd.xlane.f32.xlu0 %v824_v52 }
 0x1cc   : > { %v784_v2 = vpop.xlane.xlu1 %783 }
 0x1cd   : > { %v800_v3 = vsub.f32 %v767_v29, %v784_v2 }
 0x1cf   : > { %v1702_v4 = vpop.eup %1501  ;;  %v811_v5 = vmul.f32 1.442695, %v800_v3 }
 0x1d0   : > { %v827_v6 = vsel %vm772_vm1, %v1702_v4, 0.0 }
 0x1d1   : > { %1503 = vpow2.f32 %v811_v5  ;;  %828 = vadd.xlane.f32.xlu2 %v827_v6 }
 0x1d4   : > { %v787_v7 = vpop.xlane.xlu2 %786 }
 0x1d5   : > { %v801_v8 = vsub.f32 %v768_v35, %v787_v7 }
 0x1d7   : > { %v1504_v9 = vpop.eup %1503  ;;  %v813_v10 = vmul.f32 1.442695, %v801_v8 }
 0x1d8   : > { %v830_v11 = vsel %vm772_vm1, %v1504_v9, 0.0 }
 0x1d9   : > { %1505 = vpow2.f32 %v813_v10  ;;  %831 = vadd.xlane.f32.xlu0 %v830_v11 }
 0x1dc   : > { %v790_v12 = vpop.xlane.xlu2 %789 }
 0x1dd   : > { %v802_v13 = vsub.f32 %v769_v41, %v790_v12 }
 0x1df   : > { %v1707_v14 = vpop.eup %1505  ;;  %v815_v15 = vmul.f32 1.442695, %v802_v13  ;;  %v1445_v13 = vld [vmem:[%s1847_s5 + $0x8] sm:$0xff] }
 0x1e0   : > { %v833_v16 = vsel %vm772_vm1, %v1707_v14, 0.0  ;;  %1007 = vmatpush.bf16.msrb.mxu0 %v1445_v13 }
 0x1e1   : > { %1507 = vpow2.f32 %v815_v15  ;;  %834 = vadd.xlane.f32.xlu0 %v833_v16 }
 0x1e4   : > { %v793_v17 = vpop.xlane.xlu0 %792 }
 0x1e5   : > { %v803_v18 = vsub.f32 %v770_v47, %v793_v17 }
 0x1e7   : > { %v1508_v19 = vpop.eup %1507  ;;  %v817_v20 = vmul.f32 1.442695, %v803_v18 }
 0x1e8   : > { %v836_v21 = vsel %vm772_vm1, %v1508_v19, 0.0 }
 0x1e9   : > { %1509 = vpow2.f32 %v817_v20  ;;  %899 = vrot.lane.b32.xlu2 %v1663_v36, %s1571_s14  ;;  %837 = vadd.xlane.f32.xlu0 %v836_v21 }
 0x1ec   : > { %v796_v25 = vpop.xlane.xlu1 %795 }
 0x1ed   : > { %v804_v26 = vsub.f32 %v771_v53, %v796_v25 }
 0x1ef   : > { %v1714_v22 = vpop.eup %1509  ;;  %v819_v27 = vmul.f32 1.442695, %v804_v26 }
 0x1f0   : > { %v839_v23 = vsel %vm772_vm1, %v1714_v22, 0.0 }
 0x1f1   : > { %840 = vadd.xlane.f32.xlu0 %v839_v23  ;;  %1511 = vpow2.f32 %v819_v27 }
 0x1f7   : > { %v1512_v30 = vpop.eup %1511 }
 0x1f8   : > { %v842_v31 = vsel %vm772_vm1, %v1512_v30, 0.0 }
 0x204   : > { %v875_v28 = vpop.permute.xlu1 %874 }
 0x205   : > { %887 = vmatpush.bf16.msrb.mxu2 %v875_v28 }
 0x20c   : > { %v925_v29 = vpop.permute.xlu1 %924 }
 0x20d   : > { %937 = vmatpush.bf16.msra.mxu2 %v925_v29 }
 0x212   : > { %843 = vadd.xlane.f32.xlu2 %v842_v31 }
 0x214   : > { %v950_v47 = vpop.permute.xlu1 %949 }
 0x234   : > { %v823_v36 = vpop.xlane.xlu2 %822 }
 0x235   : > { %1513 = vrcp.f32 %v823_v36 }
 0x23b   : > { %v1514_v33 = vpop.eup %1513 }
 0x23c   : > { %v826_v32 = vpop.xlane.xlu0 %825  ;;  %v853_v34 = vmul.f32 %v1514_v33, %v1498_v60 }
 0x23d   : > { %1515 = vrcp.f32 %v826_v32 }
 0x23e   : > { %v861_v37 = vpack.c.bf16 %v853_v34, %v853_v34 }
 0x240   : > { %v871_v41 = vunpack.c.l.b16 %v861_v37 }
 0x243   : > { %v1516_v35 = vpop.eup %1515 }
 0x244   : > { %v854_v38 = vmul.f32 %v1516_v35, %v1500_v24  ;;  %v829_v39 = vpop.xlane.xlu2 %828 }
 0x245   : > { %1517 = vrcp.f32 %v829_v39 }
 0x246   : > { %v862_v40 = vpack.c.bf16 %v854_v38, %v854_v38 }
 0x248   : > { %v872_v42 = vunpack.c.l.b16 %v862_v40 }
 0x24a   : > { %v873_v43 = vpack.c.b16 %v872_v42, %v871_v41 }
 0x24b   : > { %v1518_v46 = vpop.eup %1517 }
 0x24c   : > { %v832_v44 = vpop.xlane.xlu0 %831  ;;  %1411 = vmatmul.msk.bf16.vlgmr.msrb.gmra.mxu2 %vm772_vm1, %v873_v43  ;;  %v900_v45 = vpop.permute.xlu2 %899  ;;  %v855_v48 = vmul.f32 %v1518_v46, %v1702_v4 }
 0x24d   : > { %1519 = vrcp.f32 %v832_v44  ;;  %912 = vmatpush.bf16.msrb.mxu3 %v900_v45  ;;  %v1572_v44 = vmov 32.0  }
 0x24e   : > { %v863_v50 = vpack.c.bf16 %v855_v48, %v855_v48 }
 0x250   : > { %v896_v55 = vunpack.c.l.b16 %v863_v50 }
 0x251   : > { %962 = vmatpush.bf16.msra.mxu3 %v950_v47 }
 0x253   : > { %v1520_v49 = vpop.eup %1519 }
 0x254   : > { %v856_v51 = vmul.f32 %v1520_v49, %v1504_v9  ;;  %v835_v53 = vpop.xlane.xlu0 %834 }
 0x255   : > { %1521 = vrcp.f32 %v835_v53 }
 0x256   : > { %v864_v54 = vpack.c.bf16 %v856_v51, %v856_v51 }
 0x258   : > { %v897_v56 = vunpack.c.l.b16 %v864_v54 }
 0x25a   : > { %v898_v57 = vpack.c.b16 %v897_v56, %v896_v55 }
 0x25b   : > { %v1522_v59 = vpop.eup %1521 }
 0x25c   : > { %v838_v58 = vpop.xlane.xlu0 %837  ;;  %1412 = vmatmul.msk.bf16.vlgmr.msrb.gmra.mxu3 %vm772_vm1, %v898_v57  ;;  %v857_v60 = vmul.f32 %v1522_v59, %v1707_v14  ;;  %v1444_v14 = vld [vmem:[%s1847_s5] sm:$0xff] }
 0x25d   : > { %1523 = vrcp.f32 %v838_v58  ;;  %1008 = vmatpush.bf16.msrb.mxu0 %v1444_v14 }
 0x25e   : > { %v865_v62 = vpack.c.bf16 %v857_v60, %v857_v60 }
 0x260   : > { %v921_v24 = vunpack.c.l.b16 %v865_v62 }
 0x263   : > { %v1524_v61 = vpop.eup %1523 }
 0x264   : > { %v858_v63 = vmul.f32 %v1524_v61, %v1508_v19  ;;  %v841_v2 = vpop.xlane.xlu0 %840 }
 0x265   : > { %1525 = vrcp.f32 %v841_v2 }
 0x266   : > { %v866_v0 = vpack.c.bf16 %v858_v63, %v858_v63 }
 0x268   : > { %v922_v1 = vunpack.c.l.b16 %v866_v0 }
 0x26a   : > { %v923_v52 = vpack.c.b16 %v922_v1, %v921_v24 }
 0x26b   : > { %v1526_v4 = vpop.eup %1525 }
 0x26c   : > { %1413 = vmatmul.msk.bf16.vlgmr.msra.gmra.mxu2 %vm772_vm1, %v923_v52  ;;  %v859_v5 = vmul.f32 %v1526_v4, %v1714_v22 }
 0x26e   : > { %v867_v7 = vpack.c.bf16 %v859_v5, %v859_v5 }
 0x270   : > { %v946_v10 = vunpack.c.l.b16 %v867_v7 }
 0x285   : > { %v844_v3 = vpop.xlane.xlu2 %843 }
 0x286   : > { %1527 = vrcp.f32 %v844_v3 }
 0x287   : > { %1529 = vrcp.f32 %v1572_v44 }
 0x28c   : > { %v1528_v6 = vpop.eup %1527 }
 0x28d   : > { %v860_v8 = vmul.f32 %v1528_v6, %v1512_v30  ;;  %v1530_v45 = vpop.eup %1529 }
 0x28e   : > { %v1055_v46 = vmul.f32 32.0, %v1530_v45  ;;  %vm1059_vm2 = vweird.f32 %v1530_v45 }
 0x28f   : > { %v868_v9 = vpack.c.bf16 %v860_v8, %v860_v8 }
 0x290   : > { %v1056_v47 = vsub.f32 1.0, %v1055_v46 }
 0x291   : > { %v947_v11 = vunpack.c.l.b16 %v868_v9 }
 0x292   : > { %v1057_v48 = vmul.f32 %v1530_v45, %v1056_v47 }
 0x293   : > { %v948_v12 = vpack.c.b16 %v947_v11, %v946_v10 }
 0x294   : > { %v1058_v49 = vadd.f32 %v1530_v45, %v1057_v48 }
 0x295   : > { %1414 = vmatmul.msk.bf16.vlgmr.msra.gmra.mxu3 %vm772_vm1, %v948_v12 }
 0x296   : > { %v1744_v50 = vsel %vm1059_vm2, %v1530_v45, %v1058_v49 }
 0x2cf   : > { %v889_v15 = vpop.f32.mrf.mxu2 }
 0x2d7   : > { %v891_v16 = vpop.f32.mrf.mxu2 }
 0x2d8   : > { %v969_v17 = vpack.c.bf16 %v891_v16, %v889_v15 }
 0x2da   : > { %1423 = vmatmul.msk.bf16.vlgmr.msrb.gmra.mxu0 %vm485_vm0, %v969_v17 }
 0x2df   : > { %v914_v18 = vpop.f32.mrf.mxu3 }
 0x2e7   : > { %v916_v19 = vpop.f32.mrf.mxu3 }
 0x2e8   : > { %v970_v20 = vpack.c.bf16 %v916_v19, %v914_v18 }
 0x2ea   : > { %1424 = vmatmul.msk.bf16.gmra.mxu0 %vm485_vm0, %v970_v20 }
 0x2ef   : > { %v939_v21 = vpop.f32.mrf.mxu2 }
 0x2f7   : > { %v941_v22 = vpop.f32.mrf.mxu2 }
 0x2f8   : > { %v971_v23 = vpack.c.bf16 %v941_v22, %v939_v21 }
 0x2fa   : > { %1425 = vmatmul.msk.bf16.gmra.mxu0 %vm485_vm0, %v971_v23 }
 0x318   : > { %v964_v25 = vpop.f32.mrf.mxu3 }
 0x320   : > { %v966_v26 = vpop.f32.mrf.mxu3 }
 0x321   : > { %v972_v27 = vpack.c.bf16 %v966_v26, %v964_v25 }
 0x323   : > { %1426 = vmatmul.msk.bf16.gmra.mxu0 %vm485_vm0, %v972_v27 }
 0x357   : > { %v1010_v28 = vpop.f32.mrf.mxu0 }
 0x358   : > { %v1030_v29 = vsel %vm485_vm0, %v1010_v28, 0.0 }
 0x359   : > { %1031 = vadd.xlane.f32.xlu0 %v1030_v29 }
 0x35f   : > { %v1012_v30 = vpop.f32.mrf.mxu0 }
 0x360   : > { %v1033_v31 = vsel %vm485_vm0, %v1012_v30, 0.0 }
 0x361   : > { %1034 = vadd.xlane.f32.xlu1 %v1033_v31 }
 0x367   : > { %v1015_v36 = vpop.f32.mrf.mxu0 }
 0x368   : > { %v1036_v32 = vsel %vm485_vm0, %v1015_v36, 0.0 }
 0x369   : > { %1037 = vadd.xlane.f32.xlu0 %v1036_v32 }
 0x36f   : > { %v1017_v33 = vpop.f32.mrf.mxu0 }
 0x370   : > { %v1039_v34 = vsel %vm485_vm0, %v1017_v33, 0.0 }
 0x371   : > { %1040 = vadd.xlane.f32.xlu0 %v1039_v34 }
 0x377   : > { %v1020_v35 = vpop.f32.mrf.mxu0 }
 0x378   : > { %v1042_v37 = vsel %vm485_vm0, %v1020_v35, 0.0 }
 0x379   : > { %1043 = vadd.xlane.f32.xlu0 %v1042_v37 }
 0x37f   : > { %v1022_v38 = vpop.f32.mrf.mxu0 }
 0x380   : > { %v1045_v39 = vsel %vm485_vm0, %v1022_v38, 0.0 }
 0x381   : > { %1046 = vadd.xlane.f32.xlu0 %v1045_v39 }
 0x3a0   : > { %v1025_v40 = vpop.f32.mrf.mxu0 }
 0x3a1   : > { %v1048_v41 = vsel %vm485_vm0, %v1025_v40, 0.0 }
 0x3a2   : > { %1049 = vadd.xlane.f32.xlu2 %v1048_v41 }
 0x3a8   : > { %v1027_v42 = vpop.f32.mrf.mxu0 }
 0x3a9   : > { %v1051_v43 = vsel %vm485_vm0, %v1027_v42, 0.0 }
 0x3aa   : > { %1052 = vadd.xlane.f32.xlu0 %v1051_v43 }
 0x3cc   : > { %v1032_v51 = vpop.xlane.xlu0 %1031 }
 0x3cd   : > { %v1061_v53 = vmul.f32 %v1744_v50, %v1032_v51 }
 0x3cf   : > { %v1747_v54 = vsub.f32 %v1010_v28, %v1061_v53 }
 0x3d1   : > { %v1077_v55 = vmul.f32 %v1747_v54, %v1747_v54 }
 0x3d3   : > { %v1085_v56 = vsel %vm485_vm0, %v1077_v55, 0.0 }
 0x3d4   : > { %v1035_v57 = vpop.xlane.xlu1 %1034  ;;  %1086 = vadd.xlane.f32.xlu2 %v1085_v56 }
 0x3d5   : > { %v1062_v58 = vmul.f32 %v1744_v50, %v1035_v57 }
 0x3d7   : > { %v1753_v59 = vsub.f32 %v1012_v30, %v1062_v58 }
 0x3d9   : > { %v1078_v60 = vmul.f32 %v1753_v59, %v1753_v59 }
 0x3db   : > { %v1088_v61 = vsel %vm485_vm0, %v1078_v60, 0.0 }
 0x3dc   : > { %1089 = vadd.xlane.f32.xlu1 %v1088_v61  ;;  %v1038_v62 = vpop.xlane.xlu0 %1037 }
 0x3dd   : > { %v1063_v63 = vmul.f32 %v1744_v50, %v1038_v62 }
 0x3df   : > { %v1759_v0 = vsub.f32 %v1015_v36, %v1063_v63 }
 0x3e1   : > { %v1079_v24 = vmul.f32 %v1759_v0, %v1759_v0 }
 0x3e3   : > { %v1091_v1 = vsel %vm485_vm0, %v1079_v24, 0.0 }
 0x3e4   : > { %v1041_v52 = vpop.xlane.xlu0 %1040  ;;  %1092 = vadd.xlane.f32.xlu0 %v1091_v1 }
 0x3e5   : > { %v1064_v2 = vmul.f32 %v1744_v50, %v1041_v52 }
 0x3e7   : > { %v1765_v3 = vsub.f32 %v1017_v33, %v1064_v2 }
 0x3e9   : > { %v1080_v4 = vmul.f32 %v1765_v3, %v1765_v3 }
 0x3eb   : > { %v1094_v5 = vsel %vm485_vm0, %v1080_v4, 0.0 }
 0x3ec   : > { %v1044_v6 = vpop.xlane.xlu0 %1043  ;;  %1095 = vadd.xlane.f32.xlu2 %v1094_v5 }
 0x3ed   : > { %v1065_v7 = vmul.f32 %v1744_v50, %v1044_v6 }
 0x3ef   : > { %v1771_v8 = vsub.f32 %v1020_v35, %v1065_v7 }
 0x3f1   : > { %v1081_v9 = vmul.f32 %v1771_v8, %v1771_v8 }
 0x3f3   : > { %v1097_v10 = vsel %vm485_vm0, %v1081_v9, 0.0 }
 0x3f4   : > { %1098 = vadd.xlane.f32.xlu1 %v1097_v10  ;;  %v1047_v11 = vpop.xlane.xlu0 %1046 }
 0x3f5   : > { %v1066_v12 = vmul.f32 %v1744_v50, %v1047_v11 }
 0x3f7   : > { %v1777_v13 = vsub.f32 %v1022_v38, %v1066_v12 }
 0x3f9   : > { %v1082_v14 = vmul.f32 %v1777_v13, %v1777_v13 }
 0x3fb   : > { %v1100_v15 = vsel %vm485_vm0, %v1082_v14, 0.0 }
 0x3fc   : > { %1101 = vadd.xlane.f32.xlu0 %v1100_v15 }
 0x415   : > { %v1050_v16 = vpop.xlane.xlu2 %1049 }
 0x416   : > { %v1067_v17 = vmul.f32 %v1744_v50, %v1050_v16 }
 0x418   : > { %v1783_v18 = vsub.f32 %v1025_v40, %v1067_v17 }
 0x41a   : > { %v1083_v19 = vmul.f32 %v1783_v18, %v1783_v18 }
 0x41c   : > { %v1103_v20 = vsel %vm485_vm0, %v1083_v19, 0.0 }
 0x41d   : > { %1104 = vadd.xlane.f32.xlu2 %v1103_v20  ;;  %v1053_v21 = vpop.xlane.xlu0 %1052 }
 0x41e   : > { %v1068_v22 = vmul.f32 %v1744_v50, %v1053_v21 }
 0x420   : > { %v1789_v23 = vsub.f32 %v1027_v42, %v1068_v22 }
 0x422   : > { %v1084_v25 = vmul.f32 %v1789_v23, %v1789_v23 }
 0x424   : > { %v1106_v26 = vsel %vm485_vm0, %v1084_v25, 0.0 }
 0x425   : > { %1107 = vadd.xlane.f32.xlu1 %v1106_v26 }
 0x447   : > { %v1087_v27 = vpop.xlane.xlu2 %1086 }
 0x448   : > { %v1109_v28 = vmul.f32 %v1087_v27, %v1744_v50 }
 0x44a   : > { %v1117_v29 = vadd.f32 1e-05, %v1109_v28 }
 0x44c   : > { %1531 = vrsqrt.f32 %v1117_v29  ;;  %vm1131_vm4 = vweird.f32 %v1117_v29 }
 0x44f   : > { %v1090_v30 = vpop.xlane.xlu1 %1089 }
 0x450   : > { %v1110_v31 = vmul.f32 %v1090_v30, %v1744_v50 }
 0x452   : > { %v1532_v36 = vpop.eup %1531  ;;  %v1118_v32 = vadd.f32 1e-05, %v1110_v31 }
 0x453   : > { %v1126_v33 = vmul.f32 %v1532_v36, %v1117_v29  ;;  %vm1132_vm3 = vweird.f32 %v1532_v36 }
 0x454   : > { %1533 = vrsqrt.f32 %v1118_v32  ;;  %vm1133_vm5 = vmor %vm1131_vm4, %vm1132_vm3  ;;  %vm1141_vm8 = vweird.f32 %v1118_v32 }
 0x455   : > { %v1127_v34 = vmul.f32 %v1532_v36, %v1126_v33 }
 0x457   : > { %v1128_v35 = vmul.f32 0.5, %v1127_v34  ;;  %v1093_v37 = vpop.xlane.xlu0 %1092 }
 0x458   : > { %v1111_v38 = vmul.f32 %v1093_v37, %v1744_v50 }
 0x459   : > { %v1129_v39 = vsub.f32 1.5, %v1128_v35 }
 0x45a   : > { %v1534_v40 = vpop.eup %1533  ;;  %v1119_v41 = vadd.f32 1e-05, %v1111_v38 }
 0x45b   : > { %v1130_v42 = vmul.f32 %v1532_v36, %v1129_v39  ;;  %v1136_v43 = vmul.f32 %v1534_v40, %v1118_v32  ;;  %vm1142_vm7 = vweird.f32 %v1534_v40 }
 0x45c   : > { %1535 = vrsqrt.f32 %v1119_v41  ;;  %vm1143_vm9 = vmor %vm1141_vm8, %vm1142_vm7  ;;  %vm1151_vm11 = vweird.f32 %v1119_v41 }
 0x45d   : > { %v1134_v44 = vsel %vm1133_vm5, %v1532_v36, %v1130_v42  ;;  %v1137_v45 = vmul.f32 %v1534_v40, %v1136_v43 }
 0x45e   : > { %v1205_v46 = vmul.f32 %v1134_v44, %v1747_v54 }
 0x45f   : > { %v1138_v47 = vmul.f32 0.5, %v1137_v45  ;;  %v1096_v48 = vpop.xlane.xlu2 %1095 }
 0x460   : > { %v1213_v49 = vpack.c.bf16 %v1205_v46, %v1205_v46  ;;  %v1112_v51 = vmul.f32 %v1096_v48, %v1744_v50 }
 0x461   : > { %v1139_v53 = vsub.f32 1.5, %v1138_v47 }
 0x462   : > { %v1536_v55 = vpop.eup %1535  ;;  %1222 = vst.msk [vmem:[%s1803_s21] sm:$0xf] %vm1221_vm6, %v1213_v49  ;;  %v1120_v56 = vadd.f32 1e-05, %v1112_v51 }
 0x463   : > { %v1140_v54 = vmul.f32 %v1534_v40, %v1139_v53  ;;  %v1146_v57 = vmul.f32 %v1536_v55, %v1119_v41  ;;  %vm1152_vm10 = vweird.f32 %v1536_v55 }
 0x464   : > { %1537 = vrsqrt.f32 %v1120_v56  ;;  %vm1153_vm12 = vmor %vm1151_vm11, %vm1152_vm10  ;;  %vm1161_vm14 = vweird.f32 %v1120_v56 }
 0x465   : > { %v1144_v58 = vsel %vm1143_vm9, %v1534_v40, %v1140_v54  ;;  %v1147_v60 = vmul.f32 %v1536_v55, %v1146_v57 }
 0x466   : > { %v1206_v61 = vmul.f32 %v1144_v58, %v1753_v59 }
 0x467   : > { %v1148_v62 = vmul.f32 0.5, %v1147_v60  ;;  %v1099_v63 = vpop.xlane.xlu1 %1098 }
 0x468   : > { %v1214_v24 = vpack.c.bf16 %v1206_v61, %v1206_v61  ;;  %v1113_v1 = vmul.f32 %v1099_v63, %v1744_v50 }
 0x469   : > { %v1149_v52 = vsub.f32 1.5, %v1148_v62 }
 0x46a   : > { %v1538_v2 = vpop.eup %1537  ;;  %1223 = vst.msk [vmem:[%s1803_s21 + $0x4] sm:$0xf] %vm1221_vm6, %v1214_v24  ;;  %v1121_v4 = vadd.f32 1e-05, %v1113_v1 }
 0x46b   : > { %v1150_v5 = vmul.f32 %v1536_v55, %v1149_v52  ;;  %v1156_v6 = vmul.f32 %v1538_v2, %v1120_v56  ;;  %vm1162_vm13 = vweird.f32 %v1538_v2 }
 0x46c   : > { %1539 = vrsqrt.f32 %v1121_v4  ;;  %vm1163_vm15 = vmor %vm1161_vm14, %vm1162_vm13  ;;  %vm1171_vm1 = vweird.f32 %v1121_v4 }
 0x46d   : > { %v1154_v7 = vsel %vm1153_vm12, %v1536_v55, %v1150_v5  ;;  %v1157_v9 = vmul.f32 %v1538_v2, %v1156_v6 }
 0x46e   : > { %v1207_v59 = vmul.f32 %v1154_v7, %v1759_v0 }
 0x46f   : > { %v1158_v10 = vmul.f32 0.5, %v1157_v9  ;;  %v1102_v11 = vpop.xlane.xlu0 %1101 }
 0x470   : > { %v1215_v12 = vpack.c.bf16 %v1207_v59, %v1207_v59  ;;  %v1114_v14 = vmul.f32 %v1102_v11, %v1744_v50 }
 0x471   : > { %v1159_v15 = vsub.f32 1.5, %v1158_v10 }
 0x472   : > { %v1540_v16 = vpop.eup %1539  ;;  %1224 = vst.msk [vmem:[%s1803_s21 + $0x8] sm:$0xf] %vm1221_vm6, %v1215_v12  ;;  %v1122_v17 = vadd.f32 1e-05, %v1114_v14 }
 0x473   : > { %v1160_v19 = vmul.f32 %v1538_v2, %v1159_v15  ;;  %v1166_v20 = vmul.f32 %v1540_v16, %v1121_v4  ;;  %vm1172_vm0 = vweird.f32 %v1540_v16 }
 0x474   : > { %1541 = vrsqrt.f32 %v1122_v17  ;;  %vm1173_vm2 = vmor %vm1171_vm1, %vm1172_vm0  ;;  %vm1181_vm4 = vweird.f32 %v1122_v17 }
 0x475   : > { %v1164_v21 = vsel %vm1163_vm15, %v1538_v2, %v1160_v19  ;;  %v1167_v22 = vmul.f32 %v1540_v16, %v1166_v20 }
 0x476   : > { %v1208_v0 = vmul.f32 %v1164_v21, %v1765_v3 }
 0x477   : > { %v1168_v25 = vmul.f32 0.5, %v1167_v22 }
 0x478   : > { %v1216_v26 = vpack.c.bf16 %v1208_v0, %v1208_v0 }
 0x479   : > { %v1169_v27 = vsub.f32 1.5, %v1168_v25 }
 0x47a   : > { %v1542_v28 = vpop.eup %1541  ;;  %1225 = vst.msk [vmem:[%s1803_s21 + $0xc] sm:$0xf] %vm1221_vm6, %v1216_v26 }
 0x47b   : > { %v1170_v29 = vmul.f32 %v1540_v16, %v1169_v27  ;;  %v1176_v30 = vmul.f32 %v1542_v28, %v1122_v17  ;;  %vm1182_vm3 = vweird.f32 %v1542_v28 }
 0x47c   : > { %vm1183_vm5 = vmor %vm1181_vm4, %vm1182_vm3 }
 0x47d   : > { %v1174_v31 = vsel %vm1173_vm2, %v1540_v16, %v1170_v29  ;;  %v1177_v36 = vmul.f32 %v1542_v28, %v1176_v30 }
 0x47e   : > { %v1209_v32 = vmul.f32 %v1174_v31, %v1771_v8 }
 0x47f   : > { %v1178_v33 = vmul.f32 0.5, %v1177_v36 }
 0x480   : > { %v1217_v34 = vpack.c.bf16 %v1209_v32, %v1209_v32 }
 0x481   : > { %v1179_v3 = vsub.f32 1.5, %v1178_v33 }
 0x482   : > { %1226 = vst.msk [vmem:[%s1803_s21 + $0x10] sm:$0xf] %vm1221_vm6, %v1217_v34 }
 0x483   : > { %v1180_v35 = vmul.f32 %v1542_v28, %v1179_v3 }
 0x485   : > { %v1184_v37 = vsel %vm1183_vm5, %v1542_v28, %v1180_v35 }
 0x486   : > { %v1210_v38 = vmul.f32 %v1184_v37, %v1777_v13 }
 0x488   : > { %v1218_v39 = vpack.c.bf16 %v1210_v38, %v1210_v38 }
 0x48a   : > { %1227 = vst.msk [vmem:[%s1803_s21 + $0x14] sm:$0xf] %vm1221_vm6, %v1218_v39 }
 0x490   : > { %v1105_v40 = vpop.xlane.xlu2 %1104 }
 0x491   : > { %v1115_v41 = vmul.f32 %v1105_v40, %v1744_v50 }
 0x493   : > { %v1123_v42 = vadd.f32 1e-05, %v1115_v41 }
 0x495   : > { %1543 = vrsqrt.f32 %v1123_v42  ;;  %vm1191_vm8 = vweird.f32 %v1123_v42 }
 0x498   : > { %v1108_v8 = vpop.xlane.xlu1 %1107 }
 0x499   : > { %v1116_v43 = vmul.f32 %v1108_v8, %v1744_v50 }
 0x49b   : > { %v1544_v44 = vpop.eup %1543  ;;  %v1124_v45 = vadd.f32 1e-05, %v1116_v43 }
 0x49c   : > { %v1186_v46 = vmul.f32 %v1544_v44, %v1123_v42  ;;  %vm1192_vm7 = vweird.f32 %v1544_v44 }
 0x49d   : > { %1545 = vrsqrt.f32 %v1124_v45  ;;  %vm1193_vm9 = vmor %vm1191_vm8, %vm1192_vm7  ;;  %vm1201_vm11 = vweird.f32 %v1124_v45 }
 0x49e   : > { %v1187_v47 = vmul.f32 %v1544_v44, %v1186_v46 }
 0x4a0   : > { %v1188_v48 = vmul.f32 0.5, %v1187_v47 }
 0x4a2   : > { %v1189_v49 = vsub.f32 1.5, %v1188_v48 }
 0x4a3   : > { %v1546_v13 = vpop.eup %1545 }
 0x4a4   : > { %v1190_v51 = vmul.f32 %v1544_v44, %v1189_v49  ;;  %v1196_v53 = vmul.f32 %v1546_v13, %v1124_v45  ;;  %vm1202_vm10 = vweird.f32 %v1546_v13 }
 0x4a5   : > { %vm1203_vm12 = vmor %vm1201_vm11, %vm1202_vm10 }
 0x4a6   : > { %v1194_v55 = vsel %vm1193_vm9, %v1544_v44, %v1190_v51  ;;  %v1197_v56 = vmul.f32 %v1546_v13, %v1196_v53 }
 0x4a7   : > { %v1211_v54 = vmul.f32 %v1194_v55, %v1783_v18 }
 0x4a8   : > { %v1198_v50 = vmul.f32 0.5, %v1197_v56 }
 0x4a9   : > { %v1219_v57 = vpack.c.bf16 %v1211_v54, %v1211_v54 }
 0x4aa   : > { %v1199_v58 = vsub.f32 1.5, %v1198_v50 }
 0x4ab   : > { %1228 = vst.msk [vmem:[%s1803_s21 + $0x18] sm:$0xf] %vm1221_vm6, %v1219_v57 }
 0x4ac   : > { %v1200_v60 = vmul.f32 %v1546_v13, %v1199_v58 }
 0x4ae   : > { %v1204_v61 = vsel %vm1203_vm12, %v1546_v13, %v1200_v60 }
 0x4af   : > { %v1212_v62 = vmul.f32 %v1204_v61, %v1789_v23 }
 0x4b1   : > { %v1220_v63 = vpack.c.bf16 %v1212_v62, %v1212_v62 }
 0x4b3   : > { %1229 = vst.msk [vmem:[%s1803_s21 + $0x1c] sm:$0xf] %vm1221_vm6, %v1220_v63 }
 0x4b4 PF: > { %s16_s23 = sadd.s32 1, %s1569_s23   ;;  %s1849_s21 = smov %s1565_s22 }
 0x4b5   : > { %p13_p8 = scmp.ge.s32.totalorder %s16_s23, 6   ;;  %s1850_s22 = smov %s1852_s24 }
 0x4b7   :  { %15 = sbr.rel (!%p13_p8) target bundleno = 2 (0x2), region = 80 }

// kernel: _lambda_.3
= control target key start
LH: loop header
LB: loop body
LE: loop exit
PB: predicated region body
PF: predicated region fallthrough
CT: control target
= control target key end

     0   :  { %vm193_vm0 = vcmask 261120   ;;  %s9573_s3 = inlined_call_operand.vmem [shape: bf16[32,256], index: 3, kind: input, shape index: {}]   ;;  %s9574_s2 = inlined_call_operand.vmem [shape: bf16[32,256], index: 2, kind: input, shape index: {}]   ;;  %s9575_s1 = inlined_call_operand.vmem [shape: bf16[256,32], index: 1, kind: input, shape index: {}]   ;;  %s9576_s0 = inlined_call_operand.vmem [shape: bf16[256,32], index: 0, kind: input, shape index: {}]   ;;  %s9577_s4 = inlined_call_operand.vmem [shape: bf16[256,32], index: 4, kind: input, shape index: {}]   ;;  %s9578_s5 = inlined_call_operand.vmem [shape: f32[256,32], index: 5, kind: output, shape index: {}]  }
   0x1   :  { %v4721_v0 = vld [vmem:[%s9573_s3 + $0x10] sm:$0xf]  ;;  %v5038_v1 = vld [vmem:[%s9573_s3 + $0x14] sm:$0xf0]  ;;  %v5037_v2 = vld [vmem:[%s9573_s3 + $0x14] sm:$0xf] }
   0x2   :  { %v4722_v3 = vor.u32 %v5038_v1, %v4721_v0  ;;  %v4723_v4 = vld [vmem:[%s9573_s3 + $0x18] sm:$0xf0]  ;;  %v4713_v5 = vld [vmem:[%s9573_s3] sm:$0xf]  ;;  %v5036_v6 = vld [vmem:[%s9573_s3 + $0x4] sm:$0xf0] }
   0x3   :  { %v4726_v7 = vor.u32 %v5037_v2, %v4723_v4  ;;  %v5035_v8 = vld [vmem:[%s9573_s3 + $0x4] sm:$0xf]  ;;  %v4715_v9 = vld [vmem:[%s9573_s3 + $0x8] sm:$0xf0]  ;;  %v4714_v10 = vor.u32 %v5036_v6, %v4713_v5  ;;  %v4833_v11 = vld [vmem:[%s9574_s2 + $0x10] sm:$0xf] }
   0x4   :  { %5055 = vmatpush.bf16.msra.mxu2 %v4722_v3  ;;  %v5018_v12 = vld [vmem:[%s9574_s2 + $0x14] sm:$0xf0]  ;;  %v5017_v13 = vld [vmem:[%s9574_s2 + $0x14] sm:$0xf]  ;;  %248 = vmatpush.bf16.msra.mxu0 %v4722_v3  ;;  %v4718_v14 = vor.u32 %v5035_v8, %v4715_v9  ;;  %v4835_v16 = vld [vmem:[%s9574_s2 + $0x18] sm:$0xf0] }
   0x5   :  { %5057 = vmatpush.bf16.msra.mxu3 %v4726_v7  ;;  %v4834_v15 = vor.u32 %v5018_v12, %v4833_v11  ;;  %337 = vmatpush.bf16.msra.mxu1 %v4726_v7  ;;  %v4838_v17 = vor.u32 %v5017_v13, %v4835_v16  ;;  %v5027_v18 = vld [vmem:[%s9575_s1 + $0x40] sm:$0xff]  ;;  %v5028_v19 = vld [vmem:[%s9575_s1 + $0x48] sm:$0xff]  ;;  %v5029_v20 = vld [vmem:[%s9575_s1 + $0x50] sm:$0xff] }
   0x6   :  { %v4825_v21 = vld [vmem:[%s9574_s2] sm:$0xf]  ;;  %v5016_v22 = vld [vmem:[%s9574_s2 + $0x4] sm:$0xf0]  ;;  %v5015_v23 = vld [vmem:[%s9574_s2 + $0x4] sm:$0xf] }
   0x7   :  { %v4826_v24 = vor.u32 %v5016_v22, %v4825_v21  ;;  %v4827_v25 = vld [vmem:[%s9574_s2 + $0x8] sm:$0xf0]  ;;  %v5030_v27 = vld [vmem:[%s9575_s1 + $0x58] sm:$0xff]  ;;  %v5031_v28 = vld [vmem:[%s9575_s1 + $0x60] sm:$0xff] }
   0x8   :  { %5056 = vmatpush.bf16.msra.mxu2 %v4714_v10  ;;  %249 = vmatpush.bf16.msra.mxu0 %v4714_v10  ;;  %v4830_v26 = vor.u32 %v5015_v23, %v4827_v25  ;;  %v5032_v29 = vld [vmem:[%s9575_s1 + $0x68] sm:$0xff]  ;;  %v5019_v30 = vld [vmem:[%s9575_s1] sm:$0xff]  ;;  %v5033_v31 = vld [vmem:[%s9575_s1 + $0x70] sm:$0xff] }
   0x9   :  { %5058 = vmatpush.bf16.msra.mxu3 %v4718_v14  ;;  %338 = vmatpush.bf16.msra.mxu1 %v4718_v14  ;;  %v5034_v32 = vld [vmem:[%s9575_s1 + $0x78] sm:$0xff]  ;;  %v5020_v33 = vld [vmem:[%s9575_s1 + $0x8] sm:$0xff]  ;;  %v4999_v34 = vld [vmem:[%s9576_s0] sm:$0xff] }
   0xa   :  { %v5021_v35 = vld [vmem:[%s9575_s1 + $0x10] sm:$0xff]  ;;  %v5000_v40 = vld [vmem:[%s9576_s0 + $0x8] sm:$0xff]  ;;  %v5022_v41 = vld [vmem:[%s9575_s1 + $0x18] sm:$0xff] }
   0xb   :  { %4735 = vmatmul.msk.bf16.vlgmr.msra.gmra.mxu2 %vm193_vm0, %v5027_v18  ;;  %4727 = vmatmul.msk.bf16.vlgmr.msra.gmra.mxu0 %vm193_vm0, %v5019_v30  ;;  %v5001_v46 = vld [vmem:[%s9576_s0 + $0x10] sm:$0xff]  ;;  %v5023_v47 = vld [vmem:[%s9575_s1 + $0x20] sm:$0xff]  ;;  %v5046_v50 = vld [vmem:[%s9577_s4 + $0x38] sm:$0xff] }
   0xc   :  { %574 = vmatpush.bf16.msrb.mxu2 %v4834_v15  ;;  %4751 = vmatmul.msk.bf16.vlgmr.msra.gmra.mxu3 %vm193_vm0, %v5027_v18  ;;  %v5054_v51 = vld [vmem:[%s9577_s4 + $0x78] sm:$0xff]  ;;  %v5024_v55 = vld [vmem:[%s9575_s1 + $0x28] sm:$0xff]  ;;  %v5045_v58 = vld [vmem:[%s9577_s4 + $0x30] sm:$0xff] }
   0xd   :  { %663 = vmatpush.bf16.msrb.mxu3 %v4838_v17  ;;  %4743 = vmatmul.msk.bf16.vlgmr.msra.gmra.mxu1 %vm193_vm0, %v5019_v30  ;;  %v5002_v54 = vld [vmem:[%s9576_s0 + $0x18] sm:$0xff]  ;;  %v5053_v59 = vld [vmem:[%s9577_s4 + $0x70] sm:$0xff]  ;;  %v5003_v62 = vld [vmem:[%s9576_s0 + $0x20] sm:$0xff] }
   0xe   :  { %3722 = vmatpush.bf16.msrb.mxu0 %v5046_v50  ;;  %3811 = vmatpush.bf16.msrb.mxu1 %v5054_v51  ;;  %v5025_v63 = vld [vmem:[%s9575_s1 + $0x30] sm:$0xff]  ;;  %v5044_v2 = vld [vmem:[%s9577_s4 + $0x28] sm:$0xff]  ;;  %v5026_v7 = vld [vmem:[%s9575_s1 + $0x38] sm:$0xff] }
   0xf   :  { %v5052_v3 = vld [vmem:[%s9577_s4 + $0x68] sm:$0xff]  ;;  %v5043_v10 = vld [vmem:[%s9577_s4 + $0x20] sm:$0xff]  ;;  %v5005_v14 = vld [vmem:[%s9576_s0 + $0x30] sm:$0xff] }
  0x10   :  { %575 = vmatpush.bf16.msrb.mxu2 %v4826_v24  ;;  %v5004_v6 = vld [vmem:[%s9576_s0 + $0x28] sm:$0xff]  ;;  %v5051_v11 = vld [vmem:[%s9577_s4 + $0x60] sm:$0xff] }
  0x11   :  { %664 = vmatpush.bf16.msrb.mxu3 %v4830_v26  ;;  %v5007_v24 = vld [vmem:[%s9576_s0 + $0x40] sm:$0xff] }
  0x12   :  { %3723 = vmatpush.bf16.msrb.mxu0 %v5045_v58  ;;  %3812 = vmatpush.bf16.msrb.mxu1 %v5053_v59 }
  0x16   :  { %3724 = vmatpush.bf16.msrb.mxu0 %v5044_v2  ;;  %3813 = vmatpush.bf16.msrb.mxu1 %v5052_v3 }
  0x1a   :  { %3725 = vmatpush.bf16.msrb.mxu0 %v5043_v10  ;;  %3814 = vmatpush.bf16.msrb.mxu1 %v5051_v11 }
  0x1b   :  { %4736 = vmatmul.msk.bf16.gmra.mxu2 %vm193_vm0, %v5028_v19  ;;  %4728 = vmatmul.msk.bf16.gmra.mxu0 %vm193_vm0, %v5020_v33 }
  0x1c   :  { %4752 = vmatmul.msk.bf16.gmra.mxu3 %vm193_vm0, %v5028_v19  ;;  %v5006_v19 = vld [vmem:[%s9576_s0 + $0x38] sm:$0xff] }
  0x1d   :  { %4744 = vmatmul.msk.bf16.gmra.mxu1 %vm193_vm0, %v5020_v33 }
  0x2b   :  { %4737 = vmatmul.msk.bf16.gmra.mxu2 %vm193_vm0, %v5029_v20  ;;  %4729 = vmatmul.msk.bf16.gmra.mxu0 %vm193_vm0, %v5021_v35 }
  0x2c   :  { %4753 = vmatmul.msk.bf16.gmra.mxu3 %vm193_vm0, %v5029_v20 }
  0x2d   :  { %4745 = vmatmul.msk.bf16.gmra.mxu1 %vm193_vm0, %v5021_v35 }
  0x3b   :  { %4738 = vmatmul.msk.bf16.gmra.mxu2 %vm193_vm0, %v5030_v27  ;;  %4730 = vmatmul.msk.bf16.gmra.mxu0 %vm193_vm0, %v5022_v41 }
  0x3c   :  { %4754 = vmatmul.msk.bf16.gmra.mxu3 %vm193_vm0, %v5030_v27 }
  0x3d   :  { %4746 = vmatmul.msk.bf16.gmra.mxu1 %vm193_vm0, %v5022_v41 }
  0x4b   :  { %4739 = vmatmul.msk.bf16.gmra.mxu2 %vm193_vm0, %v5031_v28  ;;  %4731 = vmatmul.msk.bf16.gmra.mxu0 %vm193_vm0, %v5023_v47 }
  0x4c   :  { %4755 = vmatmul.msk.bf16.gmra.mxu3 %vm193_vm0, %v5031_v28 }
  0x4d   :  { %4747 = vmatmul.msk.bf16.gmra.mxu1 %vm193_vm0, %v5023_v47 }
  0x5b   :  { %4740 = vmatmul.msk.bf16.gmra.mxu2 %vm193_vm0, %v5032_v29  ;;  %4732 = vmatmul.msk.bf16.gmra.mxu0 %vm193_vm0, %v5024_v55 }
  0x5c   :  { %4756 = vmatmul.msk.bf16.gmra.mxu3 %vm193_vm0, %v5032_v29 }
  0x5d   :  { %4748 = vmatmul.msk.bf16.gmra.mxu1 %vm193_vm0, %v5024_v55  ;;  %v5008_v55 = vld [vmem:[%s9576_s0 + $0x48] sm:$0xff] }
  0x6b   :  { %4741 = vmatmul.msk.bf16.gmra.mxu2 %vm193_vm0, %v5033_v31  ;;  %4733 = vmatmul.msk.bf16.gmra.mxu0 %vm193_vm0, %v5025_v63 }
  0x6c   :  { %4757 = vmatmul.msk.bf16.gmra.mxu3 %vm193_vm0, %v5033_v31 }
  0x6d   :  { %4749 = vmatmul.msk.bf16.gmra.mxu1 %vm193_vm0, %v5025_v63 }
  0x7b   :  { %4742 = vmatmul.msk.bf16.gmra.mxu2 %vm193_vm0, %v5034_v32  ;;  %4734 = vmatmul.msk.bf16.gmra.mxu0 %vm193_vm0, %v5026_v7 }
  0x7c   :  { %4758 = vmatmul.msk.bf16.gmra.mxu3 %vm193_vm0, %v5034_v32 }
  0x7d   :  { %4750 = vmatmul.msk.bf16.gmra.mxu1 %vm193_vm0, %v5026_v7 }
  0x88   :  { %v251_v25 = vpop.f32.mrf.mxu0 }
  0x8a   :  { %v340_v26 = vpop.f32.mrf.mxu1 }
  0x8b   :  { %4839 = vmatmul.msk.bf16.vlgmr.msrb.gmra.mxu2 %vm193_vm0, %v4999_v34 }
  0x8c   :  { %4855 = vmatmul.msk.bf16.vlgmr.msrb.gmra.mxu3 %vm193_vm0, %v4999_v34 }
  0x8e   :  { %v5393_v36 = vpop.f32.mrf.mxu2 }
  0x8f   :  { %9590 = vst [vmem:[#allocation2_spill] sm:$0xff] %v5393_v36  ;;  %v5395_v37 = vpop.f32.mrf.mxu3 }
  0x90   :  { %9591 = vst [vmem:[#allocation3_spill] sm:$0xff] %v5395_v37 }
  0x92   :  { %v342_v47 = vpop.f32.mrf.mxu1 }
  0x96   :  { %v5397_v38 = vpop.f32.mrf.mxu2 }
  0x97   :  { %9592 = vst [vmem:[#allocation4_spill] sm:$0xff] %v5397_v38  ;;  %v5399_v39 = vpop.f32.mrf.mxu3 }
  0x98   :  { %9593 = vst [vmem:[#allocation5_spill] sm:$0xff] %v5399_v39 }
  0x9b   :  { %4840 = vmatmul.msk.bf16.gmra.mxu2 %vm193_vm0, %v5000_v40 }
  0x9c   :  { %4856 = vmatmul.msk.bf16.gmra.mxu3 %vm193_vm0, %v5000_v40  ;;  %v253_v40 = vpop.f32.mrf.mxu0 }
  0x9e   :  { %v5411_v42 = vpop.f32.mrf.mxu2 }
  0x9f   :  { %9594 = vst [vmem:[#allocation6_spill] sm:$0xff] %v5411_v42  ;;  %v5413_v43 = vpop.f32.mrf.mxu3 }
  0xa0   :  { %9595 = vst [vmem:[#allocation7_spill] sm:$0xff] %v5413_v43 }
  0xa6   :  { %v5415_v44 = vpop.f32.mrf.mxu2 }
  0xa7   :  { %9596 = vst [vmem:[#allocation8_spill] sm:$0xff] %v5415_v44  ;;  %v5417_v45 = vpop.f32.mrf.mxu3 }
  0xa8   :  { %9597 = vst [vmem:[#allocation9_spill] sm:$0xff] %v5417_v45 }
  0xab   :  { %4841 = vmatmul.msk.bf16.gmra.mxu2 %vm193_vm0, %v5001_v46 }
  0xac   :  { %4857 = vmatmul.msk.bf16.gmra.mxu3 %vm193_vm0, %v5001_v46 }
  0xae   :  { %v5429_v48 = vpop.f32.mrf.mxu2 }
  0xaf   :  { %9598 = vst [vmem:[#allocation10_spill] sm:$0xff] %v5429_v48  ;;  %v5431_v49 = vpop.f32.mrf.mxu3 }
  0xb0   :  { %9599 = vst [vmem:[#allocation11_spill] sm:$0xff] %v5431_v49 }
  0xb6   :  { %v5439_v52 = vpop.f32.mrf.mxu2 }
  0xb7   :  { %9600 = vst [vmem:[#allocation12_spill] sm:$0xff] %v5439_v52  ;;  %v5441_v53 = vpop.f32.mrf.mxu3 }
  0xb8   :  { %9601 = vst [vmem:[#allocation13_spill] sm:$0xff] %v5441_v53 }
  0xbb   :  { %4842 = vmatmul.msk.bf16.gmra.mxu2 %vm193_vm0, %v5002_v54 }
  0xbc   :  { %4858 = vmatmul.msk.bf16.gmra.mxu3 %vm193_vm0, %v5002_v54 }
  0xbe   :  { %v5453_v56 = vpop.f32.mrf.mxu2 }
  0xbf   :  { %9602 = vst [vmem:[#allocation14_spill] sm:$0xff] %v5453_v56  ;;  %v5455_v57 = vpop.f32.mrf.mxu3 }
  0xc0   :  { %9603 = vst [vmem:[#allocation15_spill] sm:$0xff] %v5455_v57 }
  0xc6   :  { %v5463_v60 = vpop.f32.mrf.mxu2 }
  0xc7   :  { %9604 = vst [vmem:[#allocation16_spill] sm:$0xff] %v5463_v60  ;;  %v5465_v61 = vpop.f32.mrf.mxu3 }
  0xc8   :  { %9605 = vst [vmem:[#allocation17_spill] sm:$0xff] %v5465_v61 }
  0xcb   :  { %4843 = vmatmul.msk.bf16.gmra.mxu2 %vm193_vm0, %v5003_v62 }
  0xcc   :  { %4859 = vmatmul.msk.bf16.gmra.mxu3 %vm193_vm0, %v5003_v62 }
  0xce   :  { %v5477_v0 = vpop.f32.mrf.mxu2 }
  0xcf   :  { %9606 = vst [vmem:[#allocation18_spill] sm:$0xff] %v5477_v0  ;;  %v5479_v1 = vpop.f32.mrf.mxu3  ;;  %v5011_v0 = vld [vmem:[%s9576_s0 + $0x60] sm:$0xff] }
  0xd0   :  { %9607 = vst [vmem:[#allocation19_spill] sm:$0xff] %v5479_v1 }
  0xd6   :  { %v5487_v4 = vpop.f32.mrf.mxu2 }
  0xd7   :  { %9608 = vst [vmem:[#allocation20_spill] sm:$0xff] %v5487_v4  ;;  %v5489_v5 = vpop.f32.mrf.mxu3 }
  0xd8   :  { %9609 = vst [vmem:[#allocation21_spill] sm:$0xff] %v5489_v5 }
  0xdb   :  { %4844 = vmatmul.msk.bf16.gmra.mxu2 %vm193_vm0, %v5004_v6 }
  0xdc   :  { %4860 = vmatmul.msk.bf16.gmra.mxu3 %vm193_vm0, %v5004_v6 }
  0xde   :  { %v5501_v8 = vpop.f32.mrf.mxu2 }
  0xdf   :  { %9610 = vst [vmem:[#allocation22_spill] sm:$0xff] %v5501_v8  ;;  %v5503_v9 = vpop.f32.mrf.mxu3 }
  0xe0   :  { %9611 = vst [vmem:[#allocation23_spill] sm:$0xff] %v5503_v9 }
  0xe6   :  { %v5511_v12 = vpop.f32.mrf.mxu2 }
  0xe7   :  { %9612 = vst [vmem:[#allocation24_spill] sm:$0xff] %v5511_v12  ;;  %v5513_v13 = vpop.f32.mrf.mxu3 }
  0xe8   :  { %9613 = vst [vmem:[#allocation25_spill] sm:$0xff] %v5513_v13 }
  0xeb   :  { %4845 = vmatmul.msk.bf16.gmra.mxu2 %vm193_vm0, %v5005_v14 }
  0xec   :  { %4861 = vmatmul.msk.bf16.gmra.mxu3 %vm193_vm0, %v5005_v14 }
  0xee   :  { %v5520_v15 = vpop.f32.mrf.mxu2 }
  0xef   :  { %9614 = vst [vmem:[#allocation26_spill] sm:$0xff] %v5520_v15  ;;  %v5522_v16 = vpop.f32.mrf.mxu3 }
  0xf0   :  { %9615 = vst [vmem:[#allocation27_spill] sm:$0xff] %v5522_v16 }
  0xf6   :  { %v5524_v17 = vpop.f32.mrf.mxu2 }
  0xf7   :  { %9616 = vst [vmem:[#allocation28_spill] sm:$0xff] %v5524_v17  ;;  %v5526_v18 = vpop.f32.mrf.mxu3 }
  0xf8   :  { %9617 = vst [vmem:[#allocation29_spill] sm:$0xff] %v5526_v18  ;;  %v5010_v18 = vld [vmem:[%s9576_s0 + $0x58] sm:$0xff] }
  0xfb   :  { %4846 = vmatmul.msk.bf16.gmra.mxu2 %vm193_vm0, %v5006_v19 }
  0xfc   :  { %4862 = vmatmul.msk.bf16.gmra.mxu3 %vm193_vm0, %v5006_v19 }
  0xfe   :  { %v5533_v20 = vpop.f32.mrf.mxu2 }
  0xff   :  { %9618 = vst [vmem:[#allocation30_spill] sm:$0xff] %v5533_v20  ;;  %v5535_v21 = vpop.f32.mrf.mxu3 }
 0x100   :  { %9619 = vst [vmem:[#allocation31_spill] sm:$0xff] %v5535_v21 }
 0x106   :  { %v5537_v22 = vpop.f32.mrf.mxu2 }
 0x107   :  { %9620 = vst [vmem:[#allocation32_spill] sm:$0xff] %v5537_v22  ;;  %v5539_v23 = vpop.f32.mrf.mxu3 }
 0x108   :  { %9621 = vst [vmem:[#allocation33_spill] sm:$0xff] %v5539_v23 }
 0x10b   :  { %4847 = vmatmul.msk.bf16.gmra.mxu2 %vm193_vm0, %v5007_v24 }
 0x10c   :  { %4863 = vmatmul.msk.bf16.gmra.mxu3 %vm193_vm0, %v5007_v24  ;;  %v5042_v24 = vld [vmem:[%s9577_s4 + $0x18] sm:$0xff] }
 0x10d   :  { %3726 = vmatpush.bf16.msrb.mxu0 %v5042_v24 }
 0x10e   :  { %v577_v27 = vpop.f32.mrf.mxu2 }
 0x10f   :  { %v5546_v28 = vadd.f32 %v577_v27, %v251_v25  ;;  %v666_v29 = vpop.f32.mrf.mxu3  ;;  %v5050_v25 = vld [vmem:[%s9577_s4 + $0x58] sm:$0xff] }
 0x110   :  { %v5548_v30 = vadd.f32 %v666_v29, %v340_v26  ;;  %3815 = vmatpush.bf16.msrb.mxu1 %v5050_v25 }
 0x111   :  { %v5551_v31 = vmul.f32 0.70710677, %v5546_v28 }
 0x112   :  { %v5554_v32 = vmul.f32 0.70710677, %v5548_v30 }
 0x113   :  { %v874_v33 = vmul.f32 %v5551_v31, %v5551_v31 }
 0x114   :  { %v914_v34 = vmul.f32 %v5554_v32, %v5554_v32 }
 0x115   :  { %v5560_v35 = vmin.f32 %v874_v33, 16.0 }
 0x116   :  { %v5562_v41 = vmin.f32 %v914_v34, 16.0  ;;  %v579_v46 = vpop.f32.mrf.mxu2 }
 0x117   :  { %v887_v50 = vmul.f32 3.8918573e-05, %v5560_v35  ;;  %v5565_v51 = vadd.f32 %v579_v46, %v253_v40  ;;  %v668_v54 = vpop.f32.mrf.mxu3  ;;  %v876_v40 = vmul.f32 2.1237322e-06, %v5560_v35 }
 0x118   :  { %v927_v58 = vmul.f32 3.8918573e-05, %v5562_v41  ;;  %v5571_v59 = vadd.f32 %v668_v54, %v342_v47 }
 0x119   :  { %v888_v62 = vadd.f32 0.001143296, %v887_v50  ;;  %v5574_v2 = vmul.f32 0.70710677, %v5565_v51 }
 0x11a   :  { %v928_v63 = vadd.f32 0.001143296, %v927_v58  ;;  %v5578_v6 = vmul.f32 0.70710677, %v5571_v59 }
 0x11b   :  { %v889_v3 = vmul.f32 %v888_v62, %v5560_v35  ;;  %4848 = vmatmul.msk.bf16.gmra.mxu2 %vm193_vm0, %v5008_v55  ;;  %v954_v10 = vmul.f32 %v5574_v2, %v5574_v2 }
 0x11c   :  { %v929_v7 = vmul.f32 %v928_v63, %v5562_v41  ;;  %4864 = vmatmul.msk.bf16.gmra.mxu3 %vm193_vm0, %v5008_v55  ;;  %v994_v14 = vmul.f32 %v5578_v6, %v5578_v6  ;;  %v916_v55 = vmul.f32 2.1237322e-06, %v5562_v41  ;;  %v5009_v63 = vld [vmem:[%s9576_s0 + $0x50] sm:$0xff] }
 0x11d   :  { %v890_v11 = vadd.f32 0.014752088, %v889_v3  ;;  %v5587_v19 = vmin.f32 %v954_v10, 16.0  ;;  %v877_v3 = vadd.f32 0.00028619796, %v876_v40  ;;  %v256_v10 = vpop.f32.mrf.mxu0 }
 0x11e   :  { %v930_v26 = vadd.f32 0.014752088, %v929_v7  ;;  %v5596_v29 = vmin.f32 %v994_v14, 16.0  ;;  %v582_v58 = vpop.f32.mrf.mxu2  ;;  %v917_v24 = vadd.f32 0.00028619796, %v916_v55 }
 0x11f   :  { %v967_v27 = vmul.f32 3.8918573e-05, %v5587_v19  ;;  %v891_v33 = vmul.f32 %v890_v11, %v5560_v35 }
 0x120   :  { %v931_v46 = vmul.f32 %v930_v26, %v5562_v41  ;;  %v1007_v47 = vmul.f32 3.8918573e-05, %v5596_v29 }
 0x121   :  { %v968_v34 = vadd.f32 0.001143296, %v967_v27  ;;  %v892_v50 = vadd.f32 0.112945676, %v891_v33  ;;  %v671_v27 = vpop.f32.mrf.mxu3  ;;  %v878_v33 = vmul.f32 %v877_v3, %v5560_v35 }
 0x122   :  { %v932_v7 = vadd.f32 0.112945676, %v931_v46  ;;  %v1008_v11 = vadd.f32 0.001143296, %v1007_v47  ;;  %v345_v46 = vpop.f32.mrf.mxu1  ;;  %v918_v47 = vmul.f32 %v917_v24, %v5562_v41 }
 0x123   :  { %v969_v54 = vmul.f32 %v968_v34, %v5587_v19  ;;  %v893_v14 = vmul.f32 %v892_v50, %v5560_v35  ;;  %v879_v55 = vadd.f32 0.0036580483, %v878_v33  ;;  %v5041_v33 = vld [vmem:[%s9577_s4 + $0x10] sm:$0xff] }
 0x124   :  { %v1009_v26 = vmul.f32 %v1008_v11, %v5596_v29  ;;  %v933_v34 = vmul.f32 %v932_v7, %v5562_v41  ;;  %v919_v21 = vadd.f32 0.0036580483, %v918_v47  ;;  %3727 = vmatpush.bf16.msrb.mxu0 %v5041_v33 }
 0x125   :  { %v970_v62 = vadd.f32 0.014752088, %v969_v54  ;;  %v894_v40 = vadd.f32 0.4994258, %v893_v14  ;;  %v5620_v7 = vpop.f32.mrf.mxu0  ;;  %v880_v24 = vmul.f32 %v879_v55, %v5560_v35 }
 0x126   :  { %v1010_v50 = vadd.f32 0.014752088, %v1009_v26  ;;  %v934_v23 = vadd.f32 0.4994258, %v933_v34  ;;  %v5616_v11 = vpop.f32.mrf.mxu2  ;;  %v996_v26 = vmul.f32 2.1237322e-06, %v5596_v29 }
 0x127   :  { %v971_v25 = vmul.f32 %v970_v62, %v5587_v19  ;;  %v895_v22 = vmul.f32 %v894_v40, %v5560_v35  ;;  %v5049_v34 = vld [vmem:[%s9577_s4 + $0x50] sm:$0xff] }
 0x128   :  { %v1011_v3 = vmul.f32 %v1010_v50, %v5596_v29  ;;  %3816 = vmatpush.bf16.msrb.mxu1 %v5049_v34 }
 0x129   :  { %v972_v54 = vadd.f32 0.112945676, %v971_v25  ;;  %v935_v25 = vmul.f32 %v934_v23, %v5562_v41  ;;  %v5632_v40 = vadd.f32 1.0, %v895_v22  ;;  %v920_v23 = vmul.f32 %v919_v21, %v5562_v41 }
 0x12a   :  { %v1012_v20 = vadd.f32 0.112945676, %v1011_v3  ;;  %v5639_v3 = vpop.f32.mrf.mxu1  ;;  %v881_v22 = vadd.f32 0.05243302, %v880_v24 }
 0x12b   :  { %4849 = vmatmul.msk.bf16.gmra.mxu2 %vm193_vm0, %v5009_v63  ;;  %v973_v62 = vmul.f32 %v972_v54, %v5587_v19  ;;  %v5635_v54 = vpop.f32.mrf.mxu3  ;;  %v5644_v17 = vadd.f32 1.0, %v935_v25  ;;  %5060 = vrcp.f32 %v5632_v40  ;;  %v921_v21 = vadd.f32 0.05243302, %v920_v23 }
 0x12c   :  { %4865 = vmatmul.msk.bf16.gmra.mxu3 %vm193_vm0, %v5009_v63  ;;  %v956_v63 = vmul.f32 2.1237322e-06, %v5587_v19  ;;  %v1013_v47 = vmul.f32 %v1012_v20, %v5596_v29  ;;  %v997_v20 = vadd.f32 0.00028619796, %v996_v26  ;;  %v882_v24 = vmul.f32 %v881_v22, %v5560_v35 }
 0x12d   :  { %v974_v14 = vadd.f32 0.4994258, %v973_v62  ;;  %5062 = vrcp.f32 %v5644_v17  ;;  %v5659_v26 = vpop.f32.mrf.mxu0  ;;  %v5664_v23 = vadd.f32 %v671_v27, %v345_v46  ;;  %v5040_v27 = vld [vmem:[%s9577_s4 + $0x8] sm:$0xff]  ;;  %vm902_vm1 = vweird.f32 %v5632_v40 }
 0x12e   :  { %v957_v50 = vadd.f32 0.00028619796, %v956_v63  ;;  %v1014_v62 = vadd.f32 0.4994258, %v1013_v47  ;;  %v5648_v34 = vpop.f32.mrf.mxu2  ;;  %v5653_v47 = vadd.f32 %v582_v58, %v256_v10  ;;  %v998_v25 = vmul.f32 %v997_v20, %v5596_v29  ;;  %v5048_v46 = vld [vmem:[%s9577_s4 + $0x48] sm:$0xff]  ;;  %3728 = vmatpush.bf16.msrb.mxu0 %v5040_v27  ;;  %v5047_v27 = vld [vmem:[%s9577_s4 + $0x40] sm:$0xff] }
 0x12f   :  { %v975_v55 = vmul.f32 %v974_v14, %v5587_v19  ;;  %v922_v58 = vmul.f32 %v921_v21, %v5562_v41  ;;  %v883_v20 = vadd.f32 0.18741608, %v882_v24  ;;  %v5692_v15 = vmul.f32 0.70710677, %v5664_v23  ;;  %3817 = vmatpush.bf16.msrb.mxu1 %v5048_v46 }
 0x130   :  { %v1015_v33 = vmul.f32 %v1014_v62, %v5596_v29  ;;  %v958_v63 = vmul.f32 %v957_v50, %v5587_v19  ;;  %v999_v16 = vadd.f32 0.0036580483, %v998_v25  ;;  %vm942_vm4 = vweird.f32 %v5644_v17 }
 0x131   :  { %v5651_v14 = vadd.f32 1.0, %v975_v55  ;;  %v5666_v50 = vpop.eup %5060  ;;  %v5671_v55 = vmul.f32 0.70710677, %v5653_v47  ;;  %v884_v13 = vmul.f32 %v883_v20, %v5560_v35  ;;  %v1074_v1 = vmul.f32 %v5692_v15, %v5692_v15 }
 0x132   :  { %v5662_v62 = vadd.f32 1.0, %v1015_v33  ;;  %v959_v10 = vadd.f32 0.0036580483, %v958_v63  ;;  %v898_v21 = vmul.f32 %v5666_v50, %v5632_v40  ;;  %v923_v63 = vadd.f32 0.18741608, %v922_v58 }
 0x133   :  { %5064 = vrcp.f32 %v5651_v14  ;;  %v5673_v22 = vpop.f32.mrf.mxu3  ;;  %v5684_v33 = vpop.eup %5062  ;;  %v1034_v25 = vmul.f32 %v5671_v55, %v5671_v55  ;;  %v1000_v12 = vmul.f32 %v999_v16, %v5596_v29  ;;  %3818 = vmatpush.bf16.msrb.mxu1 %v5047_v27  ;;  %v885_v61 = vadd.f32 1.1283791, %v884_v13 }
 0x134   :  { %5066 = vrcp.f32 %v5662_v62  ;;  %v960_v24 = vmul.f32 %v959_v10, %v5587_v19  ;;  %v938_v58 = vmul.f32 %v5684_v33, %v5644_v17  ;;  %v5039_v10 = vld [vmem:[%s9577_s4] sm:$0xff]  ;;  %v899_v46 = vsub.f32 1.0, %v898_v21 }
 0x135   :  { %v5708_v5 = vpop.f32.mrf.mxu0  ;;  %v924_v16 = vmul.f32 %v923_v63, %v5562_v41  ;;  %v5713_v4 = vmin.f32 %v1034_v25, 16.0  ;;  %3729 = vmatpush.bf16.msrb.mxu0 %v5039_v10  ;;  %v1001_v60 = vadd.f32 0.05243302, %v1000_v12  ;;  %v5729_v27 = vmin.f32 %v1074_v1, 16.0 }
 0x136   :  { %v5696_v9 = vpop.f32.mrf.mxu2  ;;  %v961_v20 = vadd.f32 0.05243302, %v960_v24  ;;  %v939_v57 = vsub.f32 1.0, %v938_v58  ;;  %v900_v41 = vmul.f32 %v5666_v50, %v899_v46  ;;  %v886_v12 = vmul.f32 %v885_v61, %v5551_v31 }
 0x137   :  { %v925_v24 = vadd.f32 1.1283791, %v924_v16  ;;  %v1036_v10 = vmul.f32 2.1237322e-06, %v5713_v4  ;;  %v906_v58 = vand.u32 2147483647, %v5632_v40  ;;  %v1002_v46 = vmul.f32 %v1001_v60, %v5596_v29 }
 0x138   :  { %v962_v25 = vmul.f32 %v961_v20, %v5587_v19  ;;  %v908_v16 = vand.u32 2147483648, %v5632_v40  ;;  %v940_v1 = vmul.f32 %v5684_v33, %v939_v57  ;;  %v946_v20 = vand.u32 2147483647, %v5644_v17 }
 0x139   :  { %v5698_v8 = vpop.eup %5064  ;;  %v901_v52 = vadd.f32 %v5666_v50, %v900_v41  ;;  %vm903_vm2 = vweird.f32 %v5666_v50  ;;  %v948_v61 = vand.u32 2147483648, %v5644_v17  ;;  %v926_v60 = vmul.f32 %v925_v24, %v5554_v32 }
 0x13a   :  { %v5710_v35 = vpop.eup %5066  ;;  %v978_v21 = vmul.f32 %v5698_v8, %v5651_v14  ;;  %v1037_v49 = vadd.f32 0.00028619796, %v1036_v10  ;;  %v1076_v48 = vmul.f32 2.1237322e-06, %v5729_v27  ;;  %vm5749_vm3 = vcmp.eq.f32.partialorder %v906_v58, 8.507059e+37  ;;  %vm5759_vm5 = vmor %vm902_vm1, %vm903_vm2 }
 0x13b   :  { %4850 = vmatmul.msk.bf16.gmra.mxu2 %vm193_vm0, %v5010_v18  ;;  %v5722_v56 = vpop.f32.mrf.mxu3  ;;  %v1018_v63 = vmul.f32 %v5710_v35, %v5662_v62  ;;  %v1003_v41 = vadd.f32 0.18741608, %v1002_v46  ;;  %v909_v32 = vor.u32 1.1754944e-38, %v908_v16  ;;  %v941_v24 = vadd.f32 %v5684_v33, %v940_v1 }
 0x13c   :  { %4866 = vmatmul.msk.bf16.gmra.mxu3 %vm193_vm0, %v5010_v18  ;;  %v5676_v18 = vpop.f32.mrf.mxu1  ;;  %v979_v53 = vsub.f32 1.0, %v978_v21  ;;  %vm943_vm6 = vweird.f32 %v5684_v33  ;;  %vm5765_vm7 = vcmp.eq.f32.partialorder %v946_v20, 8.507059e+37  ;;  %v949_v10 = vor.u32 1.1754944e-38, %v948_v61 }
 0x13d   :  { %v1019_v31 = vsub.f32 1.0, %v1018_v63  ;;  %v5755_v44 = vpop.f32.mrf.mxu0  ;;  %v5775_v58 = vadd.f32 %v5616_v11, %v5620_v7  ;;  %v1038_v16 = vmul.f32 %v1037_v49, %v5713_v4  ;;  %v1077_v1 = vadd.f32 0.00028619796, %v1076_v48  ;;  %vm5787_vm8 = vmor %vm942_vm4, %vm943_vm6 }
 0x13e   :  { %v5745_v21 = vpop.f32.mrf.mxu2  ;;  %v980_v57 = vmul.f32 %v5698_v8, %v979_v53  ;;  %v905_v53 = vsel %vm5759_vm5, %v5666_v50, %v901_v52  ;;  %v5781_v20 = vadd.f32 %v5635_v54, %v5639_v3  ;;  %vm982_vm9 = vweird.f32 %v5651_v14 }
 0x13f   :  { %v1020_v40 = vmul.f32 %v5710_v35, %v1019_v31  ;;  %vm983_vm10 = vweird.f32 %v5698_v8  ;;  %v1004_v48 = vmul.f32 %v1003_v41, %v5596_v29  ;;  %v910_v49 = vsel %vm5749_vm3, %v909_v32, %v905_v53 }
 0x140   :  { %v981_v11 = vadd.f32 %v5698_v8, %v980_v57  ;;  %v986_v17 = vand.u32 2147483647, %v5651_v14  ;;  %v988_v7 = vand.u32 2147483648, %v5651_v14  ;;  %vm1023_vm11 = vweird.f32 %v5710_v35  ;;  %vm5810_vm12 = vmor %vm982_vm9, %vm983_vm10 }
 0x141   :  { %v1021_v3 = vadd.f32 %v5710_v35, %v1020_v40  ;;  %v1028_v50 = vand.u32 2147483648, %v5662_v62  ;;  %v5808_v29 = vmul.f32 0.70710677, %v5775_v58  ;;  %v1078_v31 = vmul.f32 %v1077_v1, %v5729_v27 }
 0x142   :  { %v5816_v14 = vmul.f32 0.70710677, %v5781_v20  ;;  %vm1022_vm13 = vweird.f32 %v5662_v62  ;;  %v1026_v57 = vand.u32 2147483647, %v5662_v62  ;;  %v5825_v41 = vadd.f32 %v5648_v34, %v5659_v26 }
 0x143   :  { %v5783_v43 = vpop.f32.mrf.mxu3  ;;  %v911_v32 = vmul.f32 %v910_v49, %v886_v12  ;;  %v989_v53 = vor.u32 1.1754944e-38, %v988_v7  ;;  %v1005_v40 = vadd.f32 1.1283791, %v1004_v48  ;;  %vm5833_vm14 = vmor %vm1022_vm13, %vm1023_vm11  ;;  %vm987_vm15 = vcmp.eq.f32.partialorder %v986_v17, 8.507059e+37 }
 0x144   :  { %v5731_v13 = vpop.f32.mrf.mxu1  ;;  %v1025_v34 = vsel %vm5833_vm14, %v5710_v35, %v1021_v3  ;;  %v1029_v26 = vor.u32 1.1754944e-38, %v1028_v50  ;;  %v1114_v62 = vmul.f32 %v5808_v29, %v5808_v29  ;;  %vm1027_vm1 = vcmp.eq.f32.partialorder %v1026_v57, 8.507059e+37 }
 0x145   :  { %v5842_v12 = vpop.f32.mrf.mxu0  ;;  %v4871_v35 = vclamps-f32 %v911_v32, 1.0  ;;  %v1006_v17 = vmul.f32 %v1005_v40, %v5578_v6  ;;  %v5858_v3 = vadd.f32 %v5673_v22, %v5676_v18  ;;  %v746_v61 = vmul.f32 0.5, %v5546_v28  ;;  %v5012_v40 = vld [vmem:[%s9576_s0 + $0x68] sm:$0xff] }
 0x146   :  { %v5827_v63 = vpop.f32.mrf.mxu2  ;;  %v1030_v48 = vsel %vm1027_vm1, %v1029_v26, %v1025_v34  ;;  %v5854_v7 = vmin.f32 %v1114_v62, 16.0  ;;  %v747_v57 = vmul.f32 0.5, %v5548_v30  ;;  %v748_v32 = vmul.f32 0.5, %v5565_v51 }
 0x147   :  { %v3434_v6 = vadd.f32 1.0, %v4871_v35  ;;  %v5870_v22 = vadd.f32 %v5696_v9, %v5708_v5  ;;  %v5883_v5 = vadd.f32 %v5722_v56, %v5731_v13  ;;  %v5889_v62 = vadd.f32 %v5745_v21, %v5755_v44 }
 0x148   :  { %v5990_v39 = vmul.f32 0.5, %v5781_v20 }
 0x14a   :  { %9638 = vst [vmem:[#allocation38_spill] sm:$0xff] %v5990_v39 }
 0x14b   :  { %4851 = vmatmul.msk.bf16.gmra.mxu2 %vm193_vm0, %v5011_v0  ;;  %v5851_v49 = vpop.f32.mrf.mxu3 }
 0x14c   :  { %4867 = vmatmul.msk.bf16.gmra.mxu3 %vm193_vm0, %v5011_v0  ;;  %v963_v0 = vadd.f32 0.18741608, %v962_v25  ;;  %v5802_v54 = vpop.f32.mrf.mxu1 }
 0x14d   :  { %v5899_v56 = vadd.f32 %v5783_v43, %v5802_v54  ;;  %v5911_v54 = vmul.f32 0.70710677, %v5889_v62 }
 0x14e   :  { %v964_v46 = vmul.f32 %v963_v0, %v5587_v19  ;;  %v945_v19 = vsel %vm5787_vm8, %v5684_v33, %v941_v24  ;;  %v1039_v33 = vadd.f32 0.0036580483, %v1038_v16  ;;  %v985_v0 = vsel %vm5810_vm12, %v5698_v8, %v981_v11  ;;  %v597_v28 = vpop.f32.mrf.mxu2 }
 0x14f   :  { %v950_v24 = vsel %vm5765_vm7, %v949_v10, %v945_v19  ;;  %v990_v25 = vsel %vm987_vm15, %v989_v53, %v985_v0  ;;  %v1154_v16 = vmul.f32 %v5816_v14, %v5816_v14  ;;  %v5849_v11 = vmul.f32 0.70710677, %v5825_v41 }
 0x150   :  { %v965_v45 = vadd.f32 1.1283791, %v964_v46  ;;  %v1040_v10 = vmul.f32 %v1039_v33, %v5713_v4  ;;  %v1079_v46 = vadd.f32 0.0036580483, %v1078_v31  ;;  %v951_v1 = vmul.f32 %v950_v24, %v926_v60 }
 0x151   :  { %v5861_v50 = vmin.f32 %v1154_v16, 16.0  ;;  %v1031_v31 = vmul.f32 %v1030_v48, %v1006_v17  ;;  %v1194_v0 = vmul.f32 %v5849_v11, %v5849_v11  ;;  %v1116_v24 = vmul.f32 2.1237322e-06, %v5854_v7 }
 0x152   :  { %v966_v52 = vmul.f32 %v965_v45, %v5574_v2  ;;  %v1041_v60 = vadd.f32 0.05243302, %v1040_v10  ;;  %v1080_v2 = vmul.f32 %v1079_v46, %v5729_v27  ;;  %v4872_v33 = vclamps-f32 %v951_v1, 1.0 }
 0x153   :  { %v5874_v53 = vmul.f32 0.70710677, %v5858_v3  ;;  %v1156_v51 = vmul.f32 2.1237322e-06, %v5861_v50  ;;  %v4874_v34 = vclamps-f32 %v1031_v31, 1.0  ;;  %v5885_v26 = vmin.f32 %v1194_v0, 16.0 }
 0x154   :  { %v991_v19 = vmul.f32 %v990_v25, %v966_v52  ;;  %v357_v45 = vpop.f32.mrf.mxu1  ;;  %v1042_v8 = vmul.f32 %v1041_v60, %v5713_v4  ;;  %v1081_v30 = vadd.f32 0.05243302, %v1080_v2  ;;  %v3435_v9 = vadd.f32 1.0, %v4872_v33  ;;  %v271_v25 = vpop.f32.mrf.mxu0 }
 0x155   :  { %v749_v10 = vmul.f32 0.5, %v5571_v59  ;;  %v5895_v46 = vmul.f32 0.70710677, %v5870_v22  ;;  %v5901_v13 = vadd.f32 %v597_v28, %v271_v25  ;;  %v3498_v16 = vmul.f32 %v3434_v6, %v746_v61 }
 0x156   :  { %v4873_v18 = vclamps-f32 %v991_v19, 1.0  ;;  %v1117_v44 = vadd.f32 0.00028619796, %v1116_v24  ;;  %v1234_v21 = vmul.f32 %v5874_v53, %v5874_v53  ;;  %v1043_v52 = vadd.f32 0.18741608, %v1042_v8  ;;  %v686_v19 = vpop.f32.mrf.mxu3 }
 0x157   :  { %v1082_v35 = vmul.f32 %v1081_v30, %v5729_v27  ;;  %v1157_v48 = vadd.f32 0.00028619796, %v1156_v51  ;;  %v5907_v59 = vmul.f32 0.70710677, %v5883_v5  ;;  %v3499_v17 = vmul.f32 %v3435_v9, %v747_v57 }
 0x158   :  { %v3436_v1 = vadd.f32 1.0, %v4873_v18  ;;  %v3437_v60 = vadd.f32 1.0, %v4874_v34  ;;  %v1196_v43 = vmul.f32 2.1237322e-06, %v5885_v26  ;;  %v1274_v2 = vmul.f32 %v5895_v46, %v5895_v46 }
 0x159   :  { %v5916_v61 = vmul.f32 0.70710677, %v5899_v56  ;;  %v5920_v31 = vadd.f32 %v5827_v63, %v5842_v12  ;;  %v5923_v0 = vmul.f32 0.70710677, %v5901_v13  ;;  %v1118_v57 = vmul.f32 %v1117_v44, %v5854_v7 }
 0x15a   :  { %v3500_v6 = vmul.f32 %v3436_v1, %v748_v32  ;;  %v5926_v18 = vmin.f32 %v1234_v21, 16.0  ;;  %v1083_v28 = vadd.f32 0.18741608, %v1082_v35  ;;  %v1314_v8 = vmul.f32 %v5907_v59, %v5907_v59 }
 0x15b   :  { %4852 = vmatmul.msk.bf16.gmra.mxu2 %vm193_vm0, %v5012_v40  ;;  %v1514_v63 = vmul.f32 %v5923_v0, %v5923_v0  ;;  %v3501_v12 = vmul.f32 %v3437_v60, %v749_v10  ;;  %v1197_v30 = vadd.f32 0.00028619796, %v1196_v43  ;;  %v1354_v32 = vmul.f32 %v5911_v54, %v5911_v54 }
 0x15c   :  { %4868 = vmatmul.msk.bf16.gmra.mxu3 %vm193_vm0, %v5012_v40  ;;  %v360_v33 = vpop.f32.mrf.mxu1  ;;  %v1158_v40 = vmul.f32 %v1157_v48, %v5861_v50  ;;  %v5938_v51 = vadd.f32 %v5851_v49, %v357_v45  ;;  %v5940_v9 = vmin.f32 %v1274_v2, 16.0  ;;  %v1394_v34 = vmul.f32 %v5916_v61, %v5916_v61 }
 0x15d   :  { %v5928_v24 = vadd.f32 %v686_v19, %v360_v33  ;;  %v5945_v25 = vmul.f32 0.70710677, %v5920_v31  ;;  %v5947_v1 = vmin.f32 %v1514_v63, 16.0  ;;  %v1119_v44 = vadd.f32 0.0036580483, %v1118_v57 }
 0x15e   :  { %v1236_v10 = vmul.f32 2.1237322e-06, %v5926_v18  ;;  %v3562_v35 = vpack.c.bf16 %v3500_v6, %v3498_v16  ;;  %v1159_v48 = vadd.f32 0.0036580483, %v1158_v40  ;;  %v5953_v49 = vmin.f32 %v1314_v8, 16.0 }
 0x15f   :  { %v5951_v21 = vmul.f32 0.70710677, %v5928_v24  ;;  %v1527_v45 = vmul.f32 3.8918573e-05, %v5947_v1  ;;  %v1198_v19 = vmul.f32 %v1197_v30, %v5885_v26  ;;  %v5957_v60 = vmin.f32 %v1354_v32, 16.0 }
 0x160   :  { %v5960_v43 = vmul.f32 0.70710677, %v5938_v51  ;;  %3730 = vmatmul.bf16.vlgmr.msrb.gmra.mxu0 %v3562_v35  ;;  %v3563_v2 = vpack.c.bf16 %v3501_v12, %v3499_v17  ;;  %v5963_v33 = vmul.f32 0.5, %v5653_v47  ;;  %v1276_v57 = vmul.f32 2.1237322e-06, %v5940_v9 }
 0x161   :  { %v5966_v16 = vmin.f32 %v1394_v34, 16.0  ;;  %v1434_v6 = vmul.f32 %v5945_v25, %v5945_v25  ;;  %v1044_v40 = vmul.f32 %v1043_v52, %v5713_v4  ;;  %v5972_v8 = vmul.f32 0.5, %v5664_v23 }
 0x162   :  { %9634 = vst [vmem:[#allocation34_spill] sm:$0xff] %v5963_v33  ;;  %v1237_v63 = vadd.f32 0.00028619796, %v1236_v10  ;;  %v1554_v30 = vmul.f32 %v5951_v21, %v5951_v21  ;;  %3819 = vmatmul.bf16.vlgmr.msrb.gmra.mxu1 %v3563_v2  ;;  %v1084_v47 = vmul.f32 %v1083_v28, %v5729_v27  ;;  %v1120_v17 = vmul.f32 %v1119_v44, %v5854_v7 }
 0x163   :  { %9635 = vst [vmem:[#allocation35_spill] sm:$0xff] %v5966_v16  ;;  %v1316_v12 = vmul.f32 2.1237322e-06, %v5953_v49  ;;  %v1528_v32 = vadd.f32 0.001143296, %v1527_v45  ;;  %v1160_v34 = vmul.f32 %v1159_v48, %v5861_v50  ;;  %v1474_v23 = vmul.f32 %v5960_v43, %v5960_v43 }
 0x164   :  { %9636 = vst [vmem:[#allocation36_spill] sm:$0xff] %v5972_v8  ;;  %v1199_v35 = vadd.f32 0.0036580483, %v1198_v19  ;;  %v1356_v52 = vmul.f32 2.1237322e-06, %v5957_v60  ;;  %v5984_v10 = vmul.f32 0.5, %v5775_v58  ;;  %v1238_v48 = vmul.f32 %v1237_v63, %v5926_v18 }
 0x165   :  { %v1277_v42 = vadd.f32 0.00028619796, %v1276_v57  ;;  %v1396_v2 = vmul.f32 2.1237322e-06, %v5966_v16  ;;  %v5987_v28 = vmin.f32 %v1434_v6, 16.0  ;;  %v5993_v45 = vmin.f32 %v1554_v30, 16.0 }
 0x166   :  { %9637 = vst [vmem:[#allocation37_spill] sm:$0xff] %v5984_v10  ;;  %v1045_v44 = vadd.f32 1.1283791, %v1044_v40  ;;  %v1085_v19 = vadd.f32 1.1283791, %v1084_v47  ;;  %v1529_v36 = vmul.f32 %v1528_v32, %v5947_v1  ;;  %v1200_v57 = vmul.f32 %v1199_v35, %v5885_v26  ;;  %v599_v35 = vpop.f32.mrf.mxu2 }
 0x167   :  { %v1121_v38 = vadd.f32 0.05243302, %v1120_v17  ;;  %v1317_v37 = vadd.f32 0.00028619796, %v1316_v12  ;;  %v1161_v58 = vadd.f32 0.05243302, %v1160_v34  ;;  %v1278_v20 = vmul.f32 %v1277_v42, %v5940_v9 }
 0x168   :  { %v1357_v8 = vadd.f32 0.00028619796, %v1356_v52  ;;  %v5997_v10 = vmin.f32 %v1474_v23, 16.0  ;;  %v6000_v6 = vmul.f32 0.5, %v5825_v41  ;;  %v1397_v40 = vadd.f32 0.00028619796, %v1396_v2 }
 0x169   :  { %v1436_v63 = vmul.f32 2.1237322e-06, %v5987_v28  ;;  %v6005_v30 = vmul.f32 %v1045_v44, %v5671_v55  ;;  %v6008_v47 = vmul.f32 0.5, %v5858_v3  ;;  %v1239_v17 = vadd.f32 0.0036580483, %v1238_v48 }
 0x16a   :  { %9639 = vst [vmem:[#allocation39_spill] sm:$0xff] %v5997_v10  ;;  %v1567_v12 = vmul.f32 3.8918573e-05, %v5993_v45  ;;  %v6012_v32 = vmul.f32 %v1085_v19, %v5692_v15  ;;  %v1122_v41 = vmul.f32 %v1121_v38, %v5854_v7  ;;  %v1318_v34 = vmul.f32 %v1317_v37, %v5953_v49 }
 0x16b   :  { %9640 = vst [vmem:[#allocation40_spill] sm:$0xff] %v6000_v6  ;;  %v1530_v42 = vadd.f32 0.014752088, %v1529_v36  ;;  %v1162_v52 = vmul.f32 %v1161_v58, %v5861_v50  ;;  %v1201_v23 = vadd.f32 0.05243302, %v1200_v57  ;;  %v1358_v55 = vmul.f32 %v1357_v8, %v5957_v60 }
 0x16c   :  { %9641 = vst [vmem:[#allocation41_spill] sm:$0xff] %v6008_v47  ;;  %v1476_v3 = vmul.f32 2.1237322e-06, %v5997_v10  ;;  %v1279_v2 = vadd.f32 0.0036580483, %v1278_v20  ;;  %v1398_v44 = vmul.f32 %v1397_v40, %v5966_v16  ;;  %v273_v47 = vpop.f32.mrf.mxu0  ;;  %v1240_v38 = vmul.f32 %v1239_v17, %v5926_v18 }
 0x16d   :  { %9642 = vst [vmem:[#allocation42_spill] sm:$0xff] %v6012_v32  ;;  %v1437_v48 = vadd.f32 0.00028619796, %v1436_v63  ;;  %v1516_v15 = vmul.f32 2.1237322e-06, %v5947_v1  ;;  %v6023_v37 = vmul.f32 0.5, %v5870_v22  ;;  %v6025_v19 = vadd.f32 %v599_v35, %v273_v47 }
 0x16e   :  { %v1568_v36 = vadd.f32 0.001143296, %v1567_v12  ;;  %v1123_v58 = vadd.f32 0.18741608, %v1122_v41  ;;  %v6028_v8 = vmul.f32 0.5, %v5883_v5  ;;  %v1531_v20 = vmul.f32 %v1530_v42, %v5947_v1 }
 0x16f   :  { %9643 = vst [vmem:[#allocation43_spill] sm:$0xff] %v6023_v37  ;;  %v1319_v57 = vadd.f32 0.0036580483, %v1318_v34  ;;  %v1163_v40 = vadd.f32 0.18741608, %v1162_v52  ;;  %v1202_v63 = vmul.f32 %v1201_v23, %v5885_v26  ;;  %v1280_v17 = vmul.f32 %v1279_v2, %v5940_v9 }
 0x170   :  { %9644 = vst [vmem:[#allocation44_spill] sm:$0xff] %v6028_v8  ;;  %v1359_v6 = vadd.f32 0.0036580483, %v1358_v55  ;;  %v1477_v39 = vadd.f32 0.00028619796, %v1476_v3  ;;  %v1438_v22 = vmul.f32 %v1437_v48, %v5987_v28  ;;  %v6035_v41 = vmul.f32 0.5, %v5889_v62 }
 0x171   :  { %v1399_v32 = vadd.f32 0.0036580483, %v1398_v44  ;;  %v1517_v12 = vadd.f32 0.00028619796, %v1516_v15  ;;  %v1241_v47 = vadd.f32 0.05243302, %v1240_v38  ;;  %v1569_v5 = vmul.f32 %v1568_v36, %v5993_v45  ;;  %v688_v44 = vpop.f32.mrf.mxu3 }
 0x172   :  { %9645 = vst [vmem:[#allocation45_spill] sm:$0xff] %v6035_v41  ;;  %v6039_v34 = vmul.f32 0.70710677, %v6025_v19  ;;  %v1124_v42 = vmul.f32 %v1123_v58, %v5854_v7  ;;  %v1320_v35 = vmul.f32 %v1319_v57, %v5953_v49  ;;  %v6044_v52 = vmul.f32 0.5, %v5899_v56  ;;  %v362_v57 = vpop.f32.mrf.mxu1 }
 0x173   :  { %v1532_v23 = vadd.f32 0.112945676, %v1531_v20  ;;  %v1164_v55 = vmul.f32 %v1163_v40, %v5861_v50  ;;  %v1203_v3 = vadd.f32 0.18741608, %v1202_v63  ;;  %v1360_v2 = vmul.f32 %v1359_v6, %v5957_v60 }
 0x174   :  { %9646 = vst [vmem:[#allocation46_spill] sm:$0xff] %v6044_v52  ;;  %v1478_v62 = vmul.f32 %v1477_v39, %v5997_v10  ;;  %v1281_v48 = vadd.f32 0.05243302, %v1280_v17  ;;  %v1400_v15 = vmul.f32 %v1399_v32, %v5966_v16  ;;  %v1439_v38 = vadd.f32 0.0036580483, %v1438_v22 }
 0x175   :  { %v1518_v36 = vmul.f32 %v1517_v12, %v5947_v1  ;;  %v1242_v58 = vmul.f32 %v1241_v47, %v5926_v18  ;;  %v1556_v56 = vmul.f32 2.1237322e-06, %v5993_v45  ;;  %v1570_v20 = vadd.f32 0.014752088, %v1569_v5 }
 0x176   :  { %v1594_v40 = vmul.f32 %v6039_v34, %v6039_v34  ;;  %v1125_v63 = vadd.f32 1.1283791, %v1124_v42  ;;  %v1321_v6 = vadd.f32 0.05243302, %v1320_v35  ;;  %v1533_v39 = vmul.f32 %v1532_v23, %v5947_v1 }
 0x177   :  { %v6056_v52 = vadd.f32 %v688_v44, %v362_v57  ;;  %v1165_v17 = vadd.f32 1.1283791, %v1164_v55  ;;  %v1204_v32 = vmul.f32 %v1203_v3, %v5885_v26  ;;  %v1361_v22 = vadd.f32 0.05243302, %v1360_v2 }
 0x178   :  { %v1479_v12 = vadd.f32 0.0036580483, %v1478_v62  ;;  %v1282_v47 = vmul.f32 %v1281_v48, %v5940_v9  ;;  %v1401_v41 = vadd.f32 0.05243302, %v1400_v15  ;;  %v1440_v8 = vmul.f32 %v1439_v38, %v5987_v28 }
 0x179   :  { %v1519_v5 = vadd.f32 0.0036580483, %v1518_v36  ;;  %v1243_v37 = vadd.f32 0.18741608, %v1242_v58  ;;  %v1557_v33 = vadd.f32 0.00028619796, %v1556_v56  ;;  %v1571_v42 = vmul.f32 %v1570_v20, %v5993_v45 }
 0x17a   :  { %v6062_v35 = vmin.f32 %v1594_v40, 16.0  ;;  %v6065_v23 = vmul.f32 %v1125_v63, %v5808_v29  ;;  %v1322_v55 = vmul.f32 %v1321_v6, %v5953_v49  ;;  %v1534_v3 = vadd.f32 0.4994258, %v1533_v39 }
 0x17b   :  { %v6069_v2 = vmul.f32 0.70710677, %v6056_v52  ;;  %v6072_v62 = vmul.f32 %v1165_v17, %v5816_v14  ;;  %v1205_v44 = vadd.f32 1.1283791, %v1204_v32  ;;  %v1362_v48 = vmul.f32 %v1361_v22, %v5957_v60 }
 0x17c   :  { %v1480_v15 = vmul.f32 %v1479_v12, %v5997_v10  ;;  %v1283_v38 = vadd.f32 0.18741608, %v1282_v47  ;;  %v1402_v36 = vmul.f32 %v1401_v41, %v5966_v16  ;;  %v1441_v58 = vadd.f32 0.05243302, %v1440_v8  ;;  %v602_v47 = vpop.f32.mrf.mxu2 }
 0x17d   :  { %v1520_v29 = vmul.f32 %v1519_v5, %v5947_v1  ;;  %v1244_v57 = vmul.f32 %v1243_v37, %v5926_v18  ;;  %v1558_v56 = vmul.f32 %v1557_v33, %v5993_v45  ;;  %v1572_v20 = vadd.f32 0.112945676, %v1571_v42 }
 0x17e   :  { %v1596_v40 = vmul.f32 2.1237322e-06, %v6062_v35  ;;  %v1323_v14 = vadd.f32 0.18741608, %v1322_v55  ;;  %v1535_v63 = vmul.f32 %v1534_v3, %v5947_v1  ;;  %v1607_v6 = vmul.f32 3.8918573e-05, %v6062_v35 }
 0x17f   :  { %v1634_v39 = vmul.f32 %v6069_v2, %v6069_v2  ;;  %v1363_v17 = vadd.f32 0.18741608, %v1362_v48  ;;  %v6086_v8 = vmul.f32 0.5, %v5920_v31  ;;  %v6089_v41 = vmul.f32 0.5, %v5938_v51 }
 0x180   :  { %v1481_v37 = vadd.f32 0.05243302, %v1480_v15  ;;  %v1284_v33 = vmul.f32 %v1283_v38, %v5940_v9  ;;  %v1403_v32 = vadd.f32 0.18741608, %v1402_v36  ;;  %v1442_v22 = vmul.f32 %v1441_v58, %v5987_v28 }
 0x181   :  { %9647 = vst [vmem:[#allocation47_spill] sm:$0xff] %v6086_v8  ;;  %v1521_v12 = vadd.f32 0.05243302, %v1520_v29  ;;  %v1245_v5 = vadd.f32 1.1283791, %v1244_v57  ;;  %v1573_v55 = vmul.f32 %v1572_v20, %v5993_v45  ;;  %v1324_v48 = vmul.f32 %v1323_v14, %v5953_v49  ;;  %v276_v8 = vpop.f32.mrf.mxu0 }
 0x182   :  { %9648 = vst [vmem:[#allocation48_spill] sm:$0xff] %v6089_v41  ;;  %v1559_v42 = vadd.f32 0.0036580483, %v1558_v56  ;;  %v1597_v3 = vadd.f32 0.00028619796, %v1596_v40  ;;  %v6095_v31 = vadd.f32 1.0, %v1535_v63  ;;  %v1364_v15 = vmul.f32 %v1363_v17, %v5957_v60 }
 0x183   :  { %v1608_v51 = vadd.f32 0.001143296, %v1607_v6  ;;  %v6097_v41 = vmin.f32 %v1634_v39, 16.0  ;;  %v1482_v38 = vmul.f32 %v1481_v37, %v5997_v10  ;;  %v6102_v36 = vmul.f32 0.5, %v5901_v13  ;;  %v691_v39 = vpop.f32.mrf.mxu3 }
 0x184   :  { %v6104_v58 = vadd.f32 %v602_v47, %v276_v8  ;;  %v1285_v29 = vadd.f32 1.1283791, %v1284_v33  ;;  %v1404_v57 = vmul.f32 %v1403_v32, %v5966_v16  ;;  %v1443_v56 = vadd.f32 0.18741608, %v1442_v22 }
 0x185   :  { %v1522_v20 = vmul.f32 %v1521_v12, %v5947_v1  ;;  %v6109_v40 = vmul.f32 0.5, %v5928_v24  ;;  %v1560_v14 = vmul.f32 %v1559_v42, %v5993_v45  ;;  %v1574_v63 = vadd.f32 0.4994258, %v1573_v55  ;;  %v365_v24 = vpop.f32.mrf.mxu1 }
 0x186   :  { %v1598_v6 = vmul.f32 %v1597_v3, %v6062_v35  ;;  %v1325_v17 = vadd.f32 1.1283791, %v1324_v48  ;;  %5068 = vrcp.f32 %v6095_v31  ;;  %v1609_v13 = vmul.f32 %v1608_v51, %v6062_v35 }
 0x187   :  { %v1636_v8 = vmul.f32 2.1237322e-06, %v6097_v41  ;;  %v6117_v37 = vmul.f32 %v1205_v44, %v5849_v11  ;;  %v1365_v33 = vadd.f32 1.1283791, %v1364_v15  ;;  %v1483_v32 = vadd.f32 0.18741608, %v1482_v38 }
 0x188   :  { %v6120_v22 = vmul.f32 0.70710677, %v6104_v58  ;;  %v1405_v12 = vadd.f32 1.1283791, %v1404_v57  ;;  %v1444_v47 = vmul.f32 %v1443_v56, %v5987_v28  ;;  %v1523_v42 = vadd.f32 0.18741608, %v1522_v20 }
 0x189   :  { %v6123_v55 = vadd.f32 %v691_v39, %v365_v24  ;;  %v1561_v3 = vadd.f32 0.05243302, %v1560_v14  ;;  %v1575_v48 = vmul.f32 %v1574_v63, %v5993_v45  ;;  %v1599_v51 = vadd.f32 0.0036580483, %v1598_v6 }
 0x18a   :  { %v1647_v16 = vmul.f32 3.8918573e-05, %v6097_v41  ;;  %v6128_v11 = vmul.f32 %v1245_v5, %v5874_v53  ;;  %v1610_v44 = vadd.f32 0.014752088, %v1609_v13  ;;  %v1637_v15 = vadd.f32 0.00028619796, %v1636_v8 }
 0x18b   :  { %v1047_v38 = vmul.f32 3.8918573e-05, %v5713_v4  ;;  %v6132_v57 = vmul.f32 %v1285_v29, %v5895_v46  ;;  %v6135_v56 = vmul.f32 %v1325_v17, %v5907_v59  ;;  %v1484_v20 = vmul.f32 %v1483_v32, %v5997_v10 }
 0x18c   :  { %v1674_v14 = vmul.f32 %v6120_v22, %v6120_v22  ;;  %v6140_v63 = vpop.eup %5068  ;;  %v6143_v53 = vmul.f32 %v1365_v33, %v5911_v54  ;;  %v6146_v5 = vmul.f32 %v1405_v12, %v5916_v61  ;;  %v1445_v6 = vadd.f32 1.1283791, %v1444_v47 }
 0x18d   :  { %v6149_v46 = vmul.f32 0.70710677, %v6123_v55  ;;  %v1524_v59 = vmul.f32 %v1523_v42, %v5947_v1  ;;  %v1562_v29 = vmul.f32 %v1561_v3, %v5993_v45  ;;  %v6153_v39 = vadd.f32 1.0, %v1575_v48 }
 0x18e   :  { %9649 = vst [vmem:[#allocation49_spill] sm:$0xff] %v6143_v53  ;;  %v1600_v17 = vmul.f32 %v1599_v51, %v6062_v35  ;;  %v1611_v13 = vmul.f32 %v1610_v44, %v6062_v35  ;;  %v1638_v54 = vmul.f32 %v1637_v15, %v6097_v41  ;;  %v1648_v8 = vadd.f32 0.001143296, %v1647_v16 }
 0x18f   :  { %9650 = vst [vmem:[#allocation50_spill] sm:$0xff] %v6146_v5  ;;  %v1048_v33 = vadd.f32 0.001143296, %v1047_v38  ;;  %v1485_v61 = vadd.f32 1.1283791, %v1484_v20  ;;  %v1538_v32 = vmul.f32 %v6140_v63, %v6095_v31  ;;  %v6161_v24 = vmul.f32 0.5, %v6025_v19 }
 0x190   :  { %v6163_v1 = vmin.f32 %v1674_v14, 16.0  ;;  %v6166_v12 = vmul.f32 0.5, %v6056_v52  ;;  %v1714_v47 = vmul.f32 %v6149_v46, %v6149_v46  ;;  %v1127_v16 = vmul.f32 3.8918573e-05, %v5854_v7 }
 0x191   :  { %v1049_v42 = vmul.f32 %v1048_v33, %v5713_v4  ;;  %v6173_v3 = vmul.f32 %v1445_v6, %v5945_v25  ;;  %v1525_v48 = vadd.f32 1.1283791, %v1524_v59  ;;  %v1563_v51 = vadd.f32 0.18741608, %v1562_v29 }
 0x192   :  { %v1601_v44 = vadd.f32 0.05243302, %v1600_v17  ;;  %5070 = vrcp.f32 %v6153_v39  ;;  %v1612_v19 = vadd.f32 0.112945676, %v1611_v13  ;;  %v1639_v15 = vadd.f32 0.0036580483, %v1638_v54 }
 0x193   :  { %9651 = vst [vmem:[#allocation51_spill] sm:$0xff] %v6173_v3  ;;  %v1649_v52 = vmul.f32 %v1648_v8, %v6097_v41  ;;  %v6178_v38 = vmul.f32 %v1485_v61, %v5960_v43  ;;  %v1539_v20 = vsub.f32 1.0, %v1538_v32  ;;  %v1687_v14 = vmul.f32 3.8918573e-05, %v6163_v1 }
 0x194   :  { %v1050_v33 = vadd.f32 0.014752088, %v1049_v42  ;;  %v6182_v5 = vmul.f32 0.5, %v6104_v58  ;;  %v6184_v25 = vmin.f32 %v1714_v47, 16.0  ;;  %v1128_v6 = vadd.f32 0.001143296, %v1127_v16 }
 0x195   :  { %9652 = vst [vmem:[#allocation52_spill] sm:$0xff] %v6178_v38  ;;  %v1087_v59 = vmul.f32 3.8918573e-05, %v5729_v27  ;;  %v1548_v29 = vand.u32 2147483648, %v6095_v31  ;;  %v1564_v17 = vmul.f32 %v1563_v51, %v5993_v45  ;;  %v1602_v13 = vmul.f32 %v1601_v44, %v6062_v35 }
 0x196   :  { %v1051_v43 = vmul.f32 %v1050_v33, %v5713_v4  ;;  %v1546_v54 = vand.u32 2147483647, %v6095_v31  ;;  %v1613_v8 = vmul.f32 %v1612_v19, %v6062_v35  ;;  %v1640_v58 = vmul.f32 %v1639_v15, %v6097_v41 }
 0x197   :  { %v1650_v61 = vadd.f32 0.014752088, %v1649_v52  ;;  %v1540_v32 = vmul.f32 %v6140_v63, %v1539_v20  ;;  %v1688_v47 = vadd.f32 0.001143296, %v1687_v14  ;;  %v1129_v16 = vmul.f32 %v1128_v6, %v5854_v7 }
 0x198   :  { %v1052_v42 = vadd.f32 0.112945676, %v1051_v43  ;;  %v6196_v38 = vpop.eup %5070  ;;  %v1526_v45 = vmul.f32 %v1525_v48, %v5923_v0  ;;  %vm1542_vm2 = vweird.f32 %v6095_v31  ;;  %v1727_v51 = vmul.f32 3.8918573e-05, %v6184_v25 }
 0x199   :  { %v1088_v44 = vadd.f32 0.001143296, %v1087_v59  ;;  %vm1543_vm3 = vweird.f32 %v6140_v63  ;;  %v1549_v19 = vor.u32 1.1754944e-38, %v1548_v29  ;;  %v1565_v15 = vadd.f32 1.1283791, %v1564_v17 }
 0x19a   :  { %v1603_v52 = vadd.f32 0.18741608, %v1602_v13  ;;  %vm6202_vm4 = vcmp.eq.f32.partialorder %v1546_v54, 8.507059e+37  ;;  %v1614_v14 = vadd.f32 0.4994258, %v1613_v8  ;;  %v1651_v6 = vmul.f32 %v1650_v61, %v6097_v41  ;;  %vm6226_vm5 = vmor %vm1542_vm2, %vm1543_vm3 }
 0x19b   :  { %v1641_v33 = vadd.f32 0.05243302, %v1640_v58  ;;  %v1053_v0 = vmul.f32 %v1052_v42, %v5713_v4  ;;  %v1541_v48 = vadd.f32 %v6140_v63, %v1540_v32  ;;  %v1578_v59 = vmul.f32 %v6196_v38, %v6153_v39 }
 0x19c   :  { %v1689_v43 = vmul.f32 %v1688_v47, %v6163_v1  ;;  %v1130_v29 = vadd.f32 0.014752088, %v1129_v16  ;;  %v1728_v17 = vadd.f32 0.001143296, %v1727_v51  ;;  %v1089_v54 = vmul.f32 %v1088_v44, %v5729_v27 }
 0x19d   :  { %v1054_v13 = vadd.f32 0.4994258, %v1053_v0  ;;  %v1167_v10 = vmul.f32 3.8918573e-05, %v5861_v50  ;;  %v6215_v8 = vmul.f32 %v1565_v15, %v5951_v21  ;;  %v1588_v58 = vand.u32 2147483648, %v6153_v39 }
 0x19e   :  { %v1604_v61 = vmul.f32 %v1603_v52, %v6062_v35  ;;  %v1131_v32 = vmul.f32 %v1130_v29, %v5854_v7  ;;  %v1615_v42 = vmul.f32 %v1614_v14, %v6062_v35  ;;  %v1090_v16 = vadd.f32 0.014752088, %v1089_v54 }
 0x19f   :  { %v1055_v47 = vmul.f32 %v1054_v13, %v5713_v4  ;;  %v1168_v51 = vadd.f32 0.001143296, %v1167_v10  ;;  %v1579_v21 = vsub.f32 1.0, %v1578_v59  ;;  %v1642_v15 = vmul.f32 %v1641_v33, %v6097_v41 }
 0x1a0   :  { %v1652_v52 = vadd.f32 0.112945676, %v1651_v6  ;;  %v1690_v0 = vadd.f32 0.014752088, %v1689_v43  ;;  %v1545_v35 = vsel %vm6226_vm5, %v6140_v63, %v1541_v48  ;;  %v1729_v4 = vmul.f32 %v1728_v17, %v6184_v25 }
 0x1a1   :  { %v6235_v10 = vadd.f32 1.0, %v1055_v47  ;;  %v1132_v14 = vadd.f32 0.112945676, %v1131_v32  ;;  %vm1582_vm6 = vweird.f32 %v6153_v39  ;;  %v1605_v31 = vadd.f32 1.1283791, %v1604_v61 }
 0x1a2   :  { %v1676_v29 = vmul.f32 2.1237322e-06, %v6163_v1  ;;  %v1091_v59 = vmul.f32 %v1090_v16, %v5729_v27  ;;  %v1169_v33 = vmul.f32 %v1168_v51, %v5861_v50  ;;  %vm1583_vm7 = vweird.f32 %v6196_v38 }
 0x1a3   :  { %v1586_v6 = vand.u32 2147483647, %v6153_v39  ;;  %v1589_v43 = vor.u32 1.1754944e-38, %v1588_v58  ;;  %v6243_v63 = vadd.f32 1.0, %v1615_v42  ;;  %v1550_v48 = vsel %vm6202_vm4, %v1549_v19, %v1545_v35  ;;  %vm6277_vm9 = vmor %vm1582_vm6, %vm1583_vm7 }
 0x1a4   :  { %v1580_v17 = vmul.f32 %v6196_v38, %v1579_v21  ;;  %v1691_v13 = vmul.f32 %v1690_v0, %v6163_v1  ;;  %5072 = vrcp.f32 %v6235_v10  ;;  %v1643_v54 = vadd.f32 0.18741608, %v1642_v15 }
 0x1a5   :  { %v1653_v61 = vmul.f32 %v1652_v52, %v6097_v41  ;;  %v1730_v32 = vadd.f32 0.014752088, %v1729_v4  ;;  %v1133_v47 = vmul.f32 %v1132_v14, %v5854_v7  ;;  %v6253_v16 = vmul.f32 %v1605_v31, %v6039_v34 }
 0x1a6   :  { %v1677_v58 = vadd.f32 0.00028619796, %v1676_v29  ;;  %v1092_v42 = vadd.f32 0.112945676, %v1091_v59  ;;  %v1170_v51 = vadd.f32 0.014752088, %v1169_v33  ;;  %v6255_v20 = vmul.f32 %v1550_v48, %v1526_v45 }
 0x1a7   :  { %vm6257_vm8 = vcmp.eq.f32.partialorder %v1586_v6, 8.507059e+37  ;;  %5074 = vrcp.f32 %v6243_v63  ;;  %v1628_v44 = vand.u32 2147483648, %v6243_v63  ;;  %v1134_v21 = vadd.f32 0.4994258, %v1133_v47 }
 0x1a8   :  { %v1581_v15 = vadd.f32 %v6196_v38, %v1580_v17  ;;  %v1692_v52 = vadd.f32 0.112945676, %v1691_v13  ;;  %v1093_v34 = vmul.f32 %v1092_v42, %v5729_v27  ;;  %v1171_v0 = vmul.f32 %v1170_v51, %v5861_v50 }
 0x1a9   :  { %v1644_v45 = vmul.f32 %v1643_v54, %v6097_v41  ;;  %v1731_v4 = vmul.f32 %v1730_v32, %v6184_v25  ;;  %v1135_v14 = vmul.f32 %v1134_v21, %v5854_v7  ;;  %v1654_v29 = vadd.f32 0.4994258, %v1653_v61 }
 0x1aa   :  { %v5073_v31 = vpop.eup %5072  ;;  %v1678_v59 = vmul.f32 %v1677_v58, %v6163_v1  ;;  %v1716_v33 = vmul.f32 2.1237322e-06, %v6184_v25  ;;  %v1094_v6 = vadd.f32 0.4994258, %v1093_v34  ;;  %v1172_v54 = vadd.f32 0.112945676, %v1171_v0 }
 0x1ab   :  { %v1058_v13 = vmul.f32 %v5073_v31, %v6235_v10  ;;  %v6282_v7 = vadd.f32 1.0, %v1135_v14  ;;  %v1585_v61 = vsel %vm6277_vm9, %v6196_v38, %v1581_v15  ;;  %v6287_v32 = vor.u32 1.1754944e-38, %v1628_v44 }
 0x1ac   :  { %v1693_v47 = vmul.f32 %v1692_v52, %v6163_v1  ;;  %v1095_v58 = vmul.f32 %v1094_v6, %v5729_v27  ;;  %v1732_v42 = vadd.f32 0.112945676, %v1731_v4  ;;  %v1207_v21 = vmul.f32 3.8918573e-05, %v5885_v26 }
 0x1ad   :  { %v6291_v39 = vpop.eup %5074  ;;  %v1059_v51 = vsub.f32 1.0, %v1058_v13  ;;  %5076 = vrcp.f32 %v6282_v7  ;;  %v1655_v34 = vmul.f32 %v1654_v29, %v6097_v41  ;;  %v1717_v0 = vadd.f32 0.00028619796, %v1716_v33 }
 0x1ae   :  { %v1068_v14 = vand.u32 2147483648, %v6235_v10  ;;  %v6297_v38 = vadd.f32 1.0, %v1095_v58  ;;  %vm1063_vm10 = vweird.f32 %v5073_v31  ;;  %v1066_v15 = vand.u32 2147483647, %v6235_v10 }
 0x1af   :  { %v1060_v44 = vmul.f32 %v5073_v31, %v1059_v51  ;;  %v1173_v27 = vmul.f32 %v1172_v54, %v5861_v50  ;;  %v1590_v52 = vsel %vm6257_vm8, %v1589_v43, %v1585_v61  ;;  %v1679_v4 = vadd.f32 0.0036580483, %v1678_v59 }
 0x1b0   :  { %v1694_v6 = vadd.f32 0.4994258, %v1693_v47  ;;  %5078 = vrcp.f32 %v6297_v38  ;;  %v1733_v41 = vmul.f32 %v1732_v42, %v6184_v25  ;;  %vm1062_vm11 = vweird.f32 %v6235_v10 }
 0x1b1   :  { %v1061_v29 = vadd.f32 %v5073_v31, %v1060_v44  ;;  %v1208_v33 = vadd.f32 0.001143296, %v1207_v21  ;;  %v1645_v17 = vadd.f32 1.1283791, %v1644_v45  ;;  %v6306_v13 = vadd.f32 1.0, %v1655_v34  ;;  %vm1064_vm12 = vmor %vm1062_vm11, %vm1063_vm10  ;;  %v278_v21 = vpop.f32.mrf.mxu0 }
 0x1b2   :  { %v1069_v58 = vor.u32 1.1754944e-38, %v1068_v14  ;;  %v1174_v51 = vadd.f32 0.4994258, %v1173_v27  ;;  %v6309_v19 = vmul.f32 %v1590_v52, %v6215_v8  ;;  %v1718_v43 = vmul.f32 %v1717_v0, %v6184_v25  ;;  %v604_v14 = vpop.f32.mrf.mxu2 }
 0x1b3   :  { %v5077_v54 = vpop.eup %5076  ;;  %v1065_v59 = vsel %vm1064_vm12, %v5073_v31, %v1061_v29  ;;  %vm1067_vm13 = vcmp.eq.f32.partialorder %v1066_v15, 8.507059e+37  ;;  %v1680_v61 = vmul.f32 %v1679_v4, %v6163_v1  ;;  %v1695_v47 = vmul.f32 %v1694_v6, %v6163_v1 }
 0x1b4   :  { %v1070_v10 = vsel %vm1067_vm13, %v1069_v58, %v1065_v59  ;;  %v1138_v45 = vmul.f32 %v5077_v54, %v6282_v7  ;;  %v6317_v42 = vmul.f32 %v6291_v39, %v6243_v63  ;;  %v1734_v34 = vadd.f32 0.4994258, %v1733_v41 }
 0x1b5   :  { %v1175_v8 = vmul.f32 %v1174_v51, %v5861_v50  ;;  %v1209_v0 = vmul.f32 %v1208_v33, %v5885_v26  ;;  %5080 = vrcp.f32 %v6306_v13  ;;  %v1148_v15 = vand.u32 2147483648, %v6282_v7 }
 0x1b6   :  { %v5079_v31 = vpop.eup %5078  ;;  %v1139_v44 = vsub.f32 1.0, %v1138_v45  ;;  %v6323_v27 = vadd.f32 %v604_v14, %v278_v21  ;;  %v1719_v52 = vadd.f32 0.0036580483, %v1718_v43  ;;  %v1071_v4 = vmul.f32 %v1070_v10, %v6005_v30 }
 0x1b7   :  { %v1098_v6 = vmul.f32 %v5079_v31, %v6297_v38  ;;  %v6327_v29 = vadd.f32 1.0, %v1175_v8  ;;  %v6329_v41 = vadd.f32 1.0, %v1695_v47  ;;  %vm1143_vm14 = vweird.f32 %v5077_v54 }
 0x1b8   :  { %v1140_v50 = vmul.f32 %v5077_v54, %v1139_v44  ;;  %v1146_v33 = vand.u32 2147483647, %v6282_v7  ;;  %v1735_v58 = vmul.f32 %v1734_v34, %v6184_v25  ;;  %v1210_v59 = vadd.f32 0.014752088, %v1209_v0 }
 0x1b9   :  { %v1099_v51 = vsub.f32 1.0, %v1098_v6  ;;  %5082 = vrcp.f32 %v6327_v29  ;;  %vm1142_vm15 = vweird.f32 %v6282_v7  ;;  %v1149_v30 = vor.u32 1.1754944e-38, %v1148_v15 }
 0x1ba   :  { %v1141_v45 = vadd.f32 %v5077_v54, %v1140_v50  ;;  %v6336_v43 = vmul.f32 0.70710677, %v6323_v27  ;;  %v4875_v10 = vclamps-f32 %v1071_v4, 1.0  ;;  %vm1144_vm1 = vmor %vm1142_vm15, %vm1143_vm14  ;;  %vm1103_vm2 = vweird.f32 %v5079_v31 }
 0x1bb   :  { %v1100_v47 = vmul.f32 %v5079_v31, %v1099_v51  ;;  %v1108_v21 = vand.u32 2147483648, %v6297_v38  ;;  %v6339_v8 = vpop.eup %5080  ;;  %5084 = vrcp.f32 %v6329_v41  ;;  %vm1147_vm3 = vcmp.eq.f32.partialorder %v1146_v33, 8.507059e+37 }
 0x1bc   :  { %v1145_v34 = vsel %vm1144_vm1, %v5077_v54, %v1141_v45  ;;  %v1106_v14 = vand.u32 2147483647, %v6297_v38  ;;  %vm1102_vm4 = vweird.f32 %v6297_v38  ;;  %v1211_v44 = vmul.f32 %v1210_v59, %v5885_v26  ;;  %v693_v45 = vpop.f32.mrf.mxu3 }
 0x1bd   :  { %v1150_v0 = vsel %vm1147_vm3, %v1149_v30, %v1145_v34  ;;  %v1101_v7 = vadd.f32 %v5079_v31, %v1100_v47  ;;  %v6346_v15 = vmul.f32 %v1645_v17, %v6069_v2  ;;  %v6348_v4 = vadd.f32 1.0, %v1735_v58  ;;  %vm6351_vm5 = vmor %vm1102_vm4, %vm1103_vm2  ;;  %v5013_v30 = vld [vmem:[%s9576_s0 + $0x70] sm:$0xff] }
 0x1be   :  { %v1151_v6 = vmul.f32 %v1150_v0, %v6065_v23  ;;  %v1754_v54 = vmul.f32 %v6336_v43, %v6336_v43  ;;  %v1619_v51 = vsub.f32 1.0, %v6317_v42  ;;  %v3438_v38 = vadd.f32 1.0, %v4875_v10  ;;  %4853 = vmatmul.msk.bf16.gmra.mxu2 %vm193_vm0, %v5013_v30  ;;  %4869 = vmatmul.msk.bf16.gmra.mxu3 %vm193_vm0, %v5013_v30 }
 0x1bf   :  { %v5083_v33 = vpop.eup %5082  ;;  %v1105_v59 = vsel %vm6351_vm5, %v5079_v31, %v1101_v7  ;;  %v1109_v2 = vor.u32 1.1754944e-38, %v1108_v21  ;;  %v1681_v17 = vadd.f32 0.05243302, %v1680_v61  ;;  %vm1107_vm6 = vcmp.eq.f32.partialorder %v1106_v14, 8.507059e+37  ;;  %v367_v31 = vpop.f32.mrf.mxu1  ;;  %v9663_v7 = vld [vmem:[#allocation34_spill] sm:$0xff] }
 0x1c0   :  { %v4877_v58 = vclamps-f32 %v1151_v6, 1.0  ;;  %v1178_v23 = vmul.f32 %v5083_v33, %v6327_v29  ;;  %v1658_v47 = vmul.f32 %v6339_v8, %v6306_v13  ;;  %v1720_v42 = vmul.f32 %v1719_v52, %v6184_v25 }
 0x1c1   :  { %v1110_v10 = vsel %vm1107_vm6, %v1109_v2, %v1105_v59  ;;  %v1212_v34 = vadd.f32 0.112945676, %v1211_v44  ;;  %v6367_v0 = vpop.eup %5084  ;;  %5086 = vrcp.f32 %v6348_v4  ;;  %v6370_v14 = vmin.f32 %v1754_v54, 16.0  ;;  %v9664_v59 = vld [vmem:[#allocation37_spill] sm:$0xff] }
 0x1c2   :  { %v3440_v61 = vadd.f32 1.0, %v4877_v58  ;;  %v1179_v21 = vsub.f32 1.0, %v1178_v23  ;;  %v3502_v6 = vmul.f32 %v3438_v38, %v9663_v7  ;;  %v1186_v50 = vand.u32 2147483647, %v6327_v29  ;;  %v9665_v58 = vld [vmem:[#allocation42_spill] sm:$0xff] }
 0x1c3   :  { %v1188_v52 = vand.u32 2147483648, %v6327_v29  ;;  %v6377_v44 = vadd.f32 %v693_v45, %v367_v31  ;;  %vm1622_vm7 = vweird.f32 %v6243_v63  ;;  %v1111_v23 = vmul.f32 %v1110_v10, %v9665_v58 }
 0x1c4   :  { %v3504_v2 = vmul.f32 %v3440_v61, %v9664_v59  ;;  %v1180_v54 = vmul.f32 %v5083_v33, %v1179_v21  ;;  %vm1183_vm8 = vweird.f32 %v5083_v33  ;;  %v1620_v48 = vmul.f32 %v6291_v39, %v1619_v51 }
 0x1c5   :  { %vm1623_vm9 = vweird.f32 %v6291_v39  ;;  %v1698_v38 = vmul.f32 %v6367_v0, %v6329_v41  ;;  %v1213_v30 = vmul.f32 %v1212_v34, %v5885_v26  ;;  %vm1182_vm10 = vweird.f32 %v6327_v29 }
 0x1c6   :  { %v3564_v7 = vpack.c.bf16 %v3504_v2, %v3502_v6  ;;  %v1181_v45 = vadd.f32 %v5083_v33, %v1180_v54  ;;  %v1756_v31 = vmul.f32 2.1237322e-06, %v6370_v14  ;;  %v1659_v61 = vsub.f32 1.0, %v1658_v47  ;;  %vm1184_vm11 = vmor %vm1182_vm10, %vm1183_vm8 }
 0x1c7   :  { %v1682_v10 = vmul.f32 %v1681_v17, %v6163_v1  ;;  %v1189_v21 = vor.u32 1.1754944e-38, %v1188_v52  ;;  %v6391_v51 = vmul.f32 0.70710677, %v6377_v44  ;;  %v6393_v59 = vpop.eup %5086  ;;  %v1721_v58 = vadd.f32 0.05243302, %v1720_v42  ;;  %vm6417_vm15 = vmor %vm1622_vm7, %vm1623_vm9 }
 0x1c8   :  { %3735 = vmatmul.bf16.gmra.mxu0 %v3564_v7  ;;  %v4876_v35 = vclamps-f32 %v1111_v23, 1.0  ;;  %v1185_v34 = vsel %vm1184_vm11, %v5083_v33, %v1181_v45  ;;  %vm1187_vm12 = vcmp.eq.f32.partialorder %v1186_v50, 8.507059e+37  ;;  %v1767_v29 = vmul.f32 3.8918573e-05, %v6370_v14 }
 0x1c9   :  { %v1190_v6 = vsel %vm1187_vm12, %v1189_v21, %v1185_v34  ;;  %v1214_v2 = vadd.f32 0.4994258, %v1213_v30  ;;  %v1287_v47 = vmul.f32 3.8918573e-05, %v5940_v9  ;;  %v1621_v17 = vadd.f32 %v6291_v39, %v1620_v48 }
 0x1ca   :  { %v9666_v52 = vand.u32 2147483647, %v6243_v63  ;;  %vm1662_vm14 = vweird.f32 %v6306_v13  ;;  %v1699_v42 = vsub.f32 1.0, %v1698_v38  ;;  %v1191_v33 = vmul.f32 %v1190_v6, %v6072_v62 }
 0x1cb   :  { %v1757_v50 = vadd.f32 0.00028619796, %v1756_v31  ;;  %v1666_v23 = vand.u32 2147483647, %v6306_v13  ;;  %v1683_v7 = vadd.f32 0.18741608, %v1682_v10  ;;  %v1738_v30 = vmul.f32 %v6393_v59, %v6348_v4 }
 0x1cc   :  { %vm6400_vm13 = vcmp.eq.f32.partialorder %v9666_v52, 8.507059e+37  ;;  %v1794_v48 = vmul.f32 %v6391_v51, %v6391_v51  ;;  %v1660_v45 = vmul.f32 %v6339_v8, %v1659_v61  ;;  %v1668_v21 = vand.u32 2147483648, %v6306_v13  ;;  %v607_v13 = vpop.f32.mrf.mxu2 }
 0x1cd   :  { %v4878_v34 = vclamps-f32 %v1191_v33, 1.0  ;;  %v3439_v52 = vadd.f32 1.0, %v4876_v35  ;;  %v1722_v38 = vmul.f32 %v1721_v58, %v6184_v25  ;;  %v1768_v31 = vadd.f32 0.001143296, %v1767_v29 }
 0x1ce   :  { %v1215_v10 = vmul.f32 %v1214_v2, %v5885_v26  ;;  %v1288_v6 = vadd.f32 0.001143296, %v1287_v47  ;;  %v1625_v61 = vsel %vm6417_vm15, %v6291_v39, %v1621_v17  ;;  %v1700_v35 = vmul.f32 %v6367_v0, %v1699_v42  ;;  %v9673_v47 = vld [vmem:[#allocation36_spill] sm:$0xff]  ;;  %v9674_v42 = vld [vmem:[#allocation38_spill] sm:$0xff] }
 0x1cf   :  { %v3441_v33 = vadd.f32 1.0, %v4878_v34  ;;  %v1758_v3 = vmul.f32 %v1757_v50, %v6370_v14  ;;  %vm1663_vm1 = vweird.f32 %v6339_v8  ;;  %vm6429_vm2 = vcmp.eq.f32.partialorder %v1666_v23, 8.507059e+37 }
 0x1d0   :  { %v1684_v58 = vmul.f32 %v1683_v7, %v6163_v1  ;;  %v1739_v29 = vsub.f32 1.0, %v1738_v30  ;;  %v6434_v26 = vmin.f32 %v1794_v48, 16.0  ;;  %v1661_v2 = vadd.f32 %v6339_v8, %v1660_v45  ;;  %vm6453_vm4 = vmor %vm1662_vm14, %vm1663_vm1 }
 0x1d1   :  { %v1708_v39 = vand.u32 2147483648, %v6329_v41  ;;  %v3503_v17 = vmul.f32 %v3439_v52, %v9673_v47  ;;  %v3505_v34 = vmul.f32 %v3441_v33, %v9674_v42  ;;  %v1723_v50 = vadd.f32 0.18741608, %v1722_v38  ;;  %v281_v33 = vpop.f32.mrf.mxu0 }
 0x1d2   :  { %v1769_v62 = vmul.f32 %v1768_v31, %v6370_v14  ;;  %v6441_v23 = vadd.f32 1.0, %v1215_v10  ;;  %v1289_v53 = vmul.f32 %v1288_v6, %v5940_v9  ;;  %v1701_v1 = vadd.f32 %v6367_v0, %v1700_v35 }
 0x1d3   :  { %vm1703_vm3 = vweird.f32 %v6367_v0  ;;  %v3565_v7 = vpack.c.bf16 %v3505_v34, %v3503_v17  ;;  %v1759_v30 = vadd.f32 0.0036580483, %v1758_v3  ;;  %v1630_v48 = vsel %vm6400_vm13, %v6287_v32, %v1625_v61 }
 0x1d4   :  { %v1669_v52 = vor.u32 1.1754944e-38, %v1668_v21  ;;  %v1740_v38 = vmul.f32 %v6393_v59, %v1739_v29  ;;  %v1807_v31 = vmul.f32 3.8918573e-05, %v6434_v26  ;;  %v1665_v3 = vsel %vm6453_vm4, %v6339_v8, %v1661_v2 }
 0x1d5   :  { %v1685_v10 = vadd.f32 1.1283791, %v1684_v58  ;;  %vm1702_vm5 = vweird.f32 %v6329_v41  ;;  %v1706_v32 = vand.u32 2147483647, %v6329_v41  ;;  %3824 = vmatmul.bf16.gmra.mxu1 %v3565_v7  ;;  %v1709_v21 = vor.u32 1.1754944e-38, %v1708_v39 }
 0x1d6   :  { %vm6464_vm6 = vmor %vm1702_vm5, %vm1703_vm3  ;;  %v1770_v6 = vadd.f32 0.014752088, %v1769_v62  ;;  %5088 = vrcp.f32 %v6441_v23  ;;  %v1290_v61 = vadd.f32 0.014752088, %v1289_v53  ;;  %v1724_v35 = vmul.f32 %v1723_v50, %v6184_v25 }
 0x1d7   :  { %v1705_v8 = vsel %vm6464_vm6, %v6367_v0, %v1701_v1  ;;  %v1760_v41 = vmul.f32 %v1759_v30, %v6370_v14  ;;  %v1796_v58 = vmul.f32 2.1237322e-06, %v6434_v26  ;;  %v1741_v29 = vadd.f32 %v6393_v59, %v1740_v38 }
 0x1d8   :  { %vm1743_vm7 = vweird.f32 %v6393_v59  ;;  %v1808_v2 = vadd.f32 0.001143296, %v1807_v31  ;;  %v6477_v39 = vadd.f32 %v607_v13, %v281_v33  ;;  %v1670_v53 = vsel %vm6429_vm2, %v1669_v52, %v1665_v3  ;;  %v696_v13 = vpop.f32.mrf.mxu3 }
 0x1d9   :  { %vm1707_vm8 = vcmp.eq.f32.partialorder %v1706_v32, 8.507059e+37  ;;  %vm1742_vm9 = vweird.f32 %v6348_v4  ;;  %v1748_v25 = vand.u32 2147483648, %v6348_v4  ;;  %v1746_v47 = vand.u32 2147483647, %v6348_v4 }
 0x1da   :  { %v1710_v0 = vsel %vm1707_vm8, %v1709_v21, %v1705_v8  ;;  %v1771_v17 = vmul.f32 %v1770_v6, %v6370_v14  ;;  %v1291_v42 = vmul.f32 %v1290_v61, %v5940_v9  ;;  %v1686_v34 = vmul.f32 %v1685_v10, %v6120_v22  ;;  %vm6487_vm10 = vmor %vm1742_vm9, %vm1743_vm7 }
 0x1db   :  { %v1725_v50 = vadd.f32 1.1283791, %v1724_v35  ;;  %v1761_v63 = vadd.f32 0.05243302, %v1760_v41  ;;  %v1797_v1 = vadd.f32 0.00028619796, %v1796_v58  ;;  %v1745_v30 = vsel %vm6487_vm10, %v6393_v59, %v1741_v29 }
 0x1dc   :  { %v6491_v7 = vpop.eup %5088  ;;  %v1809_v4 = vmul.f32 %v1808_v2, %v6434_v26  ;;  %v6498_v45 = vmul.f32 0.70710677, %v6477_v39  ;;  %v1247_v22 = vmul.f32 3.8918573e-05, %v5926_v18  ;;  %v1631_v52 = vmul.f32 %v1630_v48, %v6253_v16  ;;  %v370_v48 = vpop.f32.mrf.mxu1 }
 0x1dd   :  { %v1671_v38 = vmul.f32 %v1670_v53, %v6346_v15  ;;  %v1711_v31 = vmul.f32 %v1710_v0, %v1686_v34  ;;  %v1749_v3 = vor.u32 1.1754944e-38, %v1748_v25  ;;  %v4888_v10 = vclamps-f32 %v6309_v19, 1.0 }
 0x1de   :  { %vm1747_vm11 = vcmp.eq.f32.partialorder %v1746_v47, 8.507059e+37  ;;  %v1772_v32 = vadd.f32 0.112945676, %v1771_v17  ;;  %v1292_v54 = vadd.f32 0.112945676, %v1291_v42  ;;  %v1762_v21 = vmul.f32 %v1761_v63, %v6370_v14 }
 0x1df   :  { %v1750_v59 = vsel %vm1747_vm11, %v1749_v3, %v1745_v30  ;;  %v1798_v6 = vmul.f32 %v1797_v1, %v6434_v26  ;;  %v1218_v61 = vmul.f32 %v6491_v7, %v6441_v23  ;;  %v1726_v16 = vmul.f32 %v1725_v50, %v6149_v46 }
 0x1e0   :  { %v1810_v15 = vadd.f32 0.014752088, %v1809_v4  ;;  %v1834_v8 = vmul.f32 %v6498_v45, %v6498_v45  ;;  %v1248_v19 = vadd.f32 0.001143296, %v1247_v22  ;;  %v4889_v35 = vclamps-f32 %v1631_v52, 1.0 }
 0x1e1   :  { %v4890_v33 = vclamps-f32 %v1671_v38, 1.0  ;;  %v4891_v41 = vclamps-f32 %v1711_v31, 1.0  ;;  %v6511_v58 = vadd.f32 %v696_v13, %v370_v48  ;;  %v9681_v29 = vclamps-f32 %v6255_v20, 1.0 }
 0x1e2   :  { %v1751_v53 = vmul.f32 %v1750_v59, %v1726_v16  ;;  %v1773_v25 = vmul.f32 %v1772_v32, %v6370_v14  ;;  %v1293_v0 = vmul.f32 %v1292_v54, %v5940_v9  ;;  %v3451_v46 = vadd.f32 1.0, %v4888_v10 }
 0x1e3   :  { %v3450_v2 = vadd.f32 1.0, %v9681_v29  ;;  %v1763_v47 = vadd.f32 0.18741608, %v1762_v21  ;;  %v1799_v17 = vadd.f32 0.0036580483, %v1798_v6  ;;  %v1219_v42 = vsub.f32 1.0, %v1218_v61 }
 0x1e4   :  { %v767_v34 = vmul.f32 0.5, %v6123_v55  ;;  %v1811_v50 = vmul.f32 %v1810_v15, %v6434_v26  ;;  %v6519_v62 = vmin.f32 %v1834_v8, 16.0  ;;  %v1249_v63 = vmul.f32 %v1248_v19, %v5926_v18 }
 0x1e5   :  { %v3452_v1 = vadd.f32 1.0, %v4889_v35  ;;  %v3453_v20 = vadd.f32 1.0, %v4890_v33  ;;  %v3454_v30 = vadd.f32 1.0, %v4891_v41  ;;  %v6523_v4 = vmul.f32 0.70710677, %v6511_v58 }
 0x1e6   :  { %v6526_v22 = vmul.f32 %v3450_v2, %v6102_v36  ;;  %v4892_v52 = vclamps-f32 %v1751_v53, 1.0  ;;  %v1774_v38 = vadd.f32 0.4994258, %v1773_v25  ;;  %v1294_v31 = vadd.f32 0.4994258, %v1293_v0 }
 0x1e7   :  { %v6529_v55 = vmul.f32 %v3451_v46, %v6109_v40  ;;  %v1764_v3 = vmul.f32 %v1763_v47, %v6370_v14  ;;  %v1800_v10 = vmul.f32 %v1799_v17, %v6434_v26  ;;  %v1220_v32 = vmul.f32 %v6491_v7, %v1219_v42 }
 0x1e8   :  { %v1812_v13 = vadd.f32 0.112945676, %v1811_v50  ;;  %v1836_v54 = vmul.f32 2.1237322e-06, %v6519_v62  ;;  %v1295_v59 = vmul.f32 %v1294_v31, %v5940_v9  ;;  %v1250_v21 = vadd.f32 0.014752088, %v1249_v63 }
 0x1e9   :  { %v6537_v36 = vmul.f32 %v3452_v1, %v6161_v24  ;;  %v6540_v6 = vmul.f32 %v3453_v20, %v6166_v12  ;;  %v6543_v40 = vmul.f32 %v3454_v30, %v6182_v5  ;;  %v1874_v61 = vmul.f32 %v6523_v4, %v6523_v4 }
 0x1ea   :  { %v3455_v16 = vadd.f32 1.0, %v4892_v52  ;;  %v1775_v48 = vmul.f32 %v1774_v38, %v6370_v14  ;;  %v1847_v15 = vmul.f32 3.8918573e-05, %v6519_v62  ;;  %v1226_v9 = vand.u32 2147483647, %v6441_v23 }
 0x1eb   :  { %v1765_v8 = vadd.f32 1.1283791, %v1764_v3  ;;  %v1221_v24 = vadd.f32 %v6491_v7, %v1220_v32  ;;  %v6551_v19 = vadd.f32 1.0, %v1295_v59  ;;  %v1251_v12 = vmul.f32 %v1250_v21, %v5926_v18 }
 0x1ec   :  { %v1801_v35 = vadd.f32 0.05243302, %v1800_v10  ;;  %v1813_v5 = vmul.f32 %v1812_v13, %v6434_v26  ;;  %v1837_v33 = vadd.f32 0.00028619796, %v1836_v54  ;;  %vm1223_vm12 = vweird.f32 %v6491_v7 }
 0x1ed   :  { %v6557_v41 = vmul.f32 0.5, %v6323_v27  ;;  %v6559_v14 = vmin.f32 %v1874_v61, 16.0  ;;  %v1228_v29 = vand.u32 2147483648, %v6441_v23  ;;  %5090 = vrcp.f32 %v6551_v19 }
 0x1ee   :  { %v6563_v2 = vmul.f32 %v3455_v16, %v767_v34  ;;  %v6565_v53 = vadd.f32 1.0, %v1775_v48  ;;  %v1848_v25 = vadd.f32 0.001143296, %v1847_v15  ;;  %vm1222_vm13 = vweird.f32 %v6441_v23 }
 0x1ef   :  { %v6569_v0 = vmul.f32 %v1765_v8, %v6336_v43  ;;  %v6572_v46 = vmul.f32 0.5, %v6377_v44  ;;  %vm6574_vm14 = vmor %vm1222_vm13, %vm1223_vm12  ;;  %vm6578_vm15 = vcmp.eq.f32.partialorder %v1226_v9, 8.507059e+37  ;;  %v1252_v17 = vadd.f32 0.112945676, %v1251_v12 }
 0x1f0   :  { %v1802_v42 = vmul.f32 %v1801_v35, %v6434_v26  ;;  %v1814_v34 = vadd.f32 0.4994258, %v1813_v5  ;;  %v1838_v23 = vmul.f32 %v1837_v33, %v6519_v62  ;;  %v1225_v43 = vsel %vm6574_vm14, %v6491_v7, %v1221_v24 }
 0x1f1   :  { %v1887_v44 = vmul.f32 3.8918573e-05, %v6559_v14  ;;  %v1229_v50 = vor.u32 1.1754944e-38, %v1228_v29  ;;  %v1253_v63 = vmul.f32 %v1252_v17, %v5926_v18  ;;  %v1327_v1 = vmul.f32 3.8918573e-05, %v5953_v49 }
 0x1f2   :  { %5092 = vrcp.f32 %v6565_v53  ;;  %v1786_v20 = vand.u32 2147483647, %v6565_v53  ;;  %v1849_v30 = vmul.f32 %v1848_v25, %v6519_v62  ;;  %v1367_v52 = vmul.f32 3.8918573e-05, %v5957_v60 }
 0x1f3   :  { %v5091_v38 = vpop.eup %5090  ;;  %v1788_v31 = vand.u32 2147483648, %v6565_v53  ;;  %v1230_v7 = vsel %vm6578_vm15, %v1229_v50, %v1225_v43  ;;  %v1254_v3 = vadd.f32 0.4994258, %v1253_v63  ;;  %v1328_v10 = vadd.f32 0.001143296, %v1327_v1 }
 0x1f4   :  { %v1803_v32 = vadd.f32 0.18741608, %v1802_v42  ;;  %v1839_v13 = vadd.f32 0.0036580483, %v1838_v23  ;;  %v1876_v54 = vmul.f32 2.1237322e-06, %v6559_v14  ;;  %v1298_v59 = vmul.f32 %v5091_v38, %v6551_v19 }
 0x1f5   :  { %v1815_v21 = vmul.f32 %v1814_v34, %v6434_v26  ;;  %v1888_v61 = vadd.f32 0.001143296, %v1887_v44  ;;  %v1255_v16 = vmul.f32 %v1254_v3, %v5926_v18  ;;  %v1329_v48 = vmul.f32 %v1328_v10, %v5953_v49 }
 0x1f6   :  { %v1850_v15 = vadd.f32 0.014752088, %v1849_v30  ;;  %v1231_v9 = vmul.f32 %v1230_v7, %v6117_v37  ;;  %v1299_v8 = vsub.f32 1.0, %v1298_v59  ;;  %v1368_v24 = vadd.f32 0.001143296, %v1367_v52 }
 0x1f7   :  { %v1306_v12 = vand.u32 2147483647, %v6551_v19  ;;  %v1308_v35 = vand.u32 2147483648, %v6551_v19  ;;  %v6605_v5 = vadd.f32 1.0, %v1255_v16  ;;  %v1330_v33 = vadd.f32 0.014752088, %v1329_v48 }
 0x1f8   :  { %v6607_v29 = vpop.eup %5092  ;;  %v1300_v25 = vmul.f32 %v5091_v38, %v1299_v8  ;;  %vm1303_vm1 = vweird.f32 %v5091_v38  ;;  %v1369_v18 = vmul.f32 %v1368_v24, %v5957_v60  ;;  %v1447_v27 = vmul.f32 3.8918573e-05, %v5987_v28 }
 0x1f9   :  { %v1804_v47 = vmul.f32 %v1803_v32, %v6434_v26  ;;  %v1877_v37 = vadd.f32 0.00028619796, %v1876_v54  ;;  %v1889_v17 = vmul.f32 %v1888_v61, %v6559_v14  ;;  %5094 = vrcp.f32 %v6605_v5 }
 0x1fa   :  { %v6614_v42 = vadd.f32 1.0, %v1815_v21  ;;  %v1851_v34 = vmul.f32 %v1850_v15, %v6519_v62  ;;  %v1301_v23 = vadd.f32 %v5091_v38, %v1300_v25  ;;  %vm1302_vm2 = vweird.f32 %v6551_v19 }
 0x1fb   :  { %v4879_v43 = vclamps-f32 %v1231_v9, 1.0  ;;  %vm1304_vm3 = vmor %vm1302_vm2, %vm1303_vm1  ;;  %v1309_v44 = vor.u32 1.1754944e-38, %v1308_v35  ;;  %v1331_v50 = vmul.f32 %v1330_v33, %v5953_v49  ;;  %v1370_v63 = vadd.f32 0.014752088, %v1369_v18 }
 0x1fc   :  { %v1778_v26 = vmul.f32 %v6607_v29, %v6565_v53  ;;  %v1305_v1 = vsel %vm1304_vm3, %v5091_v38, %v1301_v23  ;;  %vm1307_vm4 = vcmp.eq.f32.partialorder %v1306_v12, 8.507059e+37  ;;  %v1448_v30 = vadd.f32 0.001143296, %v1447_v27  ;;  %v609_v23 = vpop.f32.mrf.mxu2 }
 0x1fd   :  { %v1890_v52 = vadd.f32 0.014752088, %v1889_v17  ;;  %v1310_v7 = vsel %vm1307_vm4, %v1309_v44, %v1305_v1  ;;  %v1332_v3 = vadd.f32 0.112945676, %v1331_v50  ;;  %v1371_v10 = vmul.f32 %v1370_v63, %v5957_v60  ;;  %v9687_v44 = vld [vmem:[#allocation43_spill] sm:$0xff] }
 0x1fe   :  { %5096 = vrcp.f32 %v6614_v42  ;;  %v1840_v19 = vmul.f32 %v1839_v13, %v6519_v62  ;;  %v1852_v32 = vadd.f32 0.112945676, %v1851_v34  ;;  %v1311_v54 = vmul.f32 %v1310_v7, %v6132_v57 }
 0x1ff   :  { %v6625_v59 = vpop.eup %5094  ;;  %v1878_v21 = vmul.f32 %v1877_v37, %v6559_v14  ;;  %v3442_v61 = vadd.f32 1.0, %v4879_v43  ;;  %v1333_v38 = vmul.f32 %v1332_v3, %v5953_v49  ;;  %v1372_v16 = vadd.f32 0.112945676, %v1371_v10  ;;  %v9686_v37 = vld [vmem:[#allocation40_spill] sm:$0xff] }
 0x200   :  { %v6629_v48 = vor.u32 1.1754944e-38, %v1788_v31  ;;  %v4881_v15 = vclamps-f32 %v1311_v54, 1.0  ;;  %v1258_v9 = vmul.f32 %v6625_v59, %v6605_v5  ;;  %v1449_v8 = vmul.f32 %v1448_v30, %v5987_v28  ;;  %v283_v31 = vpop.f32.mrf.mxu0 }
 0x201   :  { %v1779_v13 = vsub.f32 1.0, %v1778_v26  ;;  %v1805_v24 = vadd.f32 1.1283791, %v1804_v47  ;;  %v1891_v57 = vmul.f32 %v1890_v52, %v6559_v14  ;;  %v1334_v12 = vadd.f32 0.4994258, %v1333_v38 }
 0x202   :  { %vm1783_vm5 = vweird.f32 %v6607_v29  ;;  %v1841_v35 = vadd.f32 0.05243302, %v1840_v19  ;;  %v1853_v33 = vmul.f32 %v1852_v32, %v6519_v62  ;;  %v3444_v25 = vadd.f32 1.0, %v4881_v15 }
 0x203   :  { %v1259_v18 = vsub.f32 1.0, %v1258_v9  ;;  %v1879_v27 = vadd.f32 0.0036580483, %v1878_v21  ;;  %v3506_v17 = vmul.f32 %v3442_v61, %v9686_v37  ;;  %v1335_v34 = vmul.f32 %v1334_v12, %v5953_v49  ;;  %v372_v12 = vpop.f32.mrf.mxu1 }
 0x204   :  { %v1373_v43 = vmul.f32 %v1372_v16, %v5957_v60  ;;  %v6640_v47 = vpop.eup %5096  ;;  %vm1782_vm6 = vweird.f32 %v6565_v53  ;;  %v3508_v50 = vmul.f32 %v3444_v25, %v9687_v44  ;;  %v6645_v26 = vadd.f32 %v609_v23, %v283_v31 }
 0x205   :  { %v1260_v63 = vmul.f32 %v6625_v59, %v1259_v18  ;;  %v1450_v1 = vadd.f32 0.014752088, %v1449_v8  ;;  %v1780_v30 = vmul.f32 %v6607_v29, %v1779_v13  ;;  %v1826_v52 = vand.u32 2147483647, %v6614_v42  ;;  %v698_v18 = vpop.f32.mrf.mxu3  ;;  %vm6694_vm10 = vmor %vm1782_vm6, %vm1783_vm5 }
 0x206   :  { %v1892_v7 = vadd.f32 0.112945676, %v1891_v57  ;;  %v6649_v49 = vadd.f32 1.0, %v1335_v34  ;;  %v1842_v3 = vmul.f32 %v1841_v35, %v6519_v62  ;;  %v1854_v10 = vadd.f32 0.4994258, %v1853_v33 }
 0x207   :  { %v3566_v19 = vpack.c.bf16 %v3508_v50, %v3506_v17  ;;  %v6653_v32 = vmul.f32 0.70710677, %v6645_v26  ;;  %v1818_v54 = vmul.f32 %v6640_v47, %v6614_v42  ;;  %v1880_v21 = vmul.f32 %v1879_v27, %v6559_v14 }
 0x208   :  { %5098 = vrcp.f32 %v6649_v49  ;;  %v1374_v61 = vadd.f32 0.4994258, %v1373_v43  ;;  %v1261_v38 = vadd.f32 %v6625_v59, %v1260_v63  ;;  %vm1263_vm7 = vweird.f32 %v6625_v59 }
 0x209   :  { %3740 = vmatmul.bf16.gmra.mxu0 %v3566_v19  ;;  %v1914_v16 = vmul.f32 %v6653_v32, %v6653_v32  ;;  %v1451_v15 = vmul.f32 %v1450_v1, %v5987_v28  ;;  %v6665_v9 = vadd.f32 %v6607_v29, %v1780_v30  ;;  %v1828_v8 = vand.u32 2147483648, %v6614_v42 }
 0x20a   :  { %v1893_v13 = vmul.f32 %v1892_v7, %v6559_v14  ;;  %v1268_v57 = vand.u32 2147483648, %v6605_v5  ;;  %v1855_v35 = vmul.f32 %v1854_v10, %v6519_v62  ;;  %vm1262_vm8 = vweird.f32 %v6605_v5 }
 0x20b   :  { %v1266_v33 = vand.u32 2147483647, %v6605_v5  ;;  %v6673_v25 = vmin.f32 %v1914_v16, 16.0  ;;  %v6675_v31 = vadd.f32 0.18741608, %v1842_v3  ;;  %vm6679_vm9 = vmor %vm1262_vm8, %vm1263_vm7  ;;  %v6683_v17 = vadd.f32 %v698_v18, %v372_v12 }
 0x20c   :  { %v1881_v27 = vadd.f32 0.05243302, %v1880_v21  ;;  %v1375_v34 = vmul.f32 %v1374_v61, %v5957_v60  ;;  %v1819_v23 = vsub.f32 1.0, %v1818_v54  ;;  %v1265_v5 = vsel %vm6679_vm9, %v6625_v59, %v1261_v38  ;;  %v5014_v59 = vld [vmem:[%s9576_s0 + $0x78] sm:$0xff] }
 0x20d   :  { %v1927_v43 = vmul.f32 3.8918573e-05, %v6673_v25  ;;  %v1452_v44 = vadd.f32 0.112945676, %v1451_v15  ;;  %v6699_v1 = vmul.f32 %v1805_v24, %v6391_v51  ;;  %v1894_v60 = vadd.f32 0.4994258, %v1893_v13  ;;  %4854 = vmatmul.msk.bf16.gmra.mxu2 %vm193_vm0, %v5014_v59  ;;  %4870 = vmatmul.msk.bf16.gmra.mxu3 %vm193_vm0, %v5014_v59  ;;  %v701_v37 = vpop.f32.mrf.mxu3 }
 0x20e   :  { %v5099_v50 = vpop.eup %5098  ;;  %v1269_v30 = vor.u32 1.1754944e-38, %v1268_v57  ;;  %v6702_v7 = vmul.f32 0.70710677, %v6683_v17  ;;  %v1785_v3 = vsel %vm6694_vm10, %v6607_v29, %v6665_v9  ;;  %v6711_v10 = vadd.f32 1.0, %v1855_v35  ;;  %v286_v35 = vpop.f32.mrf.mxu0 }
 0x20f   :  { %vm1267_vm11 = vcmp.eq.f32.partialorder %v1266_v33, 8.507059e+37  ;;  %v1338_v51 = vmul.f32 %v5099_v50, %v6649_v49  ;;  %vm1822_vm12 = vweird.f32 %v6614_v42  ;;  %v1928_v19 = vadd.f32 0.001143296, %v1927_v43 }
 0x210   :  { %v1270_v24 = vsel %vm1267_vm11, %v1269_v30, %v1265_v5  ;;  %v1954_v54 = vmul.f32 %v6702_v7, %v6702_v7  ;;  %v6719_v21 = vadd.f32 1.0, %v1375_v34  ;;  %vm6723_vm13 = vcmp.eq.f32.partialorder %v1786_v20, 8.507059e+37 }
 0x211   :  { %v1820_v61 = vmul.f32 %v6640_v47, %v1819_v23  ;;  %v1882_v38 = vmul.f32 %v1881_v27, %v6559_v14  ;;  %v1339_v16 = vsub.f32 1.0, %v1338_v51  ;;  %v1453_v15 = vmul.f32 %v1452_v44, %v5987_v28  ;;  %v612_v27 = vpop.f32.mrf.mxu2 }
 0x212   :  { %v1895_v9 = vmul.f32 %v1894_v60, %v6559_v14  ;;  %v1346_v13 = vand.u32 2147483647, %v6649_v49  ;;  %v1348_v57 = vand.u32 2147483648, %v6649_v49  ;;  %v6733_v12 = vmin.f32 %v1954_v54, 16.0  ;;  %v375_v60 = vpop.f32.mrf.mxu1  ;;  %v9696_v54 = vld [vmem:[#allocation35_spill] sm:$0xff] }
 0x213   :  { %5100 = vrcp.f32 %v6711_v10  ;;  %v1271_v53 = vmul.f32 %v1270_v24, %v6128_v11  ;;  %v1340_v20 = vmul.f32 %v5099_v50, %v1339_v16  ;;  %vm1343_vm14 = vweird.f32 %v5099_v50 }
 0x214   :  { %vm1823_vm15 = vweird.f32 %v6640_v47  ;;  %v1929_v33 = vmul.f32 %v1928_v19, %v6673_v25  ;;  %v1967_v18 = vmul.f32 3.8918573e-05, %v6733_v12  ;;  %5102 = vrcp.f32 %v6719_v21 }
 0x215   :  { %v1341_v34 = vadd.f32 %v5099_v50, %v1340_v20  ;;  %vm1342_vm1 = vweird.f32 %v6649_v49  ;;  %v6742_v23 = vadd.f32 %v612_v27, %v286_v35  ;;  %v1454_v5 = vadd.f32 0.4994258, %v1453_v15  ;;  %vm6766_vm5 = vmor %vm1822_vm12, %vm1823_vm15 }
 0x216   :  { %v1821_v11 = vadd.f32 %v6640_v47, %v1820_v61  ;;  %vm6747_vm2 = vcmp.eq.f32.partialorder %v1826_v52, 8.507059e+37  ;;  %v6751_v44 = vadd.f32 1.0, %v1895_v9  ;;  %vm1344_vm3 = vmor %vm1342_vm1, %vm1343_vm14  ;;  %vm1347_vm4 = vcmp.eq.f32.partialorder %v1346_v13, 8.507059e+37 }
 0x217   :  { %v1349_v63 = vor.u32 1.1754944e-38, %v1348_v57  ;;  %v4880_v30 = vclamps-f32 %v1271_v53, 1.0  ;;  %v1345_v49 = vsel %vm1344_vm3, %v5099_v50, %v1341_v34  ;;  %v6755_v59 = vmul.f32 0.70710677, %v6742_v23 }
 0x218   :  { %v6757_v51 = vadd.f32 %v701_v37, %v375_v60  ;;  %v1930_v19 = vadd.f32 0.014752088, %v1929_v33  ;;  %v1968_v52 = vadd.f32 0.001143296, %v1967_v18  ;;  %v1407_v61 = vmul.f32 3.8918573e-05, %v9696_v54 }
 0x219   :  { %v1350_v24 = vsel %vm1347_vm4, %v1349_v63, %v1345_v49  ;;  %v6760_v16 = vpop.eup %5100  ;;  %v1829_v50 = vor.u32 1.1754944e-38, %v1828_v8  ;;  %v1994_v13 = vmul.f32 %v6755_v59, %v6755_v59  ;;  %v1455_v57 = vmul.f32 %v1454_v5, %v5987_v28  ;;  %v9699_v63 = vld [vmem:[#allocation41_spill] sm:$0xff] }
 0x21a   :  { %v1351_v9 = vmul.f32 %v1350_v24, %v6135_v56  ;;  %v6776_v53 = vpop.eup %5102  ;;  %v1790_v20 = vsel %vm6723_vm13, %v6629_v48, %v1785_v3  ;;  %v1825_v35 = vsel %vm6766_vm5, %v6640_v47, %v1821_v11  ;;  %v1844_v42 = vmul.f32 %v6675_v31, %v6519_v62 }
 0x21b   :  { %v1883_v8 = vadd.f32 0.18741608, %v1882_v38  ;;  %5104 = vrcp.f32 %v6751_v44  ;;  %v3443_v33 = vadd.f32 1.0, %v4880_v30  ;;  %v6788_v28 = vmul.f32 0.70710677, %v6757_v51  ;;  %v9700_v30 = vld [vmem:[#allocation44_spill] sm:$0xff] }
 0x21c   :  { %v4882_v56 = vclamps-f32 %v1351_v9, 1.0  ;;  %v1858_v18 = vmul.f32 %v6760_v16, %v6711_v10  ;;  %v1931_v48 = vmul.f32 %v1930_v19, %v6673_v25  ;;  %v1969_v3 = vmul.f32 %v1968_v52, %v6733_v12 }
 0x21d   :  { %v1408_v29 = vadd.f32 0.001143296, %v1407_v61  ;;  %v6794_v27 = vmin.f32 %v1994_v13, 16.0  ;;  %v1378_v62 = vmul.f32 %v6776_v53, %v6719_v21  ;;  %v6798_v31 = vadd.f32 1.0, %v1455_v57 }
 0x21e   :  { %v3445_v47 = vadd.f32 1.0, %v4882_v56  ;;  %v6801_v38 = vmul.f32 %v1790_v20, %v6569_v0  ;;  %v1845_v37 = vadd.f32 1.1283791, %v1844_v42  ;;  %v1868_v34 = vand.u32 2147483648, %v6711_v10 }
 0x21f   :  { %v1884_v5 = vmul.f32 %v1883_v8, %v6559_v14  ;;  %v1830_v11 = vsel %vm6747_vm2, %v1829_v50, %v1825_v35  ;;  %v3507_v60 = vmul.f32 %v3443_v33, %v9699_v63  ;;  %v2034_v24 = vmul.f32 %v6788_v28, %v6788_v28 }
 0x220   :  { %v3509_v49 = vmul.f32 %v3445_v47, %v9700_v30  ;;  %v1859_v19 = vsub.f32 1.0, %v1858_v18  ;;  %v1932_v52 = vadd.f32 0.112945676, %v1931_v48  ;;  %v1970_v61 = vadd.f32 0.014752088, %v1969_v3 }
 0x221   :  { %v1409_v0 = vmul.f32 %v1408_v29, %v9696_v54  ;;  %v6812_v15 = vpop.eup %5104  ;;  %v2007_v14 = vmul.f32 3.8918573e-05, %v6794_v27  ;;  %v1379_v13 = vsub.f32 1.0, %v1378_v62  ;;  %5106 = vrcp.f32 %v6798_v31 }
 0x222   :  { %v3567_v9 = vpack.c.bf16 %v3509_v49, %v3507_v60  ;;  %v6818_v50 = vmul.f32 %v1845_v37, %v6498_v45  ;;  %v1885_v57 = vadd.f32 1.1283791, %v1884_v5  ;;  %v1916_v20 = vmul.f32 2.1237322e-06, %v6673_v25 }
 0x223   :  { %v6822_v35 = vmul.f32 %v1830_v11, %v6699_v1  ;;  %vm1862_vm6 = vweird.f32 %v6711_v10  ;;  %v1866_v42 = vand.u32 2147483647, %v6711_v10  ;;  %v6826_v8 = vmin.f32 %v2034_v24, 16.0 }
 0x224   :  { %3829 = vmatmul.bf16.gmra.mxu1 %v3567_v9  ;;  %v1860_v56 = vmul.f32 %v6760_v16, %v1859_v19  ;;  %v1898_v33 = vmul.f32 %v6812_v15, %v6751_v44  ;;  %v1933_v45 = vmul.f32 %v1932_v52, %v6673_v25  ;;  %v1971_v18 = vmul.f32 %v1970_v61, %v6733_v12 }
 0x225   :  { %v6833_v48 = vor.u32 1.1754944e-38, %v1868_v34  ;;  %v2008_v1 = vadd.f32 0.001143296, %v2007_v14  ;;  %v1380_v3 = vmul.f32 %v6776_v53, %v1379_v13  ;;  %v1410_v29 = vadd.f32 0.014752088, %v1409_v0 }
 0x226   :  { %v6837_v47 = vmul.f32 %v1885_v57, %v6523_v4  ;;  %v1917_v37 = vadd.f32 0.00028619796, %v1916_v20  ;;  %v1956_v5 = vmul.f32 2.1237322e-06, %v6733_v12  ;;  %vm1863_vm7 = vweird.f32 %v6760_v16  ;;  %v9707_v57 = vld [vmem:[#allocation49_spill] sm:$0xff] }
 0x227   :  { %v6841_v11 = vpop.eup %5106  ;;  %v1908_v34 = vand.u32 2147483648, %v6751_v44  ;;  %v2047_v60 = vmul.f32 3.8918573e-05, %v6826_v8  ;;  %v1861_v30 = vadd.f32 %v6760_v16, %v1860_v56  ;;  %v1899_v49 = vsub.f32 1.0, %v1898_v33  ;;  %vm6860_vm9 = vmor %vm1862_vm6, %vm1863_vm7 }
 0x228   :  { %v1934_v4 = vadd.f32 0.4994258, %v1933_v45  ;;  %v1972_v24 = vadd.f32 0.112945676, %v1971_v18  ;;  %v2009_v19 = vmul.f32 %v2008_v1, %v6794_v27  ;;  %v1381_v52 = vadd.f32 %v6776_v53, %v1380_v3 }
 0x229   :  { %vm1383_vm8 = vweird.f32 %v6776_v53  ;;  %v1411_v61 = vmul.f32 %v1410_v29, %v9696_v54  ;;  %v1918_v0 = vmul.f32 %v1917_v37, %v6673_v25  ;;  %v1957_v9 = vadd.f32 0.00028619796, %v1956_v5 }
 0x22a   :  { %v1388_v14 = vand.u32 2147483648, %v6719_v21  ;;  %v1458_v13 = vmul.f32 %v6841_v11, %v6798_v31  ;;  %v1996_v20 = vmul.f32 2.1237322e-06, %v6794_v27  ;;  %v2048_v56 = vadd.f32 0.001143296, %v2047_v60 }
 0x22b   :  { %vm1382_vm10 = vweird.f32 %v6719_v21  ;;  %v1386_v33 = vand.u32 2147483647, %v6719_v21  ;;  %vm6867_vm11 = vcmp.eq.f32.partialorder %v1866_v42, 8.507059e+37  ;;  %vm1902_vm12 = vweird.f32 %v6751_v44 }
 0x22c   :  { %vm1903_vm13 = vweird.f32 %v6812_v15  ;;  %v1909_v10 = vor.u32 1.1754944e-38, %v1908_v34  ;;  %v1935_v18 = vmul.f32 %v1934_v4, %v6673_v25  ;;  %v1973_v1 = vmul.f32 %v1972_v24, %v6733_v12  ;;  %vm6877_vm14 = vmor %vm1382_vm10, %vm1383_vm8 }
 0x22d   :  { %v1865_v21 = vsel %vm6860_vm9, %v6760_v16, %v1861_v30  ;;  %v1900_v42 = vmul.f32 %v6812_v15, %v1899_v49  ;;  %v2010_v29 = vadd.f32 0.014752088, %v2009_v19  ;;  %v1385_v37 = vsel %vm6877_vm14, %v6776_v53, %v1381_v52  ;;  %vm6914_vm4 = vmor %vm1902_vm12, %vm1903_vm13 }
 0x22e   :  { %v1919_v5 = vadd.f32 0.0036580483, %v1918_v0  ;;  %v1958_v34 = vmul.f32 %v1957_v9, %v6733_v12  ;;  %v1389_v60 = vor.u32 1.1754944e-38, %v1388_v14  ;;  %v1459_v4 = vsub.f32 1.0, %v1458_v13 }
 0x22f   :  { %v1997_v24 = vadd.f32 0.00028619796, %v1996_v20  ;;  %v2049_v63 = vmul.f32 %v2048_v56, %v6826_v8  ;;  %vm1387_vm15 = vcmp.eq.f32.partialorder %v1386_v33, 8.507059e+37  ;;  %v1412_v43 = vadd.f32 0.112945676, %v1411_v61 }
 0x230   :  { %v6890_v62 = vadd.f32 1.0, %v1935_v18  ;;  %v1974_v16 = vadd.f32 0.4994258, %v1973_v1  ;;  %v1390_v30 = vsel %vm1387_vm15, %v1389_v60, %v1385_v37  ;;  %v1460_v49 = vmul.f32 %v6841_v11, %v1459_v4 }
 0x231   :  { %v1901_v19 = vadd.f32 %v6812_v15, %v1900_v42  ;;  %v2011_v53 = vmul.f32 %v2010_v29, %v6794_v27  ;;  %vm1463_vm1 = vweird.f32 %v6841_v11  ;;  %v1468_v52 = vand.u32 2147483648, %v6798_v31 }
 0x232   :  { %v1920_v0 = vmul.f32 %v1919_v5, %v6673_v25  ;;  %v1959_v9 = vadd.f32 0.0036580483, %v1958_v34  ;;  %v1461_v14 = vadd.f32 %v6841_v11, %v1460_v49  ;;  %v1466_v61 = vand.u32 2147483647, %v6798_v31 }
 0x233   :  { %v2050_v13 = vadd.f32 0.014752088, %v2049_v63  ;;  %v1391_v20 = vmul.f32 %v1390_v30, %v9707_v57  ;;  %vm1462_vm2 = vweird.f32 %v6798_v31  ;;  %v1413_v56 = vmul.f32 %v1412_v43, %v9696_v54 }
 0x234   :  { %5108 = vrcp.f32 %v6890_v62  ;;  %v1975_v33 = vmul.f32 %v1974_v16, %v6733_v12  ;;  %v1998_v18 = vmul.f32 %v1997_v24, %v6794_v27  ;;  %v2036_v1 = vmul.f32 2.1237322e-06, %v6826_v8  ;;  %vm1464_vm3 = vmor %vm1462_vm2, %vm1463_vm1  ;;  %v9710_v16 = vld [vmem:[#allocation51_spill] sm:$0xff] }
 0x235   :  { %v1870_v3 = vsel %vm6867_vm11, %v6833_v48, %v1865_v21  ;;  %v2012_v43 = vadd.f32 0.112945676, %v2011_v53  ;;  %v1465_v63 = vsel %vm1464_vm3, %v6841_v11, %v1461_v14  ;;  %v1469_v42 = vor.u32 1.1754944e-38, %v1468_v52 }
 0x236   :  { %v1905_v29 = vsel %vm6914_vm4, %v6812_v15, %v1901_v19  ;;  %v1921_v37 = vadd.f32 0.05243302, %v1920_v0  ;;  %v1960_v45 = vmul.f32 %v1959_v9, %v6733_v12  ;;  %vm1467_vm5 = vcmp.eq.f32.partialorder %v1466_v61, 8.507059e+37  ;;  %v9712_v19 = vld [vmem:[#allocation39_spill] sm:$0xff] }
 0x237   :  { %v2051_v48 = vmul.f32 %v2050_v13, %v6826_v8  ;;  %v4883_v21 = vclamps-f32 %v1391_v20, 1.0  ;;  %v1470_v5 = vsel %vm1467_vm5, %v1469_v42, %v1465_v63  ;;  %v1414_v34 = vadd.f32 0.4994258, %v1413_v56 }
 0x238   :  { %v6924_v60 = vadd.f32 1.0, %v1975_v33  ;;  %v1999_v4 = vadd.f32 0.0036580483, %v1998_v18  ;;  %v2037_v24 = vadd.f32 0.00028619796, %v2036_v1  ;;  %v1471_v11 = vmul.f32 %v1470_v5, %v9710_v16 }
 0x239   :  { %v9711_v30 = vand.u32 2147483647, %v6751_v44  ;;  %v2013_v15 = vmul.f32 %v2012_v43, %v6794_v27  ;;  %v1415_v49 = vmul.f32 %v1414_v34, %v9696_v54  ;;  %v1487_v53 = vmul.f32 3.8918573e-05, %v9712_v19 }
 0x23a   :  { %v6932_v52 = vpop.eup %5108  ;;  %v1871_v0 = vmul.f32 %v1870_v3, %v6818_v50  ;;  %v1922_v14 = vmul.f32 %v1921_v37, %v6673_v25  ;;  %v1961_v61 = vadd.f32 0.05243302, %v1960_v45  ;;  %v2052_v13 = vadd.f32 0.112945676, %v2051_v48  ;;  %v9715_v45 = vld [vmem:[#allocation45_spill] sm:$0xff] }
 0x23b   :  { %vm1907_vm6 = vcmp.eq.f32.partialorder %v9711_v30, 8.507059e+37  ;;  %v4885_v57 = vclamps-f32 %v1471_v11, 1.0  ;;  %v3446_v20 = vadd.f32 1.0, %v4883_v21  ;;  %v6936_v56 = vadd.f32 1.0, %v1415_v49  ;;  %v9716_v21 = vld [vmem:[#allocation47_spill] sm:$0xff] }
 0x23c   :  { %v1910_v9 = vsel %vm1907_vm6, %v1909_v10, %v1905_v29  ;;  %5110 = vrcp.f32 %v6924_v60  ;;  %v2000_v44 = vmul.f32 %v1999_v4, %v6794_v27  ;;  %v2038_v54 = vmul.f32 %v2037_v24, %v6826_v8 }
 0x23d   :  { %v1488_v33 = vadd.f32 0.001143296, %v1487_v53  ;;  %v1938_v18 = vmul.f32 %v6932_v52, %v6890_v62  ;;  %v2014_v50 = vadd.f32 0.4994258, %v2013_v15  ;;  %v3448_v10 = vadd.f32 1.0, %v4885_v57 }
 0x23e   :  { %5112 = vrcp.f32 %v6936_v56  ;;  %v9713_v1 = vclamps-f32 %v6801_v38, 1.0  ;;  %v9714_v31 = vclamps-f32 %v6822_v35, 1.0  ;;  %v4895_v63 = vclamps-f32 %v1871_v0, 1.0 }
 0x23f   :  { %v1911_v42 = vmul.f32 %v1910_v9, %v6837_v47  ;;  %v1923_v29 = vadd.f32 0.18741608, %v1922_v14  ;;  %v2053_v37 = vmul.f32 %v2052_v13, %v6826_v8  ;;  %v3510_v48 = vmul.f32 %v3446_v20, %v9715_v45 }
 0x240   :  { %v3456_v3 = vadd.f32 1.0, %v9713_v1  ;;  %v3457_v43 = vadd.f32 1.0, %v9714_v31  ;;  %v3512_v5 = vmul.f32 %v3448_v10, %v9716_v21  ;;  %v770_v34 = vmul.f32 0.5, %v6477_v39 }
 0x241   :  { %v1962_v4 = vmul.f32 %v1961_v61, %v6733_v12  ;;  %v2001_v24 = vadd.f32 0.05243302, %v2000_v44  ;;  %v1489_v38 = vmul.f32 %v1488_v33, %v9712_v19  ;;  %v1939_v16 = vsub.f32 1.0, %v1938_v18 }
 0x242   :  { %v2015_v35 = vmul.f32 %v2014_v50, %v6794_v27  ;;  %v2039_v11 = vadd.f32 0.0036580483, %v2038_v54  ;;  %v3568_v30 = vpack.c.bf16 %v3512_v5, %v3510_v48  ;;  %v6956_v47 = vpop.eup %5110  ;;  %v3458_v15 = vadd.f32 1.0, %v4895_v63 }
 0x243   :  { %v771_v49 = vmul.f32 0.5, %v6511_v58  ;;  %v4896_v53 = vclamps-f32 %v1911_v42, 1.0  ;;  %v1490_v0 = vadd.f32 0.014752088, %v1489_v38  ;;  %v6962_v39 = vmul.f32 %v3456_v3, %v6557_v41  ;;  %v288_v38 = vpop.f32.mrf.mxu0 }
 0x244   :  { %v6959_v9 = vpop.eup %5112  ;;  %v6965_v14 = vmul.f32 %v3457_v43, %v6572_v46  ;;  %v1924_v61 = vmul.f32 %v1923_v29, %v6673_v25  ;;  %v2054_v13 = vadd.f32 0.4994258, %v2053_v37  ;;  %3745 = vmatmul.bf16.gmra.mxu0 %v3568_v30  ;;  %v1963_v57 = vadd.f32 0.18741608, %v1962_v4 }
 0x245   :  { %v2002_v20 = vmul.f32 %v2001_v24, %v6794_v27  ;;  %v1418_v58 = vmul.f32 %v6959_v9, %v6936_v56  ;;  %v1491_v44 = vmul.f32 %v1490_v0, %v9712_v19  ;;  %v1940_v54 = vmul.f32 %v6932_v52, %v1939_v16 }
 0x246   :  { %v1978_v41 = vmul.f32 %v6956_v47, %v6924_v60  ;;  %v6975_v33 = vadd.f32 1.0, %v2015_v35  ;;  %v2040_v46 = vmul.f32 %v2039_v11, %v6826_v8  ;;  %v6978_v25 = vmul.f32 %v3458_v15, %v770_v34  ;;  %v614_v35 = vpop.f32.mrf.mxu2 }
 0x247   :  { %v3459_v18 = vadd.f32 1.0, %v4896_v53  ;;  %v1419_v50 = vsub.f32 1.0, %v1418_v58  ;;  %v1492_v10 = vadd.f32 0.112945676, %v1491_v44  ;;  %v1925_v1 = vadd.f32 1.1283791, %v1924_v61 }
 0x248   :  { %v1946_v3 = vand.u32 2147483647, %v6890_v62  ;;  %v1948_v31 = vand.u32 2147483648, %v6890_v62  ;;  %v2055_v43 = vmul.f32 %v2054_v13, %v6826_v8  ;;  %vm1943_vm7 = vweird.f32 %v6932_v52 }
 0x249   :  { %v1964_v63 = vmul.f32 %v1963_v57, %v6733_v12  ;;  %v2003_v42 = vadd.f32 0.18741608, %v2002_v20  ;;  %v1493_v29 = vmul.f32 %v1492_v10, %v9712_v19  ;;  %v1941_v37 = vadd.f32 %v6932_v52, %v1940_v54 }
 0x24a   :  { %v1979_v45 = vsub.f32 1.0, %v1978_v41  ;;  %5114 = vrcp.f32 %v6975_v33  ;;  %v2041_v48 = vadd.f32 0.05243302, %v2040_v46  ;;  %v6988_v21 = vmul.f32 %v3459_v18, %v771_v49 }
 0x24b   :  { %v6991_v5 = vmul.f32 0.5, %v6645_v26  ;;  %v1420_v34 = vmul.f32 %v6959_v9, %v1419_v50  ;;  %v1494_v4 = vadd.f32 0.4994258, %v1493_v29  ;;  %v1926_v24 = vmul.f32 %v1925_v1, %v6653_v32 }
 0x24c   :  { %vm1942_vm8 = vweird.f32 %v6890_v62  ;;  %vm6996_vm9 = vcmp.eq.f32.partialorder %v1946_v3, 8.507059e+37  ;;  %v7000_v16 = vadd.f32 1.0, %v2055_v43  ;;  %v1949_v11 = vor.u32 1.1754944e-38, %v1948_v31 }
 0x24d   :  { %vm7004_vm10 = vmor %vm1942_vm8, %vm1943_vm7  ;;  %v1965_v30 = vadd.f32 1.1283791, %v1964_v63  ;;  %v1495_v32 = vmul.f32 %v1494_v4, %v9712_v19  ;;  %v7009_v15 = vadd.f32 %v614_v35, %v288_v38  ;;  %v1980_v49 = vmul.f32 %v6956_v47, %v1979_v45 }
 0x24e   :  { %v1945_v62 = vsel %vm7004_vm10, %v6932_v52, %v1941_v37  ;;  %v2004_v53 = vmul.f32 %v2003_v42, %v6794_v27  ;;  %v2042_v0 = vmul.f32 %v2041_v48, %v6826_v8  ;;  %v1421_v61 = vadd.f32 %v6959_v9, %v1420_v34  ;;  %v703_v37 = vpop.f32.mrf.mxu3 }
 0x24f   :  { %vm1423_vm11 = vweird.f32 %v6959_v9  ;;  %v7019_v13 = vadd.f32 1.0, %v1495_v32  ;;  %v7022_v19 = vmul.f32 0.70710677, %v7009_v15  ;;  %v1986_v20 = vand.u32 2147483647, %v6924_v60 }
 0x250   :  { %v7024_v57 = vpop.eup %5114  ;;  %v1988_v52 = vand.u32 2147483648, %v6924_v60  ;;  %5116 = vrcp.f32 %v7000_v16  ;;  %v1428_v27 = vand.u32 2147483648, %v6936_v56  ;;  %v1950_v58 = vsel %vm6996_vm9, %v1949_v11, %v1945_v62 }
 0x251   :  { %vm1422_vm12 = vweird.f32 %v6936_v56  ;;  %v1426_v44 = vand.u32 2147483647, %v6936_v56  ;;  %5118 = vrcp.f32 %v7019_v13  ;;  %v1981_v54 = vadd.f32 %v6956_v47, %v1980_v49  ;;  %v9727_v49 = vld [vmem:[#allocation50_spill] sm:$0xff] }
 0x252   :  { %vm1982_vm13 = vweird.f32 %v6924_v60  ;;  %vm1983_vm14 = vweird.f32 %v6956_v47  ;;  %vm7040_vm15 = vmor %vm1422_vm12, %vm1423_vm11  ;;  %v2074_v46 = vmul.f32 %v7022_v19, %v7022_v19  ;;  %v2005_v18 = vadd.f32 1.1283791, %v2004_v53 }
 0x253   :  { %v2018_v56 = vmul.f32 %v7024_v57, %v6975_v33  ;;  %v2043_v50 = vadd.f32 0.18741608, %v2042_v0  ;;  %v1425_v60 = vsel %vm7040_vm15, %v6959_v9, %v1421_v61  ;;  %v7051_v10 = vmul.f32 %v1950_v58, %v1926_v24  ;;  %vm7059_vm1 = vmor %vm1982_vm13, %vm1983_vm14  ;;  %v377_v9 = vpop.f32.mrf.mxu1 }
 0x254   :  { %v2028_v1 = vand.u32 2147483648, %v6975_v33  ;;  %v1429_v3 = vor.u32 1.1754944e-38, %v1428_v27  ;;  %v7054_v31 = vmin.f32 %v2074_v46, 16.0  ;;  %v7057_v43 = vmul.f32 %v1965_v30, %v6702_v7 }
 0x255   :  { %vm7063_vm2 = vcmp.eq.f32.partialorder %v1986_v20, 8.507059e+37  ;;  %v1989_v29 = vor.u32 1.1754944e-38, %v1988_v52  ;;  %vm1427_vm3 = vcmp.eq.f32.partialorder %v1426_v44, 8.507059e+37  ;;  %v1985_v48 = vsel %vm7059_vm1, %v6956_v47, %v1981_v54 }
 0x256   :  { %v7067_v45 = vpop.eup %5116  ;;  %v1430_v7 = vsel %vm1427_vm3, %v1429_v3, %v1425_v60  ;;  %v2087_v34 = vmul.f32 3.8918573e-05, %v7054_v31  ;;  %v7073_v4 = vadd.f32 %v703_v37, %v377_v9  ;;  %v7076_v12 = vmul.f32 %v2005_v18, %v6755_v59  ;;  %v617_v60 = vpop.f32.mrf.mxu2 }
 0x257   :  { %v5119_v24 = vpop.eup %5118  ;;  %v2019_v38 = vsub.f32 1.0, %v2018_v56  ;;  %v2026_v35 = vand.u32 2147483647, %v6975_v33  ;;  %v7080_v26 = vmul.f32 %v2043_v50, %v6826_v8  ;;  %v4897_v11 = vclamps-f32 %v7051_v10, 1.0 }
 0x258   :  { %v7083_v30 = vor.u32 1.1754944e-38, %v2028_v1  ;;  %v1498_v47 = vmul.f32 %v5119_v24, %v7019_v13  ;;  %v2088_v32 = vadd.f32 0.001143296, %v2087_v34  ;;  %v7088_v62 = vsel %vm7063_vm2, %v1989_v29, %v1985_v48  ;;  %v706_v1 = vpop.f32.mrf.mxu3  ;;  %v9728_v29 = vld [vmem:[#allocation2_spill] sm:$0xff]  ;;  %v9729_v48 = vld [vmem:[#allocation3_spill] sm:$0xff] }
 0x259   :  { %v2058_v59 = vmul.f32 %v7067_v45, %v7000_v16  ;;  %v1431_v53 = vmul.f32 %v1430_v7, %v9727_v49  ;;  %v7094_v0 = vmul.f32 0.70710677, %v7073_v4  ;;  %vm2022_vm4 = vweird.f32 %v6975_v33 }
 0x25a   :  { %vm2023_vm5 = vweird.f32 %v7024_v57  ;;  %v1499_v8 = vsub.f32 1.0, %v1498_v47  ;;  %v1508_v61 = vand.u32 2147483648, %v7019_v13  ;;  %v2089_v20 = vmul.f32 %v2088_v32, %v7054_v31 }
 0x25b   :  { %v2020_v52 = vmul.f32 %v7024_v57, %v2019_v38  ;;  %v2076_v27 = vmul.f32 2.1237322e-06, %v7054_v31  ;;  %v2114_v58 = vmul.f32 %v7094_v0, %v7094_v0  ;;  %v3570_v44 = vpack.c.bf16 %v6537_v36, %v6526_v22  ;;  %vm7134_vm11 = vmor %vm2022_vm4, %vm2023_vm5 }
 0x25c   :  { %v1500_v54 = vmul.f32 %v5119_v24, %v1499_v8  ;;  %vm1503_vm6 = vweird.f32 %v5119_v24  ;;  %v1506_v41 = vand.u32 2147483647, %v7019_v13  ;;  %v2090_v46 = vadd.f32 0.014752088, %v2089_v20 }
 0x25d   :  { %v2059_v18 = vsub.f32 1.0, %v2058_v59  ;;  %v4884_v56 = vclamps-f32 %v1431_v53, 1.0  ;;  %vm1502_vm7 = vweird.f32 %v7019_v13  ;;  %v7108_v50 = vmin.f32 %v2114_v58, 16.0  ;;  %3750 = vmatmul.bf16.gmra.mxu0 %v3570_v44 }
 0x25e   :  { %v1501_v3 = vadd.f32 %v5119_v24, %v1500_v54  ;;  %v1509_v63 = vor.u32 1.1754944e-38, %v1508_v61  ;;  %v2091_v42 = vmul.f32 %v2090_v46, %v7054_v31  ;;  %v7112_v22 = vadd.f32 %v617_v60, %v9728_v29  ;;  %vm1504_vm8 = vmor %vm1502_vm7, %vm1503_vm6  ;;  %v9732_v61 = vld [vmem:[#allocation52_spill] sm:$0xff] }
 0x25f   :  { %v2077_v36 = vadd.f32 0.00028619796, %v2076_v27  ;;  %v2116_v9 = vmul.f32 2.1237322e-06, %v7108_v50  ;;  %v2127_v37 = vmul.f32 3.8918573e-05, %v7108_v50  ;;  %v7117_v13 = vadd.f32 %v706_v1, %v9729_v48 }
 0x260   :  { %v2021_v7 = vadd.f32 %v7024_v57, %v2020_v52  ;;  %v1505_v34 = vsel %vm1504_vm8, %v5119_v24, %v1501_v3  ;;  %vm1507_vm9 = vcmp.eq.f32.partialorder %v1506_v41, 8.507059e+37  ;;  %v2092_v38 = vadd.f32 0.112945676, %v2091_v42  ;;  %v619_v24 = vpop.f32.mrf.mxu2 }
 0x261   :  { %vm7120_vm10 = vcmp.eq.f32.partialorder %v2026_v35, 8.507059e+37  ;;  %v1510_v32 = vsel %vm1507_vm9, %v1509_v63, %v1505_v34  ;;  %v2117_v59 = vadd.f32 0.00028619796, %v2116_v9  ;;  %v2128_v49 = vadd.f32 0.001143296, %v2127_v37 }
 0x262   :  { %v7125_v53 = vmul.f32 0.70710677, %v7112_v22  ;;  %v2060_v8 = vmul.f32 %v7067_v45, %v2059_v18  ;;  %v1511_v20 = vmul.f32 %v1510_v32, %v9732_v61  ;;  %v3447_v27 = vadd.f32 1.0, %v4884_v56 }
 0x263   :  { %v2093_v52 = vmul.f32 %v2092_v38, %v7054_v31  ;;  %v2078_v35 = vmul.f32 %v2077_v36, %v7054_v31  ;;  %v2129_v58 = vmul.f32 %v2128_v49, %v7108_v50  ;;  %v7143_v54 = vmul.f32 0.70710677, %v7117_v13 }
 0x264   :  { %v2154_v44 = vmul.f32 %v7125_v53, %v7125_v53  ;;  %v2025_v41 = vsel %vm7134_vm11, %v7024_v57, %v2021_v7  ;;  %v2068_v33 = vand.u32 2147483648, %v7000_v16  ;;  %v4886_v46 = vclamps-f32 %v1511_v20, 1.0  ;;  %v9735_v57 = vld [vmem:[#allocation46_spill] sm:$0xff]  ;;  %v9736_v7 = vld [vmem:[#allocation48_spill] sm:$0xff] }
 0x265   :  { %v2094_v18 = vadd.f32 0.4994258, %v2093_v52  ;;  %v2118_v56 = vmul.f32 %v2117_v59, %v7108_v50  ;;  %v2130_v60 = vadd.f32 0.014752088, %v2129_v58  ;;  %v2194_v3 = vmul.f32 %v7143_v54, %v7143_v54 }
 0x266   :  { %v7150_v1 = vmin.f32 %v2154_v44, 16.0  ;;  %v2061_v63 = vadd.f32 %v7067_v45, %v2060_v8  ;;  %vm2063_vm12 = vweird.f32 %v7067_v45  ;;  %v3449_v42 = vadd.f32 1.0, %v4886_v46 }
 0x267   :  { %v2095_v29 = vmul.f32 %v2094_v18, %v7054_v31  ;;  %v3511_v36 = vmul.f32 %v3447_v27, %v9735_v57  ;;  %v2079_v9 = vadd.f32 0.0036580483, %v2078_v35  ;;  %v2131_v37 = vmul.f32 %v2130_v60, %v7108_v50 }
 0x268   :  { %v2156_v48 = vmul.f32 2.1237322e-06, %v7150_v1  ;;  %v3513_v34 = vmul.f32 %v3449_v42, %v9736_v7  ;;  %v2167_v32 = vmul.f32 3.8918573e-05, %v7150_v1  ;;  %v7164_v59 = vmin.f32 %v2194_v3, 16.0 }
 0x269   :  { %v7161_v38 = vadd.f32 1.0, %v2095_v29  ;;  %v2045_v49 = vadd.f32 1.1283791, %v7080_v26  ;;  %vm2062_vm13 = vweird.f32 %v7000_v16  ;;  %v2119_v8 = vadd.f32 0.0036580483, %v2118_v56  ;;  %v9739_v56 = vld [vmem:[#allocation4_spill] sm:$0xff] }
 0x26a   :  { %v2132_v61 = vadd.f32 0.112945676, %v2131_v37  ;;  %v2030_v20 = vsel %vm7120_vm10, %v7083_v30, %v2025_v41  ;;  %v2066_v27 = vand.u32 2147483647, %v7000_v16  ;;  %v3569_v52 = vpack.c.bf16 %v3513_v34, %v3511_v36  ;;  %vm7177_vm14 = vmor %vm2062_vm13, %vm2063_vm12 }
 0x26b   :  { %5120 = vrcp.f32 %v7161_v38  ;;  %v1991_v35 = vmul.f32 %v7088_v62, %v7057_v43  ;;  %v2080_v58 = vmul.f32 %v2079_v9, %v7054_v31  ;;  %v2157_v30 = vadd.f32 0.00028619796, %v2156_v48 }
 0x26c   :  { %v2133_v47 = vmul.f32 %v2132_v61, %v7108_v50  ;;  %v2065_v16 = vsel %vm7177_vm14, %v7067_v45, %v2061_v63  ;;  %v2069_v44 = vor.u32 1.1754944e-38, %v2068_v33  ;;  %3834 = vmatmul.bf16.gmra.mxu1 %v3569_v52  ;;  %v2168_v41 = vadd.f32 0.001143296, %v2167_v32 }
 0x26d   :  { %v2207_v43 = vmul.f32 3.8918573e-05, %v7164_v59  ;;  %v2031_v62 = vmul.f32 %v2030_v20, %v7076_v12  ;;  %v2120_v46 = vmul.f32 %v2119_v8, %v7108_v50  ;;  %v7190_v60 = vadd.f32 %v619_v24, %v9739_v56 }
 0x26e   :  { %v2134_v18 = vadd.f32 0.4994258, %v2133_v47  ;;  %v2046_v3 = vmul.f32 %v2045_v49, %v6788_v28  ;;  %vm2067_vm15 = vcmp.eq.f32.partialorder %v2066_v27, 8.507059e+37  ;;  %v2169_v42 = vmul.f32 %v2168_v41, %v7150_v1  ;;  %v708_v41 = vpop.f32.mrf.mxu3 }
 0x26f   :  { %v2208_v29 = vadd.f32 0.001143296, %v2207_v43  ;;  %v2070_v45 = vsel %vm2067_vm15, %v2069_v44, %v2065_v16  ;;  %v2081_v33 = vadd.f32 0.05243302, %v2080_v58  ;;  %v2158_v57 = vmul.f32 %v2157_v30, %v7150_v1 }
 0x270   :  { %v2135_v63 = vmul.f32 %v2134_v18, %v7108_v50  ;;  %v4898_v12 = vclamps-f32 %v1991_v35, 1.0  ;;  %v2170_v9 = vadd.f32 0.014752088, %v2169_v42  ;;  %v2196_v37 = vmul.f32 2.1237322e-06, %v7164_v59 }
 0x271   :  { %v7196_v36 = vpop.eup %5120  ;;  %v2209_v48 = vmul.f32 %v2208_v29, %v7164_v59  ;;  %v4899_v7 = vclamps-f32 %v2031_v62, 1.0  ;;  %v2121_v28 = vadd.f32 0.05243302, %v2120_v46  ;;  %v7203_v32 = vmul.f32 0.70710677, %v7190_v60 }
 0x272   :  { %v7200_v34 = vadd.f32 1.0, %v2135_v63  ;;  %v2071_v49 = vmul.f32 %v2070_v45, %v2046_v3  ;;  %v2098_v8 = vmul.f32 %v7196_v36, %v7161_v38  ;;  %v2171_v61 = vmul.f32 %v2170_v9, %v7150_v1  ;;  %v9740_v45 = vld [vmem:[#allocation5_spill] sm:$0xff] }
 0x273   :  { %v2210_v20 = vadd.f32 0.014752088, %v2209_v48  ;;  %v773_v27 = vmul.f32 0.5, %v6683_v17  ;;  %v774_v52 = vmul.f32 0.5, %v6742_v23  ;;  %v2082_v24 = vmul.f32 %v2081_v33, %v7054_v31 }
 0x274   :  { %v2159_v35 = vadd.f32 0.0036580483, %v2158_v57  ;;  %v3460_v26 = vadd.f32 1.0, %v4897_v11  ;;  %v3461_v58 = vadd.f32 1.0, %v4898_v12  ;;  %v2172_v47 = vadd.f32 0.112945676, %v2171_v61 }
 0x275   :  { %v2197_v30 = vadd.f32 0.00028619796, %v2196_v37  ;;  %v2122_v16 = vmul.f32 %v2121_v28, %v7108_v50  ;;  %5122 = vrcp.f32 %v7200_v34  ;;  %v2211_v44 = vmul.f32 %v2210_v20, %v7164_v59 }
 0x276   :  { %v2234_v17 = vmul.f32 %v7203_v32, %v7203_v32  ;;  %v3462_v23 = vadd.f32 1.0, %v4899_v7  ;;  %v4900_v43 = vclamps-f32 %v2071_v49, 1.0  ;;  %v2099_v62 = vsub.f32 1.0, %v2098_v8 }
 0x277   :  { %v2173_v46 = vmul.f32 %v2172_v47, %v7150_v1  ;;  %v2083_v10 = vadd.f32 0.18741608, %v2082_v24  ;;  %v2160_v11 = vmul.f32 %v2159_v35, %v7150_v1  ;;  %v2212_v18 = vadd.f32 0.112945676, %v2211_v44 }
 0x278   :  { %v3571_v56 = vpack.c.bf16 %v6540_v6, %v6529_v55  ;;  %v2198_v42 = vmul.f32 %v2197_v30, %v7164_v59  ;;  %v7223_v29 = vmin.f32 %v2234_v17, 16.0  ;;  %v7226_v33 = vadd.f32 %v708_v41, %v9740_v45 }
 0x279   :  { %v2174_v3 = vadd.f32 0.4994258, %v2173_v46  ;;  %v7229_v63 = vmul.f32 %v3460_v26, %v6991_v5  ;;  %v775_v57 = vmul.f32 0.5, %v6757_v51  ;;  %v2123_v12 = vadd.f32 0.18741608, %v2122_v16 }
 0x27a   :  { %v2213_v9 = vmul.f32 %v2212_v18, %v7164_v59  ;;  %v7233_v37 = vmul.f32 %v3461_v58, %v773_v27  ;;  %v7235_v48 = vmul.f32 %v3462_v23, %v774_v52  ;;  %v7238_v55 = vmul.f32 0.5, %v7009_v15  ;;  %v622_v18 = vpop.f32.mrf.mxu2 }
 0x27b   :  { %v2100_v6 = vmul.f32 %v7196_v36, %v2099_v62  ;;  %v7241_v7 = vpop.eup %5122  ;;  %v3463_v28 = vadd.f32 1.0, %v4900_v43  ;;  %v2161_v49 = vadd.f32 0.05243302, %v2160_v11  ;;  %v2175_v5 = vmul.f32 %v2174_v3, %v7150_v1 }
 0x27c   :  { %v2214_v8 = vadd.f32 0.4994258, %v2213_v9  ;;  %v2084_v51 = vmul.f32 %v2083_v10, %v7054_v31  ;;  %v2199_v61 = vadd.f32 0.0036580483, %v2198_v42  ;;  %3839 = vmatmul.bf16.gmra.mxu1 %v3571_v56  ;;  %v2247_v20 = vmul.f32 3.8918573e-05, %v7223_v29 }
 0x27d   :  { %v7247_v27 = vmul.f32 0.70710677, %v7226_v33  ;;  %v2124_v15 = vmul.f32 %v2123_v12, %v7108_v50  ;;  %v7250_v52 = vadd.f32 1.0, %v2175_v5  ;;  %v2236_v35 = vmul.f32 2.1237322e-06, %v7223_v29 }
 0x27e   :  { %v2215_v24 = vmul.f32 %v2214_v8, %v7164_v59  ;;  %v2101_v26 = vadd.f32 %v7196_v36, %v2100_v6  ;;  %vm2103_vm1 = vweird.f32 %v7196_v36  ;;  %v2138_v31 = vmul.f32 %v7241_v7, %v7200_v34 }
 0x27f   :  { %v2248_v58 = vadd.f32 0.001143296, %v2247_v20  ;;  %v7258_v47 = vmul.f32 %v3463_v28, %v775_v57  ;;  %v2108_v30 = vand.u32 2147483648, %v7161_v38  ;;  %v7262_v50 = vmul.f32 0.5, %v7073_v4  ;;  %v9743_v28 = vld [vmem:[#allocation6_spill] sm:$0xff] }
 0x280   :  { %v2162_v16 = vmul.f32 %v2161_v49, %v7150_v1  ;;  %vm2102_vm2 = vweird.f32 %v7161_v38  ;;  %v2106_v44 = vand.u32 2147483647, %v7161_v38  ;;  %v2200_v17 = vmul.f32 %v2199_v61, %v7164_v59 }
 0x281   :  { %v2274_v41 = vmul.f32 %v7247_v27, %v7247_v27  ;;  %vm7270_vm3 = vmor %vm2102_vm2, %vm2103_vm1  ;;  %5124 = vrcp.f32 %v7250_v52  ;;  %v7275_v43 = vadd.f32 1.0, %v2215_v24  ;;  %v2237_v4 = vadd.f32 0.00028619796, %v2236_v35 }
 0x282   :  { %v2249_v62 = vmul.f32 %v2248_v58, %v7223_v29  ;;  %v2085_v46 = vadd.f32 1.1283791, %v2084_v51  ;;  %v2105_v38 = vsel %vm7270_vm3, %v7196_v36, %v2101_v26  ;;  %v2125_v10 = vadd.f32 1.1283791, %v2124_v15 }
 0x283   :  { %v2139_v11 = vsub.f32 1.0, %v2138_v31  ;;  %v2109_v56 = vor.u32 1.1754944e-38, %v2108_v30  ;;  %v7282_v3 = vmul.f32 0.5, %v7112_v22  ;;  %v2163_v42 = vadd.f32 0.18741608, %v2162_v16 }
 0x284   :  { %v7285_v45 = vmul.f32 0.5, %v7117_v13  ;;  %vm2107_vm4 = vcmp.eq.f32.partialorder %v2106_v44, 8.507059e+37  ;;  %v2201_v57 = vadd.f32 0.05243302, %v2200_v17  ;;  %v2250_v12 = vadd.f32 0.014752088, %v2249_v62 }
 0x285   :  { %v7287_v9 = vmin.f32 %v2274_v41, 16.0  ;;  %v2110_v6 = vsel %vm2107_vm4, %v2109_v56, %v2105_v38  ;;  %5126 = vrcp.f32 %v7275_v43  ;;  %v2238_v36 = vmul.f32 %v2237_v4, %v7223_v29 }
 0x286   :  { %v7292_v49 = vadd.f32 %v622_v18, %v9743_v28  ;;  %v2086_v22 = vmul.f32 %v2085_v46, %v7022_v19  ;;  %v2126_v5 = vmul.f32 %v2125_v10, %v7094_v0  ;;  %v2140_v13 = vmul.f32 %v7241_v7, %v2139_v11  ;;  %v711_v11 = vpop.f32.mrf.mxu3 }
 0x287   :  { %v7298_v8 = vmul.f32 0.5, %v7190_v60  ;;  %v7300_v51 = vpop.eup %5124  ;;  %v2146_v61 = vand.u32 2147483647, %v7200_v34  ;;  %v2164_v20 = vmul.f32 %v2163_v42, %v7150_v1  ;;  %v2251_v15 = vmul.f32 %v2250_v12, %v7223_v29 }
 0x288   :  { %v2287_v24 = vmul.f32 3.8918573e-05, %v7287_v9  ;;  %v2111_v35 = vmul.f32 %v2110_v6, %v2086_v22  ;;  %v2148_v19 = vand.u32 2147483648, %v7200_v34  ;;  %v2202_v0 = vmul.f32 %v2201_v57, %v7164_v59 }
 0x289   :  { %v7309_v26 = vmul.f32 0.70710677, %v7292_v49  ;;  %vm2142_vm5 = vweird.f32 %v7200_v34  ;;  %v2239_v60 = vadd.f32 0.0036580483, %v2238_v36  ;;  %v2252_v31 = vadd.f32 0.112945676, %v2251_v15 }
 0x28a   :  { %v2276_v58 = vmul.f32 2.1237322e-06, %v7287_v9  ;;  %v2141_v1 = vadd.f32 %v7241_v7, %v2140_v13  ;;  %vm2143_vm6 = vweird.f32 %v7241_v7  ;;  %v2178_v30 = vmul.f32 %v7300_v51, %v7250_v52 }
 0x28b   :  { %v2288_v16 = vadd.f32 0.001143296, %v2287_v24  ;;  %v7317_v44 = vpop.eup %5126  ;;  %vm7319_vm7 = vcmp.eq.f32.partialorder %v2146_v61, 8.507059e+37  ;;  %v2165_v41 = vadd.f32 1.1283791, %v2164_v20  ;;  %v2253_v23 = vmul.f32 %v2252_v31, %v7223_v29  ;;  %vm7329_vm8 = vmor %vm2142_vm5, %vm2143_vm6  ;;  %v9748_v20 = vld [vmem:[#allocation7_spill] sm:$0xff] }
 0x28c   :  { %v2314_v4 = vmul.f32 %v7309_v26, %v7309_v26  ;;  %v4901_v62 = vclamps-f32 %v2111_v35, 1.0  ;;  %v2149_v46 = vor.u32 1.1754944e-38, %v2148_v19  ;;  %v2203_v38 = vadd.f32 0.18741608, %v2202_v0 }
 0x28d   :  { %v2289_v10 = vmul.f32 %v2288_v16, %v7287_v9  ;;  %v2240_v56 = vmul.f32 %v2239_v60, %v7223_v29  ;;  %v2254_v42 = vadd.f32 0.4994258, %v2253_v23  ;;  %v2277_v57 = vadd.f32 0.00028619796, %v2276_v58 }
 0x28e   :  { %v7334_v12 = vmin.f32 %v2314_v4, 16.0  ;;  %v2145_v6 = vsel %vm7329_vm8, %v7241_v7, %v2141_v1  ;;  %v2179_v36 = vsub.f32 1.0, %v2178_v30  ;;  %v2218_v28 = vmul.f32 %v7317_v44, %v7275_v43 }
 0x28f   :  { %v2290_v22 = vadd.f32 0.014752088, %v2289_v10  ;;  %v7342_v34 = vmul.f32 %v2165_v41, %v7125_v53  ;;  %v2255_v13 = vmul.f32 %v2254_v42, %v7223_v29  ;;  %v7346_v61 = vmul.f32 0.5, %v7226_v33 }
 0x290   :  { %v7349_v15 = vadd.f32 %v711_v11, %v9748_v20  ;;  %v3464_v24 = vadd.f32 1.0, %v4901_v62  ;;  %v2204_v35 = vmul.f32 %v2203_v38, %v7164_v59  ;;  %v2316_v19 = vmul.f32 2.1237322e-06, %v7334_v12 }
 0x291   :  { %v2291_v7 = vmul.f32 %v2290_v22, %v7287_v9  ;;  %v2150_v0 = vsel %vm7319_vm7, %v2149_v46, %v2145_v6  ;;  %v2241_v53 = vadd.f32 0.05243302, %v2240_v56  ;;  %v2278_v60 = vmul.f32 %v2277_v57, %v7287_v9 }
 0x292   :  { %v2327_v31 = vmul.f32 3.8918573e-05, %v7334_v12  ;;  %v2180_v33 = vmul.f32 %v7300_v51, %v2179_v36  ;;  %v2219_v58 = vsub.f32 1.0, %v2218_v28  ;;  %v7359_v1 = vadd.f32 1.0, %v2255_v13 }
 0x293   :  { %v2292_v30 = vadd.f32 0.112945676, %v2291_v7  ;;  %vm2182_vm9 = vweird.f32 %v7250_v52  ;;  %v2186_v59 = vand.u32 2147483647, %v7250_v52  ;;  %v2317_v16 = vadd.f32 0.00028619796, %v2316_v19 }
 0x294   :  { %v7364_v41 = vmul.f32 0.70710677, %v7349_v15  ;;  %v2151_v17 = vmul.f32 %v2150_v0, %v2126_v5  ;;  %v2188_v23 = vand.u32 2147483648, %v7250_v52  ;;  %v2205_v4 = vadd.f32 1.1283791, %v2204_v35 }
 0x295   :  { %v2293_v62 = vmul.f32 %v2292_v30, %v7287_v9  ;;  %vm2183_vm10 = vweird.f32 %v7300_v51  ;;  %v2242_v46 = vmul.f32 %v2241_v53, %v7223_v29  ;;  %v2279_v38 = vadd.f32 0.0036580483, %v2278_v60  ;;  %v624_v53 = vpop.f32.mrf.mxu2 }
 0x296   :  { %v2328_v10 = vadd.f32 0.001143296, %v2327_v31  ;;  %v2181_v11 = vadd.f32 %v7300_v51, %v2180_v33  ;;  %v2220_v18 = vmul.f32 %v7317_v44, %v2219_v58  ;;  %5128 = vrcp.f32 %v7359_v1  ;;  %vm7389_vm11 = vmor %vm2182_vm9, %vm2183_vm10 }
 0x297   :  { %v2294_v56 = vadd.f32 0.4994258, %v2293_v62  ;;  %v7374_v5 = vmul.f32 %v3464_v24, %v7238_v55  ;;  %v2318_v42 = vmul.f32 %v2317_v16, %v7334_v12  ;;  %v2354_v6 = vmul.f32 %v7364_v41, %v7364_v41 }
 0x298   :  { %v2329_v57 = vmul.f32 %v2328_v10, %v7334_v12  ;;  %v4902_v36 = vclamps-f32 %v2151_v17, 1.0  ;;  %v3572_v22 = vpack.c.bf16 %v6962_v39, %v6543_v40  ;;  %v3573_v13 = vpack.c.bf16 %v6965_v14, %v6563_v2 }
 0x299   :  { %v2295_v28 = vmul.f32 %v2294_v56, %v7287_v9  ;;  %v2243_v20 = vadd.f32 0.18741608, %v2242_v46  ;;  %v2280_v24 = vmul.f32 %v2279_v38, %v7287_v9  ;;  %v7394_v7 = vmin.f32 %v2354_v6, 16.0  ;;  %v9755_v38 = vld [vmem:[#allocation8_spill] sm:$0xff] }
 0x29a   :  { %v2330_v35 = vadd.f32 0.014752088, %v2329_v57  ;;  %v2185_v40 = vsel %vm7389_vm11, %v7300_v51, %v2181_v11  ;;  %vm7399_vm12 = vcmp.eq.f32.partialorder %v2186_v59, 8.507059e+37  ;;  %v2221_v39 = vadd.f32 %v7317_v44, %v2220_v18  ;;  %3755 = vmatmul.bf16.gmra.mxu0 %v3572_v22  ;;  %3844 = vmatmul.bf16.gmra.mxu1 %v3573_v13 }
 0x29b   :  { %vm2223_vm13 = vweird.f32 %v7317_v44  ;;  %v7405_v14 = vadd.f32 1.0, %v2295_v28  ;;  %v2319_v52 = vadd.f32 0.0036580483, %v2318_v42  ;;  %v2367_v0 = vmul.f32 3.8918573e-05, %v7394_v7  ;;  %v713_v28 = vpop.f32.mrf.mxu3 }
 0x29c   :  { %v2331_v19 = vmul.f32 %v2330_v35, %v7334_v12  ;;  %v7409_v60 = vpop.eup %5128  ;;  %v2189_v51 = vor.u32 1.1754944e-38, %v2188_v23  ;;  %vm2222_vm14 = vweird.f32 %v7275_v43  ;;  %v2226_v31 = vand.u32 2147483647, %v7275_v43 }
 0x29d   :  { %v2228_v33 = vand.u32 2147483648, %v7275_v43  ;;  %v3465_v58 = vadd.f32 1.0, %v4902_v36  ;;  %vm7414_vm15 = vmor %vm2222_vm14, %vm2223_vm13  ;;  %v2244_v59 = vmul.f32 %v2243_v20, %v7223_v29  ;;  %v2281_v16 = vadd.f32 0.05243302, %v2280_v24 }
 0x29e   :  { %v2332_v17 = vadd.f32 0.112945676, %v2331_v19  ;;  %v2190_v62 = vsel %vm7399_vm12, %v2189_v51, %v2185_v40  ;;  %v2225_v23 = vsel %vm7414_vm15, %v7317_v44, %v2221_v39  ;;  %v2368_v46 = vadd.f32 0.001143296, %v2367_v0 }
 0x29f   :  { %v7425_v10 = vadd.f32 %v624_v53, %v9755_v38  ;;  %v2258_v43 = vmul.f32 %v7409_v60, %v7359_v1  ;;  %5130 = vrcp.f32 %v7405_v14  ;;  %v2320_v29 = vmul.f32 %v2319_v52, %v7334_v12 }
 0x2a0   :  { %v2333_v11 = vmul.f32 %v2332_v17, %v7334_v12  ;;  %v2206_v18 = vmul.f32 %v2205_v4, %v7143_v54  ;;  %vm2227_vm1 = vcmp.eq.f32.partialorder %v2226_v31, 8.507059e+37  ;;  %v2229_v56 = vor.u32 1.1754944e-38, %v2228_v33 }
 0x2a1   :  { %v2369_v42 = vmul.f32 %v2368_v46, %v7394_v7  ;;  %v2245_v44 = vadd.f32 1.1283791, %v2244_v59  ;;  %v2282_v57 = vmul.f32 %v2281_v16, %v7287_v9  ;;  %v7436_v36 = vmul.f32 0.70710677, %v7425_v10 }
 0x2a2   :  { %v2334_v6 = vadd.f32 0.4994258, %v2333_v11  ;;  %v2191_v22 = vmul.f32 %v2190_v62, %v7342_v34  ;;  %v2230_v13 = vsel %vm2227_vm1, %v2229_v56, %v2225_v23  ;;  %v2356_v55 = vmul.f32 2.1237322e-06, %v7394_v7  ;;  %v9756_v34 = vld [vmem:[#allocation9_spill] sm:$0xff] }
 0x2a3   :  { %v2370_v20 = vadd.f32 0.014752088, %v2369_v42  ;;  %v7441_v54 = vmul.f32 %v3465_v58, %v7262_v50  ;;  %v2259_v4 = vsub.f32 1.0, %v2258_v43  ;;  %v7444_v24 = vmul.f32 0.5, %v7292_v49  ;;  %v627_v58 = vpop.f32.mrf.mxu2  ;;  %v9757_v43 = vld [vmem:[#allocation10_spill] sm:$0xff] }
 0x2a4   :  { %v2321_v35 = vadd.f32 0.05243302, %v2320_v29  ;;  %v2335_v40 = vmul.f32 %v2334_v6, %v7334_v12  ;;  %v7448_v2 = vmul.f32 0.5, %v7349_v15  ;;  %v7452_v52 = vadd.f32 %v713_v28, %v9756_v34 }
 0x2a5   :  { %v2371_v39 = vmul.f32 %v2370_v20, %v7394_v7  ;;  %v7454_v19 = vpop.eup %5130  ;;  %v2231_v0 = vmul.f32 %v2230_v13, %v2206_v18  ;;  %v7457_v50 = vmul.f32 %v2245_v44, %v7203_v32  ;;  %v2283_v53 = vadd.f32 0.18741608, %v2282_v57 }
 0x2a6   :  { %v2394_v49 = vmul.f32 %v7436_v36, %v7436_v36  ;;  %v4903_v51 = vclamps-f32 %v2191_v22, 1.0  ;;  %v7461_v31 = vadd.f32 1.0, %v2335_v40  ;;  %v2357_v15 = vadd.f32 0.00028619796, %v2356_v55 }
 0x2a7   :  { %v2372_v33 = vadd.f32 0.112945676, %v2371_v39  ;;  %v2260_v30 = vmul.f32 %v7409_v60, %v2259_v4  ;;  %vm2262_vm2 = vweird.f32 %v7359_v1  ;;  %v2322_v59 = vmul.f32 %v2321_v35, %v7334_v12 }
 0x2a8   :  { %v7466_v16 = vmin.f32 %v2394_v49, 16.0  ;;  %v2266_v32 = vand.u32 2147483647, %v7359_v1  ;;  %v2298_v17 = vmul.f32 %v7454_v19, %v7405_v14  ;;  %5132 = vrcp.f32 %v7461_v31 }
 0x2a9   :  { %v7473_v62 = vmul.f32 0.70710677, %v7452_v52  ;;  %v4904_v23 = vclamps-f32 %v2231_v0, 1.0  ;;  %v2284_v46 = vmul.f32 %v2283_v53, %v7287_v9  ;;  %v2373_v38 = vmul.f32 %v2372_v33, %v7394_v7 }
 0x2aa   :  { %v7478_v29 = vadd.f32 %v627_v58, %v9757_v43  ;;  %v3466_v11 = vadd.f32 1.0, %v4903_v51  ;;  %v2268_v18 = vand.u32 2147483648, %v7359_v1  ;;  %v2358_v56 = vmul.f32 %v2357_v15, %v7394_v7 }
 0x2ab   :  { %v2407_v42 = vmul.f32 3.8918573e-05, %v7466_v16  ;;  %v2261_v44 = vadd.f32 %v7409_v60, %v2260_v30  ;;  %vm2263_vm3 = vweird.f32 %v7409_v60  ;;  %v2323_v57 = vadd.f32 0.18741608, %v2322_v59 }
 0x2ac   :  { %v2374_v6 = vadd.f32 0.4994258, %v2373_v38  ;;  %vm7485_vm4 = vcmp.eq.f32.partialorder %v2266_v32, 8.507059e+37  ;;  %v2299_v28 = vsub.f32 1.0, %v2298_v17  ;;  %v2434_v13 = vmul.f32 %v7473_v62, %v7473_v62  ;;  %vm7502_vm5 = vmor %vm2262_vm2, %vm2263_vm3 }
 0x2ad   :  { %v2408_v22 = vadd.f32 0.001143296, %v2407_v42  ;;  %v3467_v55 = vadd.f32 1.0, %v4904_v23  ;;  %v2285_v20 = vadd.f32 1.1283791, %v2284_v46  ;;  %v7498_v39 = vmul.f32 %v3466_v11, %v7282_v3 }
 0x2ae   :  { %v2375_v4 = vmul.f32 %v2374_v6, %v7394_v7  ;;  %v7493_v35 = vmul.f32 0.70710677, %v7478_v29  ;;  %v7495_v40 = vpop.eup %5132  ;;  %v2359_v0 = vadd.f32 0.0036580483, %v2358_v56  ;;  %v7507_v49 = vmin.f32 %v2434_v13, 16.0 }
 0x2af   :  { %v2409_v53 = vmul.f32 %v2408_v22, %v7466_v16  ;;  %v2265_v51 = vsel %vm7502_vm5, %v7409_v60, %v2261_v44  ;;  %v2269_v15 = vor.u32 1.1754944e-38, %v2268_v18  ;;  %v2324_v33 = vmul.f32 %v2323_v57, %v7334_v12 }
 0x2b0   :  { %v2396_v3 = vmul.f32 2.1237322e-06, %v7466_v16  ;;  %v2300_v1 = vmul.f32 %v7454_v19, %v2299_v28  ;;  %v2338_v58 = vmul.f32 %v7495_v40, %v7461_v31  ;;  %v7517_v30 = vadd.f32 1.0, %v2375_v4 }
 0x2b1   :  { %v2410_v59 = vadd.f32 0.014752088, %v2409_v53  ;;  %v7520_v32 = vmul.f32 %v3467_v55, %v7285_v45  ;;  %v2286_v17 = vmul.f32 %v2285_v20, %v7247_v27  ;;  %v2436_v60 = vmul.f32 2.1237322e-06, %v7507_v49 }
 0x2b2   :  { %v2474_v12 = vmul.f32 %v7493_v35, %v7493_v35  ;;  %v2270_v23 = vsel %vm7485_vm4, %v2269_v15, %v2265_v51  ;;  %v2306_v46 = vand.u32 2147483647, %v7405_v14  ;;  %v2360_v38 = vmul.f32 %v2359_v0, %v7394_v7 }
 0x2b3   :  { %5134 = vrcp.f32 %v7517_v30  ;;  %vm2303_vm6 = vweird.f32 %v7454_v19  ;;  %v2308_v45 = vand.u32 2147483648, %v7405_v14  ;;  %v2397_v43 = vadd.f32 0.00028619796, %v2396_v3 }
 0x2b4   :  { %v2411_v27 = vmul.f32 %v2410_v59, %v7466_v16  ;;  %v2301_v11 = vadd.f32 %v7454_v19, %v2300_v1  ;;  %v2325_v18 = vadd.f32 1.1283791, %v2324_v33  ;;  %v2339_v56 = vsub.f32 1.0, %v2338_v58  ;;  %v716_v58 = vpop.f32.mrf.mxu3 }
 0x2b5   :  { %v2447_v42 = vmul.f32 3.8918573e-05, %v7507_v49  ;;  %v2271_v44 = vmul.f32 %v2270_v23, %v7457_v50  ;;  %v2437_v6 = vadd.f32 0.00028619796, %v2436_v60  ;;  %v7537_v9 = vmin.f32 %v2474_v12, 16.0 }
 0x2b6   :  { %v2412_v57 = vadd.f32 0.112945676, %v2411_v27  ;;  %vm2302_vm7 = vweird.f32 %v7405_v14  ;;  %vm7540_vm8 = vcmp.eq.f32.partialorder %v2306_v46, 8.507059e+37  ;;  %v2361_v22 = vadd.f32 0.05243302, %v2360_v38  ;;  %v9766_v27 = vld [vmem:[#allocation11_spill] sm:$0xff] }
 0x2b7   :  { %v2448_v13 = vadd.f32 0.001143296, %v2447_v42  ;;  %vm7546_vm9 = vmor %vm2302_vm7, %vm2303_vm6  ;;  %v2309_v20 = vor.u32 1.1754944e-38, %v2308_v45  ;;  %v7551_v50 = vmul.f32 0.5, %v7425_v10  ;;  %v2398_v4 = vmul.f32 %v2397_v43, %v7466_v16 }
 0x2b8   :  { %v2413_v14 = vmul.f32 %v2412_v57, %v7466_v16  ;;  %v2305_v0 = vsel %vm7546_vm9, %v7454_v19, %v2301_v11  ;;  %v2340_v53 = vmul.f32 %v7495_v40, %v2339_v56  ;;  %v2487_v15 = vmul.f32 3.8918573e-05, %v7537_v9 }
 0x2b9   :  { %v7555_v34 = vpop.eup %5134  ;;  %v2449_v51 = vmul.f32 %v2448_v13, %v7507_v49  ;;  %v4905_v33 = vclamps-f32 %v2271_v44, 1.0  ;;  %v7564_v10 = vmul.f32 %v2325_v18, %v7309_v26  ;;  %v2346_v3 = vand.u32 2147483647, %v7461_v31 }
 0x2ba   :  { %v2438_v1 = vmul.f32 %v2437_v6, %v7507_v49  ;;  %v2362_v59 = vmul.f32 %v2361_v22, %v7394_v7  ;;  %v2378_v19 = vmul.f32 %v7555_v34, %v7517_v30  ;;  %v2414_v60 = vadd.f32 0.4994258, %v2413_v14 }
 0x2bb   :  { %v2450_v12 = vadd.f32 0.014752088, %v2449_v51  ;;  %v2310_v23 = vsel %vm7540_vm8, %v2309_v20, %v2305_v0  ;;  %v2348_v46 = vand.u32 2147483648, %v7461_v31  ;;  %v2399_v38 = vadd.f32 0.0036580483, %v2398_v4 }
 0x2bc   :  { %v2488_v26 = vadd.f32 0.001143296, %v2487_v15  ;;  %v2341_v45 = vadd.f32 %v7495_v40, %v2340_v53  ;;  %vm2343_vm10 = vweird.f32 %v7495_v40  ;;  %v7578_v11 = vadd.f32 %v716_v58, %v9766_v27 }
 0x2bd   :  { %v2451_v43 = vmul.f32 %v2450_v12, %v7507_v49  ;;  %v2415_v18 = vmul.f32 %v2414_v60, %v7466_v16  ;;  %v2439_v56 = vadd.f32 0.0036580483, %v2438_v1  ;;  %v2476_v42 = vmul.f32 2.1237322e-06, %v7537_v9 }
 0x2be   :  { %v2489_v44 = vmul.f32 %v2488_v26, %v7537_v9  ;;  %vm2342_vm11 = vweird.f32 %v7461_v31  ;;  %v2363_v57 = vadd.f32 0.18741608, %v2362_v59  ;;  %v2379_v6 = vsub.f32 1.0, %v2378_v19 }
 0x2bf   :  { %v2452_v28 = vadd.f32 0.112945676, %v2451_v43  ;;  %v2311_v22 = vmul.f32 %v2310_v23, %v2286_v17  ;;  %vm7584_vm12 = vmor %vm2342_vm11, %vm2343_vm10  ;;  %v2400_v55 = vmul.f32 %v2399_v38, %v7466_v16  ;;  %v7590_v20 = vmul.f32 0.5, %v7452_v52 }
 0x2c0   :  { %v2490_v4 = vadd.f32 0.014752088, %v2489_v44  ;;  %v7592_v14 = vadd.f32 1.0, %v4905_v33  ;;  %v2345_v31 = vsel %vm7584_vm12, %v7495_v40, %v2341_v45  ;;  %v2349_v0 = vor.u32 1.1754944e-38, %v2348_v46  ;;  %v629_v45 = vpop.f32.mrf.mxu2  ;;  %v9769_v44 = vld [vmem:[#allocation12_spill] sm:$0xff] }
 0x2c1   :  { %v7598_v53 = vmul.f32 0.70710677, %v7578_v11  ;;  %v7600_v17 = vadd.f32 1.0, %v2415_v18  ;;  %v2440_v51 = vmul.f32 %v2439_v56, %v7507_v49  ;;  %v2453_v15 = vmul.f32 %v2452_v28, %v7507_v49 }
 0x2c2   :  { %v2477_v1 = vadd.f32 0.00028619796, %v2476_v42  ;;  %vm2347_vm13 = vcmp.eq.f32.partialorder %v2346_v3, 8.507059e+37  ;;  %v2364_v52 = vmul.f32 %v2363_v57, %v7394_v7  ;;  %v2380_v33 = vmul.f32 %v7555_v34, %v2379_v6  ;;  %v718_v6 = vpop.f32.mrf.mxu3 }
 0x2c3   :  { %v2491_v58 = vmul.f32 %v2490_v4, %v7537_v9  ;;  %v4906_v59 = vclamps-f32 %v2311_v22, 1.0  ;;  %v2350_v40 = vsel %vm2347_vm13, %v2349_v0, %v2345_v31  ;;  %v2401_v19 = vadd.f32 0.05243302, %v2400_v55 }
 0x2c4   :  { %v2454_v60 = vadd.f32 0.4994258, %v2453_v15  ;;  %v2514_v23 = vmul.f32 %v7598_v53, %v7598_v53  ;;  %v3574_v46 = vpack.c.bf16 %v7229_v63, %v6978_v25  ;;  %v3575_v3 = vpack.c.bf16 %v7233_v37, %v6988_v21 }
 0x2c5   :  { %v2492_v12 = vadd.f32 0.112945676, %v2491_v58  ;;  %5136 = vrcp.f32 %v7600_v17  ;;  %v2441_v7 = vadd.f32 0.05243302, %v2440_v51  ;;  %v2478_v26 = vmul.f32 %v2477_v1, %v7537_v9 }
 0x2c6   :  { %v2455_v38 = vmul.f32 %v2454_v60, %v7507_v49  ;;  %v2381_v43 = vadd.f32 %v7555_v34, %v2380_v33  ;;  %vm2383_vm14 = vweird.f32 %v7555_v34  ;;  %v7619_v18 = vmin.f32 %v2514_v23, 16.0  ;;  %3760 = vmatmul.bf16.gmra.mxu0 %v3574_v46  ;;  %3849 = vmatmul.bf16.gmra.mxu1 %v3575_v3 }
 0x2c7   :  { %v2493_v27 = vmul.f32 %v2492_v12, %v7537_v9  ;;  %vm2382_vm15 = vweird.f32 %v7517_v30  ;;  %v2386_v25 = vand.u32 2147483647, %v7517_v30  ;;  %v2388_v21 = vand.u32 2147483648, %v7517_v30 }
 0x2c8   :  { %v2402_v63 = vmul.f32 %v2401_v19, %v7466_v16  ;;  %v2351_v37 = vmul.f32 %v2350_v40, %v7564_v10  ;;  %v7626_v56 = vadd.f32 1.0, %v2455_v38  ;;  %v7629_v57 = vadd.f32 %v629_v45, %v9769_v44  ;;  %vm7633_vm1 = vmor %vm2382_vm15, %vm2383_vm14 }
 0x2c9   :  { %v2494_v42 = vadd.f32 0.4994258, %v2493_v27  ;;  %v2365_v28 = vadd.f32 1.1283791, %v2364_v52  ;;  %v2442_v30 = vmul.f32 %v2441_v7, %v7507_v49  ;;  %v2479_v13 = vadd.f32 0.0036580483, %v2478_v26 }
 0x2ca   :  { %v2527_v55 = vmul.f32 3.8918573e-05, %v7619_v18  ;;  %v3469_v10 = vadd.f32 1.0, %v4906_v59  ;;  %v2385_v4 = vsel %vm7633_vm1, %v7555_v34, %v2381_v43  ;;  %5138 = vrcp.f32 %v7626_v56  ;;  %v9772_v52 = vld [vmem:[#allocation13_spill] sm:$0xff] }
 0x2cb   :  { %v2516_v31 = vmul.f32 2.1237322e-06, %v7619_v18  ;;  %v7644_v0 = vpop.eup %5136  ;;  %v2389_v51 = vor.u32 1.1754944e-38, %v2388_v21  ;;  %v2403_v15 = vadd.f32 0.18741608, %v2402_v63  ;;  %v2495_v1 = vmul.f32 %v2494_v42, %v7537_v9 }
 0x2cc   :  { %v7648_v33 = vadd.f32 %v718_v6, %v9772_v52  ;;  %v4907_v58 = vclamps-f32 %v2351_v37, 1.0  ;;  %vm2387_vm2 = vcmp.eq.f32.partialorder %v2386_v25, 8.507059e+37  ;;  %v2528_v59 = vadd.f32 0.001143296, %v2527_v55 }
 0x2cd   :  { %v7651_v40 = vmul.f32 0.70710677, %v7629_v57  ;;  %v2390_v34 = vsel %vm2387_vm2, %v2389_v51, %v2385_v4  ;;  %v2443_v19 = vadd.f32 0.18741608, %v2442_v30  ;;  %v2480_v60 = vmul.f32 %v2479_v13, %v7537_v9 }
 0x2ce   :  { %v7654_v12 = vadd.f32 1.0, %v2495_v1  ;;  %v2418_v23 = vmul.f32 %v7644_v0, %v7600_v17  ;;  %v2517_v46 = vadd.f32 0.00028619796, %v2516_v31  ;;  %v2529_v3 = vmul.f32 %v2528_v59, %v7619_v18 }
 0x2cf   :  { %v2554_v7 = vmul.f32 %v7651_v40, %v7651_v40  ;;  %v2366_v38 = vmul.f32 %v2365_v28, %v7364_v41  ;;  %v2404_v26 = vmul.f32 %v2403_v15, %v7466_v16  ;;  %v7665_v45 = vmul.f32 0.70710677, %v7648_v33 }
 0x2d0   :  { %5140 = vrcp.f32 %v7654_v12  ;;  %v7667_v43 = vpop.eup %5138  ;;  %v7671_v27 = vmul.f32 %v7592_v14, %v7298_v8  ;;  %v7674_v25 = vmul.f32 %v3469_v10, %v7346_v61  ;;  %v3470_v21 = vadd.f32 1.0, %v4907_v58 }
 0x2d1   :  { %v7677_v63 = vmul.f32 0.5, %v7478_v29  ;;  %v2391_v41 = vmul.f32 %v2390_v34, %v2366_v38  ;;  %v2444_v16 = vmul.f32 %v2443_v19, %v7507_v49  ;;  %v7681_v37 = vmul.f32 0.5, %v7578_v11 }
 0x2d2   :  { %v2530_v42 = vadd.f32 0.014752088, %v2529_v3  ;;  %v2419_v44 = vsub.f32 1.0, %v2418_v23  ;;  %v2481_v6 = vadd.f32 0.05243302, %v2480_v60  ;;  %v2518_v28 = vmul.f32 %v2517_v46, %v7619_v18 }
 0x2d3   :  { %v7684_v8 = vmin.f32 %v2554_v7, 16.0  ;;  %v2405_v14 = vadd.f32 1.1283791, %v2404_v26  ;;  %v2458_v61 = vmul.f32 %v7667_v43, %v7626_v56  ;;  %v2594_v22 = vmul.f32 %v7665_v45, %v7665_v45 }
 0x2d4   :  { %v2531_v29 = vmul.f32 %v2530_v42, %v7619_v18  ;;  %v7692_v49 = vmul.f32 %v3470_v21, %v7444_v24  ;;  %v2428_v11 = vand.u32 2147483648, %v7600_v17  ;;  %v4908_v10 = vclamps-f32 %v2391_v41, 1.0 }
 0x2d5   :  { %v2556_v30 = vmul.f32 2.1237322e-06, %v7684_v8  ;;  %v2567_v13 = vmul.f32 3.8918573e-05, %v7684_v8  ;;  %v2426_v4 = vand.u32 2147483647, %v7600_v17  ;;  %v2420_v15 = vmul.f32 %v7644_v0, %v2419_v44 }
 0x2d6   :  { %v7697_v55 = vpop.eup %5140  ;;  %v2532_v31 = vadd.f32 0.112945676, %v2531_v29  ;;  %v7700_v51 = vmin.f32 %v2594_v22, 16.0  ;;  %v2445_v1 = vadd.f32 1.1283791, %v2444_v16  ;;  %v2482_v24 = vmul.f32 %v2481_v6, %v7537_v9 }
 0x2d7   :  { %v2519_v52 = vadd.f32 0.0036580483, %v2518_v28  ;;  %v2459_v58 = vsub.f32 1.0, %v2458_v61  ;;  %v2498_v59 = vmul.f32 %v7697_v55, %v7654_v12  ;;  %v2568_v19 = vadd.f32 0.001143296, %v2567_v13 }
 0x2d8   :  { %v2533_v34 = vmul.f32 %v2532_v31, %v7619_v18  ;;  %v2406_v60 = vmul.f32 %v2405_v14, %v7436_v36  ;;  %vm2422_vm3 = vweird.f32 %v7600_v17  ;;  %v2429_v23 = vor.u32 1.1754944e-38, %v2428_v11 }
 0x2d9   :  { %v2557_v46 = vadd.f32 0.00028619796, %v2556_v30  ;;  %v7709_v3 = vadd.f32 1.0, %v4908_v10  ;;  %vm7711_vm4 = vcmp.eq.f32.partialorder %v2426_v4, 8.507059e+37  ;;  %v2569_v26 = vmul.f32 %v2568_v19, %v7684_v8  ;;  %v632_v10 = vpop.f32.mrf.mxu2 }
 0x2da   :  { %v2534_v38 = vadd.f32 0.4994258, %v2533_v34  ;;  %v2607_v21 = vmul.f32 3.8918573e-05, %v7700_v51  ;;  %vm2423_vm5 = vweird.f32 %v7644_v0  ;;  %v7719_v41 = vmul.f32 %v2445_v1, %v7473_v62 }
 0x2db   :  { %v2483_v36 = vadd.f32 0.18741608, %v2482_v24  ;;  %v2520_v16 = vmul.f32 %v2519_v52, %v7619_v18  ;;  %v2421_v42 = vadd.f32 %v7644_v0, %v2420_v15  ;;  %v2460_v44 = vmul.f32 %v7667_v43, %v2459_v58  ;;  %vm7737_vm6 = vmor %vm2422_vm3, %vm2423_vm5 }
 0x2dc   :  { %v2499_v6 = vsub.f32 1.0, %v2498_v59  ;;  %v2570_v28 = vadd.f32 0.014752088, %v2569_v26  ;;  %v2466_v14 = vand.u32 2147483647, %v7626_v56  ;;  %v2558_v61 = vmul.f32 %v2557_v46, %v7684_v8  ;;  %v721_v26 = vpop.f32.mrf.mxu3 }
 0x2dd   :  { %v2596_v29 = vmul.f32 2.1237322e-06, %v7700_v51  ;;  %v2608_v22 = vadd.f32 0.001143296, %v2607_v21  ;;  %v2468_v11 = vand.u32 2147483648, %v7626_v56  ;;  %v2535_v62 = vmul.f32 %v2534_v38, %v7619_v18 }
 0x2de   :  { %v7730_v30 = vmul.f32 0.5, %v7629_v57  ;;  %v2571_v13 = vmul.f32 %v2570_v28, %v7684_v8  ;;  %vm2462_vm7 = vweird.f32 %v7626_v56  ;;  %v2484_v31 = vmul.f32 %v2483_v36, %v7537_v9  ;;  %v9779_v9 = vld [vmem:[#allocation14_spill] sm:$0xff] }
 0x2df   :  { %v2521_v15 = vadd.f32 0.05243302, %v2520_v16  ;;  %v2609_v1 = vmul.f32 %v2608_v22, %v7700_v51  ;;  %v2425_v57 = vsel %vm7737_vm6, %v7644_v0, %v2421_v42  ;;  %v2461_v24 = vadd.f32 %v7667_v43, %v2460_v44 }
 0x2e0   :  { %vm2463_vm8 = vweird.f32 %v7667_v43  ;;  %v2500_v17 = vmul.f32 %v7697_v55, %v2499_v6  ;;  %vm7750_vm9 = vcmp.eq.f32.partialorder %v2466_v14, 8.507059e+37  ;;  %v2559_v58 = vadd.f32 0.0036580483, %v2558_v61  ;;  %v9782_v61 = vld [vmem:[#allocation15_spill] sm:$0xff] }
 0x2e1   :  { %v2597_v59 = vadd.f32 0.00028619796, %v2596_v29  ;;  %v7755_v34 = vadd.f32 %v632_v10, %v9779_v9  ;;  %v2469_v19 = vor.u32 1.1754944e-38, %v2468_v11  ;;  %v7757_v46 = vadd.f32 1.0, %v2535_v62  ;;  %vm7763_vm10 = vmor %vm2462_vm7, %vm2463_vm8 }
 0x2e2   :  { %v2572_v38 = vadd.f32 0.112945676, %v2571_v13  ;;  %v2610_v0 = vadd.f32 0.014752088, %v2609_v1  ;;  %v2430_v21 = vsel %vm7711_vm4, %v2429_v23, %v2425_v57  ;;  %v2485_v16 = vadd.f32 1.1283791, %v2484_v31 }
 0x2e3   :  { %vm2503_vm11 = vweird.f32 %v7697_v55  ;;  %v2522_v42 = vmul.f32 %v2521_v15, %v7619_v18  ;;  %v2465_v44 = vsel %vm7763_vm10, %v7667_v43, %v2461_v24  ;;  %v2501_v6 = vadd.f32 %v7697_v55, %v2500_v17 }
 0x2e4   :  { %v2573_v7 = vmul.f32 %v2572_v38, %v7684_v8  ;;  %v2611_v23 = vmul.f32 %v2610_v0, %v7700_v51  ;;  %v2560_v56 = vmul.f32 %v2559_v58, %v7684_v8  ;;  %v2598_v28 = vmul.f32 %v2597_v59, %v7700_v51 }
 0x2e5   :  { %v7778_v14 = vmul.f32 0.70710677, %v7755_v34  ;;  %v7781_v29 = vadd.f32 %v721_v26, %v9782_v61  ;;  %5142 = vrcp.f32 %v7757_v46  ;;  %v3576_v11 = vpack.c.bf16 %v7374_v5, %v7235_v48 }
 0x2e6   :  { %v2574_v22 = vadd.f32 0.4994258, %v2573_v7  ;;  %v2612_v43 = vadd.f32 0.112945676, %v2611_v23  ;;  %v2431_v62 = vmul.f32 %v2430_v21, %v2406_v60  ;;  %vm2502_vm12 = vweird.f32 %v7654_v12 }
 0x2e7   :  { %v2506_v13 = vand.u32 2147483647, %v7654_v12  ;;  %v2508_v10 = vand.u32 2147483648, %v7654_v12  ;;  %vm7791_vm13 = vmor %vm2502_vm12, %vm2503_vm11  ;;  %v2523_v31 = vadd.f32 0.18741608, %v2522_v42  ;;  %v2634_v48 = vmul.f32 %v7778_v14, %v7778_v14  ;;  %3765 = vmatmul.bf16.gmra.mxu0 %v3576_v11 }
 0x2e8   :  { %v2575_v15 = vmul.f32 %v2574_v22, %v7684_v8  ;;  %v2613_v1 = vmul.f32 %v2612_v43, %v7700_v51  ;;  %v2470_v5 = vsel %vm7750_vm9, %v2469_v19, %v2465_v44  ;;  %v2505_v12 = vsel %vm7791_vm13, %v7697_v55, %v2501_v6 }
 0x2e9   :  { %v2561_v60 = vadd.f32 0.05243302, %v2560_v56  ;;  %v7805_v57 = vmul.f32 0.70710677, %v7781_v29  ;;  %v2599_v17 = vadd.f32 0.0036580483, %v2598_v28  ;;  %v3577_v19 = vpack.c.bf16 %v7441_v54, %v7258_v47 }
 0x2ea   :  { %v7807_v24 = vadd.f32 1.0, %v2575_v15  ;;  %v2614_v58 = vadd.f32 0.4994258, %v2613_v1  ;;  %v7809_v59 = vmin.f32 %v2634_v48, 16.0  ;;  %v4909_v9 = vclamps-f32 %v2431_v62, 1.0  ;;  %v9785_v1 = vld [vmem:[#allocation16_spill] sm:$0xff] }
 0x2eb   :  { %v2509_v38 = vor.u32 1.1754944e-38, %v2508_v10  ;;  %v2674_v52 = vmul.f32 %v7805_v57, %v7805_v57  ;;  %v7815_v0 = vpop.eup %5142  ;;  %v2471_v55 = vmul.f32 %v2470_v5, %v7719_v41  ;;  %vm2507_vm14 = vcmp.eq.f32.partialorder %v2506_v13, 8.507059e+37  ;;  %3854 = vmatmul.bf16.gmra.mxu1 %v3577_v19 }
 0x2ec   :  { %v2524_v26 = vmul.f32 %v2523_v31, %v7619_v18  ;;  %5144 = vrcp.f32 %v7807_v24  ;;  %v2486_v21 = vmul.f32 %v2485_v16, %v7493_v35  ;;  %v2615_v42 = vmul.f32 %v2614_v58, %v7700_v51  ;;  %v634_v16 = vpop.f32.mrf.mxu2 }
 0x2ed   :  { %v2510_v36 = vsel %vm2507_vm14, %v2509_v38, %v2505_v12  ;;  %v2636_v44 = vmul.f32 2.1237322e-06, %v7809_v59  ;;  %v2562_v6 = vmul.f32 %v2561_v60, %v7684_v8  ;;  %v2600_v47 = vmul.f32 %v2599_v17, %v7700_v51 }
 0x2ee   :  { %v2647_v54 = vmul.f32 3.8918573e-05, %v7809_v59  ;;  %v7826_v41 = vmin.f32 %v2674_v52, 16.0  ;;  %v3472_v7 = vadd.f32 1.0, %v4909_v9  ;;  %v2538_v18 = vmul.f32 %v7815_v0, %v7757_v46 }
 0x2ef   :  { %v7830_v23 = vadd.f32 1.0, %v2615_v42  ;;  %v2637_v35 = vadd.f32 0.00028619796, %v2636_v44  ;;  %v4910_v56 = vclamps-f32 %v2471_v55, 1.0  ;;  %v2511_v28 = vmul.f32 %v2510_v36, %v2486_v21 }
 0x2f0   :  { %v2525_v61 = vadd.f32 1.1283791, %v2524_v26  ;;  %v2648_v22 = vadd.f32 0.001143296, %v2647_v54  ;;  %v7834_v43 = vmul.f32 %v7709_v3, %v7448_v2  ;;  %v7837_v11 = vmul.f32 0.5, %v7648_v33 }
 0x2f1   :  { %v2676_v62 = vmul.f32 2.1237322e-06, %v7826_v41  ;;  %v2687_v13 = vmul.f32 3.8918573e-05, %v7826_v41  ;;  %v2563_v4 = vadd.f32 0.18741608, %v2562_v6  ;;  %v7845_v48 = vadd.f32 %v634_v16, %v9785_v1 }
 0x2f2   :  { %v7841_v10 = vpop.eup %5144  ;;  %v2601_v31 = vadd.f32 0.05243302, %v2600_v47  ;;  %v2649_v15 = vmul.f32 %v2648_v22, %v7809_v59  ;;  %v7848_v5 = vmul.f32 %v3472_v7, %v7551_v50  ;;  %v2539_v2 = vsub.f32 1.0, %v2538_v18 }
 0x2f3   :  { %5146 = vrcp.f32 %v7830_v23  ;;  %v2638_v33 = vmul.f32 %v2637_v35, %v7809_v59  ;;  %v3473_v3 = vadd.f32 1.0, %v4910_v56  ;;  %v4911_v12 = vclamps-f32 %v2511_v28, 1.0 }
 0x2f4   :  { %v7853_v60 = vmul.f32 %v2525_v61, %v7598_v53  ;;  %v2650_v17 = vadd.f32 0.014752088, %v2649_v15  ;;  %v2546_v58 = vand.u32 2147483647, %v7757_v46  ;;  %v2578_v9 = vmul.f32 %v7841_v10, %v7807_v24 }
 0x2f5   :  { %v2677_v38 = vadd.f32 0.00028619796, %v2676_v62  ;;  %v2688_v52 = vadd.f32 0.001143296, %v2687_v13  ;;  %v2564_v50 = vmul.f32 %v2563_v4, %v7684_v8  ;;  %v2602_v19 = vmul.f32 %v2601_v31, %v7700_v51 }
 0x2f6   :  { %v2651_v55 = vmul.f32 %v2650_v17, %v7809_v59  ;;  %v7862_v26 = vmul.f32 0.70710677, %v7845_v48  ;;  %v2540_v53 = vmul.f32 %v7815_v0, %v2539_v2  ;;  %vm2542_vm15 = vweird.f32 %v7757_v46 }
 0x2f7   :  { %v2639_v21 = vadd.f32 0.0036580483, %v2638_v33  ;;  %v2689_v36 = vmul.f32 %v2688_v52, %v7826_v41  ;;  %v7868_v42 = vmul.f32 %v3473_v3, %v7590_v20  ;;  %v3474_v44 = vadd.f32 1.0, %v4911_v12 }
 0x2f8   :  { %v2548_v8 = vand.u32 2147483648, %v7757_v46  ;;  %v2652_v6 = vadd.f32 0.112945676, %v2651_v55  ;;  %vm7873_vm1 = vcmp.eq.f32.partialorder %v2546_v58, 8.507059e+37  ;;  %v2579_v7 = vsub.f32 1.0, %v2578_v9 }
 0x2f9   :  { %v7871_v47 = vpop.eup %5146  ;;  %v2678_v18 = vmul.f32 %v2677_v38, %v7826_v41  ;;  %v2690_v35 = vadd.f32 0.014752088, %v2689_v36  ;;  %v2714_v16 = vmul.f32 %v7862_v26, %v7862_v26  ;;  %vm2543_vm2 = vweird.f32 %v7815_v0  ;;  %v723_v38 = vpop.f32.mrf.mxu3 }
 0x2fa   :  { %v2565_v20 = vadd.f32 1.1283791, %v2564_v50  ;;  %v2603_v56 = vadd.f32 0.18741608, %v2602_v19  ;;  %v2653_v28 = vmul.f32 %v2652_v6, %v7809_v59  ;;  %v2541_v61 = vadd.f32 %v7815_v0, %v2540_v53  ;;  %vm7900_vm3 = vmor %vm2542_vm15, %vm2543_vm2 }
 0x2fb   :  { %v2640_v22 = vmul.f32 %v2639_v21, %v7809_v59  ;;  %v2691_v62 = vmul.f32 %v2690_v35, %v7826_v41  ;;  %v7885_v13 = vmin.f32 %v2714_v16, 16.0  ;;  %v2549_v4 = vor.u32 1.1754944e-38, %v2548_v8 }
 0x2fc   :  { %v2618_v31 = vmul.f32 %v7871_v47, %v7830_v23  ;;  %v7890_v15 = vmul.f32 0.5, %v7755_v34  ;;  %v2654_v1 = vadd.f32 0.4994258, %v2653_v28  ;;  %v7893_v2 = vmul.f32 %v3474_v44, %v7677_v63 }
 0x2fd   :  { %v2580_v33 = vmul.f32 %v7841_v10, %v2579_v7  ;;  %v2679_v3 = vadd.f32 0.0036580483, %v2678_v18  ;;  %v2692_v12 = vadd.f32 0.112945676, %v2691_v62  ;;  %v2566_v58 = vmul.f32 %v2565_v20, %v7651_v40  ;;  %v9790_v18 = vld [vmem:[#allocation17_spill] sm:$0xff] }
 0x2fe   :  { %v2655_v34 = vmul.f32 %v2654_v1, %v7809_v59  ;;  %v7907_v9 = vmul.f32 0.5, %v7781_v29  ;;  %v2727_v63 = vmul.f32 3.8918573e-05, %v7885_v13  ;;  %v2545_v52 = vsel %vm7900_vm3, %v7815_v0, %v2541_v61 }
 0x2ff   :  { %v2604_v46 = vmul.f32 %v2603_v56, %v7700_v51  ;;  %v2641_v50 = vadd.f32 0.05243302, %v2640_v22  ;;  %v2693_v19 = vmul.f32 %v2692_v12, %v7826_v41  ;;  %v2586_v55 = vand.u32 2147483647, %v7807_v24 }
 0x300   :  { %v2619_v40 = vsub.f32 1.0, %v2618_v31  ;;  %v7916_v53 = vadd.f32 1.0, %v2655_v34  ;;  %v2728_v21 = vadd.f32 0.001143296, %v2727_v63  ;;  %v2581_v29 = vadd.f32 %v7841_v10, %v2580_v33 }
 0x301   :  { %vm2583_vm4 = vweird.f32 %v7841_v10  ;;  %v2680_v36 = vmul.f32 %v2679_v3, %v7826_v41  ;;  %v2694_v44 = vadd.f32 0.4994258, %v2693_v19  ;;  %v2550_v0 = vsel %vm7873_vm1, %v2549_v4, %v2545_v52  ;;  %v637_v3 = vpop.f32.mrf.mxu2 }
 0x302   :  { %vm2582_vm5 = vweird.f32 %v7807_v24  ;;  %v2588_v51 = vand.u32 2147483648, %v7807_v24  ;;  %v2716_v8 = vmul.f32 2.1237322e-06, %v7885_v13  ;;  %v2605_v6 = vadd.f32 1.1283791, %v2604_v46 }
 0x303   :  { %v2642_v7 = vmul.f32 %v2641_v50, %v7809_v59  ;;  %5148 = vrcp.f32 %v7916_v53  ;;  %v7929_v35 = vadd.f32 %v723_v38, %v9790_v18  ;;  %vm7931_vm6 = vmor %vm2582_vm5, %vm2583_vm4  ;;  %vm7935_vm7 = vcmp.eq.f32.partialorder %v2586_v55, 8.507059e+37  ;;  %v726_v38 = vpop.f32.mrf.mxu3  ;;  %v9797_v50 = vld [vmem:[#allocation18_spill] sm:$0xff] }
 0x304   :  { %v2620_v24 = vmul.f32 %v7871_v47, %v2619_v40  ;;  %v2695_v20 = vmul.f32 %v2694_v44, %v7826_v41  ;;  %v2729_v56 = vmul.f32 %v2728_v21, %v7885_v13  ;;  %v2551_v28 = vmul.f32 %v2550_v0, %v7853_v60  ;;  %v3731_v44 = vpop.f32.mrf.mxu0 }
 0x305   :  { %v2585_v61 = vsel %vm7931_vm6, %v7841_v10, %v2581_v29  ;;  %v2626_v22 = vand.u32 2147483647, %v7830_v23  ;;  %v2681_v62 = vadd.f32 0.05243302, %v2680_v36  ;;  %v2589_v4 = vor.u32 1.1754944e-38, %v2588_v51  ;;  %v9800_v51 = vld [vmem:[#allocation19_spill] sm:$0xff] }
 0x306   :  { %v7947_v31 = vadd.f32 1.0, %v2695_v20  ;;  %v2717_v1 = vadd.f32 0.00028619796, %v2716_v8  ;;  %v2730_v33 = vadd.f32 0.014752088, %v2729_v56  ;;  %v2606_v12 = vmul.f32 %v2605_v6, %v7665_v45 }
 0x307   :  { %v2628_v17 = vand.u32 2147483648, %v7830_v23  ;;  %v2643_v34 = vadd.f32 0.18741608, %v2642_v7  ;;  %v7952_v60 = vmul.f32 0.70710677, %v7929_v35  ;;  %v2590_v10 = vsel %vm7935_vm7, %v2589_v4, %v2585_v61 }
 0x308   :  { %v2621_v63 = vadd.f32 %v7871_v47, %v2620_v24  ;;  %vm2623_vm8 = vweird.f32 %v7871_v47  ;;  %5150 = vrcp.f32 %v7947_v31  ;;  %v4912_v46 = vclamps-f32 %v2551_v28, 1.0 }
 0x309   :  { %v7959_v52 = vpop.eup %5148  ;;  %vm2622_vm9 = vweird.f32 %v7830_v23  ;;  %vm7962_vm10 = vcmp.eq.f32.partialorder %v2626_v22, 8.507059e+37  ;;  %v7967_v19 = vadd.f32 %v637_v3, %v9797_v50  ;;  %v2682_v55 = vmul.f32 %v2681_v62, %v7826_v41 }
 0x30a   :  { %v2718_v40 = vmul.f32 %v2717_v1, %v7885_v13  ;;  %v2731_v21 = vmul.f32 %v2730_v33, %v7885_v13  ;;  %v2754_v29 = vmul.f32 %v7952_v60, %v7952_v60  ;;  %v2591_v36 = vmul.f32 %v2590_v10, %v2566_v58  ;;  %vm7974_vm11 = vmor %vm2622_vm9, %vm2623_vm8 }
 0x30b   :  { %v2629_v23 = vor.u32 1.1754944e-38, %v2628_v17  ;;  %v2644_v0 = vmul.f32 %v2643_v34, %v7809_v59  ;;  %v7980_v8 = vadd.f32 %v726_v38, %v9800_v51  ;;  %v2625_v6 = vsel %vm7974_vm11, %v7871_v47, %v2621_v63 }
 0x30c   :  { %v2658_v7 = vmul.f32 %v7959_v52, %v7916_v53  ;;  %v2732_v18 = vadd.f32 0.112945676, %v2731_v21  ;;  %v7987_v16 = vmin.f32 %v2754_v29, 16.0  ;;  %v3475_v58 = vadd.f32 1.0, %v4912_v46 }
 0x30d   :  { %v7990_v54 = vmul.f32 0.5, %v7845_v48  ;;  %v7993_v24 = vmul.f32 0.70710677, %v7967_v19  ;;  %v3578_v59 = vpack.c.bf16 %v7671_v27, %v7498_v39  ;;  %v2683_v56 = vadd.f32 0.18741608, %v2682_v55 }
 0x30e   :  { %v7997_v20 = vpop.eup %5150  ;;  %v2719_v47 = vadd.f32 0.0036580483, %v2718_v40  ;;  %v2733_v28 = vmul.f32 %v2732_v18, %v7885_v13  ;;  %v2767_v61 = vmul.f32 3.8918573e-05, %v7987_v16  ;;  %v4913_v22 = vclamps-f32 %v2591_v36, 1.0 }
 0x30f   :  { %v2630_v62 = vsel %vm7962_vm10, %v2629_v23, %v2625_v6  ;;  %v2645_v48 = vadd.f32 1.1283791, %v2644_v0  ;;  %v8004_v4 = vmul.f32 0.70710677, %v7980_v8  ;;  %3770 = vmatmul.bf16.gmra.mxu0 %v3578_v59  ;;  %v2659_v1 = vsub.f32 1.0, %v2658_v7  ;;  %v3820_v23 = vpop.f32.mrf.mxu1 }
 0x310   :  { %v2734_v33 = vadd.f32 0.4994258, %v2733_v28  ;;  %v2768_v39 = vadd.f32 0.001143296, %v2767_v61  ;;  %v3579_v27 = vpack.c.bf16 %v7674_v25, %v7520_v32  ;;  %v8009_v3 = vmul.f32 %v3475_v58, %v7681_v37 }
 0x311   :  { %v2698_v17 = vmul.f32 %v7997_v20, %v7947_v31  ;;  %v2756_v34 = vmul.f32 2.1237322e-06, %v7987_v16  ;;  %v2794_v10 = vmul.f32 %v7993_v24, %v7993_v24  ;;  %v2684_v63 = vmul.f32 %v2683_v56, %v7826_v41 }
 0x312   :  { %v2720_v38 = vmul.f32 %v2719_v47, %v7885_v13  ;;  %v2735_v46 = vmul.f32 %v2734_v33, %v7885_v13  ;;  %v2769_v45 = vmul.f32 %v2768_v39, %v7987_v16  ;;  %3859 = vmatmul.bf16.gmra.mxu1 %v3579_v27  ;;  %v3476_v32 = vadd.f32 1.0, %v4913_v22 }
 0x313   :  { %v2631_v25 = vmul.f32 %v2630_v62, %v2606_v12  ;;  %v8021_v37 = vmul.f32 %v2645_v48, %v7778_v14  ;;  %v2834_v50 = vmul.f32 %v8004_v4, %v8004_v4  ;;  %v2660_v55 = vmul.f32 %v7959_v52, %v2659_v1 }
 0x314   :  { %v2666_v40 = vand.u32 2147483647, %v7916_v53  ;;  %v8027_v41 = vadd.f32 1.0, %v2735_v46  ;;  %v2770_v21 = vadd.f32 0.014752088, %v2769_v45  ;;  %vm2662_vm12 = vweird.f32 %v7916_v53 }
 0x315   :  { %v2699_v29 = vsub.f32 1.0, %v2698_v17  ;;  %v2757_v36 = vadd.f32 0.00028619796, %v2756_v34  ;;  %v8030_v12 = vmin.f32 %v2794_v10, 16.0  ;;  %v2668_v14 = vand.u32 2147483648, %v7916_v53 }
 0x316   :  { %v2685_v0 = vadd.f32 1.1283791, %v2684_v63  ;;  %v2721_v51 = vadd.f32 0.05243302, %v2720_v38  ;;  %5152 = vrcp.f32 %v8027_v41  ;;  %v8035_v6 = vmul.f32 %v3476_v32, %v7730_v30 }
 0x317   :  { %v4914_v7 = vclamps-f32 %v2631_v25, 1.0  ;;  %v2771_v18 = vmul.f32 %v2770_v21, %v7987_v16  ;;  %v8038_v58 = vmin.f32 %v2834_v50, 16.0  ;;  %v2661_v59 = vadd.f32 %v7959_v52, %v2660_v55 }
 0x318   :  { %vm2663_vm13 = vweird.f32 %v7959_v52  ;;  %vm8042_vm14 = vcmp.eq.f32.partialorder %v2666_v40, 8.507059e+37  ;;  %v8046_v47 = vadd.f32 %v3820_v23, %v3731_v44  ;;  %v2700_v28 = vmul.f32 %v7997_v20, %v2699_v29 }
 0x319   :  { %v2758_v30 = vmul.f32 %v2757_v36, %v7987_v16  ;;  %v2772_v61 = vadd.f32 0.112945676, %v2771_v18  ;;  %v2796_v22 = vmul.f32 2.1237322e-06, %v8030_v12  ;;  %v2669_v62 = vor.u32 1.1754944e-38, %v2668_v14  ;;  %vm8056_vm15 = vmor %vm2662_vm12, %vm2663_vm13 }
 0x31a   :  { %v2686_v48 = vmul.f32 %v2685_v0, %v7805_v57  ;;  %v2722_v1 = vmul.f32 %v2721_v51, %v7885_v13  ;;  %v2807_v33 = vmul.f32 3.8918573e-05, %v8030_v12  ;;  %vm2702_vm1 = vweird.f32 %v7947_v31  ;;  %v3733_v51 = vpop.f32.mrf.mxu0 }
 0x31b   :  { %v8062_v27 = vmul.f32 0.5, %v7929_v35  ;;  %v2773_v17 = vmul.f32 %v2772_v61, %v7987_v16  ;;  %v2847_v34 = vmul.f32 3.8918573e-05, %v8038_v58  ;;  %v2665_v10 = vsel %vm8056_vm15, %v7959_v52, %v2661_v59 }
 0x31c   :  { %v8066_v57 = vpop.eup %5152  ;;  %v2708_v53 = vand.u32 2147483648, %v7947_v31  ;;  %v2808_v63 = vadd.f32 0.001143296, %v2807_v33  ;;  %v3900_v38 = vsel %vm193_vm0, %v8046_v47, 0.0  ;;  %v2701_v46 = vadd.f32 %v7997_v20, %v2700_v28  ;;  %v639_v28 = vpop.f32.mrf.mxu2 }
 0x31d   :  { %vm2703_vm2 = vweird.f32 %v7997_v20  ;;  %v2759_v35 = vadd.f32 0.0036580483, %v2758_v30  ;;  %v2797_v45 = vadd.f32 0.00028619796, %v2796_v22  ;;  %3901 = vadd.xlane.f32.xlu0 %v3900_v38  ;;  %v2706_v32 = vand.u32 2147483647, %v7947_v31  ;;  %v3822_v31 = vpop.f32.mrf.mxu1  ;;  %v728_v38 = vpop.f32.mrf.mxu3 }
 0x31e   :  { %v2723_v25 = vadd.f32 0.18741608, %v2722_v1  ;;  %v2774_v50 = vadd.f32 0.4994258, %v2773_v17  ;;  %v2809_v55 = vmul.f32 %v2808_v63, %v8030_v12  ;;  %v2670_v52 = vsel %vm8042_vm14, %v2669_v62, %v2665_v10  ;;  %vm8085_vm3 = vmor %vm2702_vm1, %vm2703_vm2 }
 0x31f   :  { %v2738_v40 = vmul.f32 %v8066_v57, %v8027_v41  ;;  %v2836_v21 = vmul.f32 2.1237322e-06, %v8038_v58  ;;  %v2848_v29 = vadd.f32 0.001143296, %v2847_v34  ;;  %v3477_v36 = vadd.f32 1.0, %v4914_v7  ;;  %v9807_v34 = vld [vmem:[#allocation20_spill] sm:$0xff] }
 0x320   :  { %v2709_v23 = vor.u32 1.1754944e-38, %v2708_v53  ;;  %v2775_v14 = vmul.f32 %v2774_v50, %v7987_v16  ;;  %v2810_v0 = vadd.f32 0.014752088, %v2809_v55  ;;  %v2705_v18 = vsel %vm8085_vm3, %v7997_v20, %v2701_v46 }
 0x321   :  { %v2760_v59 = vmul.f32 %v2759_v35, %v7987_v16  ;;  %v2798_v56 = vmul.f32 %v2797_v45, %v8030_v12  ;;  %v2849_v7 = vmul.f32 %v2848_v29, %v8038_v58  ;;  %v2671_v30 = vmul.f32 %v2670_v52, %v8021_v37 }
 0x322   :  { %v2724_v61 = vmul.f32 %v2723_v25, %v7885_v13  ;;  %v8098_v22 = vadd.f32 1.0, %v2775_v14  ;;  %v2811_v62 = vmul.f32 %v2810_v0, %v8030_v12  ;;  %vm2707_vm4 = vcmp.eq.f32.partialorder %v2706_v32, 8.507059e+37 }
 0x323   :  { %v2739_v1 = vsub.f32 1.0, %v2738_v40  ;;  %v2837_v33 = vadd.f32 0.00028619796, %v2836_v21  ;;  %v2850_v20 = vadd.f32 0.014752088, %v2849_v7  ;;  %v2710_v39 = vsel %vm2707_vm4, %v2709_v23, %v2705_v18  ;;  %v9808_v40 = vld [vmem:[#allocation21_spill] sm:$0xff] }
 0x324   :  { %5154 = vrcp.f32 %v8098_v22  ;;  %v8102_v17 = vadd.f32 %v3822_v31, %v3733_v51  ;;  %v8105_v10 = vadd.f32 %v639_v28, %v9807_v34  ;;  %v8108_v37 = vmul.f32 %v3477_v36, %v7837_v11 }
 0x325   :  { %v2761_v13 = vadd.f32 0.05243302, %v2760_v59  ;;  %v2799_v53 = vadd.f32 0.0036580483, %v2798_v56  ;;  %v2812_v63 = vadd.f32 0.112945676, %v2811_v62  ;;  %vm2742_vm5 = vweird.f32 %v8027_v41 }
 0x326   :  { %v4915_v46 = vclamps-f32 %v2671_v30, 1.0  ;;  %v2725_v35 = vadd.f32 1.1283791, %v2724_v61  ;;  %v2851_v45 = vmul.f32 %v2850_v20, %v8038_v58  ;;  %v2711_v32 = vmul.f32 %v2710_v39, %v2686_v48 }
 0x327   :  { %v2740_v25 = vmul.f32 %v8066_v57, %v2739_v1  ;;  %v2813_v50 = vmul.f32 %v2812_v63, %v8030_v12  ;;  %v2838_v55 = vmul.f32 %v2837_v33, %v8038_v58  ;;  %v8116_v11 = vmul.f32 0.70710677, %v8105_v10 }
 0x328   :  { %v2852_v52 = vadd.f32 0.112945676, %v2851_v45  ;;  %v8119_v21 = vadd.f32 %v728_v38, %v9808_v40  ;;  %v3903_v29 = vsel %vm193_vm0, %v8102_v17, 0.0  ;;  %v2746_v36 = vand.u32 2147483647, %v8027_v41 }
 0x329   :  { %v2762_v48 = vmul.f32 %v2761_v13, %v7987_v16  ;;  %v2800_v44 = vmul.f32 %v2799_v53, %v8030_v12  ;;  %v2814_v23 = vadd.f32 0.4994258, %v2813_v50  ;;  %3904 = vadd.xlane.f32.xlu0 %v3903_v29  ;;  %v2748_v0 = vand.u32 2147483648, %v8027_v41 }
 0x32a   :  { %v8126_v14 = vpop.eup %5154  ;;  %v2853_v51 = vmul.f32 %v2852_v52, %v8038_v58  ;;  %v2874_v18 = vmul.f32 %v8116_v11, %v8116_v11  ;;  %v8133_v59 = vmul.f32 0.70710677, %v8119_v21  ;;  %v2741_v56 = vadd.f32 %v8066_v57, %v2740_v25 }
 0x32b   :  { %vm2743_vm6 = vweird.f32 %v8066_v57  ;;  %v2778_v7 = vmul.f32 %v8126_v14, %v8098_v22  ;;  %v2815_v31 = vmul.f32 %v2814_v23, %v8030_v12  ;;  %v4916_v28 = vclamps-f32 %v2711_v32, 1.0 }
 0x32c   :  { %v2839_v30 = vadd.f32 0.0036580483, %v2838_v55  ;;  %v2854_v61 = vadd.f32 0.4994258, %v2853_v51  ;;  %v8140_v62 = vmin.f32 %v2874_v18, 16.0  ;;  %v2914_v39 = vmul.f32 %v8133_v59, %v8133_v59  ;;  %vm8148_vm7 = vmor %vm2742_vm5, %vm2743_vm6 }
 0x32d   :  { %v2763_v1 = vadd.f32 0.18741608, %v2762_v48  ;;  %v2801_v33 = vadd.f32 0.05243302, %v2800_v44  ;;  %v8142_v20 = vadd.f32 1.0, %v2815_v31  ;;  %v2779_v13 = vsub.f32 1.0, %v2778_v7 }
 0x32e   :  { %v2855_v53 = vmul.f32 %v2854_v61, %v8038_v58  ;;  %v2876_v63 = vmul.f32 2.1237322e-06, %v8140_v62  ;;  %v2887_v38 = vmul.f32 3.8918573e-05, %v8140_v62  ;;  %v3478_v45 = vadd.f32 1.0, %v4915_v46  ;;  %v642_v61 = vpop.f32.mrf.mxu2 }
 0x32f   :  { %v2745_v32 = vsel %vm8148_vm7, %v8066_v57, %v2741_v56  ;;  %vm2747_vm8 = vcmp.eq.f32.partialorder %v2746_v36, 8.507059e+37  ;;  %5156 = vrcp.f32 %v8142_v20  ;;  %v3479_v41 = vadd.f32 1.0, %v4916_v28 }
 0x330   :  { %v2749_v25 = vor.u32 1.1754944e-38, %v2748_v0  ;;  %v2840_v50 = vmul.f32 %v2839_v30, %v8038_v58  ;;  %v2877_v55 = vadd.f32 0.00028619796, %v2876_v63  ;;  %v2802_v52 = vmul.f32 %v2801_v33, %v8030_v12 }
 0x331   :  { %v8161_v40 = vadd.f32 1.0, %v2855_v53  ;;  %v2888_v29 = vadd.f32 0.001143296, %v2887_v38  ;;  %v8163_v48 = vmin.f32 %v2914_v39, 16.0  ;;  %v2764_v44 = vmul.f32 %v2763_v1, %v7987_v16 }
 0x332   :  { %v2750_v46 = vsel %vm2747_vm8, %v2749_v25, %v2745_v32  ;;  %v2780_v57 = vmul.f32 %v8126_v14, %v2779_v13  ;;  %v8168_v36 = vmul.f32 0.5, %v7967_v19  ;;  %v2726_v23 = vmul.f32 %v2725_v35, %v7862_v26  ;;  %v9811_v32 = vld [vmem:[#allocation22_spill] sm:$0xff] }
 0x333   :  { %v8172_v0 = vmul.f32 0.5, %v7980_v8  ;;  %v2878_v51 = vmul.f32 %v2877_v55, %v8140_v62  ;;  %v2889_v18 = vmul.f32 %v2888_v29, %v8140_v62  ;;  %v8177_v56 = vmul.f32 %v3478_v45, %v7890_v15 }
 0x334   :  { %v8180_v7 = vmul.f32 %v3479_v41, %v7907_v9  ;;  %v2841_v16 = vadd.f32 0.05243302, %v2840_v50  ;;  %v2927_v31 = vmul.f32 3.8918573e-05, %v8163_v48  ;;  %v2751_v28 = vmul.f32 %v2750_v46, %v2726_v23  ;;  %v3825_v50 = vpop.f32.mrf.mxu1 }
 0x335   :  { %v8183_v19 = vpop.eup %5156  ;;  %v2803_v26 = vadd.f32 0.18741608, %v2802_v52  ;;  %5158 = vrcp.f32 %v8161_v40  ;;  %v2890_v8 = vadd.f32 0.014752088, %v2889_v18  ;;  %v2765_v35 = vadd.f32 1.1283791, %v2764_v44 }
 0x336   :  { %v2781_v30 = vadd.f32 %v8126_v14, %v2780_v57  ;;  %vm2783_vm9 = vweird.f32 %v8126_v14  ;;  %v2928_v15 = vadd.f32 0.001143296, %v2927_v31  ;;  %v2818_v9 = vmul.f32 %v8183_v19, %v8142_v20 }
 0x337   :  { %v2879_v1 = vadd.f32 0.0036580483, %v2878_v51  ;;  %v2891_v33 = vmul.f32 %v2890_v8, %v8140_v62  ;;  %v2916_v39 = vmul.f32 2.1237322e-06, %v8163_v48  ;;  %vm2782_vm10 = vweird.f32 %v8098_v22 }
 0x338   :  { %v2788_v34 = vand.u32 2147483648, %v8098_v22  ;;  %v2842_v13 = vmul.f32 %v2841_v16, %v8038_v58  ;;  %v2929_v53 = vmul.f32 %v2928_v15, %v8163_v48  ;;  %v4917_v63 = vclamps-f32 %v2751_v28, 1.0  ;;  %vm8204_vm11 = vmor %vm2782_vm10, %vm2783_vm9  ;;  %v731_v28 = vpop.f32.mrf.mxu3 }
 0x339   :  { %v2786_v38 = vand.u32 2147483647, %v8098_v22  ;;  %v2804_v45 = vmul.f32 %v2803_v26, %v8030_v12  ;;  %v8199_v41 = vadd.f32 %v642_v61, %v9811_v32  ;;  %v2766_v25 = vmul.f32 %v2765_v35, %v7952_v60  ;;  %v3736_v32 = vpop.f32.mrf.mxu0 }
 0x33a   :  { %v8209_v55 = vmul.f32 0.5, %v8105_v10  ;;  %v2892_v52 = vadd.f32 0.112945676, %v2891_v33  ;;  %v2930_v29 = vadd.f32 0.014752088, %v2929_v53  ;;  %v2785_v12 = vsel %vm8204_vm11, %v8126_v14, %v2781_v30 }
 0x33b   :  { %v8211_v46 = vpop.eup %5158  ;;  %v2819_v22 = vsub.f32 1.0, %v2818_v9  ;;  %v2880_v60 = vmul.f32 %v2879_v1, %v8140_v62  ;;  %v2917_v44 = vadd.f32 0.00028619796, %v2916_v39  ;;  %v2789_v57 = vor.u32 1.1754944e-38, %v2788_v34  ;;  %v9814_v34 = vld [vmem:[#allocation23_spill] sm:$0xff] }
 0x33c   :  { %v2843_v23 = vadd.f32 0.18741608, %v2842_v13  ;;  %v2893_v51 = vmul.f32 %v2892_v52, %v8140_v62  ;;  %v2931_v18 = vmul.f32 %v2930_v29, %v8163_v48  ;;  %v3480_v10 = vadd.f32 1.0, %v4917_v63 }
 0x33d   :  { %vm2787_vm12 = vcmp.eq.f32.partialorder %v2786_v38, 8.507059e+37  ;;  %v2805_v16 = vadd.f32 1.1283791, %v2804_v45  ;;  %v8220_v31 = vmul.f32 0.70710677, %v8199_v41  ;;  %v2858_v14 = vmul.f32 %v8211_v46, %v8161_v40 }
 0x33e   :  { %v2790_v26 = vsel %vm2787_vm12, %v2789_v57, %v2785_v12  ;;  %v2894_v8 = vadd.f32 0.4994258, %v2893_v51  ;;  %v2932_v35 = vadd.f32 0.112945676, %v2931_v18  ;;  %v2820_v30 = vmul.f32 %v8183_v19, %v2819_v22 }
 0x33f   :  { %v2881_v15 = vadd.f32 0.05243302, %v2880_v60  ;;  %v2918_v61 = vmul.f32 %v2917_v44, %v8163_v48  ;;  %v2954_v9 = vmul.f32 %v8220_v31, %v8220_v31  ;;  %v2844_v1 = vmul.f32 %v2843_v23, %v8038_v58 }
 0x340   :  { %v2895_v33 = vmul.f32 %v2894_v8, %v8140_v62  ;;  %v2933_v39 = vmul.f32 %v2932_v35, %v8163_v48  ;;  %v8232_v13 = vadd.f32 %v731_v28, %v9814_v34  ;;  %v2791_v53 = vmul.f32 %v2790_v26, %v2766_v25 }
 0x341   :  { %v2806_v63 = vmul.f32 %v2805_v16, %v7993_v24  ;;  %v2828_v38 = vand.u32 2147483648, %v8142_v20  ;;  %v8237_v45 = vmul.f32 0.5, %v8119_v21  ;;  %vm2823_vm13 = vweird.f32 %v8183_v19  ;;  %v733_v16 = vpop.f32.mrf.mxu3 }
 0x342   :  { %v2859_v58 = vsub.f32 1.0, %v2858_v14  ;;  %v8240_v52 = vadd.f32 1.0, %v2895_v33  ;;  %v8242_v29 = vmin.f32 %v2954_v9, 16.0  ;;  %v2821_v12 = vadd.f32 %v8183_v19, %v2820_v30 }
 0x343   :  { %v2882_v25 = vmul.f32 %v2881_v15, %v8140_v62  ;;  %v2919_v22 = vadd.f32 0.0036580483, %v2918_v61  ;;  %v2934_v24 = vadd.f32 0.4994258, %v2933_v39  ;;  %v8247_v60 = vmul.f32 %v3480_v10, %v7990_v54 }
 0x344   :  { %v2845_v21 = vadd.f32 1.1283791, %v2844_v1  ;;  %v8249_v44 = vadd.f32 %v3825_v50, %v3736_v32  ;;  %v8252_v57 = vmul.f32 0.70710677, %v8232_v13  ;;  %vm2822_vm14 = vweird.f32 %v8142_v20 }
 0x345   :  { %v2826_v23 = vand.u32 2147483647, %v8142_v20  ;;  %v2829_v51 = vor.u32 1.1754944e-38, %v2828_v38  ;;  %v2935_v18 = vmul.f32 %v2934_v24, %v8163_v48  ;;  %vm8259_vm15 = vmor %vm2822_vm14, %vm2823_vm13  ;;  %v2860_v54 = vmul.f32 %v8211_v46, %v2859_v58 }
 0x346   :  { %5160 = vrcp.f32 %v8240_v52  ;;  %v2956_v10 = vmul.f32 2.1237322e-06, %v8242_v29  ;;  %v2967_v28 = vmul.f32 3.8918573e-05, %v8242_v29  ;;  %v4918_v26 = vclamps-f32 %v2791_v53, 1.0 }
 0x347   :  { %v2825_v20 = vsel %vm8259_vm15, %v8183_v19, %v2821_v12  ;;  %v2883_v14 = vadd.f32 0.18741608, %v2882_v25  ;;  %v2920_v8 = vmul.f32 %v2919_v22, %v8163_v48  ;;  %v8271_v35 = vadd.f32 1.0, %v2935_v18 }
 0x348   :  { %v2968_v30 = vadd.f32 0.001143296, %v2967_v28  ;;  %v2994_v15 = vmul.f32 %v8252_v57, %v8252_v57  ;;  %v3580_v61 = vpack.c.bf16 %v7848_v5, %v7692_v49  ;;  %vm2827_vm1 = vcmp.eq.f32.partialorder %v2826_v23, 8.507059e+37  ;;  %v644_v5 = vpop.f32.mrf.mxu2 }
 0x349   :  { %vm2862_vm2 = vweird.f32 %v8161_v40  ;;  %vm2863_vm3 = vweird.f32 %v8211_v46  ;;  %v2866_v9 = vand.u32 2147483647, %v8161_v40  ;;  %v2830_v19 = vsel %vm2827_vm1, %v2829_v51, %v2825_v20 }
 0x34a   :  { %v2861_v1 = vadd.f32 %v8211_v46, %v2860_v54  ;;  %v2957_v33 = vadd.f32 0.00028619796, %v2956_v10  ;;  %v2969_v39 = vmul.f32 %v2968_v30, %v8242_v29  ;;  %3775 = vmatmul.bf16.gmra.mxu0 %v3580_v61  ;;  %v3481_v34 = vadd.f32 1.0, %v4918_v26  ;;  %vm8296_vm4 = vmor %vm2862_vm2, %vm2863_vm3 }
 0x34b   :  { %v2868_v53 = vand.u32 2147483648, %v8161_v40  ;;  %v8283_v38 = vmin.f32 %v2994_v15, 16.0  ;;  %v3581_v49 = vpack.c.bf16 %v7868_v42, %v7834_v43  ;;  %v2884_v50 = vmul.f32 %v2883_v14, %v8140_v62  ;;  %v9819_v40 = vld [vmem:[#allocation24_spill] sm:$0xff] }
 0x34c   :  { %v8287_v32 = vpop.eup %5160  ;;  %v2921_v58 = vadd.f32 0.05243302, %v2920_v8  ;;  %5162 = vrcp.f32 %v8271_v35  ;;  %v2970_v12 = vadd.f32 0.014752088, %v2969_v39  ;;  %v2831_v25 = vmul.f32 %v2830_v19, %v2806_v63 }
 0x34d   :  { %v2846_v22 = vmul.f32 %v2845_v21, %v8004_v4  ;;  %v3007_v43 = vmul.f32 3.8918573e-05, %v8283_v38  ;;  %3864 = vmatmul.bf16.gmra.mxu1 %v3581_v49  ;;  %v3906_v42 = vsel %vm193_vm0, %v8249_v44, 0.0  ;;  %v2865_v62 = vsel %vm8296_vm4, %v8211_v46, %v2861_v1 }
 0x34e   :  { %v2958_v4 = vmul.f32 %v2957_v33, %v8242_v29  ;;  %v2971_v63 = vmul.f32 %v2970_v12, %v8242_v29  ;;  %3907 = vadd.xlane.f32.xlu1 %v3906_v42  ;;  %v8309_v21 = vadd.f32 %v644_v5, %v9819_v40  ;;  %vm2867_vm5 = vcmp.eq.f32.partialorder %v2866_v9, 8.507059e+37 }
 0x34f   :  { %v2869_v23 = vor.u32 1.1754944e-38, %v2868_v53  ;;  %v2898_v51 = vmul.f32 %v8287_v32, %v8240_v52  ;;  %v3008_v18 = vadd.f32 0.001143296, %v3007_v43  ;;  %v8314_v54 = vmul.f32 %v3481_v34, %v8062_v27  ;;  %v9820_v27 = vld [vmem:[#allocation25_spill] sm:$0xff] }
 0x350   :  { %v2885_v10 = vadd.f32 1.1283791, %v2884_v50  ;;  %v2922_v46 = vmul.f32 %v2921_v58, %v8163_v48  ;;  %v2972_v28 = vadd.f32 0.112945676, %v2971_v63  ;;  %v4919_v26 = vclamps-f32 %v2831_v25, 1.0  ;;  %v3827_v63 = vpop.f32.mrf.mxu1 }
 0x351   :  { %v2870_v20 = vsel %vm2867_vm5, %v2869_v23, %v2865_v62  ;;  %v8318_v14 = vmul.f32 0.5, %v8199_v41  ;;  %v3009_v8 = vmul.f32 %v3008_v18, %v8283_v38  ;;  %v2959_v15 = vadd.f32 0.0036580483, %v2958_v4  ;;  %v3738_v4 = vpop.f32.mrf.mxu0 }
 0x352   :  { %v8321_v30 = vpop.eup %5162  ;;  %v2973_v61 = vmul.f32 %v2972_v28, %v8242_v29  ;;  %v8325_v9 = vmul.f32 0.70710677, %v8309_v21  ;;  %v8328_v19 = vadd.f32 %v733_v16, %v9820_v27  ;;  %v2899_v1 = vsub.f32 1.0, %v2898_v51 }
 0x353   :  { %v8331_v33 = vmul.f32 0.5, %v8232_v13  ;;  %v2996_v41 = vmul.f32 2.1237322e-06, %v8283_v38  ;;  %v3010_v39 = vadd.f32 0.014752088, %v3009_v8  ;;  %v2871_v34 = vmul.f32 %v2870_v20, %v2846_v22 }
 0x354   :  { %v8335_v53 = vmul.f32 %v2885_v10, %v8116_v11  ;;  %v2923_v49 = vadd.f32 0.18741608, %v2922_v46  ;;  %v2974_v5 = vadd.f32 0.4994258, %v2973_v61  ;;  %v3482_v50 = vadd.f32 1.0, %v4919_v26 }
 0x355   :  { %v2938_v58 = vmul.f32 %v8321_v30, %v8271_v35  ;;  %v3011_v12 = vmul.f32 %v3010_v39, %v8283_v38  ;;  %v3034_v25 = vmul.f32 %v8325_v9, %v8325_v9  ;;  %vm2902_vm6 = vweird.f32 %v8240_v52 }
 0x356   :  { %v2960_v13 = vmul.f32 %v2959_v15, %v8242_v29  ;;  %v2975_v22 = vmul.f32 %v2974_v5, %v8242_v29  ;;  %v8346_v11 = vmul.f32 0.70710677, %v8328_v19  ;;  %v2900_v24 = vmul.f32 %v8287_v32, %v2899_v1 }
 0x357   :  { %v2906_v43 = vand.u32 2147483647, %v8240_v52  ;;  %v2997_v42 = vadd.f32 0.00028619796, %v2996_v41  ;;  %v3012_v62 = vadd.f32 0.112945676, %v3011_v12  ;;  %v2924_v16 = vmul.f32 %v2923_v49, %v8163_v48 }
 0x358   :  { %v4920_v40 = vclamps-f32 %v2871_v34, 1.0  ;;  %v2908_v23 = vand.u32 2147483648, %v8240_v52  ;;  %v8351_v51 = vadd.f32 1.0, %v2975_v22  ;;  %v8353_v18 = vmin.f32 %v3034_v25, 16.0 }
 0x359   :  { %v2939_v10 = vsub.f32 1.0, %v2938_v58  ;;  %v3013_v46 = vmul.f32 %v3012_v62, %v8283_v38  ;;  %v3074_v28 = vmul.f32 %v8346_v11, %v8346_v11  ;;  %v8360_v26 = vmul.f32 %v3482_v50, %v8168_v36 }
 0x35a   :  { %v2961_v20 = vadd.f32 0.05243302, %v2960_v13  ;;  %5164 = vrcp.f32 %v8351_v51  ;;  %v8363_v8 = vadd.f32 %v3827_v63, %v3738_v4  ;;  %v2901_v15 = vadd.f32 %v8287_v32, %v2900_v24 }
 0x35b   :  { %vm2903_vm7 = vweird.f32 %v8287_v32  ;;  %v2998_v48 = vmul.f32 %v2997_v42, %v8283_v38  ;;  %v3014_v61 = vadd.f32 0.4994258, %v3013_v46  ;;  %v3483_v27 = vadd.f32 1.0, %v4920_v40 }
 0x35c   :  { %9821 = vst [vmem:[#allocation34_spill] sm:$0xff] %v8363_v8  ;;  %vm8368_vm8 = vcmp.eq.f32.partialorder %v2906_v43, 8.507059e+37  ;;  %v3036_v36 = vmul.f32 2.1237322e-06, %v8353_v18  ;;  %v3047_v41 = vmul.f32 3.8918573e-05, %v8353_v18  ;;  %v2940_v34 = vmul.f32 %v8321_v30, %v2939_v10  ;;  %vm8380_vm9 = vmor %vm2902_vm6, %vm2903_vm7 }
 0x35d   :  { %v2909_v39 = vor.u32 1.1754944e-38, %v2908_v23  ;;  %v3015_v49 = vmul.f32 %v3014_v61, %v8283_v38  ;;  %v8376_v5 = vmin.f32 %v3074_v28, 16.0  ;;  %v2962_v58 = vmul.f32 %v2961_v20, %v8242_v29  ;;  %v647_v23 = vpop.f32.mrf.mxu2  ;;  %v9826_v61 = vld [vmem:[#allocation26_spill] sm:$0xff] }
 0x35e   :  { %v3037_v12 = vadd.f32 0.00028619796, %v3036_v36  ;;  %v3048_v25 = vadd.f32 0.001143296, %v3047_v41  ;;  %v3909_v13 = vsel %vm193_vm0, %v8363_v8, 0.0  ;;  %v2905_v22 = vsel %vm8380_vm9, %v8287_v32, %v2901_v15 }
 0x35f   :  { %v2925_v24 = vadd.f32 1.1283791, %v2924_v16  ;;  %v2999_v43 = vadd.f32 0.0036580483, %v2998_v48  ;;  %v8390_v42 = vadd.f32 1.0, %v3015_v49  ;;  %3910 = vadd.xlane.f32.xlu1 %v3909_v13  ;;  %v2948_v62 = vand.u32 2147483648, %v8271_v35 }
 0x360   :  { %v8392_v52 = vpop.eup %5164  ;;  %v3038_v4 = vmul.f32 %v3037_v12, %v8353_v18  ;;  %v3049_v63 = vmul.f32 %v3048_v25, %v8353_v18  ;;  %v3087_v40 = vmul.f32 3.8918573e-05, %v8376_v5  ;;  %v2941_v10 = vadd.f32 %v8321_v30, %v2940_v34 }
 0x361   :  { %vm2943_vm10 = vweird.f32 %v8321_v30  ;;  %v2978_v32 = vmul.f32 %v8392_v52, %v8351_v51  ;;  %v3076_v16 = vmul.f32 2.1237322e-06, %v8376_v5  ;;  %v2910_v46 = vsel %vm8368_vm8, %v2909_v39, %v2905_v22 }
 0x362   :  { %vm2942_vm11 = vweird.f32 %v8271_v35  ;;  %v2946_v28 = vand.u32 2147483647, %v8271_v35  ;;  %v2963_v20 = vadd.f32 0.18741608, %v2962_v58  ;;  %v3000_v15 = vmul.f32 %v2999_v43, %v8283_v38 }
 0x363   :  { %5166 = vrcp.f32 %v8390_v42  ;;  %v3050_v48 = vadd.f32 0.014752088, %v3049_v63  ;;  %v8410_v36 = vadd.f32 %v647_v23, %v9826_v61  ;;  %v8413_v41 = vmul.f32 %v3483_v27, %v8172_v0  ;;  %vm8415_vm12 = vmor %vm2942_vm11, %vm2943_vm10  ;;  %v736_v61 = vpop.f32.mrf.mxu3 }
 0x364   :  { %v2949_v1 = vor.u32 1.1754944e-38, %v2948_v62  ;;  %v3039_v39 = vadd.f32 0.0036580483, %v3038_v4  ;;  %v3088_v49 = vadd.f32 0.001143296, %v3087_v40  ;;  %v2945_v35 = vsel %vm8415_vm12, %v8321_v30, %v2941_v10 }
 0x365   :  { %v2979_v50 = vsub.f32 1.0, %v2978_v32  ;;  %v3051_v58 = vmul.f32 %v3050_v48, %v8353_v18  ;;  %v3077_v12 = vadd.f32 0.00028619796, %v3076_v16  ;;  %v2911_v25 = vmul.f32 %v2910_v46, %v8335_v53 }
 0x366   :  { %v2964_v0 = vmul.f32 %v2963_v20, %v8242_v29  ;;  %v3089_v27 = vmul.f32 %v3088_v49, %v8376_v5  ;;  %v8427_v13 = vmul.f32 0.70710677, %v8410_v36  ;;  %vm2947_vm13 = vcmp.eq.f32.partialorder %v2946_v28, 8.507059e+37 }
 0x367   :  { %v3001_v22 = vadd.f32 0.05243302, %v3000_v15  ;;  %v3052_v43 = vadd.f32 0.112945676, %v3051_v58  ;;  %v3582_v62 = vpack.c.bf16 %v8035_v6, %v7893_v2  ;;  %v2926_v30 = vmul.f32 %v2925_v24, %v8133_v59 }
 0x368   :  { %v2950_v4 = vsel %vm2947_vm13, %v2949_v1, %v2945_v35  ;;  %v3040_v63 = vmul.f32 %v3039_v39, %v8353_v18  ;;  %v3090_v40 = vadd.f32 0.014752088, %v3089_v27  ;;  %v2980_v29 = vmul.f32 %v8392_v52, %v2979_v50  ;;  %v3741_v27 = vpop.f32.mrf.mxu0 }
 0x369   :  { %v8433_v53 = vpop.eup %5166  ;;  %v3053_v23 = vmul.f32 %v3052_v43, %v8353_v18  ;;  %v3078_v10 = vmul.f32 %v3077_v12, %v8376_v5  ;;  %v3114_v32 = vmul.f32 %v8427_v13, %v8427_v13  ;;  %3780 = vmatmul.bf16.gmra.mxu0 %v3582_v62  ;;  %v4921_v16 = vclamps-f32 %v2911_v25, 1.0  ;;  %v9829_v43 = vld [vmem:[#allocation27_spill] sm:$0xff] }
 0x36a   :  { %v2965_v2 = vadd.f32 1.1283791, %v2964_v0  ;;  %v8441_v6 = vmul.f32 0.5, %v8309_v21  ;;  %v3091_v59 = vmul.f32 %v3090_v40, %v8376_v5  ;;  %v2951_v24 = vmul.f32 %v2950_v4, %v2926_v30 }
 0x36b   :  { %v3002_v46 = vmul.f32 %v3001_v22, %v8283_v38  ;;  %v3054_v28 = vadd.f32 0.4994258, %v3053_v23  ;;  %v8445_v20 = vmin.f32 %v3114_v32, 16.0  ;;  %vm2982_vm14 = vweird.f32 %v8351_v51  ;;  %v3830_v22 = vpop.f32.mrf.mxu1 }
 0x36c   :  { %vm2983_vm15 = vweird.f32 %v8392_v52  ;;  %v3018_v15 = vmul.f32 %v8433_v53, %v8390_v42  ;;  %v3092_v48 = vadd.f32 0.112945676, %v3091_v59  ;;  %v2981_v21 = vadd.f32 %v8392_v52, %v2980_v29 }
 0x36d   :  { %v3041_v34 = vadd.f32 0.05243302, %v3040_v63  ;;  %v3055_v1 = vmul.f32 %v3054_v28, %v8353_v18  ;;  %v3079_v39 = vadd.f32 0.0036580483, %v3078_v10  ;;  %v2988_v49 = vand.u32 2147483648, %v8351_v51  ;;  %vm8467_vm1 = vmor %vm2982_vm14, %vm2983_vm15 }
 0x36e   :  { %v3093_v35 = vmul.f32 %v3092_v48, %v8376_v5  ;;  %v3116_v50 = vmul.f32 2.1237322e-06, %v8445_v20  ;;  %v3127_v58 = vmul.f32 3.8918573e-05, %v8445_v20  ;;  %v2986_v12 = vand.u32 2147483647, %v8351_v51 }
 0x36f   :  { %v3003_v25 = vadd.f32 0.18741608, %v3002_v46  ;;  %v8458_v0 = vadd.f32 1.0, %v3055_v1  ;;  %v8461_v62 = vadd.f32 %v736_v61, %v9829_v43  ;;  %v3484_v30 = vadd.f32 1.0, %v4921_v16 }
 0x370   :  { %v3019_v63 = vsub.f32 1.0, %v3018_v15  ;;  %v3094_v40 = vadd.f32 0.4994258, %v3093_v35  ;;  %v3128_v29 = vadd.f32 0.001143296, %v3127_v58  ;;  %v4922_v23 = vclamps-f32 %v2951_v24, 1.0 }
 0x371   :  { %v2985_v10 = vsel %vm8467_vm1, %v8392_v52, %v2981_v21  ;;  %v3042_v32 = vmul.f32 %v3041_v34, %v8353_v18  ;;  %v3080_v16 = vmul.f32 %v3079_v39, %v8376_v5  ;;  %v2989_v59 = vor.u32 1.1754944e-38, %v2988_v49 }
 0x372   :  { %5168 = vrcp.f32 %v8458_v0  ;;  %v8477_v51 = vadd.f32 %v3830_v22, %v3741_v27  ;;  %v3117_v46 = vadd.f32 0.00028619796, %v3116_v50  ;;  %vm2987_vm2 = vcmp.eq.f32.partialorder %v2986_v12, 8.507059e+37  ;;  %v649_v27 = vpop.f32.mrf.mxu2 }
 0x373   :  { %v3095_v28 = vmul.f32 %v3094_v40, %v8376_v5  ;;  %v3129_v15 = vmul.f32 %v3128_v29, %v8445_v20  ;;  %v8482_v24 = vmul.f32 0.70710677, %v8461_v62  ;;  %v2966_v52 = vmul.f32 %v2965_v2, %v8220_v31  ;;  %v9833_v40 = vld [vmem:[#allocation28_spill] sm:$0xff] }
 0x374   :  { %9832 = vst [vmem:[#allocation37_spill] sm:$0xff] %v8477_v51  ;;  %v2990_v48 = vsel %vm2987_vm2, %v2989_v59, %v2985_v10  ;;  %v3020_v61 = vmul.f32 %v8433_v53, %v3019_v63  ;;  %v8487_v21 = vmul.f32 0.5, %v8328_v19  ;;  %v3043_v34 = vadd.f32 0.18741608, %v3042_v32 }
 0x375   :  { %v3081_v1 = vadd.f32 0.05243302, %v3080_v16  ;;  %v3130_v39 = vadd.f32 0.014752088, %v3129_v15  ;;  %v3154_v49 = vmul.f32 %v8482_v24, %v8482_v24  ;;  %v8491_v35 = vadd.f32 1.0, %v3095_v28 }
 0x376   :  { %v3118_v50 = vmul.f32 %v3117_v46, %v8445_v20  ;;  %v3583_v58 = vpack.c.bf16 %v8108_v37, %v8009_v3  ;;  %v3912_v31 = vsel %vm193_vm0, %v8477_v51, 0.0  ;;  %v8499_v2 = vmul.f32 %v3484_v30, %v8209_v55 }
 0x377   :  { %v3485_v19 = vadd.f32 1.0, %v4922_v23  ;;  %v3004_v12 = vmul.f32 %v3003_v25, %v8283_v38  ;;  %vm3022_vm3 = vweird.f32 %v8390_v42  ;;  %3913 = vadd.xlane.f32.xlu2 %v3912_v31  ;;  %v2991_v43 = vmul.f32 %v2990_v48, %v2966_v52  ;;  %v738_v23 = vpop.f32.mrf.mxu3 }
 0x378   :  { %v8503_v22 = vpop.eup %5168  ;;  %v3021_v4 = vadd.f32 %v8433_v53, %v3020_v61  ;;  %vm3023_vm4 = vweird.f32 %v8433_v53  ;;  %v3026_v3 = vand.u32 2147483647, %v8390_v42  ;;  %3869 = vmatmul.bf16.gmra.mxu1 %v3583_v58  ;;  %v3028_v37 = vand.u32 2147483648, %v8390_v42 }
 0x379   :  { %v3044_v55 = vmul.f32 %v3043_v34, %v8353_v18  ;;  %v3131_v38 = vmul.f32 %v3130_v39, %v8445_v20  ;;  %v8511_v25 = vmin.f32 %v3154_v49, 16.0  ;;  %v3082_v30 = vmul.f32 %v3081_v1, %v8376_v5  ;;  %vm8520_vm5 = vmor %vm3022_vm3, %vm3023_vm4  ;;  %v3743_v34 = vpop.f32.mrf.mxu0  ;;  %v3832_v1 = vpop.f32.mrf.mxu1  ;;  %v9836_v39 = vld [vmem:[#allocation29_spill] sm:$0xff] }
 0x37a   :  { %5170 = vrcp.f32 %v8491_v35  ;;  %v3119_v63 = vadd.f32 0.0036580483, %v3118_v50  ;;  %v8516_v29 = vadd.f32 %v649_v27, %v9833_v40  ;;  %v3005_v10 = vadd.f32 1.1283791, %v3004_v12 }
 0x37b   :  { %v3058_v18 = vmul.f32 %v8503_v22, %v8458_v0  ;;  %v3132_v16 = vadd.f32 0.112945676, %v3131_v38  ;;  %v3167_v59 = vmul.f32 3.8918573e-05, %v8511_v25  ;;  %v8528_v46 = vmul.f32 %v3485_v19, %v8237_v45 }
 0x37c   :  { %v4923_v28 = vclamps-f32 %v2991_v43, 1.0  ;;  %v3025_v15 = vsel %vm8520_vm5, %v8433_v53, %v3021_v4  ;;  %v8534_v42 = vmul.f32 0.70710677, %v8516_v29  ;;  %v3029_v52 = vor.u32 1.1754944e-38, %v3028_v37 }
 0x37d   :  { %v3133_v48 = vmul.f32 %v3132_v16, %v8445_v20  ;;  %v3168_v61 = vadd.f32 0.001143296, %v3167_v59  ;;  %v8538_v49 = vadd.f32 %v738_v23, %v9836_v39  ;;  %vm3027_vm6 = vcmp.eq.f32.partialorder %v3026_v3, 8.507059e+37 }
 0x37e   :  { %v3045_v45 = vadd.f32 1.1283791, %v3044_v55  ;;  %v3083_v50 = vadd.f32 0.18741608, %v3082_v30  ;;  %v3120_v58 = vmul.f32 %v3119_v63, %v8445_v20  ;;  %v3030_v31 = vsel %vm3027_vm6, %v3029_v52, %v3025_v15 }
 0x37f   :  { %v3059_v19 = vsub.f32 1.0, %v3058_v18  ;;  %v3134_v53 = vadd.f32 0.4994258, %v3133_v48  ;;  %v3169_v12 = vmul.f32 %v3168_v61, %v8511_v25  ;;  %v3486_v43 = vadd.f32 1.0, %v4923_v28 }
 0x380   :  { %v8542_v27 = vpop.eup %5170  ;;  %v3006_v4 = vmul.f32 %v3005_v10, %v8252_v57  ;;  %v3156_v37 = vmul.f32 2.1237322e-06, %v8511_v25  ;;  %v3194_v38 = vmul.f32 %v8534_v42, %v8534_v42  ;;  %v8549_v3 = vmul.f32 0.5, %v8410_v36 }
 0x381   :  { %v3135_v55 = vmul.f32 %v3134_v53, %v8445_v20  ;;  %v3170_v30 = vadd.f32 0.014752088, %v3169_v12  ;;  %v8553_v63 = vmul.f32 0.70710677, %v8538_v49  ;;  %v8556_v23 = vmul.f32 %v3045_v45, %v8325_v9 }
 0x382   :  { %v3031_v40 = vmul.f32 %v3030_v31, %v3006_v4  ;;  %v3121_v32 = vadd.f32 0.05243302, %v3120_v58  ;;  %v8559_v57 = vmul.f32 0.5, %v8461_v62  ;;  %v3060_v10 = vmul.f32 %v8503_v22, %v3059_v19  ;;  %v8583_v31 = vpop.f32.mrf.mxu0  ;;  %v8585_v19 = vpop.f32.mrf.mxu1 }
 0x383   :  { %v3084_v18 = vmul.f32 %v3083_v50, %v8376_v5  ;;  %v3098_v36 = vmul.f32 %v8542_v27, %v8491_v35  ;;  %v3171_v16 = vmul.f32 %v3170_v30, %v8511_v25  ;;  %v8567_v59 = vmul.f32 %v3486_v43, %v8318_v14 }
 0x384   :  { %v8569_v28 = vadd.f32 1.0, %v3135_v55  ;;  %v3157_v9 = vadd.f32 0.00028619796, %v3156_v37  ;;  %v8571_v15 = vmin.f32 %v3194_v38, 16.0  ;;  %vm3062_vm7 = vweird.f32 %v8458_v0 }
 0x385   :  { %v3066_v62 = vand.u32 2147483647, %v8458_v0  ;;  %v8575_v52 = vadd.f32 %v3832_v1, %v3743_v34  ;;  %v3234_v5 = vmul.f32 %v8553_v63, %v8553_v63  ;;  %v4924_v48 = vclamps-f32 %v3031_v40, 1.0 }
 0x386   :  { %v3068_v61 = vand.u32 2147483648, %v8458_v0  ;;  %v3122_v14 = vmul.f32 %v3121_v32, %v8445_v20  ;;  %v3172_v39 = vadd.f32 0.112945676, %v3171_v16  ;;  %v3061_v45 = vadd.f32 %v8503_v22, %v3060_v10 }
 0x387   :  { %9837 = vst [vmem:[#allocation42_spill] sm:$0xff] %v8575_v52  ;;  %vm3063_vm8 = vweird.f32 %v8503_v22  ;;  %v3085_v50 = vadd.f32 1.1283791, %v3084_v18  ;;  %v3099_v58 = vsub.f32 1.0, %v3098_v36  ;;  %5172 = vrcp.f32 %v8569_v28 }
 0x388   :  { %v3158_v34 = vmul.f32 %v3157_v9, %v8511_v25  ;;  %v3173_v1 = vmul.f32 %v3172_v39, %v8511_v25  ;;  %v3196_v53 = vmul.f32 2.1237322e-06, %v8571_v15  ;;  %vm8591_vm9 = vcmp.eq.f32.partialorder %v3066_v62, 8.507059e+37  ;;  %vm8602_vm10 = vmor %vm3062_vm7, %vm3063_vm8 }
 0x389   :  { %v3207_v43 = vmul.f32 3.8918573e-05, %v8571_v15  ;;  %v8596_v4 = vmin.f32 %v3234_v5, 16.0  ;;  %v3915_v37 = vsel %vm193_vm0, %v8575_v52, 0.0  ;;  %v3487_v38 = vadd.f32 1.0, %v4924_v48  ;;  %v652_v5 = vpop.f32.mrf.mxu2 }
 0x38a   :  { %v3069_v30 = vor.u32 1.1754944e-38, %v3068_v61  ;;  %v3123_v40 = vadd.f32 0.18741608, %v3122_v14  ;;  %v3174_v32 = vadd.f32 0.4994258, %v3173_v1  ;;  %3916 = vadd.xlane.f32.xlu2 %v3915_v37  ;;  %v3065_v10 = vsel %vm8602_vm10, %v8503_v22, %v3061_v45 }
 0x38b   :  { %v8610_v18 = vmul.f32 %v3085_v50, %v8346_v11  ;;  %v3100_v36 = vmul.f32 %v8542_v27, %v3099_v58  ;;  %v3208_v16 = vadd.f32 0.001143296, %v3207_v43  ;;  %vm3102_vm11 = vweird.f32 %v8491_v35 }
 0x38c   :  { %v3159_v0 = vadd.f32 0.0036580483, %v3158_v34  ;;  %v3197_v9 = vadd.f32 0.00028619796, %v3196_v53  ;;  %v3236_v62 = vmul.f32 2.1237322e-06, %v8596_v4  ;;  %v3175_v14 = vmul.f32 %v3174_v32, %v8511_v25 }
 0x38d   :  { %v3106_v48 = vand.u32 2147483647, %v8491_v35  ;;  %v3108_v61 = vand.u32 2147483648, %v8491_v35  ;;  %v3209_v22 = vmul.f32 %v3208_v16, %v8571_v15  ;;  %v8619_v11 = vpop.eup %5172  ;;  %v3070_v39 = vsel %vm8591_vm9, %v3069_v30, %v3065_v10  ;;  %v9842_v53 = vld [vmem:[#allocation30_spill] sm:$0xff]  ;;  %v8644_v10 = vpop.f32.mrf.mxu0 }
 0x38e   :  { %vm3103_vm12 = vweird.f32 %v8542_v27  ;;  %v3124_v45 = vmul.f32 %v3123_v40, %v8445_v20  ;;  %v3247_v50 = vmul.f32 3.8918573e-05, %v8596_v4  ;;  %v3101_v58 = vadd.f32 %v8542_v27, %v3100_v36  ;;  %v8646_v36 = vpop.f32.mrf.mxu1 }
 0x38f   :  { %v8627_v34 = vadd.f32 1.0, %v3175_v14  ;;  %v3210_v1 = vadd.f32 0.014752088, %v3209_v22  ;;  %v8630_v43 = vadd.f32 %v652_v5, %v9842_v53  ;;  %v3160_v37 = vmul.f32 %v3159_v0, %v8511_v25  ;;  %vm8653_vm14 = vmor %vm3102_vm11, %vm3103_vm12  ;;  %v9848_v53 = vld [vmem:[#allocation31_spill] sm:$0xff] }
 0x390   :  { %v3198_v55 = vmul.f32 %v3197_v9, %v8571_v15  ;;  %v3237_v12 = vadd.f32 0.00028619796, %v3236_v62  ;;  %v3248_v30 = vadd.f32 0.001143296, %v3247_v50  ;;  %v8635_v32 = vmul.f32 %v3487_v38, %v8331_v33  ;;  %v741_v62 = vpop.f32.mrf.mxu3 }
 0x391   :  { %9843 = vst [vmem:[#allocation36_spill] sm:$0xff] %v8630_v43  ;;  %vm8637_vm13 = vcmp.eq.f32.partialorder %v3106_v48, 8.507059e+37  ;;  %v3138_v40 = vmul.f32 %v8619_v11, %v8569_v28  ;;  %5174 = vrcp.f32 %v8627_v34  ;;  %v3071_v16 = vmul.f32 %v3070_v39, %v8556_v23 }
 0x392   :  { %v3109_v38 = vor.u32 1.1754944e-38, %v3108_v61  ;;  %v3125_v0 = vadd.f32 1.1283791, %v3124_v45  ;;  %v3211_v9 = vmul.f32 %v3210_v1, %v8571_v15  ;;  %v3105_v5 = vsel %vm8653_vm14, %v8542_v27, %v3101_v58 }
 0x393   :  { %v8662_v48 = vmul.f32 0.5, %v8516_v29  ;;  %v3249_v23 = vmul.f32 %v3248_v30, %v8596_v4  ;;  %v8666_v35 = vmul.f32 0.70710677, %v8630_v43  ;;  %v3161_v14 = vadd.f32 0.05243302, %v3160_v37 }
 0x394   :  { %v3199_v22 = vadd.f32 0.0036580483, %v3198_v55  ;;  %v3212_v39 = vadd.f32 0.112945676, %v3211_v9  ;;  %v3238_v61 = vmul.f32 %v3237_v12, %v8596_v4  ;;  %v3139_v45 = vsub.f32 1.0, %v3138_v40 }
 0x395   :  { %v3250_v50 = vadd.f32 0.014752088, %v3249_v23  ;;  %v3274_v1 = vmul.f32 %v8666_v35, %v8666_v35  ;;  %v8672_v27 = vadd.f32 %v741_v62, %v9848_v53  ;;  %v4925_v29 = vclamps-f32 %v3071_v16, 1.0 }
 0x396   :  { %v8675_v58 = vmul.f32 %v3125_v0, %v8427_v13  ;;  %v3213_v30 = vmul.f32 %v3212_v39, %v8571_v15  ;;  %v8679_v37 = vmul.f32 0.5, %v8538_v49  ;;  %v3110_v12 = vsel %vm8637_vm13, %v3109_v38, %v3105_v5 }
 0x397   :  { %9849 = vst [vmem:[#allocation38_spill] sm:$0xff] %v8672_v27  ;;  %v8681_v55 = vpop.eup %5174  ;;  %vm3142_vm15 = vweird.f32 %v8569_v28  ;;  %v3146_v40 = vand.u32 2147483647, %v8569_v28  ;;  %v3251_v33 = vmul.f32 %v3250_v50, %v8596_v4  ;;  %v8688_v16 = vmin.f32 %v3274_v1, 16.0 }
 0x398   :  { %v3162_v13 = vmul.f32 %v3161_v14, %v8511_v25  ;;  %v3200_v0 = vmul.f32 %v3199_v22, %v8571_v15  ;;  %v3239_v9 = vadd.f32 0.0036580483, %v3238_v61  ;;  %v8693_v49 = vmul.f32 0.70710677, %v8672_v27 }
 0x399   :  { %v3140_v62 = vmul.f32 %v8619_v11, %v3139_v45  ;;  %v3214_v20 = vadd.f32 0.4994258, %v3213_v30  ;;  %v3252_v38 = vadd.f32 0.112945676, %v3251_v33  ;;  %v3276_v5 = vmul.f32 2.1237322e-06, %v8688_v16  ;;  %v8704_v45 = vpop.f32.mrf.mxu0  ;;  %v8706_v30 = vpop.f32.mrf.mxu1 }
 0x39a   :  { %v3488_v23 = vadd.f32 1.0, %v4925_v29  ;;  %v3148_v39 = vand.u32 2147483648, %v8569_v28  ;;  %v3178_v50 = vmul.f32 %v8681_v55, %v8627_v34  ;;  %v3287_v14 = vmul.f32 3.8918573e-05, %v8688_v16 }
 0x39b   :  { %v3111_v22 = vmul.f32 %v3110_v12, %v8610_v18  ;;  %v3215_v61 = vmul.f32 %v3214_v20, %v8571_v15  ;;  %v3253_v1 = vmul.f32 %v3252_v38, %v8596_v4  ;;  %v3277_v53 = vadd.f32 0.00028619796, %v3276_v5 }
 0x39c   :  { %v3163_v33 = vadd.f32 0.18741608, %v3162_v13  ;;  %v3240_v29 = vmul.f32 %v3239_v9, %v8596_v4  ;;  %v3288_v52 = vadd.f32 0.001143296, %v3287_v14  ;;  %v3314_v51 = vmul.f32 %v8693_v49, %v8693_v49 }
 0x39d   :  { %v3141_v8 = vadd.f32 %v8619_v11, %v3140_v62  ;;  %vm3143_vm1 = vweird.f32 %v8619_v11  ;;  %v3201_v18 = vadd.f32 0.05243302, %v3200_v0  ;;  %v3254_v12 = vadd.f32 0.4994258, %v3253_v1 }
 0x39e   :  { %v3179_v20 = vsub.f32 1.0, %v3178_v50  ;;  %v8713_v38 = vadd.f32 1.0, %v3215_v61  ;;  %v3289_v5 = vmul.f32 %v3288_v52, %v8688_v16  ;;  %v3584_v13 = vpack.c.bf16 %v8247_v60, %v8177_v56  ;;  %vm8728_vm3 = vmor %vm3142_vm15, %vm3143_vm1 }
 0x39f   :  { %v4926_v27 = vclamps-f32 %v3111_v22, 1.0  ;;  %vm8718_vm2 = vcmp.eq.f32.partialorder %v3146_v40, 8.507059e+37  ;;  %v3149_v14 = vor.u32 1.1754944e-38, %v3148_v39  ;;  %v3278_v62 = vmul.f32 %v3277_v53, %v8688_v16 }
 0x3a0   :  { %v8724_v43 = vmul.f32 %v3488_v23, %v8441_v6  ;;  %v3241_v52 = vadd.f32 0.05243302, %v3240_v29  ;;  %v3255_v56 = vmul.f32 %v3254_v12, %v8596_v4  ;;  %v8733_v60 = vmin.f32 %v3314_v51, 16.0  ;;  %3785 = vmatmul.bf16.gmra.mxu0 %v3584_v13  ;;  %v654_v12 = vpop.f32.mrf.mxu2 }
 0x3a1   :  { %v3145_v40 = vsel %vm8728_vm3, %v8619_v11, %v3141_v8  ;;  %v3164_v39 = vmul.f32 %v3163_v33, %v8511_v25  ;;  %v8741_v6 = vadd.f32 %v8585_v19, %v8583_v31  ;;  %v3290_v28 = vadd.f32 0.014752088, %v3289_v5  ;;  %v8759_v29 = vpop.f32.mrf.mxu0 }
 0x3a2   :  { %v3180_v23 = vmul.f32 %v8681_v55, %v3179_v20  ;;  %v3202_v50 = vmul.f32 %v3201_v18, %v8571_v15  ;;  %5176 = vrcp.f32 %v8713_v38  ;;  %v8746_v51 = vadd.f32 1.0, %v3255_v56 }
 0x3a3   :  { %9854 = vst [vmem:[#allocation40_spill] sm:$0xff] %v8741_v6  ;;  %v3489_v22 = vadd.f32 1.0, %v4926_v27  ;;  %v3279_v61 = vadd.f32 0.0036580483, %v3278_v62  ;;  %v3291_v1 = vmul.f32 %v3290_v28, %v8688_v16  ;;  %v3585_v8 = vpack.c.bf16 %v8314_v54, %v8180_v7  ;;  %v8761_v7 = vpop.f32.mrf.mxu1 }
 0x3a4   :  { %v3150_v25 = vsel %vm8718_vm2, %v3149_v14, %v3145_v40  ;;  %v3242_v31 = vmul.f32 %v3241_v52, %v8596_v4  ;;  %5178 = vrcp.f32 %v8746_v51  ;;  %v3327_v19 = vmul.f32 3.8918573e-05, %v8733_v60 }
 0x3a5   :  { %v3165_v11 = vadd.f32 1.1283791, %v3164_v39  ;;  %v3188_v53 = vand.u32 2147483648, %v8627_v34  ;;  %v3292_v33 = vadd.f32 0.112945676, %v3291_v1  ;;  %3874 = vmatmul.bf16.gmra.mxu1 %v3585_v8  ;;  %v3918_v27 = vsel %vm193_vm0, %v8741_v6, 0.0 }
 0x3a6   :  { %v3181_v54 = vadd.f32 %v8681_v55, %v3180_v23  ;;  %vm3182_vm4 = vweird.f32 %v8627_v34  ;;  %vm3183_vm5 = vweird.f32 %v8681_v55  ;;  %v3203_v18 = vadd.f32 0.18741608, %v3202_v50  ;;  %3919 = vadd.xlane.f32.xlu0 %v3918_v27  ;;  %v9858_v23 = vld [vmem:[#allocation32_spill] sm:$0xff] }
 0x3a7   :  { %v3151_v20 = vmul.f32 %v3150_v25, %v8675_v58  ;;  %v3186_v5 = vand.u32 2147483647, %v8627_v34  ;;  %v3280_v13 = vmul.f32 %v3279_v61, %v8688_v16  ;;  %v3293_v9 = vmul.f32 %v3292_v33, %v8688_v16  ;;  %vm8780_vm6 = vmor %vm3182_vm4, %vm3183_vm5 }
 0x3a8   :  { %v8770_v14 = vpop.eup %5176  ;;  %v3243_v62 = vadd.f32 0.18741608, %v3242_v31  ;;  %v3316_v0 = vmul.f32 2.1237322e-06, %v8733_v60  ;;  %v3328_v52 = vadd.f32 0.001143296, %v3327_v19  ;;  %v8775_v56 = vadd.f32 %v8646_v36, %v8644_v10  ;;  %v743_v19 = vpop.f32.mrf.mxu3 }
 0x3a9   :  { %v3166_v40 = vmul.f32 %v3165_v11, %v8482_v24  ;;  %v3189_v39 = vor.u32 1.1754944e-38, %v3188_v53  ;;  %v3294_v28 = vadd.f32 0.4994258, %v3293_v9  ;;  %v8785_v50 = vadd.f32 %v654_v12, %v9858_v23 }
 0x3aa   :  { %9855 = vst [vmem:[#allocation43_spill] sm:$0xff] %v8775_v56  ;;  %v8787_v61 = vpop.eup %5178  ;;  %v3185_v10 = vsel %vm8780_vm6, %v8681_v55, %v3181_v54  ;;  %v3204_v36 = vmul.f32 %v3203_v18, %v8571_v15  ;;  %v3329_v24 = vmul.f32 %v3328_v52, %v8733_v60  ;;  %v3921_v34 = vsel %vm193_vm0, %v8775_v56, 0.0  ;;  %v8807_v18 = vpop.f32.mrf.mxu0 }
 0x3ab   :  { %v4927_v1 = vclamps-f32 %v3151_v20, 1.0  ;;  %v3218_v8 = vmul.f32 %v8770_v14, %v8713_v38  ;;  %v3281_v25 = vadd.f32 0.05243302, %v3280_v13  ;;  %v3295_v31 = vmul.f32 %v3294_v28, %v8688_v16  ;;  %3922 = vadd.xlane.f32.xlu1 %v3921_v34  ;;  %v8809_v12 = vpop.f32.mrf.mxu1  ;;  %v9859_v13 = vld [vmem:[#allocation33_spill] sm:$0xff] }
 0x3ac   :  { %vm3187_vm7 = vcmp.eq.f32.partialorder %v3186_v5, 8.507059e+37  ;;  %v3244_v11 = vmul.f32 %v3243_v62, %v8596_v4  ;;  %v3317_v55 = vadd.f32 0.00028619796, %v3316_v0  ;;  %v3330_v53 = vadd.f32 0.014752088, %v3329_v24 }
 0x3ad   :  { %v3190_v15 = vsel %vm3187_vm7, %v3189_v39, %v3185_v10  ;;  %v3258_v33 = vmul.f32 %v8787_v61, %v8746_v51  ;;  %v8802_v27 = vadd.f32 1.0, %v3295_v31  ;;  %v8805_v54 = vmul.f32 0.70710677, %v8785_v50 }
 0x3ae   :  { %v3205_v20 = vadd.f32 1.1283791, %v3204_v36  ;;  %v3228_v5 = vand.u32 2147483648, %v8713_v38  ;;  %v3331_v4 = vmul.f32 %v3330_v53, %v8733_v60  ;;  %v8814_v9 = vadd.f32 %v743_v19, %v9859_v13 }
 0x3af   :  { %v8817_v62 = vmul.f32 %v3489_v22, %v8487_v21  ;;  %v8819_v0 = vadd.f32 1.0, %v4927_v1  ;;  %v3219_v52 = vsub.f32 1.0, %v3218_v8  ;;  %v3282_v58 = vmul.f32 %v3281_v25, %v8688_v16 }
 0x3b0   :  { %v3191_v39 = vmul.f32 %v3190_v15, %v3166_v40  ;;  %v3226_v28 = vand.u32 2147483647, %v8713_v38  ;;  %v3245_v23 = vadd.f32 1.1283791, %v3244_v11  ;;  %v3318_v10 = vmul.f32 %v3317_v55, %v8733_v60 }
 0x3b1   :  { %v3259_v36 = vsub.f32 1.0, %v3258_v33  ;;  %5180 = vrcp.f32 %v8802_v27  ;;  %v3332_v24 = vadd.f32 0.112945676, %v3331_v4  ;;  %v3354_v34 = vmul.f32 %v8805_v54, %v8805_v54 }
 0x3b2   :  { %v8828_v21 = vmul.f32 %v3205_v20, %v8534_v42  ;;  %vm3222_vm8 = vweird.f32 %v8713_v38  ;;  %v3229_v22 = vor.u32 1.1754944e-38, %v3228_v5  ;;  %v8832_v40 = vmul.f32 0.70710677, %v8814_v9  ;;  %v8850_v5 = vpop.f32.mrf.mxu0 }
 0x3b3   :  { %v3220_v1 = vmul.f32 %v8770_v14, %v3219_v52  ;;  %v3283_v8 = vadd.f32 0.18741608, %v3282_v58  ;;  %v3333_v25 = vmul.f32 %v3332_v24, %v8733_v60  ;;  %v8836_v31 = vmin.f32 %v3354_v34, 16.0  ;;  %v8852_v4 = vpop.f32.mrf.mxu1 }
 0x3b4   :  { %v4928_v19 = vclamps-f32 %v3191_v39, 1.0  ;;  %v8839_v11 = vmul.f32 %v3245_v23, %v8553_v63  ;;  %v3319_v55 = vadd.f32 0.0036580483, %v3318_v10  ;;  %v3394_v42 = vmul.f32 %v8832_v40, %v8832_v40 }
 0x3b5   :  { %vm8843_vm9 = vcmp.eq.f32.partialorder %v3226_v28, 8.507059e+37  ;;  %v3260_v15 = vmul.f32 %v8787_v61, %v3259_v36  ;;  %vm3262_vm10 = vweird.f32 %v8746_v51  ;;  %v3334_v33 = vadd.f32 0.4994258, %v3333_v25 }
 0x3b6   :  { %v3356_v20 = vmul.f32 2.1237322e-06, %v8836_v31  ;;  %vm3223_vm11 = vweird.f32 %v8770_v14  ;;  %v3266_v63 = vand.u32 2147483647, %v8746_v51  ;;  %v3268_v13 = vand.u32 2147483648, %v8746_v51 }
 0x3b7   :  { %v3367_v52 = vmul.f32 3.8918573e-05, %v8836_v31  ;;  %v8858_v58 = vpop.eup %5180  ;;  %v3221_v39 = vadd.f32 %v8770_v14, %v3220_v1  ;;  %v3284_v28 = vmul.f32 %v3283_v8, %v8688_v16  ;;  %v3335_v23 = vmul.f32 %v3334_v33, %v8733_v60  ;;  %vm8877_vm13 = vmor %vm3222_vm8, %vm3223_vm11 }
 0x3b8   :  { %v3357_v10 = vadd.f32 0.00028619796, %v3356_v20  ;;  %v3320_v36 = vmul.f32 %v3319_v55, %v8733_v60  ;;  %v8864_v34 = vmin.f32 %v3394_v42, 16.0  ;;  %v3586_v25 = vpack.c.bf16 %v8499_v2, %v8360_v26 }
 0x3b9   :  { %v3368_v24 = vadd.f32 0.001143296, %v3367_v52  ;;  %v3261_v56 = vadd.f32 %v8787_v61, %v3260_v15  ;;  %vm3263_vm12 = vweird.f32 %v8787_v61  ;;  %v8870_v6 = vadd.f32 1.0, %v3335_v23 }
 0x3ba   :  { %v3358_v1 = vmul.f32 %v3357_v10, %v8836_v31  ;;  %v3298_v8 = vmul.f32 %v8858_v58, %v8802_v27  ;;  %v3396_v2 = vmul.f32 2.1237322e-06, %v8864_v34  ;;  %v3407_v55 = vmul.f32 3.8918573e-05, %v8864_v34  ;;  %3790 = vmatmul.bf16.gmra.mxu0 %v3586_v25  ;;  %vm8904_vm15 = vmor %vm3262_vm10, %vm3263_vm12  ;;  %v3761_v10 = vpop.f32.mrf.mxu0 }
 0x3bb   :  { %v3369_v26 = vmul.f32 %v3368_v24, %v8836_v31  ;;  %v8886_v42 = vadd.f32 1.0, %v4928_v19  ;;  %v3225_v38 = vsel %vm8877_vm13, %v8770_v14, %v3221_v39  ;;  %vm8891_vm14 = vcmp.eq.f32.partialorder %v3266_v63, 8.507059e+37 }
 0x3bc   :  { %5182 = vrcp.f32 %v8870_v6  ;;  %v3285_v33 = vadd.f32 1.1283791, %v3284_v28  ;;  %v3321_v20 = vadd.f32 0.05243302, %v3320_v36  ;;  %v3359_v52 = vadd.f32 0.0036580483, %v3358_v1  ;;  %v3850_v36 = vpop.f32.mrf.mxu1 }
 0x3bd   :  { %v8898_v23 = vadd.f32 %v8706_v30, %v8704_v45  ;;  %v3370_v14 = vadd.f32 0.014752088, %v3369_v26  ;;  %v3397_v63 = vadd.f32 0.00028619796, %v3396_v2  ;;  %v3408_v39 = vadd.f32 0.001143296, %v3407_v55 }
 0x3be   :  { %v3587_v28 = vpack.c.bf16 %v8528_v46, %v8413_v41  ;;  %v3230_v45 = vsel %vm8843_vm9, %v3229_v22, %v3225_v38  ;;  %v3265_v30 = vsel %vm8904_vm15, %v8787_v61, %v3261_v56  ;;  %v3269_v51 = vor.u32 1.1754944e-38, %v3268_v13 }
 0x3bf   :  { %v3299_v24 = vsub.f32 1.0, %v3298_v8  ;;  %v3360_v25 = vmul.f32 %v3359_v52, %v8836_v31  ;;  %v3371_v1 = vmul.f32 %v3370_v14, %v8836_v31  ;;  %v3398_v16 = vmul.f32 %v3397_v63, %v8864_v34 }
 0x3c0   :  { %v3409_v26 = vmul.f32 %v3408_v39, %v8864_v34  ;;  %3879 = vmatmul.bf16.gmra.mxu1 %v3587_v28  ;;  %v8920_v41 = vmul.f32 %v3285_v33, %v8666_v35  ;;  %v3322_v46 = vmul.f32 %v3321_v20, %v8733_v60  ;;  %v3924_v22 = vsel %vm193_vm0, %v8898_v23, 0.0 }
 0x3c1   :  { %v8927_v56 = vadd.f32 %v8761_v7, %v8759_v29  ;;  %v3270_v53 = vsel %vm8891_vm14, %v3269_v51, %v3265_v30  ;;  %v3372_v13 = vadd.f32 0.112945676, %v3371_v1  ;;  %v3399_v8 = vadd.f32 0.0036580483, %v3398_v16  ;;  %3925 = vadd.xlane.f32.xlu2 %v3924_v22 }
 0x3c2   :  { %v8929_v61 = vpop.eup %5182  ;;  %v3410_v2 = vadd.f32 0.014752088, %v3409_v26  ;;  %v3231_v35 = vmul.f32 %v3230_v45, %v8828_v21  ;;  %v3300_v55 = vmul.f32 %v8858_v58, %v3299_v24  ;;  %vm3302_vm1 = vweird.f32 %v8802_v27  ;;  %v3763_v39 = vpop.f32.mrf.mxu0 }
 0x3c3   :  { %v8938_v38 = vadd.f32 %v8809_v12, %v8807_v18  ;;  %v3361_v29 = vadd.f32 0.05243302, %v3360_v25  ;;  %v3373_v7 = vmul.f32 %v3372_v13, %v8836_v31  ;;  %v3927_v33 = vsel %vm193_vm0, %v8927_v56, 0.0 }
 0x3c4   :  { %v3411_v15 = vmul.f32 %v3410_v2, %v8864_v34  ;;  %v3271_v20 = vmul.f32 %v3270_v53, %v8839_v11  ;;  %v3306_v21 = vand.u32 2147483647, %v8802_v27  ;;  %v3308_v52 = vand.u32 2147483648, %v8802_v27  ;;  %3928 = vadd.xlane.f32.xlu0 %v3927_v33  ;;  %v3852_v28 = vpop.f32.mrf.mxu1 }
 0x3c5   :  { %v3338_v19 = vmul.f32 %v8929_v61, %v8870_v6  ;;  %v3323_v18 = vadd.f32 0.18741608, %v3322_v46  ;;  %v3374_v12 = vadd.f32 0.4994258, %v3373_v7  ;;  %v3400_v14 = vmul.f32 %v3399_v8, %v8864_v34 }
 0x3c6   :  { %v3412_v63 = vadd.f32 0.112945676, %v3411_v15  ;;  %v3301_v45 = vadd.f32 %v8858_v58, %v3300_v55  ;;  %vm3303_vm2 = vweird.f32 %v8858_v58  ;;  %v3588_v11 = vpack.c.bf16 %v8724_v43, %v8567_v59 }
 0x3c7   :  { %v3930_v30 = vsel %vm193_vm0, %v8938_v38, 0.0  ;;  %v3362_v51 = vmul.f32 %v3361_v29, %v8836_v31  ;;  %v3375_v24 = vmul.f32 %v3374_v12, %v8836_v31  ;;  %v8961_v1 = vadd.f32 %v8852_v4, %v8850_v5  ;;  %vm8967_vm3 = vmor %vm3302_vm1, %vm3303_vm2 }
 0x3c8   :  { %v3413_v25 = vmul.f32 %v3412_v63, %v8864_v34  ;;  %3931 = vadd.xlane.f32.xlu1 %v3930_v30  ;;  %v4929_v16 = vclamps-f32 %v3231_v35, 1.0  ;;  %v4930_v26 = vclamps-f32 %v3271_v20, 1.0  ;;  %v3339_v46 = vsub.f32 1.0, %v3338_v19 }
 0x3c9   :  { %v8963_v22 = vadd.f32 %v3850_v36, %v3761_v10  ;;  %v8971_v43 = vadd.f32 1.0, %v3375_v24  ;;  %v3401_v53 = vadd.f32 0.05243302, %v3400_v14  ;;  %v3933_v8 = vsel %vm193_vm0, %v8961_v1, 0.0 }
 0x3ca   :  { %v3414_v13 = vadd.f32 0.4994258, %v3413_v25  ;;  %v3305_v5 = vsel %vm8967_vm3, %v8858_v58, %v3301_v45  ;;  %vm3307_vm4 = vcmp.eq.f32.partialorder %v3306_v21, 8.507059e+37  ;;  %v3324_v4 = vmul.f32 %v3323_v18, %v8733_v60  ;;  %3795 = vmatmul.bf16.gmra.mxu0 %v3588_v11  ;;  %3934 = vadd.xlane.f32.xlu2 %v3933_v8  ;;  %v3766_v33 = vpop.f32.mrf.mxu0  ;;  %v9016_v25 = vpop.xlane.xlu0 %3901 }
 0x3cb   :  { %v3936_v27 = vsel %vm193_vm0, %v8963_v22, 0.0  ;;  %v3309_v10 = vor.u32 1.1754944e-38, %v3308_v52  ;;  %v3363_v36 = vadd.f32 0.18741608, %v3362_v51  ;;  %5184 = vrcp.f32 %v8971_v43 }
 0x3cc   :  { %v3589_v2 = vpack.c.bf16 %v8817_v62, %v8635_v32  ;;  %v3492_v35 = vadd.f32 1.0, %v4929_v16  ;;  %v3493_v55 = vadd.f32 1.0, %v4930_v26  ;;  %v3340_v29 = vmul.f32 %v8929_v61, %v3339_v46  ;;  %3937 = vadd.xlane.f32.xlu0 %v3936_v27  ;;  %v3855_v20 = vpop.f32.mrf.mxu1 }
 0x3cd   :  { %v3415_v58 = vmul.f32 %v3414_v13, %v8864_v34  ;;  %v3310_v60 = vsel %vm3307_vm4, %v3309_v10, %v3305_v5  ;;  %v3402_v7 = vmul.f32 %v3401_v53, %v8864_v34  ;;  %v8987_v15 = vadd.f32 %v3852_v28, %v3763_v39 }
 0x3ce   :  { %v3325_v21 = vadd.f32 1.1283791, %v3324_v4  ;;  %v3346_v52 = vand.u32 2147483647, %v8870_v6  ;;  %v3348_v19 = vand.u32 2147483648, %v8870_v6  ;;  %v3364_v62 = vmul.f32 %v3363_v36, %v8836_v31 }
 0x3cf   :  { %v8991_v32 = vadd.f32 1.0, %v3415_v58  ;;  %v3939_v18 = vsel %vm193_vm0, %v8987_v15, 0.0  ;;  %v8996_v12 = vadd.f32 %v3855_v20, %v3766_v33  ;;  %v5254_v14 = vmov 32.0  }
 0x3d0   :  { %3884 = vmatmul.bf16.gmra.mxu1 %v3589_v2  ;;  %5186 = vrcp.f32 %v5254_v14  ;;  %v3311_v63 = vmul.f32 %v3310_v60, %v8920_v41  ;;  %v3341_v39 = vadd.f32 %v8929_v61, %v3340_v29  ;;  %vm3343_vm5 = vweird.f32 %v8929_v61  ;;  %3940 = vadd.xlane.f32.xlu1 %v3939_v18 }
 0x3d1   :  { %5188 = vrcp.f32 %v8991_v32  ;;  %v5185_v28 = vpop.eup %5184  ;;  %v3554_v31 = vmul.f32 %v8819_v0, %v8549_v3  ;;  %v3556_v45 = vmul.f32 %v3492_v35, %v8662_v48  ;;  %v3403_v11 = vadd.f32 0.18741608, %v3402_v7 }
 0x3d2   :  { %v3942_v30 = vsel %vm193_vm0, %v8996_v12, 0.0  ;;  %v9009_v41 = vmul.f32 %v8886_v42, %v8559_v57  ;;  %vm3342_vm6 = vweird.f32 %v8870_v6  ;;  %v9013_v51 = vmul.f32 0.5, %v8785_v50  ;;  %v3768_v13 = vpop.f32.mrf.mxu0 }
 0x3d3   :  { %v3378_v24 = vmul.f32 %v5185_v28, %v8971_v43  ;;  %3943 = vadd.xlane.f32.xlu2 %v3942_v30  ;;  %v9019_v3 = vmul.f32 %v3493_v55, %v8679_v37  ;;  %v3326_v48 = vmul.f32 %v3325_v21, %v8693_v49  ;;  %vm9024_vm7 = vmor %vm3342_vm6, %vm3343_vm5  ;;  %vm9028_vm8 = vcmp.eq.f32.partialorder %v3346_v52, 8.507059e+37  ;;  %v3908_v52 = vpop.xlane.xlu1 %3907 }
 0x3d4   :  { %v3365_v50 = vadd.f32 1.1283791, %v3364_v62  ;;  %v4931_v0 = vclamps-f32 %v3311_v63, 1.0  ;;  %v3345_v42 = vsel %vm9024_vm7, %v8929_v61, %v3341_v39  ;;  %v3349_v37 = vor.u32 1.1754944e-38, %v3348_v19  ;;  %v3857_v8 = vpop.f32.mrf.mxu1  ;;  %v3905_v39 = vpop.xlane.xlu0 %3904 }
 0x3d5   :  { %v3379_v16 = vsub.f32 1.0, %v3378_v24  ;;  %v3386_v49 = vand.u32 2147483647, %v8971_v43  ;;  %v3388_v46 = vand.u32 2147483648, %v8971_v43  ;;  %v3404_v59 = vmul.f32 %v3403_v11, %v8864_v34 }
 0x3d6   :  { %v5187_v26 = vpop.eup %5186  ;;  %v3590_v53 = vpack.c.bf16 %v3556_v45, %v3554_v31  ;;  %vm3383_vm9 = vweird.f32 %v5185_v28  ;;  %v9038_v10 = vadd.f32 %v3857_v8, %v3768_v13  ;;  %v3350_v61 = vsel %vm9028_vm8, %v3349_v37, %v3345_v42 }
 0x3d7   :  { %v5189_v5 = vpop.eup %5188  ;;  %v3380_v4 = vmul.f32 %v5185_v28, %v3379_v16  ;;  %v3997_v27 = vmul.f32 32.0, %v5187_v26  ;;  %v3366_v36 = vmul.f32 %v3365_v50, %v8805_v54  ;;  %v3591_v35 = vpack.c.bf16 %v9019_v3, %v9009_v41 }
 0x3d8   :  { %v3418_v2 = vmul.f32 %v5189_v5, %v8991_v32  ;;  %vm3382_vm10 = vweird.f32 %v8971_v43  ;;  %v3945_v29 = vsel %vm193_vm0, %v9038_v10, 0.0  ;;  %v3389_v58 = vor.u32 1.1754944e-38, %v3388_v46 }
 0x3d9   :  { %v3381_v34 = vadd.f32 %v5185_v28, %v3380_v4  ;;  %v3998_v55 = vsub.f32 1.0, %v3997_v27  ;;  %vm3384_vm11 = vmor %vm3382_vm10, %vm3383_vm9  ;;  %v3405_v60 = vadd.f32 1.1283791, %v3404_v59  ;;  %v3426_v33 = vand.u32 2147483647, %v8991_v32  ;;  %3946 = vadd.xlane.f32.xlu0 %v3945_v29 }
 0x3da   :  { %v3419_v7 = vsub.f32 1.0, %v3418_v2  ;;  %vm3387_vm12 = vcmp.eq.f32.partialorder %v3386_v49, 8.507059e+37  ;;  %v3428_v20 = vand.u32 2147483648, %v8991_v32  ;;  %3800 = vmatmul.bf16.gmra.mxu0 %v3590_v53  ;;  %vm3423_vm13 = vweird.f32 %v5189_v5  ;;  %v9874_v49 = vld [vmem:[#allocation36_spill] sm:$0xff] }
 0x3db   :  { %v3385_v54 = vsel %vm3384_vm11, %v5185_v28, %v3381_v34  ;;  %v3999_v21 = vmul.f32 %v5187_v26, %v3998_v55  ;;  %vm4001_vm14 = vweird.f32 %v5187_v26  ;;  %v3494_v62 = vadd.f32 1.0, %v4931_v0  ;;  %v3771_v28 = vpop.f32.mrf.mxu0  ;;  %v3911_v4 = vpop.xlane.xlu1 %3910  ;;  %v9875_v55 = vld [vmem:[#allocation38_spill] sm:$0xff] }
 0x3dc   :  { %v3390_v19 = vsel %vm3387_vm12, %v3389_v58, %v3385_v54  ;;  %v3420_v43 = vmul.f32 %v5189_v5, %v3419_v7  ;;  %v3351_v18 = vmul.f32 %v3350_v61, %v3326_v48  ;;  %v3406_v31 = vmul.f32 %v3405_v60, %v8832_v40  ;;  %v3860_v11 = vpop.f32.mrf.mxu1 }
 0x3dd   :  { %v3391_v14 = vmul.f32 %v3390_v19, %v3366_v36  ;;  %v4000_v63 = vadd.f32 %v5187_v26, %v3999_v21  ;;  %vm3422_vm15 = vweird.f32 %v8991_v32  ;;  %vm3427_vm1 = vcmp.eq.f32.partialorder %v3426_v33, 8.507059e+37  ;;  %v9876_v21 = vld [vmem:[#allocation34_spill] sm:$0xff] }
 0x3de   :  { %v3421_v45 = vadd.f32 %v5189_v5, %v3420_v43  ;;  %vm3424_vm2 = vmor %vm3422_vm15, %vm3423_vm13  ;;  %v3429_v41 = vor.u32 1.1754944e-38, %v3428_v20  ;;  %v9055_v3 = vadd.f32 %v3860_v11, %v3771_v28  ;;  %v4932_v32 = vclamps-f32 %v3351_v18, 1.0 }
 0x3df   :  { %v4933_v30 = vclamps-f32 %v3391_v14, 1.0  ;;  %v9053_v24 = vsel %vm4001_vm14, %v5187_v26, %v4000_v63  ;;  %v806_v46 = vmul.f32 0.5, %v9874_v49  ;;  %v807_v29 = vmul.f32 0.5, %v9875_v55  ;;  %v9877_v14 = vld [vmem:[#allocation37_spill] sm:$0xff] }
 0x3e0   :  { %v3425_v57 = vsel %vm3424_vm2, %v5189_v5, %v3421_v45  ;;  %3889 = vmatmul.bf16.gmra.mxu1 %v3591_v35  ;;  %v4003_v48 = vmul.f32 %v9053_v24, %v9016_v25  ;;  %v4004_v40 = vmul.f32 %v9053_v24, %v3905_v39  ;;  %v4005_v6 = vmul.f32 %v9053_v24, %v3908_v52 }
 0x3e1   :  { %v3496_v50 = vadd.f32 1.0, %v4933_v30  ;;  %v3430_v0 = vsel %vm3427_vm1, %v3429_v41, %v3425_v57  ;;  %v3948_v42 = vsel %vm193_vm0, %v9055_v3, 0.0  ;;  %v809_v5 = vmul.f32 0.5, %v8814_v9 }
 0x3e2   :  { %v3431_v37 = vmul.f32 %v3430_v0, %v3406_v31  ;;  %v9064_v16 = vsub.f32 %v8046_v47, %v4003_v48  ;;  %v9067_v26 = vsub.f32 %v8102_v17, %v4004_v40  ;;  %3949 = vadd.xlane.f32.xlu1 %v3948_v42  ;;  %v9070_v25 = vsub.f32 %v8249_v44, %v4005_v6  ;;  %v9878_v42 = vld [vmem:[#allocation42_spill] sm:$0xff] }
 0x3e3   :  { %v3560_v59 = vmul.f32 %v3496_v50, %v9013_v51  ;;  %v3558_v17 = vmul.f32 %v3494_v62, %v806_v46  ;;  %v3495_v44 = vadd.f32 1.0, %v4932_v32  ;;  %v3773_v36 = vpop.f32.mrf.mxu0  ;;  %v4006_v9 = vmul.f32 %v9053_v24, %v3911_v4  ;;  %v9879_v4 = vld [vmem:[#allocation40_spill] sm:$0xff] }
 0x3e4   :  { %v4934_v53 = vclamps-f32 %v3431_v37, 1.0  ;;  %v4067_v13 = vmul.f32 %v9064_v16, %v9064_v16  ;;  %v4068_v8 = vmul.f32 %v9067_v26, %v9067_v26  ;;  %v4069_v47 = vmul.f32 %v9070_v25, %v9070_v25  ;;  %v3862_v2 = vpop.f32.mrf.mxu1 }
 0x3e5   :  { %v3592_v35 = vpack.c.bf16 %v3560_v59, %v3558_v17  ;;  %v9085_v60 = vadd.f32 %v3862_v2, %v3773_v36  ;;  %v3559_v7 = vmul.f32 %v3495_v44, %v807_v29  ;;  %v9091_v52 = vsub.f32 %v9876_v21, %v4006_v9 }
 0x3e6   :  { %v3497_v27 = vadd.f32 1.0, %v4934_v53  ;;  %v4099_v61 = vsel %vm193_vm0, %v4067_v13, 0.0  ;;  %v4102_v51 = vsel %vm193_vm0, %v4068_v8, 0.0  ;;  %v4105_v34 = vsel %vm193_vm0, %v4069_v47, 0.0 }
 0x3e7   :  { %4100 = vadd.xlane.f32.xlu2 %v4099_v61  ;;  %4103 = vadd.xlane.f32.xlu0 %v4102_v51  ;;  %v3951_v20 = vsel %vm193_vm0, %v9085_v60, 0.0  ;;  %v4070_v39 = vmul.f32 %v9091_v52, %v9091_v52 }
 0x3e8   :  { %v3561_v58 = vmul.f32 %v3497_v27, %v809_v5 }
 0x3e9   :  { %v4108_v28 = vsel %vm193_vm0, %v4070_v39, 0.0 }
 0x3ea   :  { %4106 = vadd.xlane.f32.xlu1 %v4105_v34  ;;  %3805 = vmatmul.bf16.gmra.mxu0 %v3592_v35  ;;  %v3914_v33 = vpop.xlane.xlu2 %3913  ;;  %v3593_v54 = vpack.c.bf16 %v3561_v58, %v3559_v7  ;;  %v9880_v35 = vld [vmem:[#allocation43_spill] sm:$0xff] }
 0x3eb   :  { %v4007_v19 = vmul.f32 %v9053_v24, %v3914_v33  ;;  %v3776_v43 = vpop.f32.mrf.mxu0 }
 0x3ec   :  { %v3865_v62 = vpop.f32.mrf.mxu1 }
 0x3ed   :  { %v9094_v18 = vadd.f32 %v3865_v62, %v3776_v43  ;;  %v9097_v63 = vsub.f32 %v9877_v14, %v4007_v19 }
 0x3ef   :  { %3952 = vadd.xlane.f32.xlu2 %v3951_v20  ;;  %v3954_v31 = vsel %vm193_vm0, %v9094_v18, 0.0  ;;  %v4071_v45 = vmul.f32 %v9097_v63, %v9097_v63 }
 0x3f0   :  { %3894 = vmatmul.bf16.gmra.mxu1 %v3593_v54  ;;  %3955 = vadd.xlane.f32.xlu0 %v3954_v31 }
 0x3f1   :  { %v4111_v57 = vsel %vm193_vm0, %v4071_v45, 0.0 }
 0x3f3   :  { %v3778_v11 = vpop.f32.mrf.mxu0 }
 0x3f4   :  { %v3867_v30 = vpop.f32.mrf.mxu1 }
 0x3f5   :  { %v9106_v41 = vadd.f32 %v3867_v30, %v3778_v11 }
 0x3f7   :  { %4109 = vadd.xlane.f32.xlu2 %v4108_v28  ;;  %v3957_v48 = vsel %vm193_vm0, %v9106_v41, 0.0 }
 0x3f8   :  { %3958 = vadd.xlane.f32.xlu1 %v3957_v48  ;;  %4112 = vadd.xlane.f32.xlu0 %v4111_v57 }
 0x3fb   :  { %v3781_v6 = vpop.f32.mrf.mxu0 }
 0x3fc   :  { %v3870_v50 = vpop.f32.mrf.mxu1 }
 0x3fd   :  { %v3917_v40 = vpop.xlane.xlu2 %3916  ;;  %v9112_v0 = vadd.f32 %v3870_v50, %v3781_v6 }
 0x3fe   :  { %v4008_v32 = vmul.f32 %v9053_v24, %v3917_v40 }
 0x3ff   :  { %v3960_v49 = vsel %vm193_vm0, %v9112_v0, 0.0 }
 0x400   :  { %v9115_v37 = vsub.f32 %v9878_v42, %v4008_v32  ;;  %3961 = vadd.xlane.f32.xlu2 %v3960_v49 }
 0x402   :  { %v4072_v46 = vmul.f32 %v9115_v37, %v9115_v37 }
 0x403   :  { %v3783_v53 = vpop.f32.mrf.mxu0 }
 0x404   :  { %v4114_v59 = vsel %vm193_vm0, %v4072_v46, 0.0  ;;  %v3872_v13 = vpop.f32.mrf.mxu1 }
 0x405   :  { %4115 = vadd.xlane.f32.xlu1 %v4114_v59  ;;  %v9122_v8 = vadd.f32 %v3872_v13, %v3783_v53 }
 0x407   :  { %v3963_v47 = vsel %vm193_vm0, %v9122_v8, 0.0 }
 0x408   :  { %3964 = vadd.xlane.f32.xlu0 %v3963_v47 }
 0x419   :  { %v3920_v17 = vpop.xlane.xlu0 %3919 }
 0x41a   :  { %v4009_v5 = vmul.f32 %v9053_v24, %v3920_v17 }
 0x41c   :  { %v9128_v44 = vsub.f32 %v9879_v4, %v4009_v5 }
 0x41d   :  { %v3786_v51 = vpop.f32.mrf.mxu0 }
 0x41e   :  { %v3923_v27 = vpop.xlane.xlu1 %3922  ;;  %v4073_v61 = vmul.f32 %v9128_v44, %v9128_v44 }
 0x41f   :  { %v4010_v36 = vmul.f32 %v9053_v24, %v3923_v27 }
 0x420   :  { %v4117_v2 = vsel %vm193_vm0, %v4073_v61, 0.0 }
 0x421   :  { %v9135_v34 = vsub.f32 %v9880_v35, %v4010_v36  ;;  %4118 = vadd.xlane.f32.xlu2 %v4117_v2 }
 0x422   :  { %v3875_v55 = vpop.f32.mrf.mxu1 }
 0x423   :  { %v9137_v29 = vadd.f32 %v3875_v55, %v3786_v51  ;;  %v4074_v58 = vmul.f32 %v9135_v34, %v9135_v34 }
 0x425   :  { %v3966_v9 = vsel %vm193_vm0, %v9137_v29, 0.0  ;;  %v4120_v7 = vsel %vm193_vm0, %v4074_v58, 0.0  ;;  %v3788_v33 = vpop.f32.mrf.mxu0 }
 0x426   :  { %3967 = vadd.xlane.f32.xlu1 %v3966_v9  ;;  %4121 = vadd.xlane.f32.xlu0 %v4120_v7 }
 0x42a   :  { %v3877_v54 = vpop.f32.mrf.mxu1 }
 0x42b   :  { %v9144_v20 = vadd.f32 %v3877_v54, %v3788_v33 }
 0x42d   :  { %v3969_v21 = vsel %vm193_vm0, %v9144_v20, 0.0 }
 0x42e   :  { %3970 = vadd.xlane.f32.xlu2 %v3969_v21 }
 0x434   :  { %v3926_v19 = vpop.xlane.xlu2 %3925 }
 0x435   :  { %v4011_v43 = vmul.f32 %v9053_v24, %v3926_v19 }
 0x437   :  { %v9150_v62 = vsub.f32 %v8898_v23, %v4011_v43  ;;  %v3929_v14 = vpop.xlane.xlu0 %3928  ;;  %v3791_v39 = vpop.f32.mrf.mxu0 }
 0x438   :  { %v4012_v31 = vmul.f32 %v9053_v24, %v3929_v14 }
 0x439   :  { %v4075_v45 = vmul.f32 %v9150_v62, %v9150_v62 }
 0x43a   :  { %v9156_v28 = vsub.f32 %v8927_v56, %v4012_v31 }
 0x43b   :  { %v3932_v11 = vpop.xlane.xlu1 %3931  ;;  %v4123_v30 = vsel %vm193_vm0, %v4075_v45, 0.0 }
 0x43c   :  { %v4013_v57 = vmul.f32 %v9053_v24, %v3932_v11  ;;  %4124 = vadd.xlane.f32.xlu1 %v4123_v30  ;;  %v4076_v23 = vmul.f32 %v9156_v28, %v9156_v28 }
 0x43d   :  { %v3880_v48 = vpop.f32.mrf.mxu1  ;;  %v3935_v50 = vpop.xlane.xlu2 %3934 }
 0x43e   :  { %v9162_v40 = vadd.f32 %v3880_v48, %v3791_v39  ;;  %v9165_v6 = vsub.f32 %v8938_v38, %v4013_v57  ;;  %v4126_v32 = vsel %vm193_vm0, %v4076_v23, 0.0  ;;  %v4014_v49 = vmul.f32 %v9053_v24, %v3935_v50 }
 0x43f   :  { %4127 = vadd.xlane.f32.xlu2 %v4126_v32  ;;  %v3793_v42 = vpop.f32.mrf.mxu0  ;;  %v3938_v47 = vpop.xlane.xlu0 %3937 }
 0x440   :  { %v3972_v56 = vsel %vm193_vm0, %v9162_v40, 0.0  ;;  %v4077_v46 = vmul.f32 %v9165_v6, %v9165_v6  ;;  %v9176_v38 = vsub.f32 %v8961_v1, %v4014_v49  ;;  %v4015_v4 = vmul.f32 %v9053_v24, %v3938_v47 }
 0x441   :  { %3973 = vadd.xlane.f32.xlu0 %v3972_v56 }
 0x442   :  { %v4129_v13 = vsel %vm193_vm0, %v4077_v46, 0.0  ;;  %v4078_v27 = vmul.f32 %v9176_v38, %v9176_v38  ;;  %v9187_v1 = vsub.f32 %v8963_v22, %v4015_v4 }
 0x443   :  { %v3941_v51 = vpop.xlane.xlu1 %3940 }
 0x444   :  { %v4132_v2 = vsel %vm193_vm0, %v4078_v27, 0.0  ;;  %v4016_v58 = vmul.f32 %v9053_v24, %v3941_v51  ;;  %v4079_v9 = vmul.f32 %v9187_v1, %v9187_v1 }
 0x445   :  { %v3882_v59 = vpop.f32.mrf.mxu1 }
 0x446   :  { %v9173_v53 = vadd.f32 %v3882_v59, %v3793_v42  ;;  %v9195_v7 = vpop.xlane.xlu2 %3943  ;;  %v9200_v19 = vsub.f32 %v8987_v15, %v4016_v58  ;;  %v4135_v43 = vsel %vm193_vm0, %v4079_v9, 0.0 }
 0x447   :  { %v3796_v5 = vpop.f32.mrf.mxu0 }
 0x448   :  { %v3975_v17 = vsel %vm193_vm0, %v9173_v53, 0.0  ;;  %v4080_v31 = vmul.f32 %v9200_v19, %v9200_v19 }
 0x449   :  { %3976 = vadd.xlane.f32.xlu1 %v3975_v17  ;;  %4130 = vadd.xlane.f32.xlu0 %v4129_v13 }
 0x44a   :  { %v4138_v56 = vsel %vm193_vm0, %v4080_v31, 0.0 }
 0x44c   :  { %v3947_v33 = vpop.xlane.xlu0 %3946 }
 0x44d   :  { %v3885_v61 = vpop.f32.mrf.mxu1  ;;  %v4018_v49 = vmul.f32 %v9053_v24, %v3947_v33 }
 0x44e   :  { %v9184_v36 = vadd.f32 %v3885_v61, %v3796_v5 }
 0x44f   :  { %v3798_v55 = vpop.f32.mrf.mxu0  ;;  %v9219_v17 = vsub.f32 %v9038_v10, %v4018_v49 }
 0x450   :  { %v3978_v35 = vsel %vm193_vm0, %v9184_v36, 0.0 }
 0x451   :  { %3979 = vadd.xlane.f32.xlu2 %v3978_v35  ;;  %4133 = vadd.xlane.f32.xlu1 %v4132_v2  ;;  %v4082_v35 = vmul.f32 %v9219_v17, %v9219_v17 }
 0x455   :  { %v3887_v54 = vpop.f32.mrf.mxu1  ;;  %v3950_v21 = vpop.xlane.xlu1 %3949 }
 0x456   :  { %v9197_v22 = vadd.f32 %v3887_v54, %v3798_v55  ;;  %v4019_v54 = vmul.f32 %v9053_v24, %v3950_v21 }
 0x457   :  { %v3801_v39 = vpop.f32.mrf.mxu0 }
 0x458   :  { %v3981_v14 = vsel %vm193_vm0, %v9197_v22, 0.0 }
 0x459   :  { %3982 = vadd.xlane.f32.xlu0 %v3981_v14  ;;  %4136 = vadd.xlane.f32.xlu2 %v4135_v43 }
 0x45a   :  { %v4101_v45 = vpop.xlane.xlu2 %4100  ;;  %v4104_v11 = vpop.xlane.xlu0 %4103 }
 0x45b   :  { %v4195_v30 = vmul.f32 %v4101_v45, %v9053_v24  ;;  %v4196_v57 = vmul.f32 %v4104_v11, %v9053_v24  ;;  %v4144_v11 = vsel %vm193_vm0, %v4082_v35, 0.0 }
 0x45d   :  { %v3890_v48 = vpop.f32.mrf.mxu1  ;;  %v4227_v15 = vadd.f32 1e-05, %v4195_v30  ;;  %v4228_v23 = vadd.f32 1e-05, %v4196_v57  ;;  %v4107_v32 = vpop.xlane.xlu1 %4106 }
 0x45e   :  { %v9209_v50 = vadd.f32 %v3890_v48, %v3801_v39  ;;  %v4197_v42 = vmul.f32 %v4107_v32, %v9053_v24 }
 0x45f   :  { %5190 = vrsqrt.f32 %v4227_v15  ;;  %v3803_v59 = vpop.f32.mrf.mxu0  ;;  %vm4265_vm3 = vweird.f32 %v4227_v15  ;;  %vm4275_vm6 = vweird.f32 %v4228_v23 }
 0x460   :  { %v3984_v46 = vsel %vm193_vm0, %v9209_v50, 0.0  ;;  %5192 = vrsqrt.f32 %v4228_v23  ;;  %v4229_v13 = vadd.f32 1e-05, %v4197_v42 }
 0x461   :  { %3985 = vadd.xlane.f32.xlu1 %v3984_v46  ;;  %4139 = vadd.xlane.f32.xlu0 %v4138_v56  ;;  %v9232_v56 = vsub.f32 %v9055_v3, %v4019_v54 }
 0x462   :  { %v9216_v47 = vpop.xlane.xlu2 %3952  ;;  %5194 = vrsqrt.f32 %v4229_v13  ;;  %vm4285_vm10 = vweird.f32 %v4229_v13 }
 0x463   :  { %v3956_v2 = vpop.xlane.xlu0 %3955 }
 0x464   :  { %v4021_v31 = vmul.f32 %v9053_v24, %v3956_v2 }
 0x465   :  { %v5191_v5 = vpop.eup %5190  ;;  %v3892_v4 = vpop.f32.mrf.mxu1 }
 0x466   :  { %v5193_v27 = vpop.eup %5192  ;;  %v9221_v61 = vadd.f32 %v3892_v4, %v3803_v59  ;;  %v4260_v51 = vmul.f32 %v5191_v5, %v4227_v15  ;;  %vm4266_vm4 = vweird.f32 %v5191_v5 }
 0x467   :  { %v4270_v55 = vmul.f32 %v5193_v27, %v4228_v23  ;;  %v3806_v10 = vpop.f32.mrf.mxu0  ;;  %vm4276_vm5 = vweird.f32 %v5193_v27  ;;  %vm4267_vm7 = vmor %vm4265_vm3, %vm4266_vm4 }
 0x468   :  { %v5195_v58 = vpop.eup %5194  ;;  %v3987_v9 = vsel %vm193_vm0, %v9221_v61, 0.0  ;;  %v4261_v33 = vmul.f32 %v5191_v5, %v4260_v51  ;;  %v9239_v51 = vsub.f32 %v9094_v18, %v4021_v31  ;;  %vm4277_vm9 = vmor %vm4275_vm6, %vm4276_vm5 }
 0x469   :  { %3988 = vadd.xlane.f32.xlu2 %v3987_v9  ;;  %v4271_v43 = vmul.f32 %v5193_v27, %v4270_v55  ;;  %v4280_v14 = vmul.f32 %v5195_v58, %v4229_v13  ;;  %vm4286_vm8 = vweird.f32 %v5195_v58 }
 0x46a   :  { %v4262_v39 = vmul.f32 0.5, %v4261_v33  ;;  %v4110_v45 = vpop.xlane.xlu2 %4109  ;;  %vm4287_vm11 = vmor %vm4285_vm10, %vm4286_vm8 }
 0x46b   :  { %v4272_v30 = vmul.f32 0.5, %v4271_v43  ;;  %v4281_v57 = vmul.f32 %v5195_v58, %v4280_v14  ;;  %v4198_v48 = vmul.f32 %v4110_v45, %v9053_v24  ;;  %v4113_v2 = vpop.xlane.xlu0 %4112  ;;  %v3959_v3 = vpop.xlane.xlu1 %3958  ;;  %v4083_v43 = vmul.f32 %v9232_v56, %v9232_v56 }
 0x46c   :  { %v4263_v32 = vsub.f32 1.5, %v4262_v39  ;;  %v4199_v33 = vmul.f32 %v4113_v2, %v9053_v24  ;;  %v4017_v39 = vmul.f32 %v9053_v24, %v9195_v7 }
 0x46d   :  { %v3895_v21 = vpop.f32.mrf.mxu1  ;;  %v4273_v42 = vsub.f32 1.5, %v4272_v30  ;;  %v4282_v49 = vmul.f32 0.5, %v4281_v57  ;;  %v9234_v46 = vadd.f32 1e-05, %v4198_v48 }
 0x46e   :  { %v9236_v59 = vadd.f32 %v3895_v21, %v3806_v10  ;;  %v4264_v4 = vmul.f32 %v5191_v5, %v4263_v32  ;;  %v4231_v14 = vadd.f32 1e-05, %v4199_v33  ;;  %v9277_v57 = vsub.f32 %v8996_v12, %v4017_v39 }
 0x46f   :  { %v4274_v15 = vmul.f32 %v5193_v27, %v4273_v42  ;;  %v4283_v35 = vsub.f32 1.5, %v4282_v49  ;;  %5196 = vrsqrt.f32 %v9234_v46  ;;  %vm4295_vm13 = vweird.f32 %v9234_v46 }
 0x470   :  { %v4268_v55 = vsel %vm4267_vm7, %v5191_v5, %v4264_v4  ;;  %v3990_v9 = vsel %vm193_vm0, %v9236_v59, 0.0  ;;  %v4022_v5 = vmul.f32 %v9053_v24, %v3959_v3  ;;  %5198 = vrsqrt.f32 %v4231_v14 }
 0x471   :  { %v4579_v23 = vmul.f32 %v4268_v55, %v9064_v16  ;;  %3991 = vadd.xlane.f32.xlu0 %v3990_v9  ;;  %4145 = vadd.xlane.f32.xlu2 %v4144_v11  ;;  %v4278_v18 = vsel %vm4277_vm9, %v5193_v27, %v4274_v15  ;;  %v4284_v54 = vmul.f32 %v5195_v58, %v4283_v35  ;;  %v3808_v16 = vpop.f32.mrf.mxu0  ;;  %v4147_v11 = vsel %vm193_vm0, %v4083_v43, 0.0 }
 0x472   :  { %v4580_v10 = vmul.f32 %v4278_v18, %v9067_v26  ;;  %v4085_v26 = vmul.f32 %v9239_v51, %v9239_v51  ;;  %v9274_v30 = vsub.f32 %v9106_v41, %v4022_v5  ;;  %v4081_v12 = vmul.f32 %v9277_v57, %v9277_v57 }
 0x473   :  { %4611 = vst.msk [vmem:[%s9578_s5] sm:$0xff] %vm193_vm0, %v4579_v23  ;;  %v4288_v13 = vsel %vm4287_vm11, %v5195_v58, %v4284_v54  ;;  %v4020_v15 = vmul.f32 %v9053_v24, %v9216_v47  ;;  %v3962_v54 = vpop.xlane.xlu2 %3961  ;;  %vm4305_vm1 = vweird.f32 %v4231_v14 }
 0x474   :  { %4612 = vst.msk [vmem:[%s9578_s5 + $0x8] sm:$0xff] %vm193_vm0, %v4580_v10  ;;  %v4581_v27 = vmul.f32 %v4288_v13, %v9070_v25  ;;  %v4153_v25 = vsel %vm193_vm0, %v4085_v26, 0.0  ;;  %v4086_v4 = vmul.f32 %v9274_v30, %v9274_v30  ;;  %v4141_v47 = vsel %vm193_vm0, %v4081_v12, 0.0 }
 0x475   :  { %v5197_v31 = vpop.eup %5196  ;;  %v3897_v7 = vpop.f32.mrf.mxu1  ;;  %v9293_v43 = vsub.f32 %v9085_v60, %v4020_v15  ;;  %v4023_v13 = vmul.f32 %v9053_v24, %v3962_v54 }
 0x476   :  { %v9265_v45 = vadd.f32 %v3897_v7, %v3808_v16  ;;  %4613 = vst.msk [vmem:[%s9578_s5 + $0x10] sm:$0xff] %vm193_vm0, %v4581_v27  ;;  %v4290_v58 = vmul.f32 %v5197_v31, %v9234_v46  ;;  %v5199_v42 = vpop.eup %5198  ;;  %vm4296_vm12 = vweird.f32 %v5197_v31  ;;  %v4156_v33 = vsel %vm193_vm0, %v4086_v4, 0.0 }
 0x477   :  { %v4300_v2 = vmul.f32 %v5199_v42, %v4231_v14  ;;  %vm4297_vm14 = vmor %vm4295_vm13, %vm4296_vm12  ;;  %vm4306_vm15 = vweird.f32 %v5199_v42 }
 0x478   :  { %v3993_v48 = vsel %vm193_vm0, %v9265_v45, 0.0  ;;  %v4291_v32 = vmul.f32 %v5197_v31, %v4290_v58  ;;  %v4116_v21 = vpop.xlane.xlu1 %4115  ;;  %vm4307_vm2 = vmor %vm4305_vm1, %vm4306_vm15  ;;  %v9312_v58 = vsub.f32 %v9112_v0, %v4023_v13 }
 0x479   :  { %3994 = vadd.xlane.f32.xlu1 %v3993_v48  ;;  %4148 = vadd.xlane.f32.xlu0 %v4147_v11  ;;  %v4200_v41 = vmul.f32 %v4116_v21, %v9053_v24  ;;  %v4301_v55 = vmul.f32 %v5199_v42, %v4300_v2 }
 0x47a   :  { %v4292_v49 = vmul.f32 0.5, %v4291_v32  ;;  %4154 = vadd.xlane.f32.xlu2 %v4153_v25  ;;  %v4087_v32 = vmul.f32 %v9312_v58, %v9312_v58 }
 0x47b   :  { %v4232_v3 = vadd.f32 1e-05, %v4200_v41  ;;  %v3965_v23 = vpop.xlane.xlu0 %3964  ;;  %v4302_v18 = vmul.f32 0.5, %v4301_v55 }
 0x47c   :  { %v4293_v35 = vsub.f32 1.5, %v4292_v49  ;;  %v4024_v10 = vmul.f32 %v9053_v24, %v3965_v23  ;;  %v4159_v0 = vsel %vm193_vm0, %v4087_v32, 0.0 }
 0x47d   :  { %5200 = vrsqrt.f32 %v4232_v3  ;;  %v4303_v16 = vsub.f32 1.5, %v4302_v18  ;;  %vm4315_vm4 = vweird.f32 %v4232_v3 }
 0x47e   :  { %v4294_v9 = vmul.f32 %v5197_v31, %v4293_v35  ;;  %v9298_v46 = vsub.f32 %v9122_v8, %v4024_v10 }
 0x47f   :  { %v4304_v60 = vmul.f32 %v5199_v42, %v4303_v16 }
 0x480   :  { %v4298_v5 = vsel %vm4297_vm14, %v5197_v31, %v4294_v9  ;;  %v4088_v26 = vmul.f32 %v9298_v46, %v9298_v46 }
 0x481   :  { %4142 = vadd.xlane.f32.xlu1 %v4141_v47  ;;  %v4582_v39 = vmul.f32 %v4298_v5, %v9091_v52  ;;  %4157 = vadd.xlane.f32.xlu0 %v4156_v33  ;;  %v4084_v52 = vmul.f32 %v9293_v43, %v9293_v43  ;;  %v4308_v31 = vsel %vm4307_vm2, %v5199_v42, %v4304_v60 }
 0x482   :  { %v4162_v7 = vsel %vm193_vm0, %v4088_v26, 0.0  ;;  %v4583_v11 = vmul.f32 %v4308_v31, %v9097_v63 }
 0x483   :  { %4614 = vst.msk [vmem:[%s9578_s5 + $0x18] sm:$0xff] %vm193_vm0, %v4582_v39  ;;  %v5201_v27 = vpop.eup %5200  ;;  %4163 = vadd.xlane.f32.xlu2 %v4162_v7  ;;  %v4150_v14 = vsel %vm193_vm0, %v4084_v52, 0.0 }
 0x484   :  { %v4310_v8 = vmul.f32 %v5201_v27, %v4232_v3  ;;  %4615 = vst.msk [vmem:[%s9578_s5 + $0x20] sm:$0xff] %vm193_vm0, %v4583_v11  ;;  %vm4316_vm3 = vweird.f32 %v5201_v27 }
 0x485   :  { %vm4317_vm5 = vmor %vm4315_vm4, %vm4316_vm3 }
 0x486   :  { %v4311_v25 = vmul.f32 %v5201_v27, %v4310_v8 }
 0x488   :  { %v4312_v48 = vmul.f32 0.5, %v4311_v25 }
 0x489   :  { %4151 = vadd.xlane.f32.xlu1 %v4150_v14 }
 0x48a   :  { %v4313_v21 = vsub.f32 1.5, %v4312_v48 }
 0x48c   :  { %v4314_v63 = vmul.f32 %v5201_v27, %v4313_v21 }
 0x48e   :  { %v4318_v42 = vsel %vm4317_vm5, %v5201_v27, %v4314_v63 }
 0x48f   :  { %v4584_v49 = vmul.f32 %v4318_v42, %v9115_v37 }
 0x491   :  { %4160 = vadd.xlane.f32.xlu1 %v4159_v0  ;;  %4616 = vst.msk [vmem:[%s9578_s5 + $0x28] sm:$0xff] %vm193_vm0, %v4584_v49 }
 0x494   :  { %v4119_v4 = vpop.xlane.xlu2 %4118 }
 0x495   :  { %v4201_v41 = vmul.f32 %v4119_v4, %v9053_v24 }
 0x497   :  { %v4233_v12 = vadd.f32 1e-05, %v4201_v41 }
 0x499   :  { %5202 = vrsqrt.f32 %v4233_v12  ;;  %v3968_v2 = vpop.xlane.xlu1 %3967  ;;  %v4122_v15 = vpop.xlane.xlu0 %4121  ;;  %vm4325_vm7 = vweird.f32 %v4233_v12 }
 0x49a   :  { %v4025_v35 = vmul.f32 %v9053_v24, %v3968_v2  ;;  %v4202_v3 = vmul.f32 %v4122_v15, %v9053_v24 }
 0x49c   :  { %v9331_v55 = vsub.f32 %v9137_v29, %v4025_v35  ;;  %v4234_v37 = vadd.f32 1e-05, %v4202_v3 }
 0x49e   :  { %5204 = vrsqrt.f32 %v4234_v37  ;;  %v4089_v9 = vmul.f32 %v9331_v55, %v9331_v55  ;;  %vm4335_vm10 = vweird.f32 %v4234_v37 }
 0x49f   :  { %v5203_v33 = vpop.eup %5202 }
 0x4a0   :  { %v4320_v23 = vmul.f32 %v5203_v33, %v4233_v12  ;;  %v4165_v18 = vsel %vm193_vm0, %v4089_v9, 0.0  ;;  %vm4326_vm6 = vweird.f32 %v5203_v33 }
 0x4a1   :  { %v3971_v54 = vpop.xlane.xlu2 %3970  ;;  %4166 = vadd.xlane.f32.xlu0 %v4165_v18  ;;  %vm4327_vm8 = vmor %vm4325_vm7, %vm4326_vm6 }
 0x4a2   :  { %v4321_v10 = vmul.f32 %v5203_v33, %v4320_v23  ;;  %v4026_v47 = vmul.f32 %v9053_v24, %v3971_v54 }
 0x4a4   :  { %v5205_v5 = vpop.eup %5204  ;;  %v4322_v39 = vmul.f32 0.5, %v4321_v10  ;;  %v9338_v16 = vsub.f32 %v9144_v20, %v4026_v47 }
 0x4a5   :  { %v4330_v29 = vmul.f32 %v5205_v5, %v4234_v37  ;;  %vm4336_vm9 = vweird.f32 %v5205_v5 }
 0x4a6   :  { %v4323_v13 = vsub.f32 1.5, %v4322_v39  ;;  %v4090_v60 = vmul.f32 %v9338_v16, %v9338_v16  ;;  %vm4337_vm11 = vmor %vm4335_vm10, %vm4336_vm9 }
 0x4a7   :  { %v4331_v26 = vmul.f32 %v5205_v5, %v4330_v29 }
 0x4a8   :  { %v4324_v27 = vmul.f32 %v5203_v33, %v4323_v13  ;;  %v4168_v52 = vsel %vm193_vm0, %v4090_v60, 0.0 }
 0x4a9   :  { %v4332_v31 = vmul.f32 0.5, %v4331_v26  ;;  %4169 = vadd.xlane.f32.xlu1 %v4168_v52 }
 0x4aa   :  { %v4328_v8 = vsel %vm4327_vm8, %v5203_v33, %v4324_v27 }
 0x4ab   :  { %v4585_v7 = vmul.f32 %v4328_v8, %v9128_v44  ;;  %v4333_v11 = vsub.f32 1.5, %v4332_v31 }
 0x4ad   :  { %4617 = vst.msk [vmem:[%s9578_s5 + $0x30] sm:$0xff] %vm193_vm0, %v4585_v7  ;;  %v4334_v20 = vmul.f32 %v5205_v5, %v4333_v11 }
 0x4af   :  { %v4338_v25 = vsel %vm4337_vm11, %v5205_v5, %v4334_v20  ;;  %v4125_v14 = vpop.xlane.xlu1 %4124 }
 0x4b0   :  { %v4586_v48 = vmul.f32 %v4338_v25, %v9135_v34  ;;  %v4203_v32 = vmul.f32 %v4125_v14, %v9053_v24 }
 0x4b2   :  { %4618 = vst.msk [vmem:[%s9578_s5 + $0x38] sm:$0xff] %vm193_vm0, %v4586_v48  ;;  %v4235_v44 = vadd.f32 1e-05, %v4203_v32  ;;  %v4128_v21 = vpop.xlane.xlu2 %4127 }
 0x4b3   :  { %v4204_v0 = vmul.f32 %v4128_v21, %v9053_v24 }
 0x4b4   :  { %v3974_v63 = vpop.xlane.xlu0 %3973  ;;  %5206 = vrsqrt.f32 %v4235_v44  ;;  %vm4345_vm13 = vweird.f32 %v4235_v44 }
 0x4b5   :  { %v4027_v42 = vmul.f32 %v9053_v24, %v3974_v63  ;;  %v4236_v49 = vadd.f32 1e-05, %v4204_v0 }
 0x4b7   :  { %v9357_v4 = vsub.f32 %v9162_v40, %v4027_v42  ;;  %5208 = vrsqrt.f32 %v4236_v49  ;;  %vm4355_vm1 = vweird.f32 %v4236_v49 }
 0x4b9   :  { %v4091_v34 = vmul.f32 %v9357_v4, %v9357_v4 }
 0x4ba   :  { %v5207_v41 = vpop.eup %5206 }
 0x4bb   :  { %v4171_v12 = vsel %vm193_vm0, %v4091_v34, 0.0  ;;  %v4340_v2 = vmul.f32 %v5207_v41, %v4235_v44  ;;  %vm4346_vm12 = vweird.f32 %v5207_v41 }
 0x4bc   :  { %v3977_v15 = vpop.xlane.xlu1 %3976  ;;  %4172 = vadd.xlane.f32.xlu2 %v4171_v12  ;;  %v4131_v35 = vpop.xlane.xlu0 %4130  ;;  %vm4347_vm14 = vmor %vm4345_vm13, %vm4346_vm12 }
 0x4bd   :  { %v4028_v3 = vmul.f32 %v9053_v24, %v3977_v15  ;;  %v4205_v37 = vmul.f32 %v4131_v35, %v9053_v24  ;;  %v5209_v9 = vpop.eup %5208  ;;  %v4341_v33 = vmul.f32 %v5207_v41, %v4340_v2 }
 0x4be   :  { %v4350_v23 = vmul.f32 %v5209_v9, %v4236_v49  ;;  %vm4356_vm15 = vweird.f32 %v5209_v9 }
 0x4bf   :  { %v9365_v40 = vsub.f32 %v9173_v53, %v4028_v3  ;;  %v4237_v18 = vadd.f32 1e-05, %v4205_v37  ;;  %v4342_v54 = vmul.f32 0.5, %v4341_v33  ;;  %vm4357_vm2 = vmor %vm4355_vm1, %vm4356_vm15 }
 0x4c0   :  { %v4351_v10 = vmul.f32 %v5209_v9, %v4350_v23 }
 0x4c1   :  { %5210 = vrsqrt.f32 %v4237_v18  ;;  %v4092_v47 = vmul.f32 %v9365_v40, %v9365_v40  ;;  %v4343_v5 = vsub.f32 1.5, %v4342_v54  ;;  %vm4365_vm4 = vweird.f32 %v4237_v18 }
 0x4c2   :  { %v4352_v39 = vmul.f32 0.5, %v4351_v10 }
 0x4c3   :  { %v4174_v29 = vsel %vm193_vm0, %v4092_v47, 0.0  ;;  %v4344_v13 = vmul.f32 %v5207_v41, %v4343_v5 }
 0x4c4   :  { %v3980_v60 = vpop.xlane.xlu2 %3979  ;;  %4175 = vadd.xlane.f32.xlu0 %v4174_v29  ;;  %v4134_v26 = vpop.xlane.xlu1 %4133  ;;  %v4353_v53 = vsub.f32 1.5, %v4352_v39 }
 0x4c5   :  { %v4029_v27 = vmul.f32 %v9053_v24, %v3980_v60  ;;  %v4206_v52 = vmul.f32 %v4134_v26, %v9053_v24  ;;  %v4348_v31 = vsel %vm4347_vm14, %v5207_v41, %v4344_v13 }
 0x4c6   :  { %v4587_v7 = vmul.f32 %v4348_v31, %v9150_v62  ;;  %v4354_v11 = vmul.f32 %v5209_v9, %v4353_v53 }
 0x4c7   :  { %v5211_v8 = vpop.eup %5210  ;;  %v9374_v20 = vsub.f32 %v9184_v36, %v4029_v27  ;;  %v4238_v25 = vadd.f32 1e-05, %v4206_v52 }
 0x4c8   :  { %v4360_v14 = vmul.f32 %v5211_v8, %v4237_v18  ;;  %4619 = vst.msk [vmem:[%s9578_s5 + $0x40] sm:$0xff] %vm193_vm0, %v4587_v7  ;;  %v4358_v48 = vsel %vm4357_vm2, %v5209_v9, %v4354_v11  ;;  %vm4366_vm3 = vweird.f32 %v5211_v8 }
 0x4c9   :  { %5212 = vrsqrt.f32 %v4238_v25  ;;  %v4093_v32 = vmul.f32 %v9374_v20, %v9374_v20  ;;  %v4588_v44 = vmul.f32 %v4358_v48, %v9156_v28  ;;  %vm4367_vm5 = vmor %vm4365_vm4, %vm4366_vm3  ;;  %vm4375_vm7 = vweird.f32 %v4238_v25 }
 0x4ca   :  { %v4361_v62 = vmul.f32 %v5211_v8, %v4360_v14 }
 0x4cb   :  { %v4177_v21 = vsel %vm193_vm0, %v4093_v32, 0.0  ;;  %4620 = vst.msk [vmem:[%s9578_s5 + $0x48] sm:$0xff] %vm193_vm0, %v4588_v44 }
 0x4cc   :  { %v4362_v36 = vmul.f32 0.5, %v4361_v62  ;;  %v3983_v63 = vpop.xlane.xlu0 %3982  ;;  %4178 = vadd.xlane.f32.xlu1 %v4177_v21  ;;  %v4137_v0 = vpop.xlane.xlu2 %4136 }
 0x4cd   :  { %v4030_v42 = vmul.f32 %v9053_v24, %v3983_v63  ;;  %v4207_v49 = vmul.f32 %v4137_v0, %v9053_v24 }
 0x4ce   :  { %v4363_v34 = vsub.f32 1.5, %v4362_v36 }
 0x4cf   :  { %v5213_v41 = vpop.eup %5212  ;;  %v9391_v28 = vsub.f32 %v9197_v22, %v4030_v42  ;;  %v4239_v12 = vadd.f32 1e-05, %v4207_v49 }
 0x4d0   :  { %v4364_v2 = vmul.f32 %v5211_v8, %v4363_v34  ;;  %v4370_v15 = vmul.f32 %v5213_v41, %v4238_v25  ;;  %vm4376_vm6 = vweird.f32 %v5213_v41 }
 0x4d1   :  { %5214 = vrsqrt.f32 %v4239_v12  ;;  %v4094_v35 = vmul.f32 %v9391_v28, %v9391_v28  ;;  %vm4377_vm8 = vmor %vm4375_vm7, %vm4376_vm6  ;;  %vm4385_vm10 = vweird.f32 %v4239_v12 }
 0x4d2   :  { %v4368_v3 = vsel %vm4367_vm5, %v5211_v8, %v4364_v2  ;;  %v4371_v37 = vmul.f32 %v5213_v41, %v4370_v15 }
 0x4d3   :  { %v4589_v9 = vmul.f32 %v4368_v3, %v9165_v6  ;;  %v4180_v33 = vsel %vm193_vm0, %v4094_v35, 0.0 }
 0x4d4   :  { %v4372_v23 = vmul.f32 0.5, %v4371_v37  ;;  %v3986_v54 = vpop.xlane.xlu1 %3985  ;;  %4181 = vadd.xlane.f32.xlu2 %v4180_v33  ;;  %v4140_v22 = vpop.xlane.xlu0 %4139 }
 0x4d5   :  { %4621 = vst.msk [vmem:[%s9578_s5 + $0x50] sm:$0xff] %vm193_vm0, %v4589_v9  ;;  %v4031_v18 = vmul.f32 %v9053_v24, %v3986_v54  ;;  %v4208_v10 = vmul.f32 %v4140_v22, %v9053_v24 }
 0x4d6   :  { %v4373_v47 = vsub.f32 1.5, %v4372_v23 }
 0x4d7   :  { %v5215_v5 = vpop.eup %5214  ;;  %v9404_v6 = vsub.f32 %v9209_v50, %v4031_v18  ;;  %v4240_v39 = vadd.f32 1e-05, %v4208_v10 }
 0x4d8   :  { %v4374_v29 = vmul.f32 %v5213_v41, %v4373_v47  ;;  %v4380_v13 = vmul.f32 %v5215_v5, %v4239_v12  ;;  %vm4386_vm9 = vweird.f32 %v5215_v5 }
 0x4d9   :  { %5216 = vrsqrt.f32 %v4240_v39  ;;  %v4095_v60 = vmul.f32 %v9404_v6, %v9404_v6  ;;  %vm4387_vm11 = vmor %vm4385_vm10, %vm4386_vm9  ;;  %vm4395_vm13 = vweird.f32 %v4240_v39 }
 0x4da   :  { %v4378_v26 = vsel %vm4377_vm8, %v5213_v41, %v4374_v29  ;;  %v4381_v53 = vmul.f32 %v5215_v5, %v4380_v13 }
 0x4db   :  { %v4590_v27 = vmul.f32 %v4378_v26, %v9176_v38  ;;  %v4183_v52 = vsel %vm193_vm0, %v4095_v60, 0.0 }
 0x4dc   :  { %v4382_v31 = vmul.f32 0.5, %v4381_v53  ;;  %v3989_v8 = vpop.xlane.xlu2 %3988  ;;  %4184 = vadd.xlane.f32.xlu0 %v4183_v52 }
 0x4dd   :  { %4622 = vst.msk [vmem:[%s9578_s5 + $0x58] sm:$0xff] %vm193_vm0, %v4590_v27  ;;  %v4032_v50 = vmul.f32 %v9053_v24, %v3989_v8 }
 0x4de   :  { %v4383_v7 = vsub.f32 1.5, %v4382_v31 }
 0x4df   :  { %v5217_v11 = vpop.eup %5216  ;;  %v9416_v25 = vsub.f32 %v9221_v61, %v4032_v50 }
 0x4e0   :  { %v4384_v14 = vmul.f32 %v5215_v5, %v4383_v7  ;;  %v4390_v38 = vmul.f32 %v5217_v11, %v4240_v39  ;;  %vm4396_vm12 = vweird.f32 %v5217_v11 }
 0x4e1   :  { %v4096_v48 = vmul.f32 %v9416_v25, %v9416_v25  ;;  %vm4397_vm14 = vmor %vm4395_vm13, %vm4396_vm12 }
 0x4e2   :  { %v4388_v32 = vsel %vm4387_vm11, %v5215_v5, %v4384_v14  ;;  %v4391_v44 = vmul.f32 %v5217_v11, %v4390_v38 }
 0x4e3   :  { %v4591_v62 = vmul.f32 %v4388_v32, %v9187_v1  ;;  %v4186_v21 = vsel %vm193_vm0, %v4096_v48, 0.0 }
 0x4e4   :  { %v4392_v36 = vmul.f32 0.5, %v4391_v44  ;;  %v3992_v63 = vpop.xlane.xlu0 %3991  ;;  %4187 = vadd.xlane.f32.xlu1 %v4186_v21  ;;  %v4146_v0 = vpop.xlane.xlu2 %4145 }
 0x4e5   :  { %4623 = vst.msk [vmem:[%s9578_s5 + $0x60] sm:$0xff] %vm193_vm0, %v4591_v62  ;;  %v4033_v61 = vmul.f32 %v9053_v24, %v3992_v63  ;;  %v4210_v42 = vmul.f32 %v4146_v0, %v9053_v24 }
 0x4e6   :  { %v4393_v49 = vsub.f32 1.5, %v4392_v36 }
 0x4e7   :  { %v9429_v34 = vsub.f32 %v9236_v59, %v4033_v61  ;;  %v4242_v1 = vadd.f32 1e-05, %v4210_v42 }
 0x4e8   :  { %v4394_v41 = vmul.f32 %v5217_v11, %v4393_v49 }
 0x4e9   :  { %5218 = vrsqrt.f32 %v4242_v1  ;;  %v4097_v12 = vmul.f32 %v9429_v34, %v9429_v34  ;;  %vm4415_vm1 = vweird.f32 %v4242_v1 }
 0x4ea   :  { %v4398_v2 = vsel %vm4397_vm14, %v5217_v11, %v4394_v41 }
 0x4eb   :  { %v4592_v15 = vmul.f32 %v4398_v2, %v9200_v19  ;;  %v4189_v35 = vsel %vm193_vm0, %v4097_v12, 0.0 }
 0x4ec   :  { %4190 = vadd.xlane.f32.xlu2 %v4189_v35  ;;  %v3995_v3 = vpop.xlane.xlu1 %3994  ;;  %v4149_v37 = vpop.xlane.xlu0 %4148 }
 0x4ed   :  { %4624 = vst.msk [vmem:[%s9578_s5 + $0x68] sm:$0xff] %vm193_vm0, %v4592_v15  ;;  %v4034_v59 = vmul.f32 %v9053_v24, %v3995_v3  ;;  %v4211_v9 = vmul.f32 %v4149_v37, %v9053_v24  ;;  %v4155_v33 = vpop.xlane.xlu2 %4154 }
 0x4ee   :  { %v4213_v23 = vmul.f32 %v4155_v33, %v9053_v24 }
 0x4ef   :  { %v5219_v54 = vpop.eup %5218  ;;  %v9443_v19 = vsub.f32 %v9265_v45, %v4034_v59  ;;  %v4243_v22 = vadd.f32 1e-05, %v4211_v9 }
 0x4f0   :  { %v4410_v18 = vmul.f32 %v5219_v54, %v4242_v1  ;;  %v4245_v10 = vadd.f32 1e-05, %v4213_v23  ;;  %vm4416_vm15 = vweird.f32 %v5219_v54 }
 0x4f1   :  { %5220 = vrsqrt.f32 %v4243_v22  ;;  %v4098_v47 = vmul.f32 %v9443_v19, %v9443_v19  ;;  %vm4417_vm2 = vmor %vm4415_vm1, %vm4416_vm15  ;;  %vm4425_vm5 = vweird.f32 %v4243_v22 }
 0x4f2   :  { %v4411_v5 = vmul.f32 %v5219_v54, %v4410_v18  ;;  %5222 = vrsqrt.f32 %v4245_v10  ;;  %vm4445_vm7 = vweird.f32 %v4245_v10 }
 0x4f3   :  { %v4192_v39 = vsel %vm193_vm0, %v4098_v47, 0.0 }
 0x4f4   :  { %v4412_v29 = vmul.f32 0.5, %v4411_v5  ;;  %4193 = vadd.xlane.f32.xlu0 %v4192_v39  ;;  %v4143_v13 = vpop.xlane.xlu1 %4142  ;;  %v4158_v60 = vpop.xlane.xlu0 %4157 }
 0x4f5   :  { %v4209_v26 = vmul.f32 %v4143_v13, %v9053_v24  ;;  %v4214_v45 = vmul.f32 %v4158_v60, %v9053_v24 }
 0x4f6   :  { %v4413_v53 = vsub.f32 1.5, %v4412_v29  ;;  %v4164_v14 = vpop.xlane.xlu2 %4163 }
 0x4f7   :  { %v5221_v27 = vpop.eup %5220  ;;  %v9450_v52 = vadd.f32 1e-05, %v4209_v26  ;;  %v9452_v31 = vadd.f32 1e-05, %v4214_v45  ;;  %v4216_v62 = vmul.f32 %v4164_v14, %v9053_v24 }
 0x4f8   :  { %v5223_v8 = vpop.eup %5222  ;;  %v4414_v50 = vmul.f32 %v5219_v54, %v4413_v53  ;;  %v4420_v7 = vmul.f32 %v5221_v27, %v4243_v22  ;;  %vm4426_vm3 = vweird.f32 %v5221_v27 }
 0x4f9   :  { %5224 = vrsqrt.f32 %v9450_v52  ;;  %v4440_v11 = vmul.f32 %v5223_v8, %v4245_v10  ;;  %v9463_v61 = vadd.f32 1e-05, %v4216_v62  ;;  %vm4446_vm4 = vweird.f32 %v5223_v8  ;;  %vm4427_vm6 = vmor %vm4425_vm5, %vm4426_vm3 }
 0x4fa   :  { %v4418_v38 = vsel %vm4417_vm2, %v5219_v54, %v4414_v50  ;;  %v4421_v48 = vmul.f32 %v5221_v27, %v4420_v7  ;;  %5226 = vrsqrt.f32 %v9452_v31  ;;  %vm4447_vm8 = vmor %vm4445_vm7, %vm4446_vm4  ;;  %vm4405_vm11 = vweird.f32 %v9450_v52 }
 0x4fb   :  { %v4594_v32 = vmul.f32 %v4418_v38, %v9219_v17  ;;  %v4441_v44 = vmul.f32 %v5223_v8, %v4440_v11  ;;  %5228 = vrsqrt.f32 %v9463_v61  ;;  %vm4455_vm13 = vweird.f32 %v9452_v31 }
 0x4fc   :  { %v4422_v21 = vmul.f32 0.5, %v4421_v48  ;;  %v4152_v36 = vpop.xlane.xlu1 %4151  ;;  %vm4475_vm2 = vweird.f32 %v9463_v61 }
 0x4fd   :  { %4626 = vst.msk [vmem:[%s9578_s5 + $0x78] sm:$0xff] %vm193_vm0, %v4594_v32  ;;  %v4212_v63 = vmul.f32 %v4152_v36, %v9053_v24  ;;  %v4442_v0 = vmul.f32 0.5, %v4441_v44 }
 0x4fe   :  { %v4423_v42 = vsub.f32 1.5, %v4422_v21 }
 0x4ff   :  { %v5225_v49 = vpop.eup %5224  ;;  %v9465_v1 = vadd.f32 1e-05, %v4212_v63  ;;  %v4443_v17 = vsub.f32 1.5, %v4442_v0 }
 0x500   :  { %v5227_v41 = vpop.eup %5226  ;;  %v4424_v12 = vmul.f32 %v5221_v27, %v4423_v42  ;;  %v4400_v2 = vmul.f32 %v5225_v49, %v9450_v52  ;;  %vm4406_vm9 = vweird.f32 %v5225_v49 }
 0x501   :  { %5230 = vrsqrt.f32 %v9465_v1  ;;  %v4444_v15 = vmul.f32 %v5223_v8, %v4443_v17  ;;  %v4450_v35 = vmul.f32 %v5227_v41, %v9452_v31  ;;  %v5229_v18 = vpop.eup %5228  ;;  %vm4456_vm10 = vweird.f32 %v5227_v41  ;;  %vm4407_vm12 = vmor %vm4405_vm11, %vm4406_vm9 }
 0x502   :  { %v4428_v3 = vsel %vm4427_vm6, %v5221_v27, %v4424_v12  ;;  %v4401_v37 = vmul.f32 %v5225_v49, %v4400_v2  ;;  %vm4457_vm14 = vmor %vm4455_vm13, %vm4456_vm10  ;;  %vm4476_vm15 = vweird.f32 %v5229_v18  ;;  %vm4435_vm4 = vweird.f32 %v9465_v1 }
 0x503   :  { %v4595_v59 = vmul.f32 %v4428_v3, %v9232_v56  ;;  %v4448_v9 = vsel %vm4447_vm8, %v5223_v8, %v4444_v15  ;;  %v4451_v33 = vmul.f32 %v5227_v41, %v4450_v35  ;;  %v4470_v56 = vmul.f32 %v5229_v18, %v9463_v61  ;;  %vm4477_vm3 = vmor %vm4475_vm2, %vm4476_vm15 }
 0x504   :  { %v4402_v23 = vmul.f32 0.5, %v4401_v37  ;;  %v4597_v54 = vmul.f32 %v4448_v9, %v9239_v51  ;;  %v4161_v22 = vpop.xlane.xlu1 %4160 }
 0x505   :  { %4627 = vst.msk [vmem:[%s9578_s5 + $0x80] sm:$0xff] %vm193_vm0, %v4595_v59  ;;  %v4452_v10 = vmul.f32 0.5, %v4451_v33  ;;  %v4215_v47 = vmul.f32 %v4161_v22, %v9053_v24  ;;  %v4471_v26 = vmul.f32 %v5229_v18, %v4470_v56 }
 0x506   :  { %v4403_v5 = vsub.f32 1.5, %v4402_v23  ;;  %4629 = vst.msk [vmem:[%s9578_s5 + $0x90] sm:$0xff] %vm193_vm0, %v4597_v54 }
 0x507   :  { %v5231_v51 = vpop.eup %5230  ;;  %v4453_v39 = vsub.f32 1.5, %v4452_v10  ;;  %v4247_v29 = vadd.f32 1e-05, %v4215_v47  ;;  %v4472_v8 = vmul.f32 0.5, %v4471_v26 }
 0x508   :  { %v4404_v13 = vmul.f32 %v5225_v49, %v4403_v5  ;;  %v4430_v60 = vmul.f32 %v5231_v51, %v9465_v1  ;;  %vm4436_vm1 = vweird.f32 %v5231_v51 }
 0x509   :  { %v4454_v45 = vmul.f32 %v5227_v41, %v4453_v39  ;;  %5232 = vrsqrt.f32 %v4247_v29  ;;  %v4473_v38 = vsub.f32 1.5, %v4472_v8  ;;  %vm4437_vm5 = vmor %vm4435_vm4, %vm4436_vm1  ;;  %vm4465_vm7 = vweird.f32 %v4247_v29 }
 0x50a   :  { %v4408_v53 = vsel %vm4407_vm12, %v5225_v49, %v4404_v13  ;;  %v4431_v27 = vmul.f32 %v5231_v51, %v4430_v60 }
 0x50b   :  { %v4593_v50 = vmul.f32 %v4408_v53, %v9277_v57  ;;  %v4458_v7 = vsel %vm4457_vm14, %v5227_v41, %v4454_v45  ;;  %v4474_v31 = vmul.f32 %v5229_v18, %v4473_v38 }
 0x50c   :  { %v4432_v11 = vmul.f32 0.5, %v4431_v27  ;;  %v4598_v14 = vmul.f32 %v4458_v7, %v9274_v30 }
 0x50d   :  { %4625 = vst.msk [vmem:[%s9578_s5 + $0x70] sm:$0xff] %vm193_vm0, %v4593_v50  ;;  %v4478_v32 = vsel %vm4477_vm3, %v5229_v18, %v4474_v31 }
 0x50e   :  { %v4433_v52 = vsub.f32 1.5, %v4432_v11  ;;  %4630 = vst.msk [vmem:[%s9578_s5 + $0x98] sm:$0xff] %vm193_vm0, %v4598_v14  ;;  %v4600_v44 = vmul.f32 %v4478_v32, %v9298_v46 }
 0x50f   :  { %v5233_v57 = vpop.eup %5232 }
 0x510   :  { %v4434_v30 = vmul.f32 %v5231_v51, %v4433_v52  ;;  %v4460_v48 = vmul.f32 %v5233_v57, %v4247_v29  ;;  %4632 = vst.msk [vmem:[%s9578_s5 + $0xa8] sm:$0xff] %vm193_vm0, %v4600_v44  ;;  %vm4466_vm6 = vweird.f32 %v5233_v57 }
 0x511   :  { %vm4467_vm8 = vmor %vm4465_vm7, %vm4466_vm6 }
 0x512   :  { %v4438_v62 = vsel %vm4437_vm5, %v5231_v51, %v4434_v30  ;;  %v4461_v21 = vmul.f32 %v5233_v57, %v4460_v48 }
 0x513   :  { %v4596_v36 = vmul.f32 %v4438_v62, %v9293_v43 }
 0x514   :  { %v4462_v63 = vmul.f32 0.5, %v4461_v21  ;;  %v4167_v0 = vpop.xlane.xlu0 %4166 }
 0x515   :  { %4628 = vst.msk [vmem:[%s9578_s5 + $0x88] sm:$0xff] %vm193_vm0, %v4596_v36  ;;  %v4217_v46 = vmul.f32 %v4167_v0, %v9053_v24 }
 0x516   :  { %v4463_v61 = vsub.f32 1.5, %v4462_v63 }
 0x517   :  { %v4249_v49 = vadd.f32 1e-05, %v4217_v46 }
 0x518   :  { %v4464_v42 = vmul.f32 %v5233_v57, %v4463_v61 }
 0x519   :  { %5234 = vrsqrt.f32 %v4249_v49  ;;  %vm4485_vm10 = vweird.f32 %v4249_v49 }
 0x51a   :  { %v4468_v43 = vsel %vm4467_vm8, %v5233_v57, %v4464_v42 }
 0x51b   :  { %v4599_v1 = vmul.f32 %v4468_v43, %v9312_v58 }
 0x51c   :  { %v4170_v17 = vpop.xlane.xlu1 %4169 }
 0x51d   :  { %4631 = vst.msk [vmem:[%s9578_s5 + $0xa0] sm:$0xff] %vm193_vm0, %v4599_v1  ;;  %v4218_v41 = vmul.f32 %v4170_v17, %v9053_v24 }
 0x51f   :  { %v5235_v12 = vpop.eup %5234  ;;  %v4250_v2 = vadd.f32 1e-05, %v4218_v41 }
 0x520   :  { %v4480_v15 = vmul.f32 %v5235_v12, %v4249_v49  ;;  %vm4486_vm9 = vweird.f32 %v5235_v12 }
 0x521   :  { %5236 = vrsqrt.f32 %v4250_v2  ;;  %vm4487_vm11 = vmor %vm4485_vm10, %vm4486_vm9  ;;  %vm4495_vm13 = vweird.f32 %v4250_v2 }
 0x522   :  { %v4481_v35 = vmul.f32 %v5235_v12, %v4480_v15 }
 0x524   :  { %v4482_v3 = vmul.f32 0.5, %v4481_v35 }
 0x526   :  { %v4483_v37 = vsub.f32 1.5, %v4482_v3 }
 0x527   :  { %v5237_v59 = vpop.eup %5236 }
 0x528   :  { %v4484_v9 = vmul.f32 %v5235_v12, %v4483_v37  ;;  %v4490_v58 = vmul.f32 %v5237_v59, %v4250_v2  ;;  %vm4496_vm12 = vweird.f32 %v5237_v59 }
 0x529   :  { %vm4497_vm14 = vmor %vm4495_vm13, %vm4496_vm12 }
 0x52a   :  { %v4488_v33 = vsel %vm4487_vm11, %v5235_v12, %v4484_v9  ;;  %v4491_v23 = vmul.f32 %v5237_v59, %v4490_v58 }
 0x52b   :  { %v4601_v54 = vmul.f32 %v4488_v33, %v9331_v55 }
 0x52c   :  { %v4492_v22 = vmul.f32 0.5, %v4491_v23 }
 0x52d   :  { %4633 = vst.msk [vmem:[%s9578_s5 + $0xb0] sm:$0xff] %vm193_vm0, %v4601_v54 }
 0x52e   :  { %v4493_v18 = vsub.f32 1.5, %v4492_v22 }
 0x52f   :  { %v4173_v10 = vpop.xlane.xlu2 %4172 }
 0x530   :  { %v4219_v47 = vmul.f32 %v4173_v10, %v9053_v24  ;;  %v4494_v5 = vmul.f32 %v5237_v59, %v4493_v18 }
 0x532   :  { %v4251_v56 = vadd.f32 1e-05, %v4219_v47  ;;  %v4498_v51 = vsel %vm4497_vm14, %v5237_v59, %v4494_v5 }
 0x533   :  { %v4602_v39 = vmul.f32 %v4498_v51, %v9338_v16 }
 0x534   :  { %5238 = vrsqrt.f32 %v4251_v56  ;;  %vm4505_vm1 = vweird.f32 %v4251_v56 }
 0x535   :  { %4634 = vst.msk [vmem:[%s9578_s5 + $0xb8] sm:$0xff] %vm193_vm0, %v4602_v39 }
 0x537   :  { %v4176_v55 = vpop.xlane.xlu0 %4175 }
 0x538   :  { %v4220_v29 = vmul.f32 %v4176_v55, %v9053_v24 }
 0x53a   :  { %v5239_v13 = vpop.eup %5238  ;;  %v4252_v60 = vadd.f32 1e-05, %v4220_v29 }
 0x53b   :  { %v4500_v26 = vmul.f32 %v5239_v13, %v4251_v56  ;;  %vm4506_vm15 = vweird.f32 %v5239_v13 }
 0x53c   :  { %5240 = vrsqrt.f32 %v4252_v60  ;;  %vm4507_vm2 = vmor %vm4505_vm1, %vm4506_vm15  ;;  %vm4515_vm4 = vweird.f32 %v4252_v60 }
 0x53d   :  { %v4501_v45 = vmul.f32 %v5239_v13, %v4500_v26 }
 0x53f   :  { %v4502_v53 = vmul.f32 0.5, %v4501_v45  ;;  %v4179_v27 = vpop.xlane.xlu1 %4178 }
 0x540   :  { %v4221_v8 = vmul.f32 %v4179_v27, %v9053_v24 }
 0x541   :  { %v4503_v50 = vsub.f32 1.5, %v4502_v53 }
 0x542   :  { %v5241_v16 = vpop.eup %5240  ;;  %v4253_v7 = vadd.f32 1e-05, %v4221_v8 }
 0x543   :  { %v4504_v11 = vmul.f32 %v5239_v13, %v4503_v50  ;;  %v4510_v14 = vmul.f32 %v5241_v16, %v4252_v60  ;;  %vm4516_vm3 = vweird.f32 %v5241_v16 }
 0x544   :  { %5242 = vrsqrt.f32 %v4253_v7  ;;  %vm4517_vm5 = vmor %vm4515_vm4, %vm4516_vm3  ;;  %vm4525_vm7 = vweird.f32 %v4253_v7 }
 0x545   :  { %v4508_v38 = vsel %vm4507_vm2, %v5239_v13, %v4504_v11  ;;  %v4511_v52 = vmul.f32 %v5241_v16, %v4510_v14 }
 0x546   :  { %v4603_v31 = vmul.f32 %v4508_v38, %v9357_v4 }
 0x547   :  { %v4512_v57 = vmul.f32 0.5, %v4511_v52  ;;  %v4182_v30 = vpop.xlane.xlu2 %4181 }
 0x548   :  { %4635 = vst.msk [vmem:[%s9578_s5 + $0xc0] sm:$0xff] %vm193_vm0, %v4603_v31  ;;  %v4222_v48 = vmul.f32 %v4182_v30, %v9053_v24 }
 0x549   :  { %v4513_v32 = vsub.f32 1.5, %v4512_v57 }
 0x54a   :  { %v5243_v44 = vpop.eup %5242  ;;  %v4254_v62 = vadd.f32 1e-05, %v4222_v48 }
 0x54b   :  { %v4514_v21 = vmul.f32 %v5241_v16, %v4513_v32  ;;  %v4520_v36 = vmul.f32 %v5243_v44, %v4253_v7  ;;  %vm4526_vm6 = vweird.f32 %v5243_v44 }
 0x54c   :  { %5244 = vrsqrt.f32 %v4254_v62  ;;  %vm4527_vm8 = vmor %vm4525_vm7, %vm4526_vm6  ;;  %vm4535_vm10 = vweird.f32 %v4254_v62 }
 0x54d   :  { %v4518_v63 = vsel %vm4517_vm5, %v5241_v16, %v4514_v21  ;;  %v4521_v4 = vmul.f32 %v5243_v44, %v4520_v36 }
 0x54e   :  { %v4604_v0 = vmul.f32 %v4518_v63, %v9365_v40 }
 0x54f   :  { %v4522_v61 = vmul.f32 0.5, %v4521_v4  ;;  %v4185_v46 = vpop.xlane.xlu0 %4184 }
 0x550   :  { %4636 = vst.msk [vmem:[%s9578_s5 + $0xc8] sm:$0xff] %vm193_vm0, %v4604_v0  ;;  %v4223_v42 = vmul.f32 %v4185_v46, %v9053_v24 }
 0x551   :  { %v4523_v49 = vsub.f32 1.5, %v4522_v61 }
 0x552   :  { %v5245_v43 = vpop.eup %5244  ;;  %v4255_v1 = vadd.f32 1e-05, %v4223_v42 }
 0x553   :  { %v4524_v17 = vmul.f32 %v5243_v44, %v4523_v49  ;;  %v4530_v41 = vmul.f32 %v5245_v43, %v4254_v62  ;;  %vm4536_vm9 = vweird.f32 %v5245_v43 }
 0x554   :  { %5246 = vrsqrt.f32 %v4255_v1  ;;  %vm4537_vm11 = vmor %vm4535_vm10, %vm4536_vm9  ;;  %vm4545_vm13 = vweird.f32 %v4255_v1 }
 0x555   :  { %v4528_v12 = vsel %vm4527_vm8, %v5243_v44, %v4524_v17  ;;  %v4531_v40 = vmul.f32 %v5245_v43, %v4530_v41 }
 0x556   :  { %v4605_v2 = vmul.f32 %v4528_v12, %v9374_v20 }
 0x557   :  { %v4532_v15 = vmul.f32 0.5, %v4531_v40  ;;  %v4188_v35 = vpop.xlane.xlu1 %4187 }
 0x558   :  { %4637 = vst.msk [vmem:[%s9578_s5 + $0xd0] sm:$0xff] %vm193_vm0, %v4605_v2  ;;  %v4224_v3 = vmul.f32 %v4188_v35, %v9053_v24 }
 0x559   :  { %v4533_v37 = vsub.f32 1.5, %v4532_v15 }
 0x55a   :  { %v5247_v59 = vpop.eup %5246  ;;  %v4256_v9 = vadd.f32 1e-05, %v4224_v3 }
 0x55b   :  { %v4534_v58 = vmul.f32 %v5245_v43, %v4533_v37  ;;  %v4540_v33 = vmul.f32 %v5247_v59, %v4255_v1  ;;  %vm4546_vm12 = vweird.f32 %v5247_v59 }
 0x55c   :  { %5248 = vrsqrt.f32 %v4256_v9  ;;  %vm4547_vm14 = vmor %vm4545_vm13, %vm4546_vm12  ;;  %vm4555_vm1 = vweird.f32 %v4256_v9 }
 0x55d   :  { %v4538_v23 = vsel %vm4537_vm11, %v5245_v43, %v4534_v58  ;;  %v4541_v20 = vmul.f32 %v5247_v59, %v4540_v33 }
 0x55e   :  { %v4606_v54 = vmul.f32 %v4538_v23, %v9391_v28 }
 0x55f   :  { %v4542_v22 = vmul.f32 0.5, %v4541_v20  ;;  %v4191_v18 = vpop.xlane.xlu2 %4190 }
 0x560   :  { %4638 = vst.msk [vmem:[%s9578_s5 + $0xd8] sm:$0xff] %vm193_vm0, %v4606_v54  ;;  %v4225_v10 = vmul.f32 %v4191_v18, %v9053_v24 }
 0x561   :  { %v4543_v47 = vsub.f32 1.5, %v4542_v22 }
 0x562   :  { %v5249_v5 = vpop.eup %5248  ;;  %v4257_v56 = vadd.f32 1e-05, %v4225_v10 }
 0x563   :  { %v4544_v51 = vmul.f32 %v5247_v59, %v4543_v47  ;;  %v4550_v39 = vmul.f32 %v5249_v5, %v4256_v9  ;;  %vm4556_vm15 = vweird.f32 %v5249_v5 }
 0x564   :  { %5250 = vrsqrt.f32 %v4257_v56  ;;  %vm4557_vm2 = vmor %vm4555_vm1, %vm4556_vm15  ;;  %vm4565_vm4 = vweird.f32 %v4257_v56 }
 0x565   :  { %v4548_v55 = vsel %vm4547_vm14, %v5247_v59, %v4544_v51  ;;  %v4551_v28 = vmul.f32 %v5249_v5, %v4550_v39 }
 0x566   :  { %v4607_v29 = vmul.f32 %v4548_v55, %v9404_v6 }
 0x567   :  { %v4552_v13 = vmul.f32 0.5, %v4551_v28  ;;  %v4194_v60 = vpop.xlane.xlu0 %4193 }
 0x568   :  { %4639 = vst.msk [vmem:[%s9578_s5 + $0xe0] sm:$0xff] %vm193_vm0, %v4607_v29  ;;  %v4226_v26 = vmul.f32 %v4194_v60, %v9053_v24 }
 0x569   :  { %v4553_v45 = vsub.f32 1.5, %v4552_v13 }
 0x56a   :  { %v5251_v53 = vpop.eup %5250  ;;  %v4258_v27 = vadd.f32 1e-05, %v4226_v26 }
 0x56b   :  { %v4554_v8 = vmul.f32 %v5249_v5, %v4553_v45  ;;  %v4560_v50 = vmul.f32 %v5251_v53, %v4257_v56  ;;  %vm4566_vm3 = vweird.f32 %v5251_v53 }
 0x56c   :  { %5252 = vrsqrt.f32 %v4258_v27  ;;  %vm4567_vm5 = vmor %vm4565_vm4, %vm4566_vm3  ;;  %vm4575_vm7 = vweird.f32 %v4258_v27 }
 0x56d   :  { %v4558_v16 = vsel %vm4557_vm2, %v5249_v5, %v4554_v8  ;;  %v4561_v6 = vmul.f32 %v5251_v53, %v4560_v50 }
 0x56e   :  { %v4608_v7 = vmul.f32 %v4558_v16, %v9416_v25 }
 0x56f   :  { %v4562_v11 = vmul.f32 0.5, %v4561_v6 }
 0x570   :  { %4640 = vst.msk [vmem:[%s9578_s5 + $0xe8] sm:$0xff] %vm193_vm0, %v4608_v7 }
 0x571   :  { %v4563_v24 = vsub.f32 1.5, %v4562_v11 }
 0x572   :  { %v5253_v14 = vpop.eup %5252 }
 0x573   :  { %v4564_v38 = vmul.f32 %v5251_v53, %v4563_v24  ;;  %v4570_v52 = vmul.f32 %v5253_v14, %v4258_v27  ;;  %vm4576_vm6 = vweird.f32 %v5253_v14 }
 0x574   :  { %vm4577_vm8 = vmor %vm4575_vm7, %vm4576_vm6 }
 0x575   :  { %v4568_v31 = vsel %vm4567_vm5, %v5251_v53, %v4564_v38  ;;  %v4571_v57 = vmul.f32 %v5253_v14, %v4570_v52 }
 0x576   :  { %v4609_v30 = vmul.f32 %v4568_v31, %v9429_v34 }
 0x577   :  { %v4572_v48 = vmul.f32 0.5, %v4571_v57 }
 0x578   :  { %4641 = vst.msk [vmem:[%s9578_s5 + $0xf0] sm:$0xff] %vm193_vm0, %v4609_v30 }
 0x579   :  { %v4573_v25 = vsub.f32 1.5, %v4572_v48 }
 0x57b   :  { %v4574_v32 = vmul.f32 %v5253_v14, %v4573_v25 }
 0x57d   :  { %v4578_v44 = vsel %vm4577_vm8, %v5253_v14, %v4574_v32 }
 0x57e   :  { %v4610_v62 = vmul.f32 %v4578_v44, %v9443_v19 }
 0x580   :  { %4642 = vst.msk [vmem:[%s9578_s5 + $0xf8] sm:$0xff] %vm193_vm0, %v4610_v62 }

</bundles_post_ra>
